<compile_context>
chip_gen: v5e
topology: v5e:2x2
jax: 0.10.0
libtpu: 0.0.40
codegen_flags: <defaults>
</compile_context>

<pallas_src>
import functools

import jax
import jax.numpy as jnp
from jax import lax
from jax.experimental import pallas as pl
from jax.experimental.pallas import tpu as pltpu

EPS = 1e-5


def _default_vmem_limit():
    """~48 MiB on v7x (64 MiB / TensorCore), ~112 MiB on v5e/v6e (128 MiB)."""
    try:
        cap = int(pltpu.get_tpu_info().vmem_capacity_bytes)
    except Exception:                       # conservative fallback (v7x-sized)
        cap = 64 * 1024 * 1024
    return int(min(max(cap - 16 * 1024 * 1024, 32 * 1024 * 1024),
                   112 * 1024 * 1024))


_VMEM_LIMIT = _default_vmem_limit()


# ----------------------------------------------------------------------------
# Kernel helpers
# ----------------------------------------------------------------------------
def _conv3x3_same(x_bf16, w_ref):
    """3x3 'same' conv via 9 accumulating per-tap MXU dots (no 9x im2col).

    x_bf16 : (NB, H, W, Cin) bf16 activations.
    w_ref  : (9, Cin, Cout) bf16 weights, tap index = kh*3 + kw (HWIO order).
    Returns the conv output as an (NB*H*W, Cout) float32 matrix (f32 MXU acc).

    Halo handling (no padded scratch, no misaligned interior copy):
      * H halo: two zero rows concatenated along H (a leading, untiled axis).
      * W halo: two one-column-shifted operands (xl / xr) built once and shared
        by all three kh taps of that column offset.
    """
    NB, H, W, Cin = x_bf16.shape
    cout = w_ref.shape[-1]

    zrow = jnp.zeros((NB, 1, W, Cin), jnp.bfloat16)
    xc = jnp.concatenate([zrow, x_bf16, zrow], axis=1)          # (NB,H+2,W,Cin)
    zcol = jnp.zeros((NB, H + 2, 1, Cin), jnp.bfloat16)
    xl = jnp.concatenate([zcol, xc[:, :, :W - 1, :]], axis=2)   # input col w-1
    xr = jnp.concatenate([xc[:, :, 1:, :], zcol], axis=2)       # input col w+1
    shifted = (xl, xc, xr)

    m = NB * H * W
    acc = jnp.zeros((m, cout), jnp.float32)
    # NOTE: per-tap K = Cin keeps VMEM traffic minimal; on v5e/v6e taps could
    # be paired along channels (K = 2*Cin / 4*Cin) for better MXU K-fill.
    for kh in range(3):
        for kw in range(3):
            a = shifted[kw][:, kh:kh + H, :, :].reshape(m, Cin)
            acc = acc + jnp.dot(a, w_ref[kh * 3 + kw, :, :],
                                preferred_element_type=jnp.float32)
    return acc


def _store_partial_stats(stats_ref, acc):
    """Per-block partial BN statistics (per-channel sum and sum of squares),
    taken from the f32 accumulator so tiled statistics stay exact."""
    cout = acc.shape[-1]
    stats_ref[:, 0:1, :] = jnp.sum(acc, axis=0).reshape(1, 1, cout)
    stats_ref[:, 1:2, :] = jnp.sum(acc * acc, axis=0).reshape(1, 1, cout)


# ----------------------------------------------------------------------------
# Kernels
# ----------------------------------------------------------------------------
def conv1_stats_kernel(x_ref, w1_ref, stats_ref):
    """Pass 1 (stats only): conv1 (bias-free; the bias is exactly cancelled by
    the training-mode BN1 that follows) -> partial BN1 statistics.
    x is cast to bf16 in-kernel (no wrapper-side cast pass over HBM)."""
    acc = _conv3x3_same(x_ref[...].astype(jnp.bfloat16), w1_ref)
    _store_partial_stats(stats_ref, acc)


def conv1_bn1_relu_conv2_kernel(x_ref, w1_ref, w2_ref, scale1_ref, shift1_ref,
                                y2_ref, stats_ref):
    """Pass 2: recompute conv1 from x (cheaper than writing/reading the y1
    intermediate through HBM), apply BN1 (affine form, f32) + ReLU, conv2,
    emit partial BN2 statistics, and store y2 in bf16."""
    nb, hh, ww, _ = x_ref.shape
    cout = w2_ref.shape[-1]
    acc1 = _conv3x3_same(x_ref[...].astype(jnp.bfloat16), w1_ref)
    h = jnp.maximum(acc1 * scale1_ref[...] + shift1_ref[...], 0.0)   # f32 VPU
    h4 = h.reshape(nb, hh, ww, cout).astype(jnp.bfloat16)
    acc2 = _conv3x3_same(h4, w2_ref)
    _store_partial_stats(stats_ref, acc2)
    y2_ref[...] = acc2.astype(jnp.bfloat16)


def bn2_add_relu_kernel(scale_ref, shift_ref, y2_ref, x_ref, o_ref):
    """Pass 3: lane-dense BN2 (affine form) + residual add + ReLU, all f32."""
    o_ref[...] = jnp.maximum(
        y2_ref[...].astype(jnp.float32) * scale_ref[...] + shift_ref[...]
        + x_ref[...], 0.0)


# ----------------------------------------------------------------------------
# Wrapper
# ----------------------------------------------------------------------------
def _finalize_bn(stats, gamma, beta, count):
    """Combine per-block (sum, sumsq) into BN's affine scale / shift (f32)."""
    s = jnp.sum(stats[:, 0, :], axis=0)
    ss = jnp.sum(stats[:, 1, :], axis=0)
    mean = s / count
    var = jnp.maximum(ss / count - mean * mean, 0.0)       # biased (train mode)
    scale = gamma.reshape(-1) * lax.rsqrt(var + EPS)
    shift = beta.reshape(-1) - mean * scale
    return scale.reshape(1, -1), shift.reshape(1, -1)


@functools.partial(jax.jit, static_argnames=("batch_block",))
def resblock_forward_nhwc(x_nhwc, params, *, batch_block=1):
    """Identity ResBlock forward, NHWC in / NHWC out (training-mode BN).

    Activations stay NHWC (and lane-dense where free) through the whole block,
    so the NCHW<->NHWC transposes of the PyTorch layout are paid once at the
    network boundary, not per block.  `batch_block` is the per-grid-step batch
    tile; at real ResNet sizes pick it so N / batch_block is even (v7x) and the
    per-step footprint fits the per-generation VMEM limit.
    """
    w1, _b1, g1, be1, w2, _b2, g2, be2 = params            # conv biases unused:
    # they are exactly cancelled by the training-mode BatchNorm that follows.
    N, H, W, Cin = x_nhwc.shape
    cout = w1.shape[-1]
    assert Cin == cout, "identity residual needs input_channel == output_channel"
    NB = batch_block
    assert N % NB == 0, "batch must be divisible by batch_block"
    G = N // NB
    assert (NB * H) % 8 == 0 or G == 1, \
        "pick batch_block so batch_block * H is a multiple of 8"
    rows, lanes = N * H, W * cout
    count = N * H * W

    x_nhwc = x_nhwc.astype(jnp.float32)
    w1_t = w1.reshape(9, Cin, cout).astype(jnp.bfloat16)       # tap = kh*3 + kw
    w2_t = w2.reshape(9, cout, cout).astype(jnp.bfloat16)

    cparams = pltpu.CompilerParams(
        dimension_semantics=("parallel",),        # v7x: 2 TensorCores split grid
        vmem_limit_bytes=_VMEM_LIMIT)

    x_spec = pl.BlockSpec((NB, H, W, Cin), lambda n: (n, 0, 0, 0))
    # Constant blocks: DMA'd once (index map is constant across the grid).
    w1_spec = pl.BlockSpec((9, Cin, cout), lambda n: (0, 0, 0))
    w2_spec = pl.BlockSpec((9, cout, cout), lambda n: (0, 0, 0))
    stats_spec = pl.BlockSpec((1, 2, cout), lambda n: (n, 0, 0))
    stats_shape = jax.ShapeDtypeStruct((G, 2, cout), jnp.float32)

    # ---- pass 1: conv1 + per-block partial BN1 statistics (stats only) ------
    stats1 = pl.pallas_call(
        conv1_stats_kernel,
        grid=(G,),
        in_specs=[x_spec, w1_spec],
        out_specs=stats_spec,
        out_shape=stats_shape,
        compiler_params=cparams,
    )(x_nhwc, w1_t)
    scale1, shift1 = _finalize_bn(stats1, g1, be1, count)

    # ---- pass 2: recompute conv1, BN1 + ReLU, conv2 + partial BN2 stats ------
    y2, stats2 = pl.pallas_call(
        conv1_bn1_relu_conv2_kernel,
        grid=(G,),
        in_specs=[x_spec, w1_spec, w2_spec,
                  pl.BlockSpec((1, cout), lambda n: (0, 0)),
                  pl.BlockSpec((1, cout), lambda n: (0, 0))],
        out_specs=[pl.BlockSpec((NB * H * W, cout), lambda n: (n, 0)),
                   stats_spec],
        out_shape=(jax.ShapeDtypeStruct((N * H * W, cout), jnp.bfloat16),
                   stats_shape),
        compiler_params=cparams,
    )(x_nhwc, w1_t, w2_t, scale1, shift1)
    scale2, shift2 = _finalize_bn(stats2, g2, be2, count)

    # ---- pass 3: BN2 + residual + ReLU, lane-dense ((W, C) -> lanes) ---------
    scale2_l = jnp.tile(scale2, (1, W))        # per-channel -> per-(w, c) lane
    shift2_l = jnp.tile(shift2, (1, W))
    y2_flat = y2.reshape(rows, lanes)          # free contiguous HBM reshapes
    x_flat = x_nhwc.reshape(rows, lanes)       # f32 residual read only here
    rblk = NB * H

    out_flat = pl.pallas_call(
        bn2_add_relu_kernel,
        grid=(G,),
        in_specs=[pl.BlockSpec((1, lanes), lambda n: (0, 0)),
                  pl.BlockSpec((1, lanes), lambda n: (0, 0)),
                  pl.BlockSpec((rblk, lanes), lambda n: (n, 0)),
                  pl.BlockSpec((rblk, lanes), lambda n: (n, 0))],
        out_specs=pl.BlockSpec((rblk, lanes), lambda n: (n, 0)),
        out_shape=jax.ShapeDtypeStruct((rows, lanes), jnp.float32),
        compiler_params=cparams,
    )(scale2_l, shift2_l, y2_flat, x_flat)

    return out_flat.reshape(N, H, W, cout)


def resblock_forward(x_nchw, params, *, batch_block=1):
    """PyTorch-layout (NCHW) adapter.  In a full network, chain the NHWC core
    directly so these transposes are paid once at the network boundary."""
    x_nhwc = jnp.transpose(x_nchw, (0, 2, 3, 1))
    out = resblock_forward_nhwc(x_nhwc, params, batch_block=batch_block)
    return jnp.transpose(out, (0, 3, 1, 2))


# ----------------------------------------------------------------------------
# Params / references
# ----------------------------------------------------------------------------
def init_params(key, cin, cout):
    """Deterministic init matching PyTorch shapes (weights stored HWIO)."""
    k1, k2, k3, k4 = jax.random.split(key, 4)
    bound1 = 1.0 / (cin * 9) ** 0.5
    w1 = jax.random.uniform(k1, (3, 3, cin, cout), jnp.float32, -bound1, bound1)
    b1 = jax.random.uniform(k2, (1, cout), jnp.float32, -bound1, bound1)
    bound2 = 1.0 / (cout * 9) ** 0.5
    w2 = jax.random.uniform(k3, (3, 3, cout, cout), jnp.float32, -bound2, bound2)
    b2 = jax.random.uniform(k4, (1, cout), jnp.float32, -bound2, bound2)
    g1 = jnp.ones((1, cout), jnp.float32)
    be1 = jnp.zeros((1, cout), jnp.float32)
    g2 = jnp.ones((1, cout), jnp.float32)
    be2 = jnp.zeros((1, cout), jnp.float32)
    return (w1, b1, g1, be1, w2, b2, g2, be2)


def _reference_module(x_nchw, params):
    """Exact PyTorch-module semantics (f32, conv biases included, train BN)."""
    w1, b1, g1, be1, w2, b2, g2, be2 = params

    def conv(x, w, b):
        y = lax.conv_general_dilated(
            x, w, (1, 1), ((1, 1), (1, 1)),
            dimension_numbers=("NCHW", "HWIO", "NCHW"))
        return y + b.reshape(1, -1, 1, 1)

    def bn(y, g, be):
        mean = jnp.mean(y, axis=(0, 2, 3), keepdims=True)
        var = jnp.mean((y - mean) ** 2, axis=(0, 2, 3), keepdims=True)
        return (y - mean) * lax.rsqrt(var + EPS) * g.reshape(1, -1, 1, 1) \
            + be.reshape(1, -1, 1, 1)

    h = jax.nn.relu(bn(conv(x_nchw, w1, b1), g1, be1))
    h = bn(conv(h, w2, b2), g2, be2)
    return jax.nn.relu(h + x_nchw)


def _reference_mirror(x_nchw, params):
    """Mirror of the kernel's precision policy: bf16 MXU operands, f32
    accumulation / BN / residual, bf16 y2 storage, conv biases dropped
    (training-mode BN cancels them exactly)."""
    w1, _b1, g1, be1, w2, _b2, g2, be2 = params

    def conv_bf16(x, w):
        return lax.conv_general_dilated(
            x.astype(jnp.bfloat16), w.astype(jnp.bfloat16),
            (1, 1), ((1, 1), (1, 1)),
            dimension_numbers=("NCHW", "HWIO", "NCHW"),
            preferred_element_type=jnp.float32)

    def bn_affine(y, g, be):
        mean = jnp.mean(y, axis=(0, 2, 3), keepdims=True)
        var = jnp.maximum(
            jnp.mean(y * y, axis=(0, 2, 3), keepdims=True) - mean * mean, 0.0)
        scale = g.reshape(1, -1, 1, 1) * lax.rsqrt(var + EPS)
        shift = be.reshape(1, -1, 1, 1) - mean * scale
        return scale, shift

    y1 = conv_bf16(x_nchw, w1)
    s1, t1 = bn_affine(y1, g1, be1)
    h = jnp.maximum(y1 * s1 + t1, 0.0)
    y2 = conv_bf16(h, w2)
    s2, t2 = bn_affine(y2, g2, be2)
    y2b = y2.astype(jnp.bfloat16).astype(jnp.float32)      # bf16 HBM storage
    return jnp.maximum(y2b * s2 + t2 + x_nchw, 0.0)


if __name__ == "__main__":
    key = jax.random.PRNGKey(0)
    kx, kp = jax.random.split(key)

    N, C, H, W = 2, 4, 16, 16          # input_channel == output_channel == 4
    x = jax.random.normal(kx, (N, C, H, W), jnp.float32)
    params = init_params(kp, C, C)

    # batch_block=1 -> G=2 grid steps (even, so v7x's two TensorCores split it).
    out = jax.block_until_ready(resblock_forward(x, params, batch_block=1))
    assert out.shape == (N, C, H, W)

    # Tight check: mirror of the kernel's exact precision policy.
    ref_mirror = _reference_mirror(x, params)
    err_m = float(jnp.max(jnp.abs(out - ref_mirror)))
    assert jnp.allclose(out, ref_mirror, rtol=2e-2, atol=2e-2), \
        f"precision-mirror mismatch, max abs diff {err_m}"

    # Loose check: exact f32 module semantics (bf16 MXU operands and bf16 y2
    # storage are the only intended differences).
    ref_f32 = _reference_module(x, params)
    err_f = float(jnp.max(jnp.abs(out - ref_f32)))
    assert jnp.allclose(out, ref_f32, rtol=1.5e-1, atol=1.5e-1), \
        f"f32 module-reference mismatch, max abs diff {err_f}"

    print("KERNEL_OK")
</pallas_src>

<mosaic_0001>
module attributes {stable_mosaic.version = 11 : i64} {
  func.func @conv1_stats_kernel(%arg0: i32, %arg1: memref<1x16x16x4xf32, #tpu.memory_space<vmem>>, %arg2: memref<9x4x4xbf16, #tpu.memory_space<vmem>>, %arg3: memref<1x2x4xf32, #tpu.memory_space<vmem>>) attributes {dimension_semantics = [#tpu.dimension_semantics<parallel>], iteration_bounds = array<i64: 2>, scalar_prefetch = 0 : i64, scratch_operands = 0 : i64, tpu.core_type = #tpu.core_type<tc>, window_params = [{transform_indices = @transform_0, window_bounds = array<i64: 1, 16, 16, 4>}, {pipeline_mode = #tpu.pipeline_mode<synchronous>, transform_indices = @transform_1, window_bounds = array<i64: 9, 4, 4>}, {transform_indices = @transform_2, window_bounds = array<i64: 1, 2, 4>}]} {
    %c0 = arith.constant 0 : index
    %c0_0 = arith.constant 0 : index
    %c0_1 = arith.constant 0 : index
    %c0_2 = arith.constant 0 : index
    %0 = vector.load %arg1[%c0, %c0_0, %c0_1, %c0_2] : memref<1x16x16x4xf32, #tpu.memory_space<vmem>>, vector<1x16x16x4xf32>
    %1 = arith.truncf %0 : vector<1x16x16x4xf32> to vector<1x16x16x4xbf16>
    %cst = arith.constant 0.000000e+00 : bf16
    %2 = vector.broadcast %cst : bf16 to vector<1x1x16x4xbf16>
    %3 = tpu.concatenate %2, %1, %2 in 1 : vector<1x1x16x4xbf16>, vector<1x16x16x4xbf16>, vector<1x1x16x4xbf16> -> vector<1x18x16x4xbf16>
    %cst_3 = arith.constant 0.000000e+00 : bf16
    %4 = vector.broadcast %cst_3 : bf16 to vector<1x18x1x4xbf16>
    %5 = vector.extract_strided_slice %3 {offsets = [0, 0, 0, 0], sizes = [1, 18, 15, 4], strides = [1, 1, 1, 1]} : vector<1x18x16x4xbf16> to vector<1x18x15x4xbf16>
    %6 = tpu.concatenate %4, %5 in 2 : vector<1x18x1x4xbf16>, vector<1x18x15x4xbf16> -> vector<1x18x16x4xbf16>
    %7 = vector.extract_strided_slice %3 {offsets = [0, 0, 1, 0], sizes = [1, 18, 15, 4], strides = [1, 1, 1, 1]} : vector<1x18x16x4xbf16> to vector<1x18x15x4xbf16>
    %8 = tpu.concatenate %7, %4 in 2 : vector<1x18x15x4xbf16>, vector<1x18x1x4xbf16> -> vector<1x18x16x4xbf16>
    %cst_4 = arith.constant 0.000000e+00 : f32
    %9 = vector.broadcast %cst_4 : f32 to vector<256x4xf32>
    %10 = vector.extract_strided_slice %6 {offsets = [0, 0, 0, 0], sizes = [1, 16, 16, 4], strides = [1, 1, 1, 1]} : vector<1x18x16x4xbf16> to vector<1x16x16x4xbf16>
    %11 = vector.shape_cast %10 : vector<1x16x16x4xbf16> to vector<256x4xbf16>
    %c0_5 = arith.constant 0 : index
    %c0_6 = arith.constant 0 : index
    %c0_7 = arith.constant 0 : index
    %12 = vector.load %arg2[%c0_5, %c0_6, %c0_7] : memref<9x4x4xbf16, #tpu.memory_space<vmem>>, vector<1x4x4xbf16>
    %13 = vector.shape_cast %12 : vector<1x4x4xbf16> to vector<4x4xbf16>
    %cst_8 = arith.constant dense<0.000000e+00> : vector<256x4xf32>
    %14 = tpu.matmul %11, %13, %cst_8 {dimension_numbers = #tpu.dot_dimension_numbers<[1], [0], [0], [1], [0, 0, 1, 1], [], []>} : vector<256x4xbf16>, vector<4x4xbf16>, vector<256x4xf32> -> vector<256x4xf32>
    %15 = arith.addf %9, %14 : vector<256x4xf32>
    %16 = vector.extract_strided_slice %3 {offsets = [0, 0, 0, 0], sizes = [1, 16, 16, 4], strides = [1, 1, 1, 1]} : vector<1x18x16x4xbf16> to vector<1x16x16x4xbf16>
    %17 = vector.shape_cast %16 : vector<1x16x16x4xbf16> to vector<256x4xbf16>
    %c1 = arith.constant 1 : index
    %c0_9 = arith.constant 0 : index
    %c0_10 = arith.constant 0 : index
    %18 = vector.load %arg2[%c1, %c0_9, %c0_10] : memref<9x4x4xbf16, #tpu.memory_space<vmem>>, vector<1x4x4xbf16>
    %19 = vector.shape_cast %18 : vector<1x4x4xbf16> to vector<4x4xbf16>
    %cst_11 = arith.constant dense<0.000000e+00> : vector<256x4xf32>
    %20 = tpu.matmul %17, %19, %cst_11 {dimension_numbers = #tpu.dot_dimension_numbers<[1], [0], [0], [1], [0, 0, 1, 1], [], []>} : vector<256x4xbf16>, vector<4x4xbf16>, vector<256x4xf32> -> vector<256x4xf32>
    %21 = arith.addf %15, %20 : vector<256x4xf32>
    %22 = vector.extract_strided_slice %8 {offsets = [0, 0, 0, 0], sizes = [1, 16, 16, 4], strides = [1, 1, 1, 1]} : vector<1x18x16x4xbf16> to vector<1x16x16x4xbf16>
    %23 = vector.shape_cast %22 : vector<1x16x16x4xbf16> to vector<256x4xbf16>
    %c2 = arith.constant 2 : index
    %c0_12 = arith.constant 0 : index
    %c0_13 = arith.constant 0 : index
    %24 = vector.load %arg2[%c2, %c0_12, %c0_13] : memref<9x4x4xbf16, #tpu.memory_space<vmem>>, vector<1x4x4xbf16>
    %25 = vector.shape_cast %24 : vector<1x4x4xbf16> to vector<4x4xbf16>
    %cst_14 = arith.constant dense<0.000000e+00> : vector<256x4xf32>
    %26 = tpu.matmul %23, %25, %cst_14 {dimension_numbers = #tpu.dot_dimension_numbers<[1], [0], [0], [1], [0, 0, 1, 1], [], []>} : vector<256x4xbf16>, vector<4x4xbf16>, vector<256x4xf32> -> vector<256x4xf32>
    %27 = arith.addf %21, %26 : vector<256x4xf32>
    %28 = vector.extract_strided_slice %6 {offsets = [0, 1, 0, 0], sizes = [1, 16, 16, 4], strides = [1, 1, 1, 1]} : vector<1x18x16x4xbf16> to vector<1x16x16x4xbf16>
    %29 = vector.shape_cast %28 : vector<1x16x16x4xbf16> to vector<256x4xbf16>
    %c3 = arith.constant 3 : index
    %c0_15 = arith.constant 0 : index
    %c0_16 = arith.constant 0 : index
    %30 = vector.load %arg2[%c3, %c0_15, %c0_16] : memref<9x4x4xbf16, #tpu.memory_space<vmem>>, vector<1x4x4xbf16>
    %31 = vector.shape_cast %30 : vector<1x4x4xbf16> to vector<4x4xbf16>
    %cst_17 = arith.constant dense<0.000000e+00> : vector<256x4xf32>
    %32 = tpu.matmul %29, %31, %cst_17 {dimension_numbers = #tpu.dot_dimension_numbers<[1], [0], [0], [1], [0, 0, 1, 1], [], []>} : vector<256x4xbf16>, vector<4x4xbf16>, vector<256x4xf32> -> vector<256x4xf32>
    %33 = arith.addf %27, %32 : vector<256x4xf32>
    %34 = vector.extract_strided_slice %3 {offsets = [0, 1, 0, 0], sizes = [1, 16, 16, 4], strides = [1, 1, 1, 1]} : vector<1x18x16x4xbf16> to vector<1x16x16x4xbf16>
    %35 = vector.shape_cast %34 : vector<1x16x16x4xbf16> to vector<256x4xbf16>
    %c4 = arith.constant 4 : index
    %c0_18 = arith.constant 0 : index
    %c0_19 = arith.constant 0 : index
    %36 = vector.load %arg2[%c4, %c0_18, %c0_19] : memref<9x4x4xbf16, #tpu.memory_space<vmem>>, vector<1x4x4xbf16>
    %37 = vector.shape_cast %36 : vector<1x4x4xbf16> to vector<4x4xbf16>
    %cst_20 = arith.constant dense<0.000000e+00> : vector<256x4xf32>
    %38 = tpu.matmul %35, %37, %cst_20 {dimension_numbers = #tpu.dot_dimension_numbers<[1], [0], [0], [1], [0, 0, 1, 1], [], []>} : vector<256x4xbf16>, vector<4x4xbf16>, vector<256x4xf32> -> vector<256x4xf32>
    %39 = arith.addf %33, %38 : vector<256x4xf32>
    %40 = vector.extract_strided_slice %8 {offsets = [0, 1, 0, 0], sizes = [1, 16, 16, 4], strides = [1, 1, 1, 1]} : vector<1x18x16x4xbf16> to vector<1x16x16x4xbf16>
    %41 = vector.shape_cast %40 : vector<1x16x16x4xbf16> to vector<256x4xbf16>
    %c5 = arith.constant 5 : index
    %c0_21 = arith.constant 0 : index
    %c0_22 = arith.constant 0 : index
    %42 = vector.load %arg2[%c5, %c0_21, %c0_22] : memref<9x4x4xbf16, #tpu.memory_space<vmem>>, vector<1x4x4xbf16>
    %43 = vector.shape_cast %42 : vector<1x4x4xbf16> to vector<4x4xbf16>
    %cst_23 = arith.constant dense<0.000000e+00> : vector<256x4xf32>
    %44 = tpu.matmul %41, %43, %cst_23 {dimension_numbers = #tpu.dot_dimension_numbers<[1], [0], [0], [1], [0, 0, 1, 1], [], []>} : vector<256x4xbf16>, vector<4x4xbf16>, vector<256x4xf32> -> vector<256x4xf32>
    %45 = arith.addf %39, %44 : vector<256x4xf32>
    %46 = vector.extract_strided_slice %6 {offsets = [0, 2, 0, 0], sizes = [1, 16, 16, 4], strides = [1, 1, 1, 1]} : vector<1x18x16x4xbf16> to vector<1x16x16x4xbf16>
    %47 = vector.shape_cast %46 : vector<1x16x16x4xbf16> to vector<256x4xbf16>
    %c6 = arith.constant 6 : index
    %c0_24 = arith.constant 0 : index
    %c0_25 = arith.constant 0 : index
    %48 = vector.load %arg2[%c6, %c0_24, %c0_25] : memref<9x4x4xbf16, #tpu.memory_space<vmem>>, vector<1x4x4xbf16>
    %49 = vector.shape_cast %48 : vector<1x4x4xbf16> to vector<4x4xbf16>
    %cst_26 = arith.constant dense<0.000000e+00> : vector<256x4xf32>
    %50 = tpu.matmul %47, %49, %cst_26 {dimension_numbers = #tpu.dot_dimension_numbers<[1], [0], [0], [1], [0, 0, 1, 1], [], []>} : vector<256x4xbf16>, vector<4x4xbf16>, vector<256x4xf32> -> vector<256x4xf32>
    %51 = arith.addf %45, %50 : vector<256x4xf32>
    %52 = vector.extract_strided_slice %3 {offsets = [0, 2, 0, 0], sizes = [1, 16, 16, 4], strides = [1, 1, 1, 1]} : vector<1x18x16x4xbf16> to vector<1x16x16x4xbf16>
    %53 = vector.shape_cast %52 : vector<1x16x16x4xbf16> to vector<256x4xbf16>
    %c7 = arith.constant 7 : index
    %c0_27 = arith.constant 0 : index
    %c0_28 = arith.constant 0 : index
    %54 = vector.load %arg2[%c7, %c0_27, %c0_28] : memref<9x4x4xbf16, #tpu.memory_space<vmem>>, vector<1x4x4xbf16>
    %55 = vector.shape_cast %54 : vector<1x4x4xbf16> to vector<4x4xbf16>
    %cst_29 = arith.constant dense<0.000000e+00> : vector<256x4xf32>
    %56 = tpu.matmul %53, %55, %cst_29 {dimension_numbers = #tpu.dot_dimension_numbers<[1], [0], [0], [1], [0, 0, 1, 1], [], []>} : vector<256x4xbf16>, vector<4x4xbf16>, vector<256x4xf32> -> vector<256x4xf32>
    %57 = arith.addf %51, %56 : vector<256x4xf32>
    %58 = vector.extract_strided_slice %8 {offsets = [0, 2, 0, 0], sizes = [1, 16, 16, 4], strides = [1, 1, 1, 1]} : vector<1x18x16x4xbf16> to vector<1x16x16x4xbf16>
    %59 = vector.shape_cast %58 : vector<1x16x16x4xbf16> to vector<256x4xbf16>
    %c8 = arith.constant 8 : index
    %c0_30 = arith.constant 0 : index
    %c0_31 = arith.constant 0 : index
    %60 = vector.load %arg2[%c8, %c0_30, %c0_31] : memref<9x4x4xbf16, #tpu.memory_space<vmem>>, vector<1x4x4xbf16>
    %61 = vector.shape_cast %60 : vector<1x4x4xbf16> to vector<4x4xbf16>
    %cst_32 = arith.constant dense<0.000000e+00> : vector<256x4xf32>
    %62 = tpu.matmul %59, %61, %cst_32 {dimension_numbers = #tpu.dot_dimension_numbers<[1], [0], [0], [1], [0, 0, 1, 1], [], []>} : vector<256x4xbf16>, vector<4x4xbf16>, vector<256x4xf32> -> vector<256x4xf32>
    %63 = arith.addf %57, %62 : vector<256x4xf32>
    %cst_33 = arith.constant dense<0.000000e+00> : vector<4xf32>
    %64 = vector.multi_reduction <add>, %63, %cst_33 [0] : vector<256x4xf32> to vector<4xf32>
    %65 = vector.shape_cast %64 : vector<4xf32> to vector<1x1x4xf32>
    %c0_34 = arith.constant 0 : index
    %c0_35 = arith.constant 0 : index
    %c0_36 = arith.constant 0 : index
    %66 = vector.load %arg3[%c0_34, %c0_35, %c0_36] : memref<1x2x4xf32, #tpu.memory_space<vmem>>, vector<1x1x4xf32>
    tpu.vector_store %arg3[%c0_34, %c0_35, %c0_36], %65 {strides = array<i32>} : memref<1x2x4xf32, #tpu.memory_space<vmem>>, vector<1x1x4xf32>,
    %67 = arith.mulf %63, %63 : vector<256x4xf32>
    %cst_37 = arith.constant dense<0.000000e+00> : vector<4xf32>
    %68 = vector.multi_reduction <add>, %67, %cst_37 [0] : vector<256x4xf32> to vector<4xf32>
    %69 = vector.shape_cast %68 : vector<4xf32> to vector<1x1x4xf32>
    %c0_38 = arith.constant 0 : index
    %c1_39 = arith.constant 1 : index
    %c0_40 = arith.constant 0 : index
    %70 = vector.load %arg3[%c0_38, %c1_39, %c0_40] : memref<1x2x4xf32, #tpu.memory_space<vmem>>, vector<1x1x4xf32>
    tpu.vector_store %arg3[%c0_38, %c1_39, %c0_40], %69 {strides = array<i32>} : memref<1x2x4xf32, #tpu.memory_space<vmem>>, vector<1x1x4xf32>,
    return
  }
  func.func @transform_0(%arg0: i32) -> (i32, i32, i32, i32) {
    %c0_i32 = arith.constant 0 : i32
    %c0_i32_0 = arith.constant 0 : i32
    %c0_i32_1 = arith.constant 0 : i32
    %c0_i32_2 = arith.constant 0 : i32
    return %arg0, %c0_i32, %c0_i32_0, %c0_i32_1 : i32, i32, i32, i32
  }
  func.func @transform_1(%arg0: i32) -> (i32, i32, i32) {
    %c0_i32 = arith.constant 0 : i32
    %c0_i32_0 = arith.constant 0 : i32
    %c0_i32_1 = arith.constant 0 : i32
    %c0_i32_2 = arith.constant 0 : i32
    return %c0_i32, %c0_i32_0, %c0_i32_1 : i32, i32, i32
  }
  func.func @transform_2(%arg0: i32) -> (i32, i32, i32) {
    %c0_i32 = arith.constant 0 : i32
    %c0_i32_0 = arith.constant 0 : i32
    %c0_i32_1 = arith.constant 0 : i32
    return %arg0, %c0_i32, %c0_i32_0 : i32, i32, i32
  }
}

module attributes {stable_mosaic.version = 11 : i64} {
  func.func @conv1_bn1_relu_conv2_kernel(%arg0: i32, %arg1: memref<1x16x16x4xf32, #tpu.memory_space<vmem>>, %arg2: memref<9x4x4xbf16, #tpu.memory_space<vmem>>, %arg3: memref<9x4x4xbf16, #tpu.memory_space<vmem>>, %arg4: memref<1x4xf32, #tpu.memory_space<vmem>>, %arg5: memref<1x4xf32, #tpu.memory_space<vmem>>, %arg6: memref<256x4xbf16, #tpu.memory_space<vmem>>, %arg7: memref<1x2x4xf32, #tpu.memory_space<vmem>>) attributes {dimension_semantics = [#tpu.dimension_semantics<parallel>], iteration_bounds = array<i64: 2>, scalar_prefetch = 0 : i64, scratch_operands = 0 : i64, tpu.core_type = #tpu.core_type<tc>, window_params = [{transform_indices = @transform_0, window_bounds = array<i64: 1, 16, 16, 4>}, {pipeline_mode = #tpu.pipeline_mode<synchronous>, transform_indices = @transform_1, window_bounds = array<i64: 9, 4, 4>}, {pipeline_mode = #tpu.pipeline_mode<synchronous>, transform_indices = @transform_2, window_bounds = array<i64: 9, 4, 4>}, {pipeline_mode = #tpu.pipeline_mode<synchronous>, transform_indices = @transform_3, window_bounds = array<i64: 1, 4>}, {pipeline_mode = #tpu.pipeline_mode<synchronous>, transform_indices = @transform_4, window_bounds = array<i64: 1, 4>}, {transform_indices = @transform_5, window_bounds = array<i64: 256, 4>}, {transform_indices = @transform_6, window_bounds = array<i64: 1, 2, 4>}]} {
    %c0 = arith.constant 0 : index
    %c0_0 = arith.constant 0 : index
    %c0_1 = arith.constant 0 : index
    %c0_2 = arith.constant 0 : index
    %0 = vector.load %arg1[%c0, %c0_0, %c0_1, %c0_2] : memref<1x16x16x4xf32, #tpu.memory_space<vmem>>, vector<1x16x16x4xf32>
    %1 = arith.truncf %0 : vector<1x16x16x4xf32> to vector<1x16x16x4xbf16>
    %cst = arith.constant 0.000000e+00 : bf16
    %2 = vector.broadcast %cst : bf16 to vector<1x1x16x4xbf16>
    %3 = tpu.concatenate %2, %1, %2 in 1 : vector<1x1x16x4xbf16>, vector<1x16x16x4xbf16>, vector<1x1x16x4xbf16> -> vector<1x18x16x4xbf16>
    %cst_3 = arith.constant 0.000000e+00 : bf16
    %4 = vector.broadcast %cst_3 : bf16 to vector<1x18x1x4xbf16>
    %5 = vector.extract_strided_slice %3 {offsets = [0, 0, 0, 0], sizes = [1, 18, 15, 4], strides = [1, 1, 1, 1]} : vector<1x18x16x4xbf16> to vector<1x18x15x4xbf16>
    %6 = tpu.concatenate %4, %5 in 2 : vector<1x18x1x4xbf16>, vector<1x18x15x4xbf16> -> vector<1x18x16x4xbf16>
    %7 = vector.extract_strided_slice %3 {offsets = [0, 0, 1, 0], sizes = [1, 18, 15, 4], strides = [1, 1, 1, 1]} : vector<1x18x16x4xbf16> to vector<1x18x15x4xbf16>
    %8 = tpu.concatenate %7, %4 in 2 : vector<1x18x15x4xbf16>, vector<1x18x1x4xbf16> -> vector<1x18x16x4xbf16>
    %cst_4 = arith.constant 0.000000e+00 : f32
    %9 = vector.broadcast %cst_4 : f32 to vector<256x4xf32>
    %10 = vector.extract_strided_slice %6 {offsets = [0, 0, 0, 0], sizes = [1, 16, 16, 4], strides = [1, 1, 1, 1]} : vector<1x18x16x4xbf16> to vector<1x16x16x4xbf16>
    %11 = vector.shape_cast %10 : vector<1x16x16x4xbf16> to vector<256x4xbf16>
    %c0_5 = arith.constant 0 : index
    %c0_6 = arith.constant 0 : index
    %c0_7 = arith.constant 0 : index
    %12 = vector.load %arg2[%c0_5, %c0_6, %c0_7] : memref<9x4x4xbf16, #tpu.memory_space<vmem>>, vector<1x4x4xbf16>
    %13 = vector.shape_cast %12 : vector<1x4x4xbf16> to vector<4x4xbf16>
    %cst_8 = arith.constant dense<0.000000e+00> : vector<256x4xf32>
    %14 = tpu.matmul %11, %13, %cst_8 {dimension_numbers = #tpu.dot_dimension_numbers<[1], [0], [0], [1], [0, 0, 1, 1], [], []>} : vector<256x4xbf16>, vector<4x4xbf16>, vector<256x4xf32> -> vector<256x4xf32>
    %15 = arith.addf %9, %14 : vector<256x4xf32>
    %16 = vector.extract_strided_slice %3 {offsets = [0, 0, 0, 0], sizes = [1, 16, 16, 4], strides = [1, 1, 1, 1]} : vector<1x18x16x4xbf16> to vector<1x16x16x4xbf16>
    %17 = vector.shape_cast %16 : vector<1x16x16x4xbf16> to vector<256x4xbf16>
    %c1 = arith.constant 1 : index
    %c0_9 = arith.constant 0 : index
    %c0_10 = arith.constant 0 : index
    %18 = vector.load %arg2[%c1, %c0_9, %c0_10] : memref<9x4x4xbf16, #tpu.memory_space<vmem>>, vector<1x4x4xbf16>
    %19 = vector.shape_cast %18 : vector<1x4x4xbf16> to vector<4x4xbf16>
    %cst_11 = arith.constant dense<0.000000e+00> : vector<256x4xf32>
    %20 = tpu.matmul %17, %19, %cst_11 {dimension_numbers = #tpu.dot_dimension_numbers<[1], [0], [0], [1], [0, 0, 1, 1], [], []>} : vector<256x4xbf16>, vector<4x4xbf16>, vector<256x4xf32> -> vector<256x4xf32>
    %21 = arith.addf %15, %20 : vector<256x4xf32>
    %22 = vector.extract_strided_slice %8 {offsets = [0, 0, 0, 0], sizes = [1, 16, 16, 4], strides = [1, 1, 1, 1]} : vector<1x18x16x4xbf16> to vector<1x16x16x4xbf16>
    %23 = vector.shape_cast %22 : vector<1x16x16x4xbf16> to vector<256x4xbf16>
    %c2 = arith.constant 2 : index
    %c0_12 = arith.constant 0 : index
    %c0_13 = arith.constant 0 : index
    %24 = vector.load %arg2[%c2, %c0_12, %c0_13] : memref<9x4x4xbf16, #tpu.memory_space<vmem>>, vector<1x4x4xbf16>
    %25 = vector.shape_cast %24 : vector<1x4x4xbf16> to vector<4x4xbf16>
    %cst_14 = arith.constant dense<0.000000e+00> : vector<256x4xf32>
    %26 = tpu.matmul %23, %25, %cst_14 {dimension_numbers = #tpu.dot_dimension_numbers<[1], [0], [0], [1], [0, 0, 1, 1], [], []>} : vector<256x4xbf16>, vector<4x4xbf16>, vector<256x4xf32> -> vector<256x4xf32>
    %27 = arith.addf %21, %26 : vector<256x4xf32>
    %28 = vector.extract_strided_slice %6 {offsets = [0, 1, 0, 0], sizes = [1, 16, 16, 4], strides = [1, 1, 1, 1]} : vector<1x18x16x4xbf16> to vector<1x16x16x4xbf16>
    %29 = vector.shape_cast %28 : vector<1x16x16x4xbf16> to vector<256x4xbf16>
    %c3 = arith.constant 3 : index
    %c0_15 = arith.constant 0 : index
    %c0_16 = arith.constant 0 : index
    %30 = vector.load %arg2[%c3, %c0_15, %c0_16] : memref<9x4x4xbf16, #tpu.memory_space<vmem>>, vector<1x4x4xbf16>
    %31 = vector.shape_cast %30 : vector<1x4x4xbf16> to vector<4x4xbf16>
    %cst_17 = arith.constant dense<0.000000e+00> : vector<256x4xf32>
    %32 = tpu.matmul %29, %31, %cst_17 {dimension_numbers = #tpu.dot_dimension_numbers<[1], [0], [0], [1], [0, 0, 1, 1], [], []>} : vector<256x4xbf16>, vector<4x4xbf16>, vector<256x4xf32> -> vector<256x4xf32>
    %33 = arith.addf %27, %32 : vector<256x4xf32>
    %34 = vector.extract_strided_slice %3 {offsets = [0, 1, 0, 0], sizes = [1, 16, 16, 4], strides = [1, 1, 1, 1]} : vector<1x18x16x4xbf16> to vector<1x16x16x4xbf16>
    %35 = vector.shape_cast %34 : vector<1x16x16x4xbf16> to vector<256x4xbf16>
    %c4 = arith.constant 4 : index
    %c0_18 = arith.constant 0 : index
    %c0_19 = arith.constant 0 : index
    %36 = vector.load %arg2[%c4, %c0_18, %c0_19] : memref<9x4x4xbf16, #tpu.memory_space<vmem>>, vector<1x4x4xbf16>
    %37 = vector.shape_cast %36 : vector<1x4x4xbf16> to vector<4x4xbf16>
    %cst_20 = arith.constant dense<0.000000e+00> : vector<256x4xf32>
    %38 = tpu.matmul %35, %37, %cst_20 {dimension_numbers = #tpu.dot_dimension_numbers<[1], [0], [0], [1], [0, 0, 1, 1], [], []>} : vector<256x4xbf16>, vector<4x4xbf16>, vector<256x4xf32> -> vector<256x4xf32>
    %39 = arith.addf %33, %38 : vector<256x4xf32>
    %40 = vector.extract_strided_slice %8 {offsets = [0, 1, 0, 0], sizes = [1, 16, 16, 4], strides = [1, 1, 1, 1]} : vector<1x18x16x4xbf16> to vector<1x16x16x4xbf16>
    %41 = vector.shape_cast %40 : vector<1x16x16x4xbf16> to vector<256x4xbf16>
    %c5 = arith.constant 5 : index
    %c0_21 = arith.constant 0 : index
    %c0_22 = arith.constant 0 : index
    %42 = vector.load %arg2[%c5, %c0_21, %c0_22] : memref<9x4x4xbf16, #tpu.memory_space<vmem>>, vector<1x4x4xbf16>
    %43 = vector.shape_cast %42 : vector<1x4x4xbf16> to vector<4x4xbf16>
    %cst_23 = arith.constant dense<0.000000e+00> : vector<256x4xf32>
    %44 = tpu.matmul %41, %43, %cst_23 {dimension_numbers = #tpu.dot_dimension_numbers<[1], [0], [0], [1], [0, 0, 1, 1], [], []>} : vector<256x4xbf16>, vector<4x4xbf16>, vector<256x4xf32> -> vector<256x4xf32>
    %45 = arith.addf %39, %44 : vector<256x4xf32>
    %46 = vector.extract_strided_slice %6 {offsets = [0, 2, 0, 0], sizes = [1, 16, 16, 4], strides = [1, 1, 1, 1]} : vector<1x18x16x4xbf16> to vector<1x16x16x4xbf16>
    %47 = vector.shape_cast %46 : vector<1x16x16x4xbf16> to vector<256x4xbf16>
    %c6 = arith.constant 6 : index
    %c0_24 = arith.constant 0 : index
    %c0_25 = arith.constant 0 : index
    %48 = vector.load %arg2[%c6, %c0_24, %c0_25] : memref<9x4x4xbf16, #tpu.memory_space<vmem>>, vector<1x4x4xbf16>
    %49 = vector.shape_cast %48 : vector<1x4x4xbf16> to vector<4x4xbf16>
    %cst_26 = arith.constant dense<0.000000e+00> : vector<256x4xf32>
    %50 = tpu.matmul %47, %49, %cst_26 {dimension_numbers = #tpu.dot_dimension_numbers<[1], [0], [0], [1], [0, 0, 1, 1], [], []>} : vector<256x4xbf16>, vector<4x4xbf16>, vector<256x4xf32> -> vector<256x4xf32>
    %51 = arith.addf %45, %50 : vector<256x4xf32>
    %52 = vector.extract_strided_slice %3 {offsets = [0, 2, 0, 0], sizes = [1, 16, 16, 4], strides = [1, 1, 1, 1]} : vector<1x18x16x4xbf16> to vector<1x16x16x4xbf16>
    %53 = vector.shape_cast %52 : vector<1x16x16x4xbf16> to vector<256x4xbf16>
    %c7 = arith.constant 7 : index
    %c0_27 = arith.constant 0 : index
    %c0_28 = arith.constant 0 : index
    %54 = vector.load %arg2[%c7, %c0_27, %c0_28] : memref<9x4x4xbf16, #tpu.memory_space<vmem>>, vector<1x4x4xbf16>
    %55 = vector.shape_cast %54 : vector<1x4x4xbf16> to vector<4x4xbf16>
    %cst_29 = arith.constant dense<0.000000e+00> : vector<256x4xf32>
    %56 = tpu.matmul %53, %55, %cst_29 {dimension_numbers = #tpu.dot_dimension_numbers<[1], [0], [0], [1], [0, 0, 1, 1], [], []>} : vector<256x4xbf16>, vector<4x4xbf16>, vector<256x4xf32> -> vector<256x4xf32>
    %57 = arith.addf %51, %56 : vector<256x4xf32>
    %58 = vector.extract_strided_slice %8 {offsets = [0, 2, 0, 0], sizes = [1, 16, 16, 4], strides = [1, 1, 1, 1]} : vector<1x18x16x4xbf16> to vector<1x16x16x4xbf16>
    %59 = vector.shape_cast %58 : vector<1x16x16x4xbf16> to vector<256x4xbf16>
    %c8 = arith.constant 8 : index
    %c0_30 = arith.constant 0 : index
    %c0_31 = arith.constant 0 : index
    %60 = vector.load %arg2[%c8, %c0_30, %c0_31] : memref<9x4x4xbf16, #tpu.memory_space<vmem>>, vector<1x4x4xbf16>
    %61 = vector.shape_cast %60 : vector<1x4x4xbf16> to vector<4x4xbf16>
    %cst_32 = arith.constant dense<0.000000e+00> : vector<256x4xf32>
    %62 = tpu.matmul %59, %61, %cst_32 {dimension_numbers = #tpu.dot_dimension_numbers<[1], [0], [0], [1], [0, 0, 1, 1], [], []>} : vector<256x4xbf16>, vector<4x4xbf16>, vector<256x4xf32> -> vector<256x4xf32>
    %63 = arith.addf %57, %62 : vector<256x4xf32>
    %c0_33 = arith.constant 0 : index
    %c0_34 = arith.constant 0 : index
    %64 = vector.load %arg4[%c0_33, %c0_34] : memref<1x4xf32, #tpu.memory_space<vmem>>, vector<1x4xf32>
    %65 = vector.broadcast %64 : vector<1x4xf32> to vector<256x4xf32>
    %66 = arith.mulf %63, %65 : vector<256x4xf32>
    %c0_35 = arith.constant 0 : index
    %c0_36 = arith.constant 0 : index
    %67 = vector.load %arg5[%c0_35, %c0_36] : memref<1x4xf32, #tpu.memory_space<vmem>>, vector<1x4xf32>
    %68 = vector.broadcast %67 : vector<1x4xf32> to vector<256x4xf32>
    %69 = arith.addf %66, %68 : vector<256x4xf32>
    %cst_37 = arith.constant 0.000000e+00 : f32
    %70 = vector.broadcast %cst_37 : f32 to vector<256x4xf32>
    %71 = arith.maximumf %69, %70 : vector<256x4xf32>
    %72 = vector.shape_cast %71 : vector<256x4xf32> to vector<1x16x16x4xf32>
    %73 = arith.truncf %72 : vector<1x16x16x4xf32> to vector<1x16x16x4xbf16>
    %cst_38 = arith.constant 0.000000e+00 : bf16
    %74 = vector.broadcast %cst_38 : bf16 to vector<1x1x16x4xbf16>
    %75 = tpu.concatenate %74, %73, %74 in 1 : vector<1x1x16x4xbf16>, vector<1x16x16x4xbf16>, vector<1x1x16x4xbf16> -> vector<1x18x16x4xbf16>
    %cst_39 = arith.constant 0.000000e+00 : bf16
    %76 = vector.broadcast %cst_39 : bf16 to vector<1x18x1x4xbf16>
    %77 = vector.extract_strided_slice %75 {offsets = [0, 0, 0, 0], sizes = [1, 18, 15, 4], strides = [1, 1, 1, 1]} : vector<1x18x16x4xbf16> to vector<1x18x15x4xbf16>
    %78 = tpu.concatenate %76, %77 in 2 : vector<1x18x1x4xbf16>, vector<1x18x15x4xbf16> -> vector<1x18x16x4xbf16>
    %79 = vector.extract_strided_slice %75 {offsets = [0, 0, 1, 0], sizes = [1, 18, 15, 4], strides = [1, 1, 1, 1]} : vector<1x18x16x4xbf16> to vector<1x18x15x4xbf16>
    %80 = tpu.concatenate %79, %76 in 2 : vector<1x18x15x4xbf16>, vector<1x18x1x4xbf16> -> vector<1x18x16x4xbf16>
    %cst_40 = arith.constant 0.000000e+00 : f32
    %81 = vector.broadcast %cst_40 : f32 to vector<256x4xf32>
    %82 = vector.extract_strided_slice %78 {offsets = [0, 0, 0, 0], sizes = [1, 16, 16, 4], strides = [1, 1, 1, 1]} : vector<1x18x16x4xbf16> to vector<1x16x16x4xbf16>
    %83 = vector.shape_cast %82 : vector<1x16x16x4xbf16> to vector<256x4xbf16>
    %c0_41 = arith.constant 0 : index
    %c0_42 = arith.constant 0 : index
    %c0_43 = arith.constant 0 : index
    %84 = vector.load %arg3[%c0_41, %c0_42, %c0_43] : memref<9x4x4xbf16, #tpu.memory_space<vmem>>, vector<1x4x4xbf16>
    %85 = vector.shape_cast %84 : vector<1x4x4xbf16> to vector<4x4xbf16>
    %cst_44 = arith.constant dense<0.000000e+00> : vector<256x4xf32>
    %86 = tpu.matmul %83, %85, %cst_44 {dimension_numbers = #tpu.dot_dimension_numbers<[1], [0], [0], [1], [0, 0, 1, 1], [], []>} : vector<256x4xbf16>, vector<4x4xbf16>, vector<256x4xf32> -> vector<256x4xf32>
    %87 = arith.addf %81, %86 : vector<256x4xf32>
    %88 = vector.extract_strided_slice %75 {offsets = [0, 0, 0, 0], sizes = [1, 16, 16, 4], strides = [1, 1, 1, 1]} : vector<1x18x16x4xbf16> to vector<1x16x16x4xbf16>
    %89 = vector.shape_cast %88 : vector<1x16x16x4xbf16> to vector<256x4xbf16>
    %c1_45 = arith.constant 1 : index
    %c0_46 = arith.constant 0 : index
    %c0_47 = arith.constant 0 : index
    %90 = vector.load %arg3[%c1_45, %c0_46, %c0_47] : memref<9x4x4xbf16, #tpu.memory_space<vmem>>, vector<1x4x4xbf16>
    %91 = vector.shape_cast %90 : vector<1x4x4xbf16> to vector<4x4xbf16>
    %cst_48 = arith.constant dense<0.000000e+00> : vector<256x4xf32>
    %92 = tpu.matmul %89, %91, %cst_48 {dimension_numbers = #tpu.dot_dimension_numbers<[1], [0], [0], [1], [0, 0, 1, 1], [], []>} : vector<256x4xbf16>, vector<4x4xbf16>, vector<256x4xf32> -> vector<256x4xf32>
    %93 = arith.addf %87, %92 : vector<256x4xf32>
    %94 = vector.extract_strided_slice %80 {offsets = [0, 0, 0, 0], sizes = [1, 16, 16, 4], strides = [1, 1, 1, 1]} : vector<1x18x16x4xbf16> to vector<1x16x16x4xbf16>
    %95 = vector.shape_cast %94 : vector<1x16x16x4xbf16> to vector<256x4xbf16>
    %c2_49 = arith.constant 2 : index
    %c0_50 = arith.constant 0 : index
    %c0_51 = arith.constant 0 : index
    %96 = vector.load %arg3[%c2_49, %c0_50, %c0_51] : memref<9x4x4xbf16, #tpu.memory_space<vmem>>, vector<1x4x4xbf16>
    %97 = vector.shape_cast %96 : vector<1x4x4xbf16> to vector<4x4xbf16>
    %cst_52 = arith.constant dense<0.000000e+00> : vector<256x4xf32>
    %98 = tpu.matmul %95, %97, %cst_52 {dimension_numbers = #tpu.dot_dimension_numbers<[1], [0], [0], [1], [0, 0, 1, 1], [], []>} : vector<256x4xbf16>, vector<4x4xbf16>, vector<256x4xf32> -> vector<256x4xf32>
    %99 = arith.addf %93, %98 : vector<256x4xf32>
    %100 = vector.extract_strided_slice %78 {offsets = [0, 1, 0, 0], sizes = [1, 16, 16, 4], strides = [1, 1, 1, 1]} : vector<1x18x16x4xbf16> to vector<1x16x16x4xbf16>
    %101 = vector.shape_cast %100 : vector<1x16x16x4xbf16> to vector<256x4xbf16>
    %c3_53 = arith.constant 3 : index
    %c0_54 = arith.constant 0 : index
    %c0_55 = arith.constant 0 : index
    %102 = vector.load %arg3[%c3_53, %c0_54, %c0_55] : memref<9x4x4xbf16, #tpu.memory_space<vmem>>, vector<1x4x4xbf16>
    %103 = vector.shape_cast %102 : vector<1x4x4xbf16> to vector<4x4xbf16>
    %cst_56 = arith.constant dense<0.000000e+00> : vector<256x4xf32>
    %104 = tpu.matmul %101, %103, %cst_56 {dimension_numbers = #tpu.dot_dimension_numbers<[1], [0], [0], [1], [0, 0, 1, 1], [], []>} : vector<256x4xbf16>, vector<4x4xbf16>, vector<256x4xf32> -> vector<256x4xf32>
    %105 = arith.addf %99, %104 : vector<256x4xf32>
    %106 = vector.extract_strided_slice %75 {offsets = [0, 1, 0, 0], sizes = [1, 16, 16, 4], strides = [1, 1, 1, 1]} : vector<1x18x16x4xbf16> to vector<1x16x16x4xbf16>
    %107 = vector.shape_cast %106 : vector<1x16x16x4xbf16> to vector<256x4xbf16>
    %c4_57 = arith.constant 4 : index
    %c0_58 = arith.constant 0 : index
    %c0_59 = arith.constant 0 : index
    %108 = vector.load %arg3[%c4_57, %c0_58, %c0_59] : memref<9x4x4xbf16, #tpu.memory_space<vmem>>, vector<1x4x4xbf16>
    %109 = vector.shape_cast %108 : vector<1x4x4xbf16> to vector<4x4xbf16>
    %cst_60 = arith.constant dense<0.000000e+00> : vector<256x4xf32>
    %110 = tpu.matmul %107, %109, %cst_60 {dimension_numbers = #tpu.dot_dimension_numbers<[1], [0], [0], [1], [0, 0, 1, 1], [], []>} : vector<256x4xbf16>, vector<4x4xbf16>, vector<256x4xf32> -> vector<256x4xf32>
    %111 = arith.addf %105, %110 : vector<256x4xf32>
    %112 = vector.extract_strided_slice %80 {offsets = [0, 1, 0, 0], sizes = [1, 16, 16, 4], strides = [1, 1, 1, 1]} : vector<1x18x16x4xbf16> to vector<1x16x16x4xbf16>
    %113 = vector.shape_cast %112 : vector<1x16x16x4xbf16> to vector<256x4xbf16>
    %c5_61 = arith.constant 5 : index
    %c0_62 = arith.constant 0 : index
    %c0_63 = arith.constant 0 : index
    %114 = vector.load %arg3[%c5_61, %c0_62, %c0_63] : memref<9x4x4xbf16, #tpu.memory_space<vmem>>, vector<1x4x4xbf16>
    %115 = vector.shape_cast %114 : vector<1x4x4xbf16> to vector<4x4xbf16>
    %cst_64 = arith.constant dense<0.000000e+00> : vector<256x4xf32>
    %116 = tpu.matmul %113, %115, %cst_64 {dimension_numbers = #tpu.dot_dimension_numbers<[1], [0], [0], [1], [0, 0, 1, 1], [], []>} : vector<256x4xbf16>, vector<4x4xbf16>, vector<256x4xf32> -> vector<256x4xf32>
    %117 = arith.addf %111, %116 : vector<256x4xf32>
    %118 = vector.extract_strided_slice %78 {offsets = [0, 2, 0, 0], sizes = [1, 16, 16, 4], strides = [1, 1, 1, 1]} : vector<1x18x16x4xbf16> to vector<1x16x16x4xbf16>
    %119 = vector.shape_cast %118 : vector<1x16x16x4xbf16> to vector<256x4xbf16>
    %c6_65 = arith.constant 6 : index
    %c0_66 = arith.constant 0 : index
    %c0_67 = arith.constant 0 : index
    %120 = vector.load %arg3[%c6_65, %c0_66, %c0_67] : memref<9x4x4xbf16, #tpu.memory_space<vmem>>, vector<1x4x4xbf16>
    %121 = vector.shape_cast %120 : vector<1x4x4xbf16> to vector<4x4xbf16>
    %cst_68 = arith.constant dense<0.000000e+00> : vector<256x4xf32>
    %122 = tpu.matmul %119, %121, %cst_68 {dimension_numbers = #tpu.dot_dimension_numbers<[1], [0], [0], [1], [0, 0, 1, 1], [], []>} : vector<256x4xbf16>, vector<4x4xbf16>, vector<256x4xf32> -> vector<256x4xf32>
    %123 = arith.addf %117, %122 : vector<256x4xf32>
    %124 = vector.extract_strided_slice %75 {offsets = [0, 2, 0, 0], sizes = [1, 16, 16, 4], strides = [1, 1, 1, 1]} : vector<1x18x16x4xbf16> to vector<1x16x16x4xbf16>
    %125 = vector.shape_cast %124 : vector<1x16x16x4xbf16> to vector<256x4xbf16>
    %c7_69 = arith.constant 7 : index
    %c0_70 = arith.constant 0 : index
    %c0_71 = arith.constant 0 : index
    %126 = vector.load %arg3[%c7_69, %c0_70, %c0_71] : memref<9x4x4xbf16, #tpu.memory_space<vmem>>, vector<1x4x4xbf16>
    %127 = vector.shape_cast %126 : vector<1x4x4xbf16> to vector<4x4xbf16>
    %cst_72 = arith.constant dense<0.000000e+00> : vector<256x4xf32>
    %128 = tpu.matmul %125, %127, %cst_72 {dimension_numbers = #tpu.dot_dimension_numbers<[1], [0], [0], [1], [0, 0, 1, 1], [], []>} : vector<256x4xbf16>, vector<4x4xbf16>, vector<256x4xf32> -> vector<256x4xf32>
    %129 = arith.addf %123, %128 : vector<256x4xf32>
    %130 = vector.extract_strided_slice %80 {offsets = [0, 2, 0, 0], sizes = [1, 16, 16, 4], strides = [1, 1, 1, 1]} : vector<1x18x16x4xbf16> to vector<1x16x16x4xbf16>
    %131 = vector.shape_cast %130 : vector<1x16x16x4xbf16> to vector<256x4xbf16>
    %c8_73 = arith.constant 8 : index
    %c0_74 = arith.constant 0 : index
    %c0_75 = arith.constant 0 : index
    %132 = vector.load %arg3[%c8_73, %c0_74, %c0_75] : memref<9x4x4xbf16, #tpu.memory_space<vmem>>, vector<1x4x4xbf16>
    %133 = vector.shape_cast %132 : vector<1x4x4xbf16> to vector<4x4xbf16>
    %cst_76 = arith.constant dense<0.000000e+00> : vector<256x4xf32>
    %134 = tpu.matmul %131, %133, %cst_76 {dimension_numbers = #tpu.dot_dimension_numbers<[1], [0], [0], [1], [0, 0, 1, 1], [], []>} : vector<256x4xbf16>, vector<4x4xbf16>, vector<256x4xf32> -> vector<256x4xf32>
    %135 = arith.addf %129, %134 : vector<256x4xf32>
    %cst_77 = arith.constant dense<0.000000e+00> : vector<4xf32>
    %136 = vector.multi_reduction <add>, %135, %cst_77 [0] : vector<256x4xf32> to vector<4xf32>
    %137 = vector.shape_cast %136 : vector<4xf32> to vector<1x1x4xf32>
    %c0_78 = arith.constant 0 : index
    %c0_79 = arith.constant 0 : index
    %c0_80 = arith.constant 0 : index
    %138 = vector.load %arg7[%c0_78, %c0_79, %c0_80] : memref<1x2x4xf32, #tpu.memory_space<vmem>>, vector<1x1x4xf32>
    tpu.vector_store %arg7[%c0_78, %c0_79, %c0_80], %137 {strides = array<i32>} : memref<1x2x4xf32, #tpu.memory_space<vmem>>, vector<1x1x4xf32>,
    %139 = arith.mulf %135, %135 : vector<256x4xf32>
    %cst_81 = arith.constant dense<0.000000e+00> : vector<4xf32>
    %140 = vector.multi_reduction <add>, %139, %cst_81 [0] : vector<256x4xf32> to vector<4xf32>
    %141 = vector.shape_cast %140 : vector<4xf32> to vector<1x1x4xf32>
    %c0_82 = arith.constant 0 : index
    %c1_83 = arith.constant 1 : index
    %c0_84 = arith.constant 0 : index
    %142 = vector.load %arg7[%c0_82, %c1_83, %c0_84] : memref<1x2x4xf32, #tpu.memory_space<vmem>>, vector<1x1x4xf32>
    tpu.vector_store %arg7[%c0_82, %c1_83, %c0_84], %141 {strides = array<i32>} : memref<1x2x4xf32, #tpu.memory_space<vmem>>, vector<1x1x4xf32>,
    %143 = arith.truncf %135 : vector<256x4xf32> to vector<256x4xbf16>
    %c0_85 = arith.constant 0 : index
    %c0_86 = arith.constant 0 : index
    %144 = vector.load %arg6[%c0_85, %c0_86] : memref<256x4xbf16, #tpu.memory_space<vmem>>, vector<256x4xbf16>
    tpu.vector_store %arg6[%c0_85, %c0_86], %143 {strides = array<i32>} : memref<256x4xbf16, #tpu.memory_space<vmem>>, vector<256x4xbf16>,
    return
  }
  func.func @transform_0(%arg0: i32) -> (i32, i32, i32, i32) {
    %c0_i32 = arith.constant 0 : i32
    %c0_i32_0 = arith.constant 0 : i32
    %c0_i32_1 = arith.constant 0 : i32
    %c0_i32_2 = arith.constant 0 : i32
    return %arg0, %c0_i32, %c0_i32_0, %c0_i32_1 : i32, i32, i32, i32
  }
  func.func @transform_1(%arg0: i32) -> (i32, i32, i32) {
    %c0_i32 = arith.constant 0 : i32
    %c0_i32_0 = arith.constant 0 : i32
    %c0_i32_1 = arith.constant 0 : i32
    %c0_i32_2 = arith.constant 0 : i32
    return %c0_i32, %c0_i32_0, %c0_i32_1 : i32, i32, i32
  }
  func.func @transform_2(%arg0: i32) -> (i32, i32, i32) {
    %c0_i32 = arith.constant 0 : i32
    %c0_i32_0 = arith.constant 0 : i32
    %c0_i32_1 = arith.constant 0 : i32
    %c0_i32_2 = arith.constant 0 : i32
    return %c0_i32, %c0_i32_0, %c0_i32_1 : i32, i32, i32
  }
  func.func @transform_3(%arg0: i32) -> (i32, i32) {
    %c0_i32 = arith.constant 0 : i32
    %c0_i32_0 = arith.constant 0 : i32
    %c0_i32_1 = arith.constant 0 : i32
    return %c0_i32, %c0_i32_0 : i32, i32
  }
  func.func @transform_4(%arg0: i32) -> (i32, i32) {
    %c0_i32 = arith.constant 0 : i32
    %c0_i32_0 = arith.constant 0 : i32
    %c0_i32_1 = arith.constant 0 : i32
    return %c0_i32, %c0_i32_0 : i32, i32
  }
  func.func @transform_5(%arg0: i32) -> (i32, i32) {
    %c0_i32 = arith.constant 0 : i32
    %c0_i32_0 = arith.constant 0 : i32
    return %arg0, %c0_i32 : i32, i32
  }
  func.func @transform_6(%arg0: i32) -> (i32, i32, i32) {
    %c0_i32 = arith.constant 0 : i32
    %c0_i32_0 = arith.constant 0 : i32
    %c0_i32_1 = arith.constant 0 : i32
    return %arg0, %c0_i32, %c0_i32_0 : i32, i32, i32
  }
}

module attributes {stable_mosaic.version = 11 : i64} {
  func.func @bn2_add_relu_kernel(%arg0: i32, %arg1: memref<1x64xf32, #tpu.memory_space<vmem>>, %arg2: memref<1x64xf32, #tpu.memory_space<vmem>>, %arg3: memref<16x64xbf16, #tpu.memory_space<vmem>>, %arg4: memref<16x64xf32, #tpu.memory_space<vmem>>, %arg5: memref<16x64xf32, #tpu.memory_space<vmem>>) attributes {dimension_semantics = [#tpu.dimension_semantics<parallel>], iteration_bounds = array<i64: 2>, scalar_prefetch = 0 : i64, scratch_operands = 0 : i64, tpu.core_type = #tpu.core_type<tc>, window_params = [{pipeline_mode = #tpu.pipeline_mode<synchronous>, transform_indices = @transform_0, window_bounds = array<i64: 1, 64>}, {pipeline_mode = #tpu.pipeline_mode<synchronous>, transform_indices = @transform_1, window_bounds = array<i64: 1, 64>}, {transform_indices = @transform_2, window_bounds = array<i64: 16, 64>}, {transform_indices = @transform_3, window_bounds = array<i64: 16, 64>}, {transform_indices = @transform_4, window_bounds = array<i64: 16, 64>}]} {
    %c0 = arith.constant 0 : index
    %c0_0 = arith.constant 0 : index
    %0 = vector.load %arg3[%c0, %c0_0] : memref<16x64xbf16, #tpu.memory_space<vmem>>, vector<16x64xbf16>
    %1 = arith.extf %0 : vector<16x64xbf16> to vector<16x64xf32>
    %c0_1 = arith.constant 0 : index
    %c0_2 = arith.constant 0 : index
    %2 = vector.load %arg1[%c0_1, %c0_2] : memref<1x64xf32, #tpu.memory_space<vmem>>, vector<1x64xf32>
    %3 = vector.broadcast %2 : vector<1x64xf32> to vector<16x64xf32>
    %4 = arith.mulf %1, %3 : vector<16x64xf32>
    %c0_3 = arith.constant 0 : index
    %c0_4 = arith.constant 0 : index
    %5 = vector.load %arg2[%c0_3, %c0_4] : memref<1x64xf32, #tpu.memory_space<vmem>>, vector<1x64xf32>
    %6 = vector.broadcast %5 : vector<1x64xf32> to vector<16x64xf32>
    %7 = arith.addf %4, %6 : vector<16x64xf32>
    %c0_5 = arith.constant 0 : index
    %c0_6 = arith.constant 0 : index
    %8 = vector.load %arg4[%c0_5, %c0_6] : memref<16x64xf32, #tpu.memory_space<vmem>>, vector<16x64xf32>
    %9 = arith.addf %7, %8 : vector<16x64xf32>
    %cst = arith.constant 0.000000e+00 : f32
    %10 = vector.broadcast %cst : f32 to vector<16x64xf32>
    %11 = arith.maximumf %9, %10 : vector<16x64xf32>
    %c0_7 = arith.constant 0 : index
    %c0_8 = arith.constant 0 : index
    %12 = vector.load %arg5[%c0_7, %c0_8] : memref<16x64xf32, #tpu.memory_space<vmem>>, vector<16x64xf32>
    tpu.vector_store %arg5[%c0_7, %c0_8], %11 {strides = array<i32>} : memref<16x64xf32, #tpu.memory_space<vmem>>, vector<16x64xf32>,
    return
  }
  func.func @transform_0(%arg0: i32) -> (i32, i32) {
    %c0_i32 = arith.constant 0 : i32
    %c0_i32_0 = arith.constant 0 : i32
    %c0_i32_1 = arith.constant 0 : i32
    return %c0_i32, %c0_i32_0 : i32, i32
  }
  func.func @transform_1(%arg0: i32) -> (i32, i32) {
    %c0_i32 = arith.constant 0 : i32
    %c0_i32_0 = arith.constant 0 : i32
    %c0_i32_1 = arith.constant 0 : i32
    return %c0_i32, %c0_i32_0 : i32, i32
  }
  func.func @transform_2(%arg0: i32) -> (i32, i32) {
    %c0_i32 = arith.constant 0 : i32
    %c0_i32_0 = arith.constant 0 : i32
    return %arg0, %c0_i32 : i32, i32
  }
  func.func @transform_3(%arg0: i32) -> (i32, i32) {
    %c0_i32 = arith.constant 0 : i32
    %c0_i32_0 = arith.constant 0 : i32
    return %arg0, %c0_i32 : i32, i32
  }
  func.func @transform_4(%arg0: i32) -> (i32, i32) {
    %c0_i32 = arith.constant 0 : i32
    %c0_i32_0 = arith.constant 0 : i32
    return %arg0, %c0_i32 : i32, i32
  }
}

</mosaic_0001>

<bundles_post_ra>
// kernel: resblock_forward_nhwc.5
= control target key start
LH: loop header
LB: loop body
LE: loop exit
PB: predicated region body
PF: predicated region fallthrough
CT: control target
= control target key end

     0   :  { %s376_s15 = smov 0   ;;  %s402_s0 = inlined_call_operand.vmem [shape: f32[1,64], index: 0, kind: input, shape index: {}]   ;;  %s403_s1 = inlined_call_operand.vmem [shape: f32[1,64], index: 1, kind: input, shape index: {}]   ;;  %s404_s2 = inlined_call_operand.vmem [shape: bf16[32,64], index: 2, kind: input, shape index: {}]   ;;  %s405_s3 = inlined_call_operand.vmem [shape: f32[32,64], index: 3, kind: input, shape index: {}]   ;;  %s406_s4 = inlined_call_operand.vmem [shape: f32[32,64], index: 4, kind: output, shape index: {}]  }
   0x1 LB: > { %s316_s16 = sadd.s32 4294967295, %s349_s15   ;;  %p320_p0 = scmp.ge.s32.totalorder %s349_s15, 1  ;;  %s349_s15 = sphi %s376_s15, %s14_s15  }
   0x2   : > { %p174_p1 = scmp.lt.s32.totalorder %s349_s15, 3 }
   0x4   : > { %p175_p2 = pnand %p320_p0, %p174_p1 }
   0x5   : > { %s321_s17 = sshll.u32 (!%p175_p2), %s316_s16, 1 }
   0x6   : > { %178 = sbr.rel (%p175_p2) target bundleno = 27 (0x1b), region = 36  ;;  %p206_p3 = scmp.lt.s32.totalorder (!%p175_p2), %s321_s17, 3 }
   0xb   : > { %s408_s17 = smov (!%p206_p3, %s321_s17), 3  ;;  %v341_v0 = vld [vmem:[%s402_s0] ss:$0 sm:$0xff]  ;;  %vm245_vm0 = vcmask 523264  }
   0xc   : > { %s322_s18 = sshll.u32 %s408_s17, 2  ;;  %s324_s19 = sshll.u32 %s408_s17, 3  ;;  %v342_v4 = vld [vmem:[%s403_s1] ss:$0 sm:$0xff] }
   0xd   : > { %s209_s22 = scalar_lea.vmem %s404_s2, %s322_s18  ;;  %s215_s27 = scalar_lea.vmem %s405_s3, %s324_s19 }
   0xe   : > { %v330_v1 = vld [vmem:[%s209_s22] sm:$0xff]   ;;  %v240_v8 = vld [vmem:[%s215_s27 + $0x8] sm:$0xff]  ;;  %s221_s6 = scalar_lea.vmem %s406_s4, %s324_s19 }
   0xf   : > { %v331_v2 = vunpack.c.l.bf16 %v330_v1  ;;  %v332_v3 = vunpack.c.h.bf16 %v330_v1  ;;  %v239_v7 = vld [vmem:[%s215_s27] sm:$0xff] }
  0x11   : > { %v231_v5 = vmul.f32 %v341_v0, %v331_v2  ;;  %v232_v6 = vmul.f32 %v341_v0, %v332_v3 }
  0x13   : > { %v237_v9 = vadd.f32 %v342_v4, %v231_v5  ;;  %v238_v10 = vadd.f32 %v342_v4, %v232_v6 }
  0x15   : > { %v241_v11 = vadd.f32 %v239_v7, %v237_v9  ;;  %v242_v12 = vadd.f32 %v240_v8, %v238_v10 }
  0x17   : > { %v243_v13 = vmax.f32 %v241_v11, 0.0  ;;  %v244_v14 = vmax.f32 %v242_v12, 0.0 }
  0x19   : > { %246 = vst.msk [vmem:[%s221_s6] sm:$0xff] %vm245_vm0, %v243_v13 }
  0x1a   : > { %247 = vst.msk [vmem:[%s221_s6 + $0x8] sm:$0xff] %vm245_vm0, %v244_v14 }
  0x1b PF: > { %s14_s15 = sadd.s32 1, %s349_s15  }
  0x1c   : > { %p11_p4 = scmp.ge.s32.totalorder %s14_s15, 4  }
  0x1e   :  { %13 = sbr.rel (!%p11_p4) target bundleno = 1 (0x1), region = 69 }

// kernel: resblock_forward_nhwc.3
= control target key start
LH: loop header
LB: loop body
LE: loop exit
PB: predicated region body
PF: predicated region fallthrough
CT: control target
= control target key end

     0   :  { %s2144_s9 = smov 0   ;;  %s2987_s0 = inlined_call_operand.vmem [shape: f32[2,16,16,4], index: 0, kind: input, shape index: {}]   ;;  %s2988_s1 = inlined_call_operand.vmem [shape: bf16[9,4,4], index: 1, kind: input, shape index: {}]   ;;  %s2989_s2 = inlined_call_operand.vmem [shape: f32[2,2,4], index: 2, kind: output, shape index: {}]  }
   0x1 LB: > { %s1947_s10 = sadd.s32 4294967295, %s2126_s9   ;;  %p1951_p0 = scmp.ge.s32.totalorder %s2126_s9, 1  ;;  %s2126_s9 = sphi %s2144_s9, %s12_s9  }
   0x2   : > { %p112_p1 = scmp.lt.s32.totalorder %s2126_s9, 3 }
   0x4   : > { %p113_p2 = pnand %p1951_p0, %p112_p1 }
   0x6   : > { %116 = sbr.rel (%p113_p2) target bundleno = 748 (0x2ec), region = 28 }
   0xb   : > { %v1955_v0 = vld [vmem:[%s2988_s1 + $0x2] sm:$0x3]  ;;  %vm550_vm0 = vcmask 1041408   ;;  %p133_p3 = scmp.lt.s32.totalorder %s1947_s10, 1  ;;  %v1987_v2 = vld [vmem:[%s2988_s1 + $0x4] sm:$0x3] }
   0xc   : > { %v552_v1 = vsel %vm550_vm0, %v1955_v0, 0  ;;  %v2004_v3 = vld [vmem:[%s2988_s1 + $0x6] sm:$0x3]  ;;  %v834_v4 = vsel %vm550_vm0, %v1987_v2, 0  ;;  %v514_v6 = vld [vmem:[%s2988_s1] sm:$0x3] }
   0xd   : > { %2108 = vmatpush.bf16.msra.mxu1 %v552_v1  ;;  %2109 = vmatpush.bf16.msra.mxu2 %v552_v1  ;;  %s3095_s10 = smov (!%p133_p3, %s1947_s10), 1  ;;  %v963_v5 = vsel %vm550_vm0, %v2004_v3, 0  ;;  %v692_v7 = vsel %vm550_vm0, %v514_v6, 0  ;;  %v2021_v8 = vld [vmem:[%s2988_s1 + $0x8] sm:$0x3]  ;;  %v2990_v13 = vmov 0  }
   0xe   : > { %2110 = vmatpush.bf16.msra.mxu3 %v552_v1  ;;  %561 = vmatpush.bf16.msra.mxu0 %v552_v1  ;;  %s2107_s21 = sshll.u32 %s3095_s10, 8  ;;  %v1091_v9 = vsel %vm550_vm0, %v2021_v8, 0  ;;  %vm517_vm1 = vcmask 31744   ;;  %vm423_vm2 = vcmask 1040384   ;;  %vm424_vm3 = vsmask.f32 256 }
   0xf   : > { %s2178_s24 = scalar_lea.vmem %s2987_s0, %s2107_s21  ;;  %vm494_vm4 = vcmask 1047552   ;;  %vm495_vm5 = vsmask.f32 7424  ;;  %vm2292_vm6 = vmand %vm423_vm2, %vm424_vm3  ;;  %s1954_s5 = sshll.u32 %s3095_s10, 1  ;;  %vm1790_vm8 = vcmask 24576  }
  0x10   : > { %v149_v10 = vld [vmem:[%s2178_s24 + $0x30] sm:$0xff]  ;;  %v150_v11 = vld [vmem:[%s2178_s24 + $0x38] sm:$0xff]  ;;  %v143_v29 = vld [vmem:[%s2178_s24] sm:$0xff]  ;;  %s141_s8 = scalar_lea.vmem %s2989_s2, %s1954_s5 }
  0x11   : > { %843 = vmatpush.bf16.msrb.mxu2 %v834_v4  ;;  %701 = vmatpush.bf16.msrb.mxu1 %v692_v7  ;;  %v157_v12 = vld [vmem:[%s2178_s24 + $0x70] sm:$0xff]  ;;  %v181_v14 = vpack.c.bf16 %v149_v10, %v149_v10  ;;  %v182_v15 = vpack.c.bf16 %v150_v11, %v150_v11  ;;  %v158_v16 = vld [vmem:[%s2178_s24 + $0x78] sm:$0xff]  ;;  %v144_v31 = vld [vmem:[%s2178_s24 + $0x8] sm:$0xff]  ;;  %v175_v34 = vpack.c.bf16 %v143_v29, %v143_v29 }
  0x12   : > { %972 = vmatpush.bf16.msrb.mxu3 %v963_v5  ;;  %1100 = vmatpush.bf16.msrb.mxu0 %v1091_v9  ;;  %v189_v17 = vpack.c.bf16 %v157_v12, %v157_v12  ;;  %v165_v18 = vld [vmem:[%s2178_s24 + $0xb0] sm:$0xff]  ;;  %v166_v19 = vld [vmem:[%s2178_s24 + $0xb8] sm:$0xff]  ;;  %v190_v20 = vpack.c.bf16 %v158_v16, %v158_v16  ;;  %v151_v35 = vld [vmem:[%s2178_s24 + $0x40] sm:$0xff]  ;;  %v176_v38 = vpack.c.bf16 %v144_v31, %v144_v31 }
  0x13   : > { %562 = vmatmul.bf16.vlgmr.msra.gmra.mxu0 %v2990_v13  ;;  %v197_v21 = vpack.c.bf16 %v165_v18, %v165_v18  ;;  %v198_v22 = vpack.c.bf16 %v166_v19, %v166_v19  ;;  %v245_v23 = vunpack.c.l.b16 %v181_v14  ;;  %v246_v24 = vunpack.c.l.b16 %v182_v15  ;;  %v152_v36 = vld [vmem:[%s2178_s24 + $0x48] sm:$0xff]  ;;  %v159_v37 = vld [vmem:[%s2178_s24 + $0x80] sm:$0xff]  ;;  %v145_v57 = vld [vmem:[%s2178_s24 + $0x10] sm:$0xff] }
  0x14   : > { %v253_v25 = vunpack.c.l.b16 %v189_v17  ;;  %v254_v26 = vunpack.c.l.b16 %v190_v20  ;;  %v160_v39 = vld [vmem:[%s2178_s24 + $0x88] sm:$0xff]  ;;  %v167_v40 = vld [vmem:[%s2178_s24 + $0xc0] sm:$0xff]  ;;  %v239_v42 = vunpack.c.l.b16 %v175_v34  ;;  %v240_v43 = vunpack.c.l.b16 %v176_v38  ;;  %v146_v58 = vld [vmem:[%s2178_s24 + $0x18] sm:$0xff] }
  0x15   : > { %v261_v27 = vunpack.c.l.b16 %v197_v21  ;;  %v262_v28 = vunpack.c.l.b16 %v198_v22  ;;  %v2188_v30 = vpack.c.b16 %v246_v24, %v245_v23  ;;  %v168_v41 = vld [vmem:[%s2178_s24 + $0xc8] sm:$0xff]  ;;  %v183_v44 = vpack.c.bf16 %v151_v35, %v151_v35  ;;  %v153_v0 = vld [vmem:[%s2178_s24 + $0x50] sm:$0xff]  ;;  %v154_v1 = vld [vmem:[%s2178_s24 + $0x58] sm:$0xff] }
  0x16   : > { %v2191_v32 = vpack.c.b16 %v254_v26, %v253_v25  ;;  %v184_v45 = vpack.c.bf16 %v152_v36, %v152_v36  ;;  %v191_v46 = vpack.c.bf16 %v159_v37, %v159_v37  ;;  %v192_v47 = vpack.c.bf16 %v160_v39, %v160_v39  ;;  %v161_v2 = vld [vmem:[%s2178_s24 + $0x90] sm:$0xff]  ;;  %v162_v5 = vld [vmem:[%s2178_s24 + $0x98] sm:$0xff]  ;;  %v147_v22 = vld [vmem:[%s2178_s24 + $0x20] sm:$0xff] }
  0x17   : > { %v2193_v33 = vpack.c.b16 %v262_v28, %v261_v27  ;;  %1959 = vmatmul.msk.bf16.vlgmr.msra.gmra.mxu1 %vm517_vm1, %v2188_v30  ;;  %v199_v48 = vpack.c.bf16 %v167_v40, %v167_v40  ;;  %v200_v49 = vpack.c.bf16 %v168_v41, %v168_v41  ;;  %v2207_v50 = vpack.c.b16 %v240_v43, %v239_v42  ;;  %v169_v6 = vld [vmem:[%s2178_s24 + $0xd0] sm:$0xff]  ;;  %v170_v7 = vld [vmem:[%s2178_s24 + $0xd8] sm:$0xff]  ;;  %v148_v23 = vld [vmem:[%s2178_s24 + $0x28] sm:$0xff] }
  0x18   : > { %3015 = vst [vmem:[#allocation2_spill] sm:$0xff] %v2191_v32  ;;  %1963 = vmatmul.msk.bf16.vlgmr.msra.gmra.mxu2 %vm517_vm1, %v2191_v32  ;;  %v247_v51 = vunpack.c.l.b16 %v183_v44  ;;  %v248_v52 = vunpack.c.l.b16 %v184_v45  ;;  %v255_v53 = vunpack.c.l.b16 %v191_v46  ;;  %v256_v54 = vunpack.c.l.b16 %v192_v47  ;;  %v155_v29 = vld [vmem:[%s2178_s24 + $0x60] sm:$0xff]  ;;  %v156_v31 = vld [vmem:[%s2178_s24 + $0x68] sm:$0xff]  ;;  %v2088_v46 = vld [vmem:[%s2988_s1 + $0x10] sm:$0x3] }
  0x19   : > { %3016 = vst [vmem:[#allocation3_spill] sm:$0xff] %v2193_v33  ;;  %1967 = vmatmul.msk.bf16.vlgmr.msra.gmra.mxu3 %vm517_vm1, %v2193_v33  ;;  %v263_v55 = vunpack.c.l.b16 %v199_v48  ;;  %v264_v56 = vunpack.c.l.b16 %v200_v49  ;;  %v177_v62 = vpack.c.bf16 %v145_v57, %v145_v57  ;;  %v178_v63 = vpack.c.bf16 %v146_v58, %v146_v58  ;;  %v163_v34 = vld [vmem:[%s2178_s24 + $0xa0] sm:$0xff]  ;;  %v164_v35 = vld [vmem:[%s2178_s24 + $0xa8] sm:$0xff]  ;;  %vm2297_vm7 = vmand %vm494_vm4, %vm495_vm5 }
  0x1a   : > { %v2213_v59 = vpack.c.b16 %v248_v52, %v247_v51  ;;  %v2215_v60 = vpack.c.b16 %v256_v54, %v255_v53  ;;  %v185_v8 = vpack.c.bf16 %v153_v0, %v153_v0  ;;  %v186_v9 = vpack.c.bf16 %v154_v1, %v154_v1  ;;  %v171_v36 = vld [vmem:[%s2178_s24 + $0xe0] sm:$0xff]  ;;  %v2055_v39 = vld [vmem:[%s2988_s1 + $0xc] sm:$0x3]  ;;  %v2072_v40 = vld [vmem:[%s2988_s1 + $0xe] sm:$0x3] }
  0x1b   : > { %v2217_v61 = vpack.c.b16 %v264_v56, %v263_v55  ;;  %v241_v3 = vunpack.c.l.b16 %v177_v62  ;;  %v242_v4 = vunpack.c.l.b16 %v178_v63  ;;  %v193_v10 = vpack.c.bf16 %v161_v2, %v161_v2  ;;  %v2038_v41 = vld [vmem:[%s2988_s1 + $0xa] sm:$0x3] }
  0x1c   : > { %3017 = vst [vmem:[#allocation4_spill] sm:$0xff] %v2213_v59  ;;  %v194_v11 = vpack.c.bf16 %v162_v5, %v162_v5  ;;  %v201_v12 = vpack.c.bf16 %v169_v6, %v169_v6  ;;  %v202_v14 = vpack.c.bf16 %v170_v7, %v170_v7  ;;  %v249_v16 = vunpack.c.l.b16 %v185_v8  ;;  %v172_v42 = vld [vmem:[%s2178_s24 + $0xe8] sm:$0xff] }
  0x1d   : > { %3018 = vst [vmem:[#allocation5_spill] sm:$0xff] %v2215_v60  ;;  %v2231_v15 = vpack.c.b16 %v242_v4, %v241_v3  ;;  %v250_v17 = vunpack.c.l.b16 %v186_v9  ;;  %v257_v18 = vunpack.c.l.b16 %v193_v10  ;;  %v179_v27 = vpack.c.bf16 %v147_v22, %v147_v22 }
  0x1e   : > { %3019 = vst [vmem:[#allocation6_spill] sm:$0xff] %v2217_v61  ;;  %v258_v19 = vunpack.c.l.b16 %v194_v11  ;;  %v265_v20 = vunpack.c.l.b16 %v201_v12  ;;  %v266_v21 = vunpack.c.l.b16 %v202_v14  ;;  %v180_v28 = vpack.c.bf16 %v148_v23, %v148_v23 }
  0x1f   : > { %v2237_v24 = vpack.c.b16 %v250_v17, %v249_v16  ;;  %v243_v37 = vunpack.c.l.b16 %v179_v27  ;;  %v1346_v43 = vsel %vm550_vm0, %v2055_v39, 0  ;;  %v1472_v44 = vsel %vm550_vm0, %v2072_v40, 0 }
  0x20   : > { %v2239_v25 = vpack.c.b16 %v258_v19, %v257_v18  ;;  %v2241_v26 = vpack.c.b16 %v266_v21, %v265_v20  ;;  %v244_v38 = vunpack.c.l.b16 %v180_v28  ;;  %v1220_v45 = vsel %vm550_vm0, %v2038_v41, 0  ;;  %1355 = vmatpush.bf16.msra.mxu2 %v1346_v43  ;;  %1481 = vmatpush.bf16.msra.mxu3 %v1472_v44 }
  0x21   : > { %3020 = vst [vmem:[#allocation7_spill] sm:$0xff] %v2237_v24  ;;  %v1598_v47 = vsel %vm550_vm0, %v2088_v46, 0  ;;  %v187_v48 = vpack.c.bf16 %v155_v29, %v155_v29  ;;  %v188_v49 = vpack.c.bf16 %v156_v31, %v156_v31  ;;  %v195_v51 = vpack.c.bf16 %v163_v34, %v163_v34  ;;  %1229 = vmatpush.bf16.msra.mxu1 %v1220_v45 }
  0x22   : > { %3021 = vst [vmem:[#allocation8_spill] sm:$0xff] %v2239_v25  ;;  %1607 = vmatpush.bf16.msra.mxu0 %v1598_v47  ;;  %v196_v52 = vpack.c.bf16 %v164_v35, %v164_v35  ;;  %v203_v53 = vpack.c.bf16 %v171_v36, %v171_v36  ;;  %v204_v54 = vpack.c.bf16 %v172_v42, %v172_v42  ;;  %v295_v4 = vshrl.u32 %v2207_v50, 16 }
  0x23   : > { %1956 = vmatmul.msk.bf16.gmra.mxu0 %vm517_vm1, %v2207_v50  ;;  %3022 = vst [vmem:[#allocation9_spill] sm:$0xff] %v2241_v26  ;;  %v2271_v55 = vpack.c.b16 %v244_v38, %v243_v37  ;;  %v251_v56 = vunpack.c.l.b16 %v187_v48  ;;  %v252_v57 = vunpack.c.l.b16 %v188_v49  ;;  %v259_v58 = vunpack.c.l.b16 %v195_v51 }
  0x24   : > { %v260_v62 = vunpack.c.l.b16 %v196_v52  ;;  %v267_v63 = vunpack.c.l.b16 %v203_v53  ;;  %v268_v0 = vunpack.c.l.b16 %v204_v54  ;;  %v297_v5 = vrot.slane %v295_v4, 7 }
  0x25   : > { %v2275_v1 = vpack.c.b16 %v252_v57, %v251_v56  ;;  %v298_v6 = vshll.u32 %v2207_v50, 16  ;;  %v290_v7 = vrot.slane %v2990_v13, 7  ;;  %v443_v9 = vrot.slane %v2990_v13, 1 }
  0x26   : > { %v2277_v2 = vpack.c.b16 %v260_v62, %v259_v58  ;;  %v2279_v3 = vpack.c.b16 %v268_v0, %v267_v63  ;;  %v302_v16 = vshrl.u32 %v2231_v15, 16  ;;  %v305_v19 = vshll.u32 %v2231_v15, 16 }
  0x27   : > { %1960 = vmatmul.msk.bf16.gmra.mxu1 %vm517_vm1, %v2213_v59  ;;  %3023 = vst [vmem:[#allocation10_spill] sm:$0xff] %v2275_v1  ;;  %v300_v10 = vor.u32 %v298_v6, %v297_v5  ;;  %v2303_v12 = vsel %vm2292_vm6, 0, %v290_v7  ;;  %v2307_v14 = vsel %vm2297_vm7, %v443_v9, 0  ;;  %v445_v17 = vrot.slane %v298_v6, 1 }
  0x28   : > { %1964 = vmatmul.msk.bf16.gmra.mxu2 %vm517_vm1, %v2215_v60  ;;  %3024 = vst [vmem:[#allocation11_spill] sm:$0xff] %v2277_v2  ;;  %v304_v18 = vrot.slane %v302_v16, 7  ;;  %v309_v27 = vshrl.u32 %v2271_v55, 16  ;;  %v447_v28 = vrot.slane %v305_v19, 1  ;;  %v312_v31 = vshll.u32 %v2271_v55, 16 }
  0x29   : > { %1968 = vmatmul.msk.bf16.gmra.mxu3 %vm517_vm1, %v2217_v61  ;;  %3029 = vst [vmem:[#allocation12_spill] sm:$0xff] %v2303_v12  ;;  %v446_v20 = vor.u32 %v445_v17, %v295_v4  ;;  %v316_v38 = vshrl.u32 %v2188_v30, 16  ;;  %v319_v41 = vshll.u32 %v2188_v30, 16  ;;  %v323_v46 = vshrl.u32 %v2213_v59, 16 }
  0x2a   : > { %3030 = vst [vmem:[#allocation13_spill] sm:$0xff] %v2307_v14  ;;  %v307_v21 = vor.u32 %v305_v19, %v304_v18  ;;  %v311_v29 = vrot.slane %v309_v27, 7  ;;  %v448_v34 = vor.u32 %v447_v28, %v302_v16  ;;  %v449_v39 = vrot.slane %v312_v31, 1 }
  0x2b   : > { %v2322_v22 = vsel %vm2297_vm7, %v446_v20, 0  ;;  %v318_v40 = vrot.slane %v316_v38, 7  ;;  %v451_v48 = vrot.slane %v319_v41, 1  ;;  %v325_v49 = vrot.slane %v323_v46, 7 }
  0x2c   : > { %v2326_v23 = vsel %vm2292_vm6, 0, %v307_v21  ;;  %v314_v35 = vor.u32 %v312_v31, %v311_v29  ;;  %v2339_v36 = vsel %vm2297_vm7, %v448_v34, 0  ;;  %v450_v42 = vor.u32 %v449_v39, %v309_v27 }
  0x2d   : > { %v321_v43 = vor.u32 %v319_v41, %v318_v40  ;;  %v326_v51 = vshll.u32 %v2213_v59, 16  ;;  %v452_v52 = vor.u32 %v451_v48, %v316_v38  ;;  %v330_v62 = vshrl.u32 %v2237_v24, 16 }
  0x2e   : > { %v2343_v37 = vsel %vm2292_vm6, 0, %v314_v35  ;;  %v2357_v44 = vsel %vm2297_vm7, %v450_v42, 0  ;;  %v333_v9 = vshll.u32 %v2237_v24, 16  ;;  %v337_v27 = vshrl.u32 %v2275_v1, 16 }
  0x2f   : > { %v2361_v45 = vsel %vm2292_vm6, 0, %v321_v43  ;;  %v328_v53 = vor.u32 %v326_v51, %v325_v49  ;;  %v2379_v56 = vsel %vm2297_vm7, %v452_v52, 0  ;;  %v453_v6 = vrot.slane %v326_v51, 1 }
  0x30   : > { %v332_v7 = vrot.slane %v330_v62, 7  ;;  %v455_v35 = vrot.slane %v333_v9, 1  ;;  %v339_v38 = vrot.slane %v337_v27, 7  ;;  %v340_v39 = vshll.u32 %v2275_v1, 16 }
  0x31   : > { %v2383_v57 = vsel %vm2292_vm6, 0, %v328_v53  ;;  %v344_v52 = vshrl.u32 %v2191_v32, 16 }
  0x32   : > { %v456_v40 = vor.u32 %v455_v35, %v330_v62  ;;  %v342_v41 = vor.u32 %v340_v39, %v339_v38 }
  0x33   : > { %1957 = vmatmul.msk.bf16.gmra.mxu0 %vm517_vm1, %v2231_v15 }
  0x34   : > { %v2447_v48 = vsel %vm2297_vm7, %v456_v40, 0  ;;  %v2451_v49 = vsel %vm2292_vm6, 0, %v342_v41 }
  0x35   : > { %3036 = vst [vmem:[#allocation19_spill] sm:$0xff] %v2447_v48 }
  0x36   : > { %3037 = vst [vmem:[#allocation20_spill] sm:$0xff] %v2451_v49 }
  0x37   : > { %1961 = vmatmul.msk.bf16.gmra.mxu1 %vm517_vm1, %v2237_v24 }
  0x38   : > { %1965 = vmatmul.msk.bf16.gmra.mxu2 %vm517_vm1, %v2239_v25 }
  0x39   : > { %1969 = vmatmul.msk.bf16.gmra.mxu3 %vm517_vm1, %v2241_v26 }
  0x43   : > { %1958 = vmatmul.msk.bf16.gmra.mxu0 %vm517_vm1, %v2271_v55 }
  0x47   : > { %1962 = vmatmul.msk.bf16.gmra.mxu1 %vm517_vm1, %v2275_v1 }
  0x48   : > { %1966 = vmatmul.msk.bf16.gmra.mxu2 %vm517_vm1, %v2277_v2 }
  0x49   : > { %1970 = vmatmul.msk.bf16.gmra.mxu3 %vm517_vm1, %v2279_v3 }
  0x53   : > { %2022 = vmatmul.msk.bf16.vlgmr.msrb.gmra.mxu0 %vm517_vm1, %v2207_v50  ;;  %v427_v50 = vsel %vm2292_vm6, 0, %v300_v10  ;;  %v454_v10 = vor.u32 %v453_v6, %v323_v46 }
  0x55   : > { %v2413_v19 = vsel %vm2297_vm7, %v454_v10, 0  ;;  %v346_v10 = vrot.slane %v344_v52, 7 }
  0x57   : > { %1971 = vmatmul.msk.bf16.vlgmr.msrb.gmra.mxu1 %vm517_vm1, %v2303_v12 }
  0x58   : > { %1988 = vmatmul.msk.bf16.vlgmr.msrb.gmra.mxu2 %vm517_vm1, %v2307_v14 }
  0x59   : > { %2005 = vmatmul.msk.bf16.vlgmr.msrb.gmra.mxu3 %vm517_vm1, %v427_v50 }
  0x63   : > { %2023 = vmatmul.msk.bf16.gmra.mxu0 %vm517_vm1, %v2231_v15 }
  0x67   : > { %1972 = vmatmul.msk.bf16.gmra.mxu1 %vm517_vm1, %v427_v50  ;;  %v335_v50 = vor.u32 %v333_v9, %v332_v7  ;;  %v457_v9 = vrot.slane %v340_v39, 1 }
  0x68   : > { %1989 = vmatmul.msk.bf16.gmra.mxu2 %vm517_vm1, %v2322_v22 }
  0x69   : > { %2006 = vmatmul.msk.bf16.gmra.mxu3 %vm517_vm1, %v2326_v23  ;;  %v2417_v20 = vsel %vm2292_vm6, 0, %v335_v50  ;;  %v347_v50 = vshll.u32 %v2191_v32, 16  ;;  %v458_v35 = vor.u32 %v457_v9, %v337_v27  ;;  %v351_v27 = vshrl.u32 %v2215_v60, 16 }
  0x6a   : > { %3033 = vst [vmem:[#allocation16_spill] sm:$0xff] %v2417_v20 }
  0x6b   : > { %v349_v38 = vor.u32 %v347_v50, %v346_v10  ;;  %v2481_v12 = vsel %vm2297_vm7, %v458_v35, 0 }
  0x6c   : > { %3040 = vst [vmem:[#allocation23_spill] sm:$0xff] %v2481_v12 }
  0x6d   : > { %v2485_v39 = vsel %vm2292_vm6, 0, %v349_v38 }
  0x6e   : > { %3041 = vst [vmem:[#allocation24_spill] sm:$0xff] %v2485_v39 }
  0x73   : > { %2024 = vmatmul.msk.bf16.gmra.mxu0 %vm517_vm1, %v2271_v55 }
  0x77   : > { %1973 = vmatmul.msk.bf16.gmra.mxu1 %vm517_vm1, %v2326_v23 }
  0x78   : > { %1990 = vmatmul.msk.bf16.gmra.mxu2 %vm517_vm1, %v2339_v36 }
  0x79   : > { %2007 = vmatmul.msk.bf16.gmra.mxu3 %vm517_vm1, %v2343_v37 }
  0x83   : > { %2025 = vmatmul.msk.bf16.gmra.mxu0 %vm517_vm1, %v2188_v30 }
  0x87   : > { %1974 = vmatmul.msk.bf16.gmra.mxu1 %vm517_vm1, %v2343_v37 }
  0x88   : > { %1991 = vmatmul.msk.bf16.gmra.mxu2 %vm517_vm1, %v2357_v44 }
  0x89   : > { %2008 = vmatmul.msk.bf16.gmra.mxu3 %vm517_vm1, %v2361_v45 }
  0x90   : > { %v2370_v47 = vpop.f32.mrf.mxu0 }
  0x93   : > { %2026 = vmatmul.msk.bf16.gmra.mxu0 %vm517_vm1, %v2213_v59 }
  0x94   : > { %v2375_v54 = vpop.f32.mrf.mxu1 }
  0x97   : > { %1975 = vmatmul.msk.bf16.gmra.mxu1 %vm517_vm1, %v2361_v45 }
  0x98   : > { %v2385_v58 = vpop.f32.mrf.mxu0  ;;  %1992 = vmatmul.msk.bf16.gmra.mxu2 %vm517_vm1, %v2379_v56 }
  0x99   : > { %2009 = vmatmul.msk.bf16.gmra.mxu3 %vm517_vm1, %v2383_v57 }
  0x9b   : > { %v2394_v63 = vpop.f32.mrf.mxu2 }
  0x9c   : > { %v2396_v0 = vpop.f32.mrf.mxu3  ;;  %v2398_v4 = vpop.f32.mrf.mxu1 }
  0x9d   : > { %3031 = vst [vmem:[#allocation14_spill] sm:$0xff] %v2396_v0 }
  0xa0   : > { %v2400_v5 = vpop.f32.mrf.mxu0 }
  0xa3   : > { %2027 = vmatmul.msk.bf16.gmra.mxu0 %vm517_vm1, %v2237_v24  ;;  %v2405_v16 = vpop.f32.mrf.mxu2  ;;  %v361_v24 = vshll.u32 %v2239_v25, 16 }
  0xa4   : > { %v2407_v17 = vpop.f32.mrf.mxu3  ;;  %v2409_v18 = vpop.f32.mrf.mxu1 }
  0xa5   : > { %3032 = vst [vmem:[#allocation15_spill] sm:$0xff] %v2407_v17 }
  0xa7   : > { %1976 = vmatmul.msk.bf16.gmra.mxu1 %vm517_vm1, %v2383_v57 }
  0xa8   : > { %v2419_v21 = vpop.f32.mrf.mxu0  ;;  %1993 = vmatmul.msk.bf16.gmra.mxu2 %vm517_vm1, %v2413_v19 }
  0xa9   : > { %2010 = vmatmul.msk.bf16.gmra.mxu3 %vm517_vm1, %v2417_v20 }
  0xab   : > { %v2428_v28 = vpop.f32.mrf.mxu2 }
  0xac   : > { %v2430_v29 = vpop.f32.mrf.mxu3  ;;  %v2432_v31 = vpop.f32.mrf.mxu1 }
  0xad   : > { %3034 = vst [vmem:[#allocation17_spill] sm:$0xff] %v2430_v29 }
  0xb0   : > { %v2434_v34 = vpop.f32.mrf.mxu0 }
  0xb3   : > { %2028 = vmatmul.msk.bf16.gmra.mxu0 %vm517_vm1, %v2275_v1  ;;  %v2439_v42 = vpop.f32.mrf.mxu2 }
  0xb4   : > { %v2441_v43 = vpop.f32.mrf.mxu3  ;;  %v2443_v46 = vpop.f32.mrf.mxu1 }
  0xb5   : > { %3035 = vst [vmem:[#allocation18_spill] sm:$0xff] %v2441_v43 }
  0xb7   : > { %1977 = vmatmul.msk.bf16.gmra.mxu1 %vm517_vm1, %v2417_v20 }
  0xb8   : > { %v2453_v51 = vpop.f32.mrf.mxu0  ;;  %1994 = vmatmul.msk.bf16.gmra.mxu2 %vm517_vm1, %v2447_v48 }
  0xb9   : > { %2011 = vmatmul.msk.bf16.gmra.mxu3 %vm517_vm1, %v2451_v49 }
  0xbb   : > { %v2462_v53 = vpop.f32.mrf.mxu2 }
  0xbc   : > { %v2464_v62 = vpop.f32.mrf.mxu3  ;;  %v2466_v6 = vpop.f32.mrf.mxu1 }
  0xbd   : > { %3038 = vst [vmem:[#allocation21_spill] sm:$0xff] %v2464_v62  ;;  %v353_v62 = vrot.slane %v351_v27, 7 }
  0xc0   : > { %v2468_v7 = vpop.f32.mrf.mxu0 }
  0xc3   : > { %2029 = vmatmul.msk.bf16.gmra.mxu0 %vm517_vm1, %v2191_v32  ;;  %v2473_v40 = vpop.f32.mrf.mxu2  ;;  %v354_v32 = vshll.u32 %v2215_v60, 16 }
  0xc4   : > { %v2475_v41 = vpop.f32.mrf.mxu3  ;;  %v2477_v13 = vpop.f32.mrf.mxu1 }
  0xc5   : > { %3039 = vst [vmem:[#allocation22_spill] sm:$0xff] %v2475_v41  ;;  %v459_v41 = vrot.slane %v347_v50, 1  ;;  %v356_v29 = vor.u32 %v354_v32, %v353_v62 }
  0xc7   : > { %1978 = vmatmul.msk.bf16.gmra.mxu1 %vm517_vm1, %v2451_v49  ;;  %v460_v43 = vor.u32 %v459_v41, %v344_v52  ;;  %v2516_v50 = vsel %vm2292_vm6, 0, %v356_v29 }
  0xc8   : > { %v2487_v14 = vpop.f32.mrf.mxu0  ;;  %1995 = vmatmul.msk.bf16.gmra.mxu2 %vm517_vm1, %v2481_v12 }
  0xc9   : > { %2012 = vmatmul.msk.bf16.gmra.mxu3 %vm517_vm1, %v2485_v39 }
  0xcb   : > { %v2496_v9 = vpop.f32.mrf.mxu2 }
  0xcc   : > { %3042 = vst [vmem:[#allocation25_spill] sm:$0xff] %v2496_v9  ;;  %v2498_v10 = vpop.f32.mrf.mxu3  ;;  %v2500_v35 = vpop.f32.mrf.mxu1 }
  0xcd   : > { %3043 = vst [vmem:[#allocation26_spill] sm:$0xff] %v2498_v10  ;;  %v2512_v10 = vsel %vm2297_vm7, %v460_v43, 0 }
  0xce   : > { %3046 = vst [vmem:[#allocation29_spill] sm:$0xff] %v2512_v10 }
  0xd0   : > { %v1102_v38 = vpop.f32.mrf.mxu0 }
  0xd3   : > { %2030 = vmatmul.msk.bf16.gmra.mxu0 %vm517_vm1, %v2215_v60  ;;  %v2505_v1 = vpop.f32.mrf.mxu2 }
  0xd4   : > { %3044 = vst [vmem:[#allocation27_spill] sm:$0xff] %v2505_v1  ;;  %v2507_v49 = vpop.f32.mrf.mxu3  ;;  %v703_v17 = vpop.f32.mrf.mxu1 }
  0xd5   : > { %3045 = vst [vmem:[#allocation28_spill] sm:$0xff] %v2507_v49  ;;  %v704_v12 = vadd.f32 %v703_v17, %v2370_v47  ;;  %v358_v47 = vshrl.u32 %v2239_v25, 16  ;;  %v461_v49 = vrot.slane %v354_v32, 1 }
  0xd7   : > { %1979 = vmatmul.msk.bf16.gmra.mxu1 %vm517_vm1, %v2485_v39  ;;  %v360_v60 = vrot.slane %v358_v47, 7  ;;  %v462_v20 = vor.u32 %v461_v49, %v351_v27  ;;  %v463_v27 = vrot.slane %v361_v24, 1 }
  0xd8   : > { %v1104_v0 = vpop.f32.mrf.mxu0  ;;  %1996 = vmatmul.msk.bf16.gmra.mxu2 %vm517_vm1, %v2512_v10 }
  0xd9   : > { %2013 = vmatmul.msk.bf16.gmra.mxu3 %vm517_vm1, %v2516_v50  ;;  %v363_v1 = vor.u32 %v361_v24, %v360_v60  ;;  %v2534_v32 = vsel %vm2297_vm7, %v462_v20, 0 }
  0xdb   : > { %v845_v17 = vpop.f32.mrf.mxu2 }
  0xdc   : > { %v974_v52 = vpop.f32.mrf.mxu3  ;;  %v925_v43 = vadd.f32 %v845_v17, %v704_v12  ;;  %v705_v62 = vpop.f32.mrf.mxu1 }
  0xdd   : > { %v706_v41 = vadd.f32 %v705_v62, %v2385_v58  ;;  %v2538_v58 = vsel %vm2292_vm6, 0, %v363_v1 }
  0xde   : > { %v1054_v39 = vadd.f32 %v974_v52, %v925_v43 }
  0xe0   : > { %v1107_v29 = vpop.f32.mrf.mxu0  ;;  %v2529_v10 = vadd.f32 %v1102_v38, %v1054_v39  ;;  %v368_v38 = vshll.u32 %v2277_v2, 16 }
  0xe3   : > { %2031 = vmatmul.msk.bf16.gmra.mxu0 %vm517_vm1, %v2239_v25  ;;  %v847_v48 = vpop.f32.mrf.mxu2 }
  0xe4   : > { %v976_v9 = vpop.f32.mrf.mxu3  ;;  %v926_v59 = vadd.f32 %v847_v48, %v706_v41  ;;  %v708_v12 = vpop.f32.mrf.mxu1 }
  0xe5   : > { %v709_v17 = vadd.f32 %v708_v12, %v2400_v5  ;;  %v365_v5 = vshrl.u32 %v2277_v2, 16 }
  0xe6   : > { %v1055_v43 = vadd.f32 %v976_v9, %v926_v59 }
  0xe7   : > { %1980 = vmatmul.msk.bf16.gmra.mxu1 %vm517_vm1, %v2516_v50  ;;  %v367_v9 = vrot.slane %v365_v5, 7 }
  0xe8   : > { %v1109_v52 = vpop.f32.mrf.mxu0  ;;  %1997 = vmatmul.msk.bf16.gmra.mxu2 %vm517_vm1, %v2534_v32  ;;  %v2546_v60 = vadd.f32 %v1104_v0, %v1055_v43  ;;  %v464_v0 = vor.u32 %v463_v27, %v358_v47  ;;  %v372_v47 = vshrl.u32 %v2193_v33, 16 }
  0xe9   : > { %2014 = vmatmul.msk.bf16.gmra.mxu3 %vm517_vm1, %v2538_v58  ;;  %v370_v12 = vor.u32 %v368_v38, %v367_v9 }
  0xea   : > { %3047 = vst [vmem:[#allocation30_spill] sm:$0xff] %v2546_v60  ;;  %v2558_v24 = vsel %vm2297_vm7, %v464_v0, 0  ;;  %v375_v0 = vshll.u32 %v2193_v33, 16 }
  0xeb   : > { %v850_v20 = vpop.f32.mrf.mxu2 }
  0xec   : > { %v979_v48 = vpop.f32.mrf.mxu3  ;;  %v927_v49 = vadd.f32 %v850_v20, %v709_v17  ;;  %v710_v1 = vpop.f32.mrf.mxu1 }
  0xed   : > { %v711_v39 = vadd.f32 %v710_v1, %v2419_v21  ;;  %v2562_v21 = vsel %vm2292_vm6, 0, %v370_v12 }
  0xee   : > { %v1056_v62 = vadd.f32 %v979_v48, %v927_v49 }
  0xf0   : > { %v1112_v59 = vpop.f32.mrf.mxu0  ;;  %v2553_v41 = vadd.f32 %v1107_v29, %v1056_v62  ;;  %v374_v62 = vrot.slane %v372_v47, 7 }
  0xf3   : > { %2032 = vmatmul.msk.bf16.gmra.mxu0 %vm517_vm1, %v2277_v2  ;;  %v852_v43 = vpop.f32.mrf.mxu2 }
  0xf4   : > { %v981_v60 = vpop.f32.mrf.mxu3  ;;  %v928_v25 = vadd.f32 %v852_v43, %v711_v39  ;;  %v713_v17 = vpop.f32.mrf.mxu1 }
  0xf5   : > { %v714_v20 = vadd.f32 %v713_v17, %v2434_v34  ;;  %v377_v17 = vor.u32 %v375_v0, %v374_v62 }
  0xf6   : > { %v1057_v49 = vadd.f32 %v981_v60, %v928_v25  ;;  %v465_v60 = vrot.slane %v368_v38, 1 }
  0xf7   : > { %1981 = vmatmul.msk.bf16.gmra.mxu1 %vm517_vm1, %v2538_v58  ;;  %v2586_v38 = vsel %vm2292_vm6, 0, %v377_v17 }
  0xf8   : > { %v1114_v48 = vpop.f32.mrf.mxu0  ;;  %1998 = vmatmul.msk.bf16.gmra.mxu2 %vm517_vm1, %v2558_v24  ;;  %v2570_v34 = vadd.f32 %v1109_v52, %v1057_v49  ;;  %v466_v52 = vor.u32 %v465_v60, %v365_v5  ;;  %v379_v5 = vshrl.u32 %v2217_v61, 16 }
  0xf9   : > { %2015 = vmatmul.msk.bf16.gmra.mxu3 %vm517_vm1, %v2562_v21 }
  0xfa   : > { %3048 = vst [vmem:[#allocation31_spill] sm:$0xff] %v2570_v34 }
  0xfb   : > { %v855_v29 = vpop.f32.mrf.mxu2 }
  0xfc   : > { %v984_v1 = vpop.f32.mrf.mxu3  ;;  %v929_v39 = vadd.f32 %v855_v29, %v714_v20  ;;  %v715_v27 = vpop.f32.mrf.mxu1 }
  0xfd   : > { %v716_v9 = vadd.f32 %v715_v27, %v2453_v51  ;;  %v2582_v51 = vsel %vm2297_vm7, %v466_v52, 0  ;;  %v382_v52 = vshll.u32 %v2217_v61, 16 }
  0xfe   : > { %v1058_v12 = vadd.f32 %v984_v1, %v929_v39 }
 0x100   : > { %v1117_v25 = vpop.f32.mrf.mxu0  ;;  %v2577_v43 = vadd.f32 %v1112_v59, %v1058_v12  ;;  %v381_v12 = vrot.slane %v379_v5, 7 }
 0x103   : > { %2033 = vmatmul.msk.bf16.gmra.mxu0 %vm517_vm1, %v2193_v33  ;;  %v857_v49 = vpop.f32.mrf.mxu2 }
 0x104   : > { %v986_v34 = vpop.f32.mrf.mxu3  ;;  %v930_v2 = vadd.f32 %v857_v49, %v716_v9  ;;  %v718_v20 = vpop.f32.mrf.mxu1 }
 0x105   : > { %v719_v29 = vadd.f32 %v718_v20, %v2468_v7  ;;  %v384_v20 = vor.u32 %v382_v52, %v381_v12 }
 0x106   : > { %v1059_v39 = vadd.f32 %v986_v34, %v930_v2  ;;  %v467_v34 = vrot.slane %v375_v0, 1 }
 0x107   : > { %1982 = vmatmul.msk.bf16.gmra.mxu1 %vm517_vm1, %v2562_v21  ;;  %v2609_v0 = vsel %vm2292_vm6, 0, %v384_v20 }
 0x108   : > { %v1119_v1 = vpop.f32.mrf.mxu0  ;;  %1999 = vmatmul.msk.bf16.gmra.mxu2 %vm517_vm1, %v2582_v51  ;;  %v2594_v7 = vadd.f32 %v1114_v48, %v1059_v39  ;;  %v468_v48 = vor.u32 %v467_v34, %v372_v47  ;;  %3051 = vst [vmem:[#allocation34_spill] sm:$0xff] %v2609_v0 }
 0x109   : > { %2016 = vmatmul.msk.bf16.gmra.mxu3 %vm517_vm1, %v2586_v38 }
 0x10a   : > { %3049 = vst [vmem:[#allocation32_spill] sm:$0xff] %v2594_v7 }
 0x10b   : > { %v860_v59 = vpop.f32.mrf.mxu2 }
 0x10c   : > { %v989_v27 = vpop.f32.mrf.mxu3  ;;  %v931_v9 = vadd.f32 %v860_v59, %v719_v29  ;;  %v720_v60 = vpop.f32.mrf.mxu1 }
 0x10d   : > { %v721_v62 = vadd.f32 %v720_v60, %v2487_v14  ;;  %v2605_v14 = vsel %vm2297_vm7, %v468_v48, 0  ;;  %v389_v48 = vshll.u32 %v2241_v26, 16 }
 0x10e   : > { %v1060_v17 = vadd.f32 %v989_v27, %v931_v9 }
 0x110   : > { %v1122_v2 = vpop.f32.mrf.mxu0  ;;  %v2601_v49 = vadd.f32 %v1117_v25, %v1060_v17  ;;  %v386_v25 = vshrl.u32 %v2241_v26, 16 }
 0x112   : > { %3050 = vst [vmem:[#allocation33_spill] sm:$0xff] %v2601_v49  ;;  %v388_v17 = vrot.slane %v386_v25, 7 }
 0x113   : > { %2034 = vmatmul.msk.bf16.gmra.mxu0 %vm517_vm1, %v2217_v61  ;;  %v862_v39 = vpop.f32.mrf.mxu2 }
 0x114   : > { %v991_v7 = vpop.f32.mrf.mxu3  ;;  %v932_v33 = vadd.f32 %v862_v39, %v721_v62  ;;  %v723_v29 = vpop.f32.mrf.mxu1 }
 0x115   : > { %v724_v9 = vadd.f32 %v723_v29, %v2375_v54 }
 0x116   : > { %v1061_v27 = vadd.f32 %v991_v7, %v932_v33  ;;  %v469_v7 = vrot.slane %v382_v52, 1 }
 0x117   : > { %1983 = vmatmul.msk.bf16.gmra.mxu1 %vm517_vm1, %v2586_v38 }
 0x118   : > { %v1124_v59 = vpop.f32.mrf.mxu0  ;;  %2000 = vmatmul.msk.bf16.gmra.mxu2 %vm517_vm1, %v2605_v14  ;;  %v2617_v47 = vadd.f32 %v1119_v1, %v1061_v27  ;;  %v470_v1 = vor.u32 %v469_v7, %v379_v5  ;;  %v391_v27 = vor.u32 %v389_v48, %v388_v17  ;;  %v393_v5 = vshrl.u32 %v2279_v3, 16  ;;  %v173_v7 = vld [vmem:[%s2178_s24 + $0xf0] sm:$0xff]  ;;  %v174_v17 = vld [vmem:[%s2178_s24 + $0xf8] sm:$0xff] }
 0x119   : > { %2017 = vmatmul.msk.bf16.gmra.mxu3 %vm517_vm1, %v2609_v0  ;;  %v206_v61 = vpack.c.bf16 %v174_v17, %v174_v17 }
 0x11a   : > { %3052 = vst [vmem:[#allocation35_spill] sm:$0xff] %v2617_v47  ;;  %v2629_v52 = vsel %vm2297_vm7, %v470_v1, 0 }
 0x11b   : > { %v865_v60 = vpop.f32.mrf.mxu2  ;;  %3054 = vst [vmem:[#allocation37_spill] sm:$0xff] %v2629_v52 }
 0x11c   : > { %v994_v62 = vpop.f32.mrf.mxu3  ;;  %v933_v34 = vadd.f32 %v865_v60, %v724_v9  ;;  %v725_v12 = vpop.f32.mrf.mxu1 }
 0x11d   : > { %v726_v54 = vadd.f32 %v725_v12, %v2398_v4 }
 0x11e   : > { %v1062_v20 = vadd.f32 %v994_v62, %v933_v34  ;;  %v2633_v62 = vsel %vm2292_vm6, 0, %v391_v27 }
 0x120   : > { %v1127_v33 = vpop.f32.mrf.mxu0  ;;  %v2624_v39 = vadd.f32 %v1122_v2, %v1062_v20 }
 0x122   : > { %3053 = vst [vmem:[#allocation36_spill] sm:$0xff] %v2624_v39  ;;  %v205_v39 = vpack.c.bf16 %v173_v7, %v173_v7 }
 0x123   : > { %2035 = vmatmul.msk.bf16.gmra.mxu0 %vm517_vm1, %v2241_v26  ;;  %v867_v29 = vpop.f32.mrf.mxu2  ;;  %v396_v26 = vshll.u32 %v2279_v3, 16 }
 0x124   : > { %v996_v9 = vpop.f32.mrf.mxu3  ;;  %v934_v60 = vadd.f32 %v867_v29, %v726_v54  ;;  %v728_v47 = vpop.f32.mrf.mxu1  ;;  %v471_v29 = vrot.slane %v389_v48, 1 }
 0x125   : > { %v729_v12 = vadd.f32 %v728_v47, %v2409_v18 }
 0x126   : > { %v1063_v34 = vadd.f32 %v996_v9, %v934_v60  ;;  %v395_v60 = vrot.slane %v393_v5, 7  ;;  %v472_v18 = vor.u32 %v471_v29, %v386_v25  ;;  %v473_v29 = vrot.slane %v396_v26, 1 }
 0x127   : > { %1984 = vmatmul.msk.bf16.gmra.mxu1 %vm517_vm1, %v2609_v0 }
 0x128   : > { %v1129_v2 = vpop.f32.mrf.mxu0  ;;  %2001 = vmatmul.msk.bf16.gmra.mxu2 %vm517_vm1, %v2629_v52  ;;  %v2641_v4 = vadd.f32 %v1124_v59, %v1063_v34  ;;  %v398_v47 = vor.u32 %v396_v26, %v395_v60  ;;  %v269_v34 = vunpack.c.l.b16 %v205_v39  ;;  %v2655_v7 = vsel %vm2297_vm7, %v472_v18, 0 }
 0x129   : > { %2018 = vmatmul.msk.bf16.gmra.mxu3 %vm517_vm1, %v2633_v62 }
 0x12a   : > { %3055 = vst [vmem:[#allocation38_spill] sm:$0xff] %v2641_v4  ;;  %v270_v4 = vunpack.c.l.b16 %v206_v61  ;;  %v2659_v17 = vsel %vm2292_vm6, 0, %v398_v47 }
 0x12b   : > { %v870_v20 = vpop.f32.mrf.mxu2 }
 0x12c   : > { %v999_v1 = vpop.f32.mrf.mxu3  ;;  %v935_v27 = vadd.f32 %v870_v20, %v729_v12  ;;  %v730_v54 = vpop.f32.mrf.mxu1 }
 0x12d   : > { %v731_v12 = vadd.f32 %v730_v54, %v2432_v31 }
 0x12e   : > { %v1064_v0 = vadd.f32 %v999_v1, %v935_v27 }
 0x130   : > { %v1132_v9 = vpop.f32.mrf.mxu0  ;;  %v2650_v59 = vadd.f32 %v1127_v33, %v1064_v0  ;;  %v2661_v33 = vpack.c.b16 %v270_v4, %v269_v34  ;;  %v474_v34 = vor.u32 %v473_v29, %v393_v5 }
 0x132   : > { %v400_v31 = vshrl.u32 %v2661_v33, 16  ;;  %v403_v18 = vshll.u32 %v2661_v33, 16 }
 0x133   : > { %2036 = vmatmul.msk.bf16.gmra.mxu0 %vm517_vm1, %v2279_v3  ;;  %v872_v20 = vpop.f32.mrf.mxu2 }
 0x134   : > { %v1001_v48 = vpop.f32.mrf.mxu3  ;;  %v936_v49 = vadd.f32 %v872_v20, %v731_v12  ;;  %v733_v52 = vpop.f32.mrf.mxu1  ;;  %v402_v60 = vrot.slane %v400_v31, 7 }
 0x135   : > { %v734_v39 = vadd.f32 %v733_v52, %v2443_v46 }
 0x136   : > { %v1065_v25 = vadd.f32 %v1001_v48, %v936_v49  ;;  %v405_v46 = vor.u32 %v403_v18, %v402_v60 }
 0x137   : > { %1985 = vmatmul.msk.bf16.gmra.mxu1 %vm517_vm1, %v2633_v62 }
 0x138   : > { %v1134_v0 = vpop.f32.mrf.mxu0  ;;  %2002 = vmatmul.msk.bf16.gmra.mxu2 %vm517_vm1, %v2655_v7  ;;  %v2669_v61 = vadd.f32 %v1129_v2, %v1065_v25  ;;  %v2685_v25 = vsel %vm2297_vm7, %v474_v34, 0 }
 0x139   : > { %2019 = vmatmul.msk.bf16.gmra.mxu3 %vm517_vm1, %v2659_v17 }
 0x13b   : > { %v875_v1 = vpop.f32.mrf.mxu2 }
 0x13c   : > { %v1004_v27 = vpop.f32.mrf.mxu3  ;;  %v937_v4 = vadd.f32 %v875_v1, %v734_v39  ;;  %v735_v54 = vpop.f32.mrf.mxu1  ;;  %v2689_v39 = vsel %vm2292_vm6, 0, %v405_v46 }
 0x13d   : > { %v736_v52 = vadd.f32 %v735_v54, %v2466_v6 }
 0x13e   : > { %v1066_v47 = vadd.f32 %v1004_v27, %v937_v4 }
 0x140   : > { %v1137_v49 = vpop.f32.mrf.mxu0  ;;  %v2678_v2 = vadd.f32 %v1132_v9, %v1066_v47 }
 0x143   : > { %2037 = vmatmul.msk.bf16.gmra.mxu0 %vm517_vm1, %v2661_v33  ;;  %v877_v12 = vpop.f32.mrf.mxu2 }
 0x144   : > { %v1006_v20 = vpop.f32.mrf.mxu3  ;;  %v938_v26 = vadd.f32 %v877_v12, %v736_v52  ;;  %v738_v48 = vpop.f32.mrf.mxu1 }
 0x145   : > { %v739_v5 = vadd.f32 %v738_v48, %v2477_v13 }
 0x146   : > { %v1067_v1 = vadd.f32 %v1006_v20, %v938_v26 }
 0x147   : > { %1986 = vmatmul.msk.bf16.gmra.mxu1 %vm517_vm1, %v2659_v17 }
 0x148   : > { %v1139_v9 = vpop.f32.mrf.mxu0  ;;  %2003 = vmatmul.msk.bf16.gmra.mxu2 %vm517_vm1, %v2685_v25  ;;  %v2697_v6 = vadd.f32 %v1134_v0, %v1067_v1 }
 0x149   : > { %2020 = vmatmul.msk.bf16.gmra.mxu3 %vm517_vm1, %v2689_v39 }
 0x14b   : > { %v880_v27 = vpop.f32.mrf.mxu2 }
 0x14c   : > { %v1009_v4 = vpop.f32.mrf.mxu3  ;;  %v939_v8 = vadd.f32 %v880_v27, %v739_v5  ;;  %v740_v54 = vpop.f32.mrf.mxu1 }
 0x14d   : > { %v741_v34 = vadd.f32 %v740_v54, %v2500_v35 }
 0x14e   : > { %v1068_v60 = vadd.f32 %v1009_v4, %v939_v8 }
 0x150   : > { %v1142_v29 = vpop.f32.mrf.mxu0  ;;  %v2702_v47 = vadd.f32 %v1137_v49, %v1068_v60 }
 0x153   : > { %2089 = vmatmul.msk.bf16.vlgmr.msra.gmra.mxu0 %vm517_vm1, %v2339_v36  ;;  %v882_v46 = vpop.f32.mrf.mxu2 }
 0x154   : > { %v1011_v52 = vpop.f32.mrf.mxu3  ;;  %v940_v12 = vadd.f32 %v882_v46, %v741_v34  ;;  %v743_v0 = vpop.f32.mrf.mxu1 }
 0x155   : > { %v744_v49 = vadd.f32 %v743_v0, %v2394_v63 }
 0x156   : > { %v1069_v26 = vadd.f32 %v1011_v52, %v940_v12 }
 0x157   : > { %2039 = vmatmul.msk.bf16.vlgmr.msra.gmra.mxu1 %vm517_vm1, %v2322_v22 }
 0x158   : > { %v1144_v20 = vpop.f32.mrf.mxu0  ;;  %2056 = vmatmul.msk.bf16.vlgmr.msra.gmra.mxu2 %vm517_vm1, %v2326_v23  ;;  %v2711_v13 = vadd.f32 %v1139_v9, %v1069_v26 }
 0x159   : > { %2073 = vmatmul.msk.bf16.vlgmr.msra.gmra.mxu3 %vm517_vm1, %v2231_v15 }
 0x15b   : > { %v885_v35 = vpop.f32.mrf.mxu2 }
 0x15c   : > { %v1014_v48 = vpop.f32.mrf.mxu3  ;;  %v941_v1 = vadd.f32 %v885_v35, %v744_v49  ;;  %v745_v5 = vpop.f32.mrf.mxu1 }
 0x15d   : > { %v746_v23 = vadd.f32 %v745_v5, %v2405_v16 }
 0x15e   : > { %v1070_v4 = vadd.f32 %v1014_v48, %v941_v1 }
 0x160   : > { %v1147_v27 = vpop.f32.mrf.mxu0  ;;  %v2716_v22 = vadd.f32 %v1142_v29, %v1070_v4 }
 0x163   : > { %2090 = vmatmul.msk.bf16.gmra.mxu0 %vm517_vm1, %v2357_v44  ;;  %v887_v8 = vpop.f32.mrf.mxu2 }
 0x164   : > { %v1016_v54 = vpop.f32.mrf.mxu3  ;;  %v942_v15 = vadd.f32 %v887_v8, %v746_v23  ;;  %v748_v9 = vpop.f32.mrf.mxu1 }
 0x165   : > { %v749_v29 = vadd.f32 %v748_v9, %v2428_v28 }
 0x166   : > { %v1071_v34 = vadd.f32 %v1016_v54, %v942_v15 }
 0x167   : > { %2040 = vmatmul.msk.bf16.gmra.mxu1 %vm517_vm1, %v2339_v36 }
 0x168   : > { %v1149_v60 = vpop.f32.mrf.mxu0  ;;  %2057 = vmatmul.msk.bf16.gmra.mxu2 %vm517_vm1, %v2343_v37  ;;  %v2725_v63 = vadd.f32 %v1144_v20, %v1071_v34 }
 0x169   : > { %2074 = vmatmul.msk.bf16.gmra.mxu3 %vm517_vm1, %v2271_v55 }
 0x16b   : > { %v890_v16 = vpop.f32.mrf.mxu2 }
 0x16c   : > { %v1019_v46 = vpop.f32.mrf.mxu3  ;;  %v943_v52 = vadd.f32 %v890_v16, %v749_v29  ;;  %v750_v12 = vpop.f32.mrf.mxu1 }
 0x16d   : > { %v751_v37 = vadd.f32 %v750_v12, %v2439_v42 }
 0x16e   : > { %v1072_v26 = vadd.f32 %v1019_v46, %v943_v52  ;;  %v3057_v46 = vld [vmem:[#allocation25_spill] sm:$0xff] }
 0x170   : > { %v1152_v0 = vpop.f32.mrf.mxu0  ;;  %v2730_v36 = vadd.f32 %v1147_v27, %v1072_v26 }
 0x173   : > { %2091 = vmatmul.msk.bf16.gmra.mxu0 %vm517_vm1, %v2379_v56  ;;  %v892_v49 = vpop.f32.mrf.mxu2 }
 0x174   : > { %v1021_v35 = vpop.f32.mrf.mxu3  ;;  %v944_v55 = vadd.f32 %v892_v49, %v751_v37  ;;  %v753_v20 = vpop.f32.mrf.mxu1 }
 0x175   : > { %v754_v5 = vadd.f32 %v753_v20, %v2462_v53  ;;  %v3056_v53 = vld [vmem:[#allocation4_spill] sm:$0xff] }
 0x176   : > { %v1073_v1 = vadd.f32 %v1021_v35, %v944_v55  ;;  %v3058_v35 = vld [vmem:[#allocation19_spill] sm:$0xff] }
 0x177   : > { %2041 = vmatmul.msk.bf16.gmra.mxu1 %vm517_vm1, %v2357_v44  ;;  %v3059_v55 = vld [vmem:[#allocation27_spill] sm:$0xff] }
 0x178   : > { %v1154_v48 = vpop.f32.mrf.mxu0  ;;  %2058 = vmatmul.msk.bf16.gmra.mxu2 %vm517_vm1, %v2361_v45  ;;  %v2739_v28 = vadd.f32 %v1149_v60, %v1073_v1 }
 0x179   : > { %2075 = vmatmul.msk.bf16.gmra.mxu3 %vm517_vm1, %v2188_v30 }
 0x17b   : > { %v895_v42 = vpop.f32.mrf.mxu2 }
 0x17c   : > { %v1024_v27 = vpop.f32.mrf.mxu3  ;;  %v945_v4 = vadd.f32 %v895_v42, %v754_v5  ;;  %v755_v23 = vpop.f32.mrf.mxu1 }
 0x17d   : > { %v756_v45 = vadd.f32 %v755_v23, %v2473_v40  ;;  %v3061_v23 = vld [vmem:[#allocation7_spill] sm:$0xff] }
 0x17e   : > { %v1074_v54 = vadd.f32 %v1024_v27, %v945_v4  ;;  %v3060_v4 = vld [vmem:[#allocation16_spill] sm:$0xff] }
 0x180   : > { %v1157_v8 = vpop.f32.mrf.mxu0  ;;  %v2744_v44 = vadd.f32 %v1152_v0, %v1074_v54 }
 0x183   : > { %2092 = vmatmul.msk.bf16.gmra.mxu0 %vm517_vm1, %v2413_v19  ;;  %v897_v15 = vpop.f32.mrf.mxu2 }
 0x184   : > { %v1026_v9 = vpop.f32.mrf.mxu3  ;;  %v946_v30 = vadd.f32 %v897_v15, %v756_v45  ;;  %v758_v60 = vpop.f32.mrf.mxu1 }
 0x185   : > { %v759_v52 = vadd.f32 %v758_v60, %v3057_v46  ;;  %v3063_v46 = vld [vmem:[#allocation23_spill] sm:$0xff] }
 0x186   : > { %v1075_v29 = vadd.f32 %v1026_v9, %v946_v30 }
 0x187   : > { %2042 = vmatmul.msk.bf16.gmra.mxu1 %vm517_vm1, %v2379_v56 }
 0x188   : > { %v1159_v34 = vpop.f32.mrf.mxu0  ;;  %2059 = vmatmul.msk.bf16.gmra.mxu2 %vm517_vm1, %v2383_v57  ;;  %v2753_v16 = vadd.f32 %v1154_v48, %v1075_v29 }
 0x189   : > { %2076 = vmatmul.msk.bf16.gmra.mxu3 %vm517_vm1, %v3056_v53 }
 0x18b   : > { %v900_v40 = vpop.f32.mrf.mxu2 }
 0x18c   : > { %v1029_v12 = vpop.f32.mrf.mxu3  ;;  %v947_v0 = vadd.f32 %v900_v40, %v759_v52  ;;  %v760_v26 = vpop.f32.mrf.mxu1  ;;  %v3064_v52 = vld [vmem:[#allocation15_spill] sm:$0xff] }
 0x18d   : > { %v761_v57 = vadd.f32 %v760_v26, %v3059_v55 }
 0x18e   : > { %v1076_v49 = vadd.f32 %v1029_v12, %v947_v0 }
 0x190   : > { %v1162_v37 = vpop.f32.mrf.mxu0  ;;  %v2758_v56 = vadd.f32 %v1157_v8, %v1076_v49  ;;  %v3062_v8 = vld [vmem:[#allocation14_spill] sm:$0xff] }
 0x193   : > { %2093 = vmatmul.msk.bf16.gmra.mxu0 %vm517_vm1, %v3058_v35  ;;  %v902_v20 = vpop.f32.mrf.mxu2 }
 0x194   : > { %v1031_v1 = vpop.f32.mrf.mxu3  ;;  %v948_v5 = vadd.f32 %v902_v20, %v761_v57  ;;  %v763_v48 = vpop.f32.mrf.mxu1  ;;  %v3065_v57 = vld [vmem:[#allocation20_spill] sm:$0xff]  ;;  %v3066_v20 = vld [vmem:[#allocation10_spill] sm:$0xff] }
 0x195   : > { %v764_v45 = vadd.f32 %v763_v48, %v3062_v8 }
 0x196   : > { %v1077_v27 = vadd.f32 %v1031_v1, %v948_v5 }
 0x197   : > { %2043 = vmatmul.msk.bf16.gmra.mxu1 %vm517_vm1, %v2413_v19 }
 0x198   : > { %v1164_v42 = vpop.f32.mrf.mxu0  ;;  %2060 = vmatmul.msk.bf16.gmra.mxu2 %vm517_vm1, %v3060_v4  ;;  %v2767_v54 = vadd.f32 %v1159_v34, %v1077_v27 }
 0x199   : > { %2077 = vmatmul.msk.bf16.gmra.mxu3 %vm517_vm1, %v3061_v23 }
 0x19b   : > { %v905_v15 = vpop.f32.mrf.mxu2 }
 0x19c   : > { %v1034_v9 = vpop.f32.mrf.mxu3  ;;  %v949_v30 = vadd.f32 %v905_v15, %v764_v45  ;;  %v765_v60 = vpop.f32.mrf.mxu1  ;;  %v3068_v15 = vld [vmem:[#allocation29_spill] sm:$0xff] }
 0x19d   : > { %v766_v40 = vadd.f32 %v765_v60, %v3064_v52 }
 0x19e   : > { %v1078_v53 = vadd.f32 %v1034_v9, %v949_v30  ;;  %v3069_v9 = vld [vmem:[#allocation18_spill] sm:$0xff] }
 0x1a0   : > { %v1167_v29 = vpop.f32.mrf.mxu0  ;;  %v2772_v19 = vadd.f32 %v1162_v37, %v1078_v53  ;;  %v3067_v37 = vld [vmem:[#allocation17_spill] sm:$0xff] }
 0x1a3   : > { %2094 = vmatmul.msk.bf16.gmra.mxu0 %vm517_vm1, %v3063_v46  ;;  %v907_v12 = vpop.f32.mrf.mxu2 }
 0x1a4   : > { %v1036_v0 = vpop.f32.mrf.mxu3  ;;  %v950_v26 = vadd.f32 %v907_v12, %v766_v40  ;;  %v768_v34 = vpop.f32.mrf.mxu1 }
 0x1a5   : > { %v769_v5 = vadd.f32 %v768_v34, %v3067_v37 }
 0x1a6   : > { %v1079_v55 = vadd.f32 %v1036_v0, %v950_v26  ;;  %v3070_v0 = vld [vmem:[#allocation24_spill] sm:$0xff]  ;;  %v3071_v26 = vld [vmem:[#allocation2_spill] sm:$0xff] }
 0x1a7   : > { %2044 = vmatmul.msk.bf16.gmra.mxu1 %vm517_vm1, %v3058_v35 }
 0x1a8   : > { %v1169_v49 = vpop.f32.mrf.mxu0  ;;  %2061 = vmatmul.msk.bf16.gmra.mxu2 %vm517_vm1, %v3065_v57  ;;  %v2781_v1 = vadd.f32 %v1164_v42, %v1079_v55 }
 0x1a9   : > { %2078 = vmatmul.msk.bf16.gmra.mxu3 %vm517_vm1, %v3066_v20 }
 0x1ab   : > { %v910_v48 = vpop.f32.mrf.mxu2 }
 0x1ac   : > { %v1039_v27 = vpop.f32.mrf.mxu3  ;;  %v951_v4 = vadd.f32 %v910_v48, %v769_v5  ;;  %v770_v23 = vpop.f32.mrf.mxu1 }
 0x1ad   : > { %v771_v30 = vadd.f32 %v770_v23, %v3069_v9 }
 0x1ae   : > { %v1080_v45 = vadd.f32 %v1039_v27, %v951_v4  ;;  %v3073_v4 = vld [vmem:[#allocation22_spill] sm:$0xff] }
 0x1b0   : > { %v1172_v8 = vpop.f32.mrf.mxu0  ;;  %v2786_v35 = vadd.f32 %v1167_v29, %v1080_v45  ;;  %v3072_v29 = vld [vmem:[#allocation21_spill] sm:$0xff] }
 0x1b3   : > { %2095 = vmatmul.msk.bf16.gmra.mxu0 %vm517_vm1, %v3068_v15  ;;  %v912_v60 = vpop.f32.mrf.mxu2 }
 0x1b4   : > { %v1041_v53 = vpop.f32.mrf.mxu3  ;;  %v952_v52 = vadd.f32 %v912_v60, %v771_v30  ;;  %v773_v42 = vpop.f32.mrf.mxu1 }
 0x1b5   : > { %v774_v55 = vadd.f32 %v773_v42, %v3072_v29 }
 0x1b6   : > { %v1081_v12 = vadd.f32 %v1041_v53, %v952_v52  ;;  %v3074_v52 = vld [vmem:[#allocation5_spill] sm:$0xff] }
 0x1b7   : > { %2045 = vmatmul.msk.bf16.gmra.mxu1 %vm517_vm1, %v3063_v46 }
 0x1b8   : > { %v1174_v40 = vpop.f32.mrf.mxu0  ;;  %2062 = vmatmul.msk.bf16.gmra.mxu2 %vm517_vm1, %v3070_v0  ;;  %v2795_v34 = vadd.f32 %v1169_v49, %v1081_v12 }
 0x1b9   : > { %2079 = vmatmul.msk.bf16.gmra.mxu3 %vm517_vm1, %v3071_v26 }
 0x1bb   : > { %v915_v57 = vpop.f32.mrf.mxu2 }
 0x1bc   : > { %v1044_v20 = vpop.f32.mrf.mxu3  ;;  %v953_v37 = vadd.f32 %v915_v57, %v774_v55  ;;  %v775_v5 = vpop.f32.mrf.mxu1 }
 0x1bd   : > { %v776_v23 = vadd.f32 %v775_v5, %v3073_v4 }
 0x1be   : > { %v1082_v27 = vadd.f32 %v1044_v20, %v953_v37  ;;  %v3076_v37 = vld [vmem:[#allocation28_spill] sm:$0xff] }
 0x1c0   : > { %v1177_v48 = vpop.f32.mrf.mxu0  ;;  %v2800_v46 = vadd.f32 %v1172_v8, %v1082_v27  ;;  %v3075_v8 = vld [vmem:[#allocation26_spill] sm:$0xff] }
 0x1c3   : > { %2096 = vmatmul.msk.bf16.gmra.mxu0 %vm517_vm1, %v2534_v32  ;;  %v917_v45 = vpop.f32.mrf.mxu2 }
 0x1c4   : > { %v1046_v9 = vpop.f32.mrf.mxu3  ;;  %v954_v30 = vadd.f32 %v917_v45, %v776_v23  ;;  %v778_v49 = vpop.f32.mrf.mxu1 }
 0x1c5   : > { %v779_v12 = vadd.f32 %v778_v49, %v3075_v8 }
 0x1c6   : > { %v1083_v53 = vadd.f32 %v1046_v9, %v954_v30  ;;  %v3077_v30 = vld [vmem:[#allocation8_spill] sm:$0xff] }
 0x1c7   : > { %2046 = vmatmul.msk.bf16.gmra.mxu1 %vm517_vm1, %v3068_v15 }
 0x1c8   : > { %v1179_v60 = vpop.f32.mrf.mxu0  ;;  %2063 = vmatmul.msk.bf16.gmra.mxu2 %vm517_vm1, %v2516_v50  ;;  %v2809_v42 = vadd.f32 %v1174_v40, %v1083_v53 }
 0x1c9   : > { %2080 = vmatmul.msk.bf16.gmra.mxu3 %vm517_vm1, %v3074_v52 }
 0x1cb   : > { %v920_v0 = vpop.f32.mrf.mxu2 }
 0x1cc   : > { %v1049_v26 = vpop.f32.mrf.mxu3  ;;  %v955_v29 = vadd.f32 %v920_v0, %v779_v12  ;;  %v780_v55 = vpop.f32.mrf.mxu1  ;;  %v3078_v12 = vld [vmem:[#allocation30_spill] sm:$0xff] }
 0x1cd   : > { %v781_v50 = vadd.f32 %v780_v55, %v3076_v37 }
 0x1ce   : > { %v1084_v20 = vadd.f32 %v1049_v26, %v955_v29 }
 0x1d0   : > { %v1609_v57 = vpop.f32.mrf.mxu0  ;;  %v2814_v15 = vadd.f32 %v1177_v48, %v1084_v20 }
 0x1d3   : > { %2097 = vmatmul.msk.bf16.gmra.mxu0 %vm517_vm1, %v2558_v24  ;;  %v922_v5 = vpop.f32.mrf.mxu2 }
 0x1d4   : > { %v1051_v27 = vpop.f32.mrf.mxu3  ;;  %v956_v4 = vadd.f32 %v922_v5, %v781_v50  ;;  %v1231_v40 = vpop.f32.mrf.mxu1 }
 0x1d5   : > { %v1311_v23 = vadd.f32 %v1231_v40, %v2529_v10 }
 0x1d6   : > { %v1085_v9 = vadd.f32 %v1051_v27, %v956_v4 }
 0x1d7   : > { %2047 = vmatmul.msk.bf16.gmra.mxu1 %vm517_vm1, %v2534_v32 }
 0x1d8   : > { %v1611_v45 = vpop.f32.mrf.mxu0  ;;  %2064 = vmatmul.msk.bf16.gmra.mxu2 %vm517_vm1, %v2538_v58  ;;  %v2824_v48 = vadd.f32 %v1179_v60, %v1085_v9 }
 0x1d9   : > { %2081 = vmatmul.msk.bf16.gmra.mxu3 %vm517_vm1, %v3077_v30 }
 0x1db   : > { %v1357_v49 = vpop.f32.mrf.mxu2 }
 0x1dc   : > { %v1483_v53 = vpop.f32.mrf.mxu3  ;;  %v1437_v52 = vadd.f32 %v1357_v49, %v1311_v23  ;;  %v1233_v8 = vpop.f32.mrf.mxu1 }
 0x1dd   : > { %v1312_v0 = vadd.f32 %v1233_v8, %v3078_v12  ;;  %v3080_v8 = vld [vmem:[#allocation31_spill] sm:$0xff] }
 0x1de   : > { %v1563_v26 = vadd.f32 %v1483_v53, %v1437_v52 }
 0x1e0   : > { %v1614_v10 = vpop.f32.mrf.mxu0  ;;  %v1689_v29 = vadd.f32 %v1609_v57, %v1563_v26  ;;  %v3079_v57 = vld [vmem:[#allocation11_spill] sm:$0xff] }
 0x1e2   : > { %v1792_v5 = vmul.f32 %v1689_v29, %v1689_v29  ;;  %v1721_v4 = vsel %vm517_vm1, %v1689_v29, 0.0 }
 0x1e3   : > { %2098 = vmatmul.msk.bf16.gmra.mxu0 %vm517_vm1, %v2582_v51  ;;  %v1359_v32 = vpop.f32.mrf.mxu2 }
 0x1e4   : > { %v1485_v55 = vpop.f32.mrf.mxu3  ;;  %v1438_v58 = vadd.f32 %v1359_v32, %v1312_v0  ;;  %v1236_v20 = vpop.f32.mrf.mxu1  ;;  %v1824_v49 = vsel %vm517_vm1, %v1792_v5, 0.0 }
 0x1e5   : > { %v1313_v37 = vadd.f32 %v1236_v20, %v2553_v41 }
 0x1e6   : > { %v1564_v50 = vadd.f32 %v1485_v55, %v1438_v58 }
 0x1e7   : > { %2048 = vmatmul.msk.bf16.gmra.mxu1 %vm517_vm1, %v2558_v24 }
 0x1e8   : > { %v1616_v60 = vpop.f32.mrf.mxu0  ;;  %v1690_v27 = vadd.f32 %v1611_v45, %v1564_v50  ;;  %2065 = vmatmul.msk.bf16.gmra.mxu2 %vm517_vm1, %v2562_v21 }
 0x1e9   : > { %2082 = vmatmul.msk.bf16.gmra.mxu3 %vm517_vm1, %v3079_v57 }
 0x1ea   : > { %v1722_v40 = vsel %vm517_vm1, %v1690_v27, 0.0  ;;  %v1793_v23 = vmul.f32 %v1690_v27, %v1690_v27 }
 0x1eb   : > { %v1723_v9 = vadd.f32 %v1722_v40, %v1721_v4  ;;  %v1362_v41 = vpop.f32.mrf.mxu2 }
 0x1ec   : > { %v1488_v30 = vpop.f32.mrf.mxu3  ;;  %v1825_v24 = vsel %vm517_vm1, %v1793_v23, 0.0  ;;  %v1439_v53 = vadd.f32 %v1362_v41, %v1313_v37  ;;  %v1238_v45 = vpop.f32.mrf.mxu1  ;;  %v3081_v23 = vld [vmem:[#allocation3_spill] sm:$0xff] }
 0x1ed   : > { %v1826_v52 = vadd.f32 %v1825_v24, %v1824_v49  ;;  %v1314_v21 = vadd.f32 %v1238_v45, %v3080_v8  ;;  %v3082_v8 = vld [vmem:[#allocation32_spill] sm:$0xff] }
 0x1ee   : > { %v1565_v0 = vadd.f32 %v1488_v30, %v1439_v53 }
 0x1f0   : > { %v1619_v12 = vpop.f32.mrf.mxu0  ;;  %v1691_v26 = vadd.f32 %v1614_v10, %v1565_v0 }
 0x1f2   : > { %v1724_v29 = vsel %vm517_vm1, %v1691_v26, 0.0  ;;  %v1794_v32 = vmul.f32 %v1691_v26, %v1691_v26 }
 0x1f3   : > { %2099 = vmatmul.msk.bf16.gmra.mxu0 %vm517_vm1, %v2605_v14  ;;  %v1725_v55 = vadd.f32 %v1724_v29, %v1723_v9  ;;  %v1364_v58 = vpop.f32.mrf.mxu2 }
 0x1f4   : > { %v1490_v20 = vpop.f32.mrf.mxu3  ;;  %v1827_v50 = vsel %vm517_vm1, %v1794_v32, 0.0  ;;  %v1440_v5 = vadd.f32 %v1364_v58, %v1314_v21  ;;  %v1241_v37 = vpop.f32.mrf.mxu1 }
 0x1f5   : > { %v1828_v27 = vadd.f32 %v1827_v50, %v1826_v52  ;;  %v1315_v57 = vadd.f32 %v1241_v37, %v2577_v43 }
 0x1f6   : > { %v1566_v40 = vadd.f32 %v1490_v20, %v1440_v5 }
 0x1f7   : > { %2049 = vmatmul.msk.bf16.gmra.mxu1 %vm517_vm1, %v2582_v51 }
 0x1f8   : > { %v1621_v4 = vpop.f32.mrf.mxu0  ;;  %v1692_v10 = vadd.f32 %v1616_v60, %v1566_v40  ;;  %2066 = vmatmul.msk.bf16.gmra.mxu2 %vm517_vm1, %v2586_v38  ;;  %v3083_v38 = vld [vmem:[#allocation37_spill] sm:$0xff] }
 0x1f9   : > { %2083 = vmatmul.msk.bf16.gmra.mxu3 %vm517_vm1, %v3081_v23  ;;  %v3085_v23 = vld [vmem:[#allocation34_spill] sm:$0xff] }
 0x1fa   : > { %v1726_v9 = vsel %vm517_vm1, %v1692_v10, 0.0  ;;  %v1795_v41 = vmul.f32 %v1692_v10, %v1692_v10 }
 0x1fb   : > { %v1727_v30 = vadd.f32 %v1726_v9, %v1725_v55  ;;  %v1367_v49 = vpop.f32.mrf.mxu2  ;;  %v3086_v9 = vld [vmem:[#allocation6_spill] sm:$0xff] }
 0x1fc   : > { %v1493_v24 = vpop.f32.mrf.mxu3  ;;  %v1829_v43 = vsel %vm517_vm1, %v1795_v41, 0.0  ;;  %v1441_v53 = vadd.f32 %v1367_v49, %v1315_v57  ;;  %v1243_v45 = vpop.f32.mrf.mxu1 }
 0x1fd   : > { %v1830_v52 = vadd.f32 %v1829_v43, %v1828_v27  ;;  %v1316_v51 = vadd.f32 %v1243_v45, %v3082_v8  ;;  %v3084_v27 = vld [vmem:[#allocation33_spill] sm:$0xff] }
 0x1fe   : > { %v1567_v21 = vadd.f32 %v1493_v24, %v1441_v53 }
 0x200   : > { %v1624_v60 = vpop.f32.mrf.mxu0  ;;  %v1693_v0 = vadd.f32 %v1619_v12, %v1567_v21 }
 0x202   : > { %v1728_v26 = vsel %vm517_vm1, %v1693_v0, 0.0  ;;  %v1796_v29 = vmul.f32 %v1693_v0, %v1693_v0 }
 0x203   : > { %2100 = vmatmul.msk.bf16.gmra.mxu0 %vm517_vm1, %v3083_v38  ;;  %v1729_v32 = vadd.f32 %v1728_v26, %v1727_v30  ;;  %v1369_v55 = vpop.f32.mrf.mxu2 }
 0x204   : > { %v1495_v58 = vpop.f32.mrf.mxu3  ;;  %v1831_v20 = vsel %vm517_vm1, %v1796_v29, 0.0  ;;  %v1442_v50 = vadd.f32 %v1369_v55, %v1316_v51  ;;  %v1246_v5 = vpop.f32.mrf.mxu1  ;;  %v3087_v51 = vld [vmem:[#allocation35_spill] sm:$0xff] }
 0x205   : > { %v1832_v37 = vadd.f32 %v1831_v20, %v1830_v52  ;;  %v1317_v57 = vadd.f32 %v1246_v5, %v3084_v27 }
 0x206   : > { %v1568_v10 = vadd.f32 %v1495_v58, %v1442_v50 }
 0x207   : > { %2050 = vmatmul.msk.bf16.gmra.mxu1 %vm517_vm1, %v2605_v14 }
 0x208   : > { %v1626_v40 = vpop.f32.mrf.mxu0  ;;  %v1694_v12 = vadd.f32 %v1621_v4, %v1568_v10  ;;  %2067 = vmatmul.msk.bf16.gmra.mxu2 %vm517_vm1, %v3085_v23  ;;  %v3089_v23 = vld [vmem:[#allocation9_spill] sm:$0xff] }
 0x209   : > { %2084 = vmatmul.msk.bf16.gmra.mxu3 %vm517_vm1, %v3086_v9 }
 0x20a   : > { %v1730_v41 = vsel %vm517_vm1, %v1694_v12, 0.0  ;;  %v1797_v30 = vmul.f32 %v1694_v12, %v1694_v12 }
 0x20b   : > { %v1731_v49 = vadd.f32 %v1730_v41, %v1729_v32  ;;  %v1372_v24 = vpop.f32.mrf.mxu2 }
 0x20c   : > { %v1498_v43 = vpop.f32.mrf.mxu3  ;;  %v1833_v53 = vsel %vm517_vm1, %v1797_v30, 0.0  ;;  %v1443_v45 = vadd.f32 %v1372_v24, %v1317_v57  ;;  %v1248_v52 = vpop.f32.mrf.mxu1 }
 0x20d   : > { %v1834_v8 = vadd.f32 %v1833_v53, %v1832_v37  ;;  %v1318_v14 = vadd.f32 %v1248_v52, %v3087_v51  ;;  %v3088_v37 = vld [vmem:[#allocation36_spill] sm:$0xff] }
 0x20e   : > { %v1569_v21 = vadd.f32 %v1498_v43, %v1443_v45 }
 0x210   : > { %v1629_v4 = vpop.f32.mrf.mxu0  ;;  %v1695_v0 = vadd.f32 %v1624_v60, %v1569_v21 }
 0x212   : > { %v1732_v26 = vsel %vm517_vm1, %v1695_v0, 0.0  ;;  %v1798_v29 = vmul.f32 %v1695_v0, %v1695_v0 }
 0x213   : > { %2101 = vmatmul.msk.bf16.gmra.mxu0 %vm517_vm1, %v2655_v7  ;;  %v1733_v55 = vadd.f32 %v1732_v26, %v1731_v49  ;;  %v1374_v32 = vpop.f32.mrf.mxu2 }
 0x214   : > { %v1500_v58 = vpop.f32.mrf.mxu3  ;;  %v1835_v20 = vsel %vm517_vm1, %v1798_v29, 0.0  ;;  %v1444_v50 = vadd.f32 %v1374_v32, %v1318_v14  ;;  %v1251_v5 = vpop.f32.mrf.mxu1 }
 0x215   : > { %v1836_v27 = vadd.f32 %v1835_v20, %v1834_v8  ;;  %v1319_v57 = vadd.f32 %v1251_v5, %v3088_v37  ;;  %v3090_v8 = vld [vmem:[#allocation38_spill] sm:$0xff] }
 0x216   : > { %v1570_v12 = vadd.f32 %v1500_v58, %v1444_v50 }
 0x217   : > { %2051 = vmatmul.msk.bf16.gmra.mxu1 %vm517_vm1, %v3083_v38 }
 0x218   : > { %v1631_v10 = vpop.f32.mrf.mxu0  ;;  %v1696_v60 = vadd.f32 %v1626_v40, %v1570_v12  ;;  %2068 = vmatmul.msk.bf16.gmra.mxu2 %vm517_vm1, %v2633_v62 }
 0x219   : > { %2085 = vmatmul.msk.bf16.gmra.mxu3 %vm517_vm1, %v3089_v23 }
 0x21a   : > { %v1734_v9 = vsel %vm517_vm1, %v1696_v60, 0.0  ;;  %v1799_v41 = vmul.f32 %v1696_v60, %v1696_v60 }
 0x21b   : > { %v1735_v30 = vadd.f32 %v1734_v9, %v1733_v55  ;;  %v1377_v49 = vpop.f32.mrf.mxu2 }
 0x21c   : > { %v1503_v24 = vpop.f32.mrf.mxu3  ;;  %v1837_v43 = vsel %vm517_vm1, %v1799_v41, 0.0  ;;  %v1445_v53 = vadd.f32 %v1377_v49, %v1319_v57  ;;  %v1253_v45 = vpop.f32.mrf.mxu1 }
 0x21d   : > { %v1838_v52 = vadd.f32 %v1837_v43, %v1836_v27  ;;  %v1320_v38 = vadd.f32 %v1253_v45, %v3090_v8 }
 0x21e   : > { %v1571_v51 = vadd.f32 %v1503_v24, %v1445_v53 }
 0x220   : > { %v1634_v40 = vpop.f32.mrf.mxu0  ;;  %v1697_v14 = vadd.f32 %v1629_v4, %v1571_v51  ;;  %v475_v4 = vrot.slane %v403_v18, 1 }
 0x222   : > { %v1736_v62 = vsel %vm517_vm1, %v1697_v14, 0.0  ;;  %v1800_v21 = vmul.f32 %v1697_v14, %v1697_v14  ;;  %v476_v57 = vor.u32 %v475_v4, %v400_v31 }
 0x223   : > { %2102 = vmatmul.msk.bf16.gmra.mxu0 %vm517_vm1, %v2685_v25  ;;  %v1737_v0 = vadd.f32 %v1736_v62, %v1735_v30  ;;  %v1379_v26 = vpop.f32.mrf.mxu2 }
 0x224   : > { %v1505_v29 = vpop.f32.mrf.mxu3  ;;  %v1839_v55 = vsel %vm517_vm1, %v1800_v21, 0.0  ;;  %v1446_v32 = vadd.f32 %v1379_v26, %v1320_v38  ;;  %v1256_v58 = vpop.f32.mrf.mxu1 }
 0x225   : > { %v1840_v20 = vadd.f32 %v1839_v55, %v1838_v52  ;;  %v1321_v50 = vadd.f32 %v1256_v58, %v2650_v59 }
 0x226   : > { %v1572_v27 = vadd.f32 %v1505_v29, %v1446_v32 }
 0x227   : > { %2052 = vmatmul.msk.bf16.gmra.mxu1 %vm517_vm1, %v2655_v7 }
 0x228   : > { %v1636_v5 = vpop.f32.mrf.mxu0  ;;  %v1698_v37 = vadd.f32 %v1631_v10, %v1572_v27  ;;  %2069 = vmatmul.msk.bf16.gmra.mxu2 %vm517_vm1, %v2659_v17 }
 0x229   : > { %2086 = vmatmul.msk.bf16.gmra.mxu3 %vm517_vm1, %v2279_v3  ;;  %v513_v3 = vsel %vm2297_vm7, %v476_v57, 0 }
 0x22a   : > { %v1738_v59 = vsel %vm517_vm1, %v1698_v37, 0.0  ;;  %v1801_v12 = vmul.f32 %v1698_v37, %v1698_v37 }
 0x22b   : > { %v1739_v60 = vadd.f32 %v1738_v59, %v1737_v0  ;;  %v1382_v23 = vpop.f32.mrf.mxu2 }
 0x22c   : > { %v1508_v18 = vpop.f32.mrf.mxu3  ;;  %v1841_v9 = vsel %vm517_vm1, %v1801_v12, 0.0  ;;  %v1447_v41 = vadd.f32 %v1382_v23, %v1321_v50  ;;  %v1258_v7 = vpop.f32.mrf.mxu1 }
 0x22d   : > { %v1842_v10 = vadd.f32 %v1841_v9, %v1840_v20  ;;  %v1322_v30 = vadd.f32 %v1258_v7, %v2669_v61 }
 0x22e   : > { %v1573_v49 = vadd.f32 %v1508_v18, %v1447_v41 }
 0x230   : > { %v1639_v17 = vpop.f32.mrf.mxu0  ;;  %v1699_v24 = vadd.f32 %v1634_v40, %v1573_v49 }
 0x232   : > { %v1740_v31 = vsel %vm517_vm1, %v1699_v24, 0.0  ;;  %v1802_v43 = vmul.f32 %v1699_v24, %v1699_v24 }
 0x233   : > { %2103 = vmatmul.msk.bf16.gmra.mxu0 %vm517_vm1, %v513_v3  ;;  %v1741_v53 = vadd.f32 %v1740_v31, %v1739_v60  ;;  %v1384_v45 = vpop.f32.mrf.mxu2 }
 0x234   : > { %v1510_v52 = vpop.f32.mrf.mxu3  ;;  %v1843_v8 = vsel %vm517_vm1, %v1802_v43, 0.0  ;;  %v1448_v38 = vadd.f32 %v1384_v45, %v1322_v30  ;;  %v1261_v51 = vpop.f32.mrf.mxu1  ;;  %v3093_v30 = vmov 0  }
 0x235   : > { %v1844_v14 = vadd.f32 %v1843_v8, %v1842_v10  ;;  %v1323_v61 = vadd.f32 %v1261_v51, %v2678_v2  ;;  %v3092_v10 = vld [vmem:[#allocation12_spill] sm:$0xff] }
 0x236   : > { %v1574_v11 = vadd.f32 %v1510_v52, %v1448_v38 }
 0x237   : > { %2053 = vmatmul.msk.bf16.gmra.mxu1 %vm517_vm1, %v2685_v25 }
 0x238   : > { %v1641_v62 = vpop.f32.mrf.mxu0  ;;  %v1700_v40 = vadd.f32 %v1636_v5, %v1574_v11  ;;  %2070 = vmatmul.msk.bf16.gmra.mxu2 %vm517_vm1, %v2689_v39  ;;  %v3091_v39 = vld [vmem:[#allocation13_spill] sm:$0xff] }
 0x239   : > { %2087 = vmatmul.msk.bf16.gmra.mxu3 %vm517_vm1, %v2661_v33 }
 0x23a   : > { %v1742_v21 = vsel %vm517_vm1, %v1700_v40, 0.0  ;;  %v1803_v0 = vmul.f32 %v1700_v40, %v1700_v40 }
 0x23b   : > { %v1743_v26 = vadd.f32 %v1742_v21, %v1741_v53  ;;  %v1387_v29 = vpop.f32.mrf.mxu2 }
 0x23c   : > { %v1513_v55 = vpop.f32.mrf.mxu3  ;;  %v1845_v2 = vsel %vm517_vm1, %v1803_v0, 0.0  ;;  %v1449_v32 = vadd.f32 %v1387_v29, %v1323_v61  ;;  %v1263_v58 = vpop.f32.mrf.mxu1 }
 0x23d   : > { %v1846_v20 = vadd.f32 %v1845_v2, %v1844_v14  ;;  %v1324_v25 = vadd.f32 %v1263_v58, %v2697_v6 }
 0x23e   : > { %v1575_v5 = vadd.f32 %v1513_v55, %v1449_v32 }
 0x240   : > { %v1644_v50 = vpop.f32.mrf.mxu0  ;;  %v1701_v4 = vadd.f32 %v1639_v17, %v1575_v5 }
 0x242   : > { %v1744_v33 = vsel %vm517_vm1, %v1701_v4, 0.0  ;;  %v1804_v27 = vmul.f32 %v1701_v4, %v1701_v4 }
 0x243   : > { %2104 = vmatmul.msk.bf16.gmra.mxu0 %vm517_vm1, %v3091_v39  ;;  %v1745_v37 = vadd.f32 %v1744_v33, %v1743_v26  ;;  %v1389_v57 = vpop.f32.mrf.mxu2 }
 0x244   : > { %v1515_v59 = vpop.f32.mrf.mxu3  ;;  %v1847_v12 = vsel %vm517_vm1, %v1804_v27, 0.0  ;;  %v1450_v60 = vadd.f32 %v1389_v57, %v1324_v25  ;;  %v1266_v23 = vpop.f32.mrf.mxu1 }
 0x245   : > { %v1848_v18 = vadd.f32 %v1847_v12, %v1846_v20  ;;  %v1325_v9 = vadd.f32 %v1266_v23, %v2702_v47 }
 0x246   : > { %v1576_v41 = vadd.f32 %v1515_v59, %v1450_v60 }
 0x247   : > { %2054 = vmatmul.msk.bf16.gmra.mxu1 %vm517_vm1, %v513_v3 }
 0x248   : > { %v1646_v6 = vpop.f32.mrf.mxu0  ;;  %v1702_v7 = vadd.f32 %v1641_v62, %v1576_v41  ;;  %2071 = vmatmul.msk.bf16.gmra.mxu2 %vm517_vm1, %v3092_v10 }
 0x249   : > { %1557 = vmatmul.bf16.gmra.mxu3 %v3093_v30 }
 0x24a   : > { %v1746_v17 = vsel %vm517_vm1, %v1702_v7, 0.0  ;;  %v1805_v49 = vmul.f32 %v1702_v7, %v1702_v7 }
 0x24b   : > { %v1747_v24 = vadd.f32 %v1746_v17, %v1745_v37  ;;  %v1392_v31 = vpop.f32.mrf.mxu2 }
 0x24c   : > { %v1518_v43 = vpop.f32.mrf.mxu3  ;;  %v1849_v53 = vsel %vm517_vm1, %v1805_v49, 0.0  ;;  %v1451_v45 = vadd.f32 %v1392_v31, %v1325_v9  ;;  %v1268_v47 = vpop.f32.mrf.mxu1 }
 0x24d   : > { %v1850_v52 = vadd.f32 %v1849_v53, %v1848_v18  ;;  %v1326_v8 = vadd.f32 %v1268_v47, %v2711_v13 }
 0x24e   : > { %v1577_v38 = vadd.f32 %v1518_v43, %v1451_v45 }
 0x250   : > { %v1649_v3 = vpop.f32.mrf.mxu0  ;;  %v1703_v51 = vadd.f32 %v1644_v50, %v1577_v38 }
 0x252   : > { %v1748_v14 = vsel %vm517_vm1, %v1703_v51, 0.0  ;;  %v1806_v61 = vmul.f32 %v1703_v51, %v1703_v51 }
 0x253   : > { %v1749_v62 = vadd.f32 %v1748_v14, %v1747_v24  ;;  %v1394_v11 = vpop.f32.mrf.mxu2 }
 0x254   : > { %v1520_v40 = vpop.f32.mrf.mxu3  ;;  %v1851_v21 = vsel %vm517_vm1, %v1806_v61, 0.0  ;;  %v1452_v0 = vadd.f32 %v1394_v11, %v1326_v8  ;;  %v1271_v26 = vpop.f32.mrf.mxu1 }
 0x255   : > { %v1852_v29 = vadd.f32 %v1851_v21, %v1850_v52  ;;  %v1327_v55 = vadd.f32 %v1271_v26, %v2716_v22 }
 0x256   : > { %v1578_v32 = vadd.f32 %v1520_v40, %v1452_v0 }
 0x258   : > { %v1651_v2 = vpop.f32.mrf.mxu0  ;;  %v1704_v58 = vadd.f32 %v1646_v6, %v1578_v32 }
 0x25a   : > { %v1750_v13 = vsel %vm517_vm1, %v1704_v58, 0.0  ;;  %v1807_v20 = vmul.f32 %v1704_v58, %v1704_v58 }
 0x25b   : > { %v1751_v25 = vadd.f32 %v1750_v13, %v1749_v62  ;;  %v1397_v50 = vpop.f32.mrf.mxu2 }
 0x25c   : > { %v1523_v5 = vpop.f32.mrf.mxu3  ;;  %v1853_v4 = vsel %vm517_vm1, %v1807_v20, 0.0  ;;  %v1453_v39 = vadd.f32 %v1397_v50, %v1327_v55  ;;  %v1273_v33 = vpop.f32.mrf.mxu1 }
 0x25d   : > { %v1854_v27 = vadd.f32 %v1853_v4, %v1852_v29  ;;  %v1328_v37 = vadd.f32 %v1273_v33, %v2725_v63 }
 0x25e   : > { %v1579_v59 = vadd.f32 %v1523_v5, %v1453_v39 }
 0x260   : > { %v1654_v57 = vpop.f32.mrf.mxu0  ;;  %v1705_v12 = vadd.f32 %v1649_v3, %v1579_v59 }
 0x262   : > { %v1752_v22 = vsel %vm517_vm1, %v1705_v12, 0.0  ;;  %v1808_v60 = vmul.f32 %v1705_v12, %v1705_v12 }
 0x263   : > { %v1753_v23 = vadd.f32 %v1752_v22, %v1751_v25  ;;  %v1399_v18 = vpop.f32.mrf.mxu2 }
 0x264   : > { %v1525_v9 = vpop.f32.mrf.mxu3  ;;  %v1855_v6 = vsel %vm517_vm1, %v1808_v60, 0.0  ;;  %v1454_v41 = vadd.f32 %v1399_v18, %v1328_v37  ;;  %v1276_v7 = vpop.f32.mrf.mxu1 }
 0x265   : > { %v1856_v10 = vadd.f32 %v1855_v6, %v1854_v27  ;;  %v1329_v30 = vadd.f32 %v1276_v7, %v2730_v36 }
 0x266   : > { %v1580_v49 = vadd.f32 %v1525_v9, %v1454_v41 }
 0x268   : > { %v1656_v17 = vpop.f32.mrf.mxu0  ;;  %v1706_v24 = vadd.f32 %v1651_v2, %v1580_v49 }
 0x26a   : > { %v1754_v63 = vsel %vm517_vm1, %v1706_v24, 0.0  ;;  %v1809_v31 = vmul.f32 %v1706_v24, %v1706_v24 }
 0x26b   : > { %v1755_v43 = vadd.f32 %v1754_v63, %v1753_v23  ;;  %v1402_v53 = vpop.f32.mrf.mxu2 }
 0x26c   : > { %v1528_v45 = vpop.f32.mrf.mxu3  ;;  %v1857_v47 = vsel %vm517_vm1, %v1809_v31, 0.0  ;;  %v1455_v52 = vadd.f32 %v1402_v53, %v1329_v30  ;;  %v1278_v8 = vpop.f32.mrf.mxu1 }
 0x26d   : > { %v1858_v3 = vadd.f32 %v1857_v47, %v1856_v10  ;;  %v1330_v38 = vadd.f32 %v1278_v8, %v2739_v28 }
 0x26e   : > { %v1581_v14 = vadd.f32 %v1528_v45, %v1455_v52 }
 0x270   : > { %v1659_v51 = vpop.f32.mrf.mxu0  ;;  %v1707_v61 = vadd.f32 %v1654_v57, %v1581_v14 }
 0x272   : > { %v1756_v36 = vsel %vm517_vm1, %v1707_v61, 0.0  ;;  %v1810_v62 = vmul.f32 %v1707_v61, %v1707_v61 }
 0x273   : > { %v1757_v11 = vadd.f32 %v1756_v36, %v1755_v43  ;;  %v1404_v40 = vpop.f32.mrf.mxu2 }
 0x274   : > { %v1530_v21 = vpop.f32.mrf.mxu3  ;;  %v1859_v0 = vsel %vm517_vm1, %v1810_v62, 0.0  ;;  %v1456_v26 = vadd.f32 %v1404_v40, %v1330_v38  ;;  %v1281_v29 = vpop.f32.mrf.mxu1 }
 0x275   : > { %v1860_v55 = vadd.f32 %v1859_v0, %v1858_v3  ;;  %v1331_v2 = vadd.f32 %v1281_v29, %v2744_v44 }
 0x276   : > { %v1582_v58 = vadd.f32 %v1530_v21, %v1456_v26 }
 0x278   : > { %v1661_v32 = vpop.f32.mrf.mxu0  ;;  %v1708_v13 = vadd.f32 %v1656_v17, %v1582_v58 }
 0x27a   : > { %v1758_v28 = vsel %vm517_vm1, %v1708_v13, 0.0  ;;  %v1811_v20 = vmul.f32 %v1708_v13, %v1708_v13 }
 0x27b   : > { %v1759_v25 = vadd.f32 %v1758_v28, %v1757_v11  ;;  %v1407_v50 = vpop.f32.mrf.mxu2 }
 0x27c   : > { %v1533_v5 = vpop.f32.mrf.mxu3  ;;  %v1861_v4 = vsel %vm517_vm1, %v1811_v20, 0.0  ;;  %v1457_v39 = vadd.f32 %v1407_v50, %v1331_v2  ;;  %v1283_v33 = vpop.f32.mrf.mxu1 }
 0x27d   : > { %v1862_v27 = vadd.f32 %v1861_v4, %v1860_v55  ;;  %v1332_v22 = vadd.f32 %v1283_v33, %v2753_v16 }
 0x27e   : > { %v1583_v57 = vadd.f32 %v1533_v5, %v1457_v39 }
 0x280   : > { %v1664_v37 = vpop.f32.mrf.mxu0  ;;  %v1709_v59 = vadd.f32 %v1659_v51, %v1583_v57 }
 0x282   : > { %v1760_v12 = vsel %vm517_vm1, %v1709_v59, 0.0  ;;  %v1812_v44 = vmul.f32 %v1709_v59, %v1709_v59 }
 0x283   : > { %v1761_v60 = vadd.f32 %v1760_v12, %v1759_v25  ;;  %v1409_v23 = vpop.f32.mrf.mxu2 }
 0x284   : > { %v1535_v18 = vpop.f32.mrf.mxu3  ;;  %v1863_v9 = vsel %vm517_vm1, %v1812_v44, 0.0  ;;  %v1458_v6 = vadd.f32 %v1409_v23, %v1332_v22  ;;  %v1286_v41 = vpop.f32.mrf.mxu1 }
 0x285   : > { %v1864_v7 = vadd.f32 %v1863_v9, %v1862_v27  ;;  %v1333_v63 = vadd.f32 %v1286_v41, %v2758_v56 }
 0x286   : > { %v1584_v10 = vadd.f32 %v1535_v18, %v1458_v6 }
 0x288   : > { %v1666_v30 = vpop.f32.mrf.mxu0  ;;  %v1710_v17 = vadd.f32 %v1661_v32, %v1584_v10 }
 0x28a   : > { %v1762_v49 = vsel %vm517_vm1, %v1710_v17, 0.0  ;;  %v1813_v24 = vmul.f32 %v1710_v17, %v1710_v17 }
 0x28b   : > { %v1763_v31 = vadd.f32 %v1762_v49, %v1761_v60  ;;  %v1412_v43 = vpop.f32.mrf.mxu2 }
 0x28c   : > { %v1538_v53 = vpop.f32.mrf.mxu3  ;;  %v1865_v16 = vsel %vm517_vm1, %v1813_v24, 0.0  ;;  %v1459_v45 = vadd.f32 %v1412_v43, %v1333_v63  ;;  %v1288_v47 = vpop.f32.mrf.mxu1 }
 0x28d   : > { %v1866_v52 = vadd.f32 %v1865_v16, %v1864_v7  ;;  %v1334_v61 = vadd.f32 %v1288_v47, %v2767_v54 }
 0x28e   : > { %v1585_v8 = vadd.f32 %v1538_v53, %v1459_v45 }
 0x290   : > { %v1711_v3 = vadd.f32 %v1664_v37, %v1585_v8  ;;  %v1669_v38 = vpop.f32.mrf.mxu0 }
 0x292   : > { %v1764_v51 = vsel %vm517_vm1, %v1711_v3, 0.0  ;;  %v1814_v14 = vmul.f32 %v1711_v3, %v1711_v3 }
 0x293   : > { %v1765_v36 = vadd.f32 %v1764_v51, %v1763_v31  ;;  %v1414_v62 = vpop.f32.mrf.mxu2 }
 0x294   : > { %v1540_v11 = vpop.f32.mrf.mxu3  ;;  %v1867_v56 = vsel %vm517_vm1, %v1814_v14, 0.0  ;;  %v1460_v40 = vadd.f32 %v1414_v62, %v1334_v61  ;;  %v1291_v21 = vpop.f32.mrf.mxu1 }
 0x295   : > { %v1868_v0 = vadd.f32 %v1867_v56, %v1866_v52  ;;  %v1335_v32 = vadd.f32 %v1291_v21, %v2772_v19 }
 0x296   : > { %v1586_v26 = vadd.f32 %v1540_v11, %v1460_v40 }
 0x298   : > { %v1712_v29 = vadd.f32 %v1666_v30, %v1586_v26  ;;  %v1671_v58 = vpop.f32.mrf.mxu0 }
 0x29a   : > { %v1766_v55 = vsel %vm517_vm1, %v1712_v29, 0.0  ;;  %v1815_v2 = vmul.f32 %v1712_v29, %v1712_v29 }
 0x29b   : > { %v1767_v13 = vadd.f32 %v1766_v55, %v1765_v36  ;;  %v1417_v28 = vpop.f32.mrf.mxu2 }
 0x29c   : > { %v1543_v20 = vpop.f32.mrf.mxu3  ;;  %v1869_v54 = vsel %vm517_vm1, %v1815_v2, 0.0  ;;  %v1461_v25 = vadd.f32 %v1417_v28, %v1335_v32  ;;  %v1293_v50 = vpop.f32.mrf.mxu1 }
 0x29d   : > { %v1870_v5 = vadd.f32 %v1869_v54, %v1868_v0  ;;  %v1336_v37 = vadd.f32 %v1293_v50, %v2781_v1 }
 0x29e   : > { %v1587_v4 = vadd.f32 %v1543_v20, %v1461_v25 }
 0x2a0   : > { %v1713_v39 = vadd.f32 %v1669_v38, %v1587_v4  ;;  %v1674_v60 = vpop.f32.mrf.mxu0 }
 0x2a2   : > { %v1768_v33 = vsel %vm517_vm1, %v1713_v39, 0.0  ;;  %v1816_v27 = vmul.f32 %v1713_v39, %v1713_v39 }
 0x2a3   : > { %v1769_v57 = vadd.f32 %v1768_v33, %v1767_v13  ;;  %v1419_v59 = vpop.f32.mrf.mxu2 }
 0x2a4   : > { %v1545_v12 = vpop.f32.mrf.mxu3  ;;  %v1871_v19 = vsel %vm517_vm1, %v1816_v27, 0.0  ;;  %v1462_v44 = vadd.f32 %v1419_v59, %v1336_v37  ;;  %v1296_v22 = vpop.f32.mrf.mxu1 }
 0x2a5   : > { %v1872_v23 = vadd.f32 %v1871_v19, %v1870_v5  ;;  %v1337_v7 = vadd.f32 %v1296_v22, %v2786_v35 }
 0x2a6   : > { %v1588_v18 = vadd.f32 %v1545_v12, %v1462_v44 }
 0x2a8   : > { %v1714_v9 = vadd.f32 %v1671_v58, %v1588_v18  ;;  %v1676_v43 = vpop.f32.mrf.mxu0 }
 0x2aa   : > { %v1770_v6 = vsel %vm517_vm1, %v1714_v9, 0.0  ;;  %v1817_v41 = vmul.f32 %v1714_v9, %v1714_v9 }
 0x2ab   : > { %v1771_v10 = vadd.f32 %v1770_v6, %v1769_v57  ;;  %v1422_v30 = vpop.f32.mrf.mxu2 }
 0x2ac   : > { %v1548_v17 = vpop.f32.mrf.mxu3  ;;  %v1873_v1 = vsel %vm517_vm1, %v1817_v41, 0.0  ;;  %v1463_v49 = vadd.f32 %v1422_v30, %v1337_v7  ;;  %v1298_v24 = vpop.f32.mrf.mxu1 }
 0x2ad   : > { %v1874_v63 = vadd.f32 %v1873_v1, %v1872_v23  ;;  %v1338_v47 = vadd.f32 %v1298_v24, %v2795_v34 }
 0x2ae   : > { %v1589_v31 = vadd.f32 %v1548_v17, %v1463_v49 }
 0x2b0   : > { %v1715_v53 = vadd.f32 %v1674_v60, %v1589_v31  ;;  %v1679_v62 = vpop.f32.mrf.mxu0 }
 0x2b2   : > { %v1772_v16 = vsel %vm517_vm1, %v1715_v53, 0.0  ;;  %v1818_v45 = vmul.f32 %v1715_v53, %v1715_v53 }
 0x2b3   : > { %v1773_v52 = vadd.f32 %v1772_v16, %v1771_v10  ;;  %v1424_v8 = vpop.f32.mrf.mxu2 }
 0x2b4   : > { %v1550_v3 = vpop.f32.mrf.mxu3  ;;  %v1875_v35 = vsel %vm517_vm1, %v1818_v45, 0.0  ;;  %v1464_v38 = vadd.f32 %v1424_v8, %v1338_v47  ;;  %v1301_v51 = vpop.f32.mrf.mxu1 }
 0x2b5   : > { %v1876_v14 = vadd.f32 %v1875_v35, %v1874_v63  ;;  %v1339_v40 = vadd.f32 %v1301_v51, %v2800_v46 }
 0x2b6   : > { %v1590_v61 = vadd.f32 %v1550_v3, %v1464_v38 }
 0x2b8   : > { %v1716_v36 = vadd.f32 %v1676_v43, %v1590_v61  ;;  %v1681_v54 = vpop.f32.mrf.mxu0 }
 0x2ba   : > { %v1774_v11 = vsel %vm517_vm1, %v1716_v36, 0.0  ;;  %v1819_v56 = vmul.f32 %v1716_v36, %v1716_v36 }
 0x2bb   : > { %v1775_v21 = vadd.f32 %v1774_v11, %v1773_v52  ;;  %v1427_v0 = vpop.f32.mrf.mxu2 }
 0x2bc   : > { %v1553_v26 = vpop.f32.mrf.mxu3  ;;  %v1877_v34 = vsel %vm517_vm1, %v1819_v56, 0.0  ;;  %v1465_v29 = vadd.f32 %v1427_v0, %v1339_v40  ;;  %v1303_v55 = vpop.f32.mrf.mxu1 }
 0x2bd   : > { %v1878_v2 = vadd.f32 %v1877_v34, %v1876_v14  ;;  %v1340_v20 = vadd.f32 %v1303_v55, %v2809_v42 }
 0x2be   : > { %v1591_v32 = vadd.f32 %v1553_v26, %v1465_v29 }
 0x2c0   : > { %v1717_v58 = vadd.f32 %v1679_v62, %v1591_v32  ;;  %v1684_v18 = vpop.f32.mrf.mxu0 }
 0x2c2   : > { %v1776_v13 = vsel %vm517_vm1, %v1717_v58, 0.0  ;;  %v1820_v28 = vmul.f32 %v1717_v58, %v1717_v58 }
 0x2c3   : > { %v1777_v25 = vadd.f32 %v1776_v13, %v1775_v21  ;;  %v1429_v50 = vpop.f32.mrf.mxu2 }
 0x2c4   : > { %v1555_v5 = vpop.f32.mrf.mxu3  ;;  %v1879_v46 = vsel %vm517_vm1, %v1820_v28, 0.0  ;;  %v1466_v4 = vadd.f32 %v1429_v50, %v1340_v20  ;;  %v1306_v33 = vpop.f32.mrf.mxu1 }
 0x2c5   : > { %v1880_v39 = vadd.f32 %v1879_v46, %v1878_v2  ;;  %v1341_v12 = vadd.f32 %v1306_v33, %v2814_v15 }
 0x2c6   : > { %v1592_v27 = vadd.f32 %v1555_v5, %v1466_v4 }
 0x2c8   : > { %v1718_v37 = vadd.f32 %v1681_v54, %v1592_v27  ;;  %v1686_v43 = vpop.f32.mrf.mxu0 }
 0x2ca   : > { %v1778_v57 = vsel %vm517_vm1, %v1718_v37, 0.0  ;;  %v1821_v59 = vmul.f32 %v1718_v37, %v1718_v37 }
 0x2cb   : > { %v1779_v19 = vadd.f32 %v1778_v57, %v1777_v25  ;;  %v1432_v44 = vpop.f32.mrf.mxu2 }
 0x2cc   : > { %v1558_v22 = vpop.f32.mrf.mxu3  ;;  %v1881_v42 = vsel %vm517_vm1, %v1821_v59, 0.0  ;;  %v1467_v60 = vadd.f32 %v1432_v44, %v1341_v12  ;;  %v1308_v6 = vpop.f32.mrf.mxu1 }
 0x2cd   : > { %v1882_v23 = vadd.f32 %v1881_v42, %v1880_v39  ;;  %v1342_v30 = vadd.f32 %v1308_v6, %v2824_v48 }
 0x2ce   : > { %v1593_v9 = vadd.f32 %v1558_v22, %v1467_v60 }
 0x2d0   : > { %v1719_v41 = vadd.f32 %v1684_v18, %v1593_v9 }
 0x2d2   : > { %v1780_v7 = vsel %vm517_vm1, %v1719_v41, 0.0  ;;  %v1822_v10 = vmul.f32 %v1719_v41, %v1719_v41 }
 0x2d3   : > { %v1781_v17 = vadd.f32 %v1780_v7, %v1779_v19  ;;  %v1434_v1 = vpop.f32.mrf.mxu2 }
 0x2d4   : > { %v1883_v15 = vsel %vm517_vm1, %v1822_v10, 0.0  ;;  %v1468_v49 = vadd.f32 %v1434_v1, %v1342_v30  ;;  %v1560_v63 = vpop.f32.mrf.mxu3 }
 0x2d5   : > { %v1884_v24 = vadd.f32 %v1883_v15, %v1882_v23 }
 0x2d6   : > { %v1594_v31 = vadd.f32 %v1560_v63, %v1468_v49 }
 0x2d8   : > { %v1720_v53 = vadd.f32 %v1686_v43, %v1594_v31 }
 0x2da   : > { %v1782_v16 = vsel %vm517_vm1, %v1720_v53, 0.0  ;;  %v1823_v45 = vmul.f32 %v1720_v53, %v1720_v53 }
 0x2db   : > { %v1783_v47 = vadd.f32 %v1782_v16, %v1781_v17 }
 0x2dc   : > { %v1885_v52 = vsel %vm517_vm1, %v1823_v45, 0.0 }
 0x2dd   : > { %v1784_v8 = vrot.slane %v1783_v47, 4  ;;  %v1886_v3 = vadd.f32 %v1885_v52, %v1884_v24 }
 0x2df   : > { %v1785_v48 = vadd.f32 %v1784_v8, %v1783_v47  ;;  %v1887_v35 = vrot.slane %v1886_v3, 4 }
 0x2e1   : > { %v1786_v38 = vrot.slane %v1785_v48, 2  ;;  %v1888_v51 = vadd.f32 %v1887_v35, %v1886_v3 }
 0x2e3   : > { %v1787_v14 = vadd.f32 %v1786_v38, %v1785_v48  ;;  %v1889_v61 = vrot.slane %v1888_v51, 2 }
 0x2e5   : > { %v1788_v36 = vrot.slane %v1787_v14, 1  ;;  %v1890_v62 = vadd.f32 %v1889_v61, %v1888_v51 }
 0x2e7   : > { %v1789_v11 = vadd.f32 %v1788_v36, %v1787_v14  ;;  %v1891_v56 = vrot.slane %v1890_v62, 1 }
 0x2e9   : > { %1791 = vst.msk [vmem:[%s141_s8] sm:$0x1] %vm1790_vm8, %v1789_v11  ;;  %v1892_v40 = vadd.f32 %v1891_v56, %v1890_v62 }
 0x2eb   : > { %1893 = vst.msk [vmem:[%s141_s8 + $0x1] sm:$0x1] %vm1790_vm8, %v1892_v40 }
 0x2ec PF: > { %s12_s9 = sadd.s32 1, %s2126_s9  }
 0x2ed   : > { %p9_p4 = scmp.ge.s32.totalorder %s12_s9, 4  }
 0x2ef   :  { %11 = sbr.rel (!%p9_p4) target bundleno = 1 (0x1), region = 66 }

// kernel: resblock_forward_nhwc.4
= control target key start
LH: loop header
LB: loop body
LE: loop exit
PB: predicated region body
PF: predicated region fallthrough
CT: control target
= control target key end

     0   :  { %s4161_s21 = smov 0   ;;  %s6290_s0 = inlined_call_operand.vmem [shape: f32[2,16,16,4], index: 0, kind: input, shape index: {}]   ;;  %s6291_s1 = inlined_call_operand.vmem [shape: bf16[9,4,4], index: 1, kind: input, shape index: {}]   ;;  %s6292_s2 = inlined_call_operand.vmem [shape: bf16[9,4,4], index: 2, kind: input, shape index: {}]   ;;  %s6293_s3 = inlined_call_operand.vmem [shape: f32[1,4], index: 3, kind: input, shape index: {}]   ;;  %s6294_s4 = inlined_call_operand.vmem [shape: f32[1,4], index: 4, kind: input, shape index: {}]   ;;  %s6295_s5 = inlined_call_operand.vmem [shape: bf16[512,4], index: 5, kind: output, shape index: {0}]   ;;  %s6296_s6 = inlined_call_operand.vmem [shape: f32[2,2,4], index: 6, kind: output, shape index: {1}]  }
   0x1 LB: > { %s4167_s22 = sadd.s32 4294967295, %s4123_s21   ;;  %p3793_p0 = scmp.ge.s32.totalorder %s4123_s21, 1  ;;  %s4123_s21 = sphi %s4161_s21, %s17_s21  }
   0x2   : > { %p215_p1 = scmp.lt.s32.totalorder %s4123_s21, 3 }
   0x4   : > { %p216_p2 = pnand %p3793_p0, %p215_p1 }
   0x6   : > { %219 = sbr.rel (%p216_p2) target bundleno = 1461 (0x5b5), region = 40 }
   0xb   : > { %v3799_v0 = vld [vmem:[%s6291_s1 + $0x2] sm:$0x3]  ;;  %vm672_vm0 = vcmask 1041408   ;;  %p249_p3 = scmp.lt.s32.totalorder %s4167_s22, 1  ;;  %v636_v2 = vld [vmem:[%s6291_s1] sm:$0x3] }
   0xc   : > { %v674_v1 = vsel %vm672_vm0, %v3799_v0, 0  ;;  %v3831_v3 = vld [vmem:[%s6291_s1 + $0x4] sm:$0x3]  ;;  %v6305_v4 = vmov 0   ;;  %v814_v6 = vsel %vm672_vm0, %v636_v2, 0  ;;  %vm545_vm1 = vcmask 1040384  }
   0xd   : > { %v412_v5 = vrot.slane %v6305_v4, 7  ;;  %683 = vmatpush.bf16.msra.mxu0 %v674_v1  ;;  %4102 = vmatpush.bf16.msra.mxu2 %v674_v1  ;;  %s4184_s29 = scalar_select %p249_p3, %s4167_s22, 1  ;;  %v956_v7 = vsel %vm672_vm0, %v3831_v3, 0  ;;  %vm546_vm2 = vsmask.f32 256  ;;  %vm639_vm4 = vcmask 31744  }
   0xe   : > { %823 = vmatpush.bf16.msra.mxu1 %v814_v6  ;;  %4103 = vmatpush.bf16.msra.mxu3 %v814_v6  ;;  %vm4188_vm3 = vmand %vm545_vm1, %vm546_vm2  ;;  %v3848_v9 = vld [vmem:[%s6291_s1 + $0x6] sm:$0x3]  ;;  %v3865_v10 = vld [vmem:[%s6291_s1 + $0x8] sm:$0x3]  ;;  %vm616_vm5 = vcmask 1047552   ;;  %s3796_s30 = sshll.u32 %s4167_s22, 5 }
   0xf   : > { %s4101_s10 = sshll.u32 %s4184_s29, 8  ;;  %v4201_v11 = vsel %vm4188_vm3, 0, %v412_v5  ;;  %v1085_v12 = vsel %vm672_vm0, %v3848_v9, 0  ;;  %v1213_v13 = vsel %vm672_vm0, %v3865_v10, 0  ;;  %vm617_vm6 = vsmask.f32 7424 }
  0x10   : > { %6399 = vst [vmem:[#allocation2_spill] sm:$0xff] %v4201_v11  ;;  %684 = vmatmul.bf16.vlgmr.msra.gmra.mxu0 %v6305_v4  ;;  %s4209_s13 = scalar_lea.vmem %s6290_s0, %s4101_s10  ;;  %vm4501_vm7 = vmand %vm616_vm5, %vm617_vm6  ;;  %p255_p4 = scmp.lt.s32.totalorder %s3796_s30, 63  ;;  %vm3669_vm8 = vcmask 27648   ;;  %vm3533_vm9 = vcmask 24576  }
  0x11   : > { %965 = vmatpush.bf16.msrb.mxu2 %v956_v7  ;;  %v279_v14 = vld [vmem:[%s4209_s13 + $0x70] sm:$0xff]  ;;  %v280_v15 = vld [vmem:[%s4209_s13 + $0x78] sm:$0xff]  ;;  %3815 = vmatmul.msk.bf16.vlgmr.msra.gmra.mxu1 %vm639_vm4, %v4201_v11  ;;  %v265_v16 = vld [vmem:[%s4209_s13] sm:$0xff]  ;;  %s3798_s22 = sshll.u32 %s4184_s29, 1 }
  0x12   : > { %1094 = vmatpush.bf16.msrb.mxu3 %v1085_v12  ;;  %1222 = vmatpush.bf16.msrb.mxu0 %v1213_v13  ;;  %v311_v17 = vpack.c.bf16 %v279_v14, %v279_v14  ;;  %v312_v18 = vpack.c.bf16 %v280_v15, %v280_v15  ;;  %v266_v19 = vld [vmem:[%s4209_s13 + $0x8] sm:$0xff]  ;;  %v297_v20 = vpack.c.bf16 %v265_v16, %v265_v16  ;;  %v281_v21 = vld [vmem:[%s4209_s13 + $0x80] sm:$0xff]  ;;  %v267_v29 = vld [vmem:[%s4209_s13 + $0x10] sm:$0xff]  ;;  %s6593_s30 = smov (!%p255_p4, %s3796_s30), 63 }
  0x13   : > { %v282_v22 = vld [vmem:[%s4209_s13 + $0x88] sm:$0xff]  ;;  %v298_v23 = vpack.c.bf16 %v266_v19, %v266_v19  ;;  %v313_v24 = vpack.c.bf16 %v281_v21, %v281_v21  ;;  %v268_v31 = vld [vmem:[%s4209_s13 + $0x18] sm:$0xff]  ;;  %v299_v35 = vpack.c.bf16 %v267_v29, %v267_v29  ;;  %v283_v53 = vld [vmem:[%s4209_s13 + $0x90] sm:$0xff]  ;;  %s3797_s7 = sshll.u32 %s6593_s30, 2 }
  0x14   : > { %v375_v25 = vunpack.c.l.b16 %v311_v17  ;;  %v376_v26 = vunpack.c.l.b16 %v312_v18  ;;  %v361_v27 = vunpack.c.l.b16 %v297_v20  ;;  %v314_v28 = vpack.c.bf16 %v282_v22, %v282_v22  ;;  %v284_v54 = vld [vmem:[%s4209_s13 + $0x98] sm:$0xff]  ;;  %v269_v60 = vld [vmem:[%s4209_s13 + $0x20] sm:$0xff]  ;;  %v270_v61 = vld [vmem:[%s4209_s13 + $0x28] sm:$0xff]  ;;  %s6037_s10 = scalar_lea.vmem %s6295_s5, %s3797_s7 }
  0x15   : > { %v362_v30 = vunpack.c.l.b16 %v298_v23  ;;  %v377_v34 = vunpack.c.l.b16 %v313_v24  ;;  %v300_v39 = vpack.c.bf16 %v268_v31, %v268_v31  ;;  %v363_v46 = vunpack.c.l.b16 %v299_v35  ;;  %v285_v16 = vld [vmem:[%s4209_s13 + $0xa0] sm:$0xff]  ;;  %v286_v17 = vld [vmem:[%s4209_s13 + $0xa8] sm:$0xff]  ;;  %v271_v23 = vld [vmem:[%s4209_s13 + $0x30] sm:$0xff] }
  0x16   : > { %v4221_v32 = vpack.c.b16 %v376_v26, %v375_v25  ;;  %v378_v38 = vunpack.c.l.b16 %v314_v28  ;;  %v315_v56 = vpack.c.bf16 %v283_v53, %v283_v53  ;;  %v316_v59 = vpack.c.bf16 %v284_v54, %v284_v54  ;;  %v272_v24 = vld [vmem:[%s4209_s13 + $0x38] sm:$0xff] }
  0x17   : > { %v4223_v33 = vpack.c.b16 %v362_v30, %v361_v27  ;;  %v364_v47 = vunpack.c.l.b16 %v300_v39  ;;  %v301_v3 = vpack.c.bf16 %v269_v60, %v269_v60  ;;  %v302_v5 = vpack.c.bf16 %v270_v61, %v270_v61  ;;  %v273_v60 = vld [vmem:[%s4209_s13 + $0x40] sm:$0xff]  ;;  %v274_v61 = vld [vmem:[%s4209_s13 + $0x48] sm:$0xff] }
  0x18   : > { %6400 = vst [vmem:[#allocation3_spill] sm:$0xff] %v4221_v32  ;;  %3807 = vmatmul.msk.bf16.vlgmr.msra.gmra.mxu2 %vm639_vm4, %v4221_v32  ;;  %v6313_v36 = vshrl.u32 %v4221_v32, 16  ;;  %v6314_v37 = vshll.u32 %v4221_v32, 16  ;;  %v4237_v45 = vpack.c.b16 %v378_v38, %v377_v34  ;;  %v379_v0 = vunpack.c.l.b16 %v315_v56 }
  0x19   : > { %v417_v40 = vshrl.u32 %v4223_v33, 16  ;;  %v420_v41 = vshll.u32 %v4223_v33, 16  ;;  %v4254_v52 = vpack.c.b16 %v364_v47, %v363_v46  ;;  %v380_v2 = vunpack.c.l.b16 %v316_v59  ;;  %v287_v47 = vld [vmem:[%s4209_s13 + $0xb0] sm:$0xff] }
  0x1a   : > { %v468_v42 = vrot.slane %v6313_v36, 7  ;;  %6401 = vst [vmem:[#allocation4_spill] sm:$0xff] %v4237_v45  ;;  %v6311_v51 = vshrl.u32 %v4237_v45, 16  ;;  %v6312_v58 = vshll.u32 %v4237_v45, 16  ;;  %v365_v10 = vunpack.c.l.b16 %v301_v3 }
  0x1b   : > { %v419_v43 = vrot.slane %v417_v40, 7  ;;  %v424_v55 = vshrl.u32 %v4254_v52, 16  ;;  %v427_v63 = vshll.u32 %v4254_v52, 16  ;;  %v4279_v9 = vpack.c.b16 %v380_v2, %v379_v0 }
  0x1c   : > { %v471_v44 = vor.u32 %v6314_v37, %v468_v42  ;;  %v475_v57 = vrot.slane %v6311_v51, 7  ;;  %v366_v12 = vunpack.c.l.b16 %v302_v5  ;;  %v317_v19 = vpack.c.bf16 %v285_v16, %v285_v16 }
  0x1d   : > { %v422_v48 = vor.u32 %v420_v41, %v419_v43  ;;  %v426_v62 = vrot.slane %v424_v55, 7  ;;  %6404 = vst [vmem:[#allocation7_spill] sm:$0xff] %v4279_v9  ;;  %v6309_v14 = vshrl.u32 %v4279_v9, 16  ;;  %v318_v20 = vpack.c.bf16 %v286_v17, %v286_v17 }
  0x1e   : > { %v4243_v49 = vsel %vm4188_vm3, 0, %v471_v44  ;;  %v478_v1 = vor.u32 %v6312_v58, %v475_v57  ;;  %v4290_v15 = vpack.c.b16 %v366_v12, %v365_v10  ;;  %v6310_v22 = vshll.u32 %v4279_v9, 16 }
  0x1f   : > { %6402 = vst [vmem:[#allocation5_spill] sm:$0xff] %v4243_v49  ;;  %3823 = vmatmul.msk.bf16.vlgmr.msra.gmra.mxu3 %vm639_vm4, %v4243_v49  ;;  %v4249_v50 = vsel %vm4188_vm3, 0, %v422_v48  ;;  %v429_v6 = vor.u32 %v427_v63, %v426_v62  ;;  %v482_v21 = vrot.slane %v6309_v14, 7  ;;  %v381_v27 = vunpack.c.l.b16 %v317_v19  ;;  %v288_v48 = vld [vmem:[%s4209_s13 + $0xb8] sm:$0xff] }
  0x20   : > { %3800 = vmatmul.msk.bf16.gmra.mxu0 %vm639_vm4, %v4223_v33  ;;  %v4277_v7 = vsel %vm4188_vm3, 0, %v478_v1  ;;  %v431_v18 = vshrl.u32 %v4290_v15, 16  ;;  %v434_v26 = vshll.u32 %v4290_v15, 16  ;;  %v382_v28 = vunpack.c.l.b16 %v318_v20 }
  0x21   : > { %3816 = vmatmul.msk.bf16.gmra.mxu1 %vm639_vm4, %v4249_v50  ;;  %6403 = vst [vmem:[#allocation6_spill] sm:$0xff] %v4277_v7  ;;  %v4283_v13 = vsel %vm4188_vm3, 0, %v429_v6  ;;  %v485_v29 = vor.u32 %v6310_v22, %v482_v21  ;;  %v303_v30 = vpack.c.bf16 %v271_v23, %v271_v23  ;;  %v304_v31 = vpack.c.bf16 %v272_v24, %v272_v24  ;;  %v289_v24 = vld [vmem:[%s4209_s13 + $0xc0] sm:$0xff] }
  0x22   : > { %v433_v25 = vrot.slane %v431_v18, 7  ;;  %v4311_v35 = vpack.c.b16 %v382_v28, %v381_v27  ;;  %v319_v57 = vpack.c.bf16 %v287_v47, %v287_v47  ;;  %v320_v59 = vpack.c.bf16 %v288_v48, %v288_v48 }
  0x23   : > { %v4315_v38 = vsel %vm4188_vm3, 0, %v485_v29  ;;  %v367_v39 = vunpack.c.l.b16 %v303_v30  ;;  %v368_v42 = vunpack.c.l.b16 %v304_v31  ;;  %v305_v5 = vpack.c.bf16 %v273_v60, %v273_v60 }
  0x24   : > { %v436_v34 = vor.u32 %v434_v26, %v433_v25  ;;  %6405 = vst [vmem:[#allocation8_spill] sm:$0xff] %v4311_v35  ;;  %v6307_v44 = vshrl.u32 %v4311_v35, 16  ;;  %v6308_v56 = vshll.u32 %v4311_v35, 16  ;;  %v383_v2 = vunpack.c.l.b16 %v319_v57  ;;  %v290_v25 = vld [vmem:[%s4209_s13 + $0xc8] sm:$0xff] }
  0x25   : > { %v4326_v46 = vpack.c.b16 %v368_v42, %v367_v39  ;;  %v384_v3 = vunpack.c.l.b16 %v320_v59  ;;  %v306_v6 = vpack.c.bf16 %v274_v61, %v274_v61  ;;  %v369_v17 = vunpack.c.l.b16 %v305_v5  ;;  %v276_v39 = vld [vmem:[%s4209_s13 + $0x58] sm:$0xff] }
  0x26   : > { %v4319_v43 = vsel %vm4188_vm3, 0, %v436_v34  ;;  %v489_v54 = vrot.slane %v6307_v44, 7  ;;  %v321_v28 = vpack.c.bf16 %v289_v24, %v289_v24  ;;  %v322_v29 = vpack.c.bf16 %v290_v25, %v290_v25  ;;  %v275_v34 = vld [vmem:[%s4209_s13 + $0x50] sm:$0xff] }
  0x27   : > { %6406 = vst [vmem:[#allocation9_spill] sm:$0xff] %v4326_v46  ;;  %v438_v53 = vshrl.u32 %v4326_v46, 16  ;;  %v441_v0 = vshll.u32 %v4326_v46, 16  ;;  %v4351_v16 = vpack.c.b16 %v384_v3, %v383_v2  ;;  %v370_v19 = vunpack.c.l.b16 %v306_v6 }
  0x28   : > { %3808 = vmatmul.msk.bf16.gmra.mxu2 %vm639_vm4, %v4237_v45  ;;  %v492_v1 = vor.u32 %v6308_v56, %v489_v54  ;;  %v385_v48 = vunpack.c.l.b16 %v321_v28  ;;  %v386_v54 = vunpack.c.l.b16 %v322_v29  ;;  %v307_v59 = vpack.c.bf16 %v275_v34, %v275_v34  ;;  %v277_v34 = vld [vmem:[%s4209_s13 + $0x60] sm:$0xff] }
  0x29   : > { %v440_v62 = vrot.slane %v438_v53, 7  ;;  %6407 = vst [vmem:[#allocation10_spill] sm:$0xff] %v4351_v16  ;;  %v6300_v21 = vshrl.u32 %v4351_v16, 16  ;;  %v4362_v23 = vpack.c.b16 %v370_v19, %v369_v17  ;;  %v6301_v31 = vshll.u32 %v4351_v16, 16  ;;  %v291_v17 = vld [vmem:[%s4209_s13 + $0xd0] sm:$0xff]  ;;  %v292_v19 = vld [vmem:[%s4209_s13 + $0xd8] sm:$0xff] }
  0x2a   : > { %v4349_v12 = vsel %vm4188_vm3, 0, %v492_v1  ;;  %v308_v60 = vpack.c.bf16 %v276_v39, %v276_v39  ;;  %v371_v2 = vunpack.c.l.b16 %v307_v59  ;;  %v323_v29 = vpack.c.bf16 %v291_v17, %v291_v17  ;;  %v278_v39 = vld [vmem:[%s4209_s13 + $0x68] sm:$0xff] }
  0x2b   : > { %v443_v10 = vor.u32 %v441_v0, %v440_v62  ;;  %6408 = vst [vmem:[#allocation11_spill] sm:$0xff] %v4362_v23  ;;  %v445_v27 = vshrl.u32 %v4362_v23, 16  ;;  %v496_v30 = vrot.slane %v6300_v21, 7  ;;  %v448_v47 = vshll.u32 %v4362_v23, 16  ;;  %v3899_v21 = vld [vmem:[%s6291_s1 + $0xc] sm:$0x3] }
  0x2c   : > { %v4383_v62 = vpack.c.b16 %v386_v54, %v385_v48  ;;  %v372_v3 = vunpack.c.l.b16 %v308_v60  ;;  %v309_v60 = vpack.c.bf16 %v277_v34, %v277_v34  ;;  %v293_v34 = vld [vmem:[%s4209_s13 + $0xe0] sm:$0xff] }
  0x2d   : > { %v4355_v20 = vsel %vm4188_vm3, 0, %v443_v10  ;;  %v447_v42 = vrot.slane %v445_v27, 7  ;;  %v499_v57 = vor.u32 %v6301_v31, %v496_v30  ;;  %v324_v30 = vpack.c.bf16 %v292_v19, %v292_v19 }
  0x2e   : > { %6409 = vst [vmem:[#allocation12_spill] sm:$0xff] %v4383_v62  ;;  %v6297_v6 = vshrl.u32 %v4383_v62, 16  ;;  %v4398_v10 = vpack.c.b16 %v372_v3, %v371_v2  ;;  %v6298_v28 = vshll.u32 %v4383_v62, 16  ;;  %v373_v19 = vunpack.c.l.b16 %v309_v60 }
  0x2f   : > { %3824 = vmatmul.msk.bf16.gmra.mxu3 %vm639_vm4, %v4277_v7  ;;  %v450_v61 = vor.u32 %v448_v47, %v447_v42  ;;  %v4387_v1 = vsel %vm4188_vm3, 0, %v499_v57  ;;  %v387_v57 = vunpack.c.l.b16 %v323_v29  ;;  %v388_v59 = vunpack.c.l.b16 %v324_v30 }
  0x30   : > { %3801 = vmatmul.msk.bf16.gmra.mxu0 %vm639_vm4, %v4254_v52  ;;  %6411 = vst [vmem:[#allocation14_spill] sm:$0xff] %v4398_v10  ;;  %v452_v24 = vshrl.u32 %v4398_v10, 16  ;;  %v503_v25 = vrot.slane %v6297_v6, 7  ;;  %v455_v48 = vshll.u32 %v4398_v10, 16 }
  0x31   : > { %3817 = vmatmul.msk.bf16.gmra.mxu1 %vm639_vm4, %v4283_v13  ;;  %v4391_v5 = vsel %vm4188_vm3, 0, %v450_v61  ;;  %v310_v61 = vpack.c.bf16 %v278_v39, %v278_v39  ;;  %v4423_v17 = vpack.c.b16 %v388_v59, %v387_v57  ;;  %v294_v39 = vld [vmem:[%s4209_s13 + $0xe8] sm:$0xff]  ;;  %v325_v59 = vpack.c.bf16 %v293_v34, %v293_v34 }
  0x32   : > { %6410 = vst [vmem:[#allocation13_spill] sm:$0xff] %v4391_v5  ;;  %v454_v42 = vrot.slane %v452_v24, 7  ;;  %v506_v54 = vor.u32 %v6298_v28, %v503_v25  ;;  %v326_v60 = vpack.c.bf16 %v294_v39, %v294_v39 }
  0x33   : > { %6412 = vst [vmem:[#allocation15_spill] sm:$0xff] %v4423_v17  ;;  %v374_v25 = vunpack.c.l.b16 %v310_v61  ;;  %v6299_v29 = vshrl.u32 %v4423_v17, 16  ;;  %v6304_v57 = vshll.u32 %v4423_v17, 16 }
  0x34   : > { %v457_v2 = vor.u32 %v455_v48, %v454_v42  ;;  %v4421_v3 = vsel %vm4188_vm3, 0, %v506_v54  ;;  %v390_v28 = vunpack.c.l.b16 %v326_v60 }
  0x35   : > { %v4434_v30 = vpack.c.b16 %v374_v25, %v373_v19  ;;  %v510_v54 = vrot.slane %v6299_v29, 7  ;;  %v389_v25 = vunpack.c.l.b16 %v325_v59  ;;  %v3916_v59 = vld [vmem:[%s6291_s1 + $0xe] sm:$0x3] }
  0x36   : > { %v4427_v6 = vsel %vm4188_vm3, 0, %v457_v2  ;;  %v1594_v60 = vsel %vm672_vm0, %v3916_v59, 0  ;;  %v567_v59 = vrot.slane %v420_v41, 1 }
  0x37   : > { %6413 = vst [vmem:[#allocation16_spill] sm:$0xff] %v4427_v6  ;;  %v6315_v42 = vshrl.u32 %v4434_v30, 16  ;;  %v6316_v2 = vshll.u32 %v4434_v30, 16  ;;  %v513_v19 = vor.u32 %v6304_v57, %v510_v54  ;;  %v4457_v39 = vpack.c.b16 %v390_v28, %v389_v25  ;;  %1603 = vmatpush.bf16.msra.mxu3 %v1594_v60  ;;  %v3932_v25 = vld [vmem:[%s6291_s1 + $0x10] sm:$0x3] }
  0x38   : > { %3809 = vmatmul.msk.bf16.gmra.mxu2 %vm639_vm4, %v4279_v9  ;;  %6414 = vst [vmem:[#allocation17_spill] sm:$0xff] %v4434_v30  ;;  %v1468_v54 = vsel %vm672_vm0, %v3899_v21, 0 }
  0x39   : > { %v461_v61 = vrot.slane %v6315_v42, 7  ;;  %v4455_v34 = vsel %vm4188_vm3, 0, %v513_v19  ;;  %1477 = vmatpush.bf16.msra.mxu2 %v1468_v54  ;;  %v6302_v28 = vshrl.u32 %v4457_v39, 16  ;;  %v1720_v54 = vsel %vm672_vm0, %v3932_v25, 0 }
  0x3a   : > { %1729 = vmatpush.bf16.msra.mxu0 %v1720_v54 }
  0x3b   : > { %v464_v29 = vor.u32 %v6316_v2, %v461_v61  ;;  %v517_v21 = vrot.slane %v6302_v28, 7  ;;  %v3882_v61 = vld [vmem:[%s6291_s1 + $0xa] sm:$0x3]  ;;  %v6416_v28 = vmov 0 }
  0x3c   : > { %v1342_v19 = vsel %vm672_vm0, %v3882_v61, 0  ;;  %v568_v61 = vor.u32 %v567_v59, %v417_v40  ;;  %v6417_v28 = vsel %vm4501_vm7, 4294967295, %v6416_v28  ;;  %v565_v40 = vrot.slane %v6305_v4, 1 }
  0x3d   : > { %v4464_v31 = vsel %vm4188_vm3, 0, %v464_v29  ;;  %v6303_v29 = vshll.u32 %v4457_v39, 16  ;;  %1351 = vmatpush.bf16.msrb.mxu1 %v1342_v19  ;;  %6418 = vst [vmem:[#allocation19_spill] sm:$0xff] %v6417_v28 }
  0x3e   : > { %6415 = vst [vmem:[#allocation18_spill] sm:$0xff] %v4464_v31  ;;  %v620_v54 = vsel %vm4501_vm7, %v568_v61, 0  ;;  %v569_v61 = vrot.slane %v427_v63, 1 }
  0x3f   : > { %3825 = vmatmul.msk.bf16.gmra.mxu3 %vm639_vm4, %v4315_v38  ;;  %v520_v60 = vor.u32 %v6303_v29, %v517_v21 }
  0x40   : > { %3802 = vmatmul.msk.bf16.gmra.mxu0 %vm639_vm4, %v4290_v15 }
  0x41   : > { %3818 = vmatmul.msk.bf16.gmra.mxu1 %vm639_vm4, %v4319_v43  ;;  %v4499_v19 = vsel %vm4188_vm3, 0, %v520_v60  ;;  %v4517_v60 = vsel %vm4501_vm7, %v565_v40, 0 }
  0x42   : > { %6419 = vst [vmem:[#allocation20_spill] sm:$0xff] %v4517_v60 }
  0x48   : > { %3810 = vmatmul.msk.bf16.gmra.mxu2 %vm639_vm4, %v4311_v35 }
  0x4f   : > { %3826 = vmatmul.msk.bf16.gmra.mxu3 %vm639_vm4, %v4349_v12 }
  0x50   : > { %3803 = vmatmul.msk.bf16.gmra.mxu0 %vm639_vm4, %v4326_v46 }
  0x51   : > { %3819 = vmatmul.msk.bf16.gmra.mxu1 %vm639_vm4, %v4355_v20 }
  0x58   : > { %3811 = vmatmul.msk.bf16.gmra.mxu2 %vm639_vm4, %v4351_v16 }
  0x5f   : > { %3827 = vmatmul.msk.bf16.gmra.mxu3 %vm639_vm4, %v4387_v1 }
  0x60   : > { %3804 = vmatmul.msk.bf16.gmra.mxu0 %vm639_vm4, %v4362_v23 }
  0x61   : > { %3820 = vmatmul.msk.bf16.gmra.mxu1 %vm639_vm4, %v4391_v5 }
  0x68   : > { %3812 = vmatmul.msk.bf16.gmra.mxu2 %vm639_vm4, %v4383_v62 }
  0x6f   : > { %3828 = vmatmul.msk.bf16.gmra.mxu3 %vm639_vm4, %v4421_v3 }
  0x70   : > { %3805 = vmatmul.msk.bf16.gmra.mxu0 %vm639_vm4, %v4398_v10 }
  0x71   : > { %3821 = vmatmul.msk.bf16.gmra.mxu1 %vm639_vm4, %v4427_v6 }
  0x78   : > { %3813 = vmatmul.msk.bf16.gmra.mxu2 %vm639_vm4, %v4423_v17 }
  0x7f   : > { %3829 = vmatmul.msk.bf16.gmra.mxu3 %vm639_vm4, %v4455_v34 }
  0x80   : > { %3806 = vmatmul.msk.bf16.gmra.mxu0 %vm639_vm4, %v4434_v30 }
  0x81   : > { %3822 = vmatmul.msk.bf16.gmra.mxu1 %vm639_vm4, %v4464_v31 }
  0x88   : > { %3814 = vmatmul.msk.bf16.gmra.mxu2 %vm639_vm4, %v4457_v39 }
  0x8d   : > { %v685_v25 = vpop.f32.mrf.mxu0 }
  0x8e   : > { %v825_v41 = vpop.f32.mrf.mxu1 }
  0x8f   : > { %3830 = vmatmul.msk.bf16.gmra.mxu3 %vm639_vm4, %v4499_v19  ;;  %v4509_v21 = vadd.f32 %v825_v41, %v685_v25 }
  0x90   : > { %3866 = vmatmul.msk.bf16.vlgmr.msrb.gmra.mxu0 %vm639_vm4, %v4223_v33  ;;  %v570_v33 = vor.u32 %v569_v61, %v424_v55 }
  0x91   : > { %3883 = vmatmul.msk.bf16.vlgmr.msrb.gmra.mxu1 %vm639_vm4, %v620_v54 }
  0x92   : > { %v4529_v44 = vsel %vm4501_vm7, %v570_v33, 0  ;;  %v571_v33 = vrot.slane %v434_v26, 1 }
  0x95   : > { %v687_v59 = vpop.f32.mrf.mxu0 }
  0x96   : > { %v827_v29 = vpop.f32.mrf.mxu1 }
  0x97   : > { %v4521_v57 = vadd.f32 %v827_v29, %v687_v59 }
  0x98   : > { %3832 = vmatmul.msk.bf16.vlgmr.msrb.gmra.mxu2 %vm639_vm4, %v4517_v60 }
  0x9b   : > { %v725_v25 = vpop.f32.mrf.mxu2 }
  0x9d   : > { %v690_v41 = vpop.f32.mrf.mxu0 }
  0x9e   : > { %v830_v4 = vpop.f32.mrf.mxu1 }
  0x9f   : > { %3849 = vmatmul.msk.bf16.vlgmr.msrb.gmra.mxu3 %vm639_vm4, %v4249_v50  ;;  %v4533_v40 = vadd.f32 %v830_v4, %v690_v41  ;;  %v572_v50 = vor.u32 %v571_v33, %v431_v18  ;;  %v573_v33 = vrot.slane %v441_v0, 1 }
  0xa0   : > { %3867 = vmatmul.msk.bf16.gmra.mxu0 %vm639_vm4, %v4254_v52 }
  0xa1   : > { %3884 = vmatmul.msk.bf16.gmra.mxu1 %vm639_vm4, %v4529_v44 }
  0xa2   : > { %v865_v63 = vpop.f32.mrf.mxu3 }
  0xa3   : > { %v4539_v55 = vadd.f32 %v865_v63, %v725_v25  ;;  %v727_v29 = vpop.f32.mrf.mxu2  ;;  %v4552_v63 = vsel %vm4501_vm7, %v572_v50, 0  ;;  %v574_v50 = vor.u32 %v573_v33, %v438_v53 }
  0xa5   : > { %v692_v59 = vpop.f32.mrf.mxu0  ;;  %v4576_v58 = vsel %vm4501_vm7, %v574_v50, 0 }
  0xa6   : > { %v832_v61 = vpop.f32.mrf.mxu1 }
  0xa7   : > { %v4543_v56 = vadd.f32 %v832_v61, %v692_v59 }
  0xa8   : > { %3833 = vmatmul.msk.bf16.gmra.mxu2 %vm639_vm4, %v620_v54 }
  0xaa   : > { %v867_v4 = vpop.f32.mrf.mxu3 }
  0xab   : > { %v4548_v41 = vadd.f32 %v867_v4, %v727_v29  ;;  %v730_v14 = vpop.f32.mrf.mxu2 }
  0xad   : > { %v695_v22 = vpop.f32.mrf.mxu0 }
  0xae   : > { %v835_v25 = vpop.f32.mrf.mxu1 }
  0xaf   : > { %3850 = vmatmul.msk.bf16.gmra.mxu3 %vm639_vm4, %v4283_v13  ;;  %v4556_v26 = vadd.f32 %v835_v25, %v695_v22 }
  0xb0   : > { %3868 = vmatmul.msk.bf16.gmra.mxu0 %vm639_vm4, %v4290_v15 }
  0xb1   : > { %3885 = vmatmul.msk.bf16.gmra.mxu1 %vm639_vm4, %v4552_v63 }
  0xb2   : > { %v870_v18 = vpop.f32.mrf.mxu3 }
  0xb3   : > { %v4562_v54 = vadd.f32 %v870_v18, %v730_v14  ;;  %v732_v29 = vpop.f32.mrf.mxu2 }
  0xb5   : > { %v697_v59 = vpop.f32.mrf.mxu0 }
  0xb6   : > { %v837_v61 = vpop.f32.mrf.mxu1 }
  0xb7   : > { %v4566_v4 = vadd.f32 %v837_v61, %v697_v59 }
  0xb8   : > { %3834 = vmatmul.msk.bf16.gmra.mxu2 %vm639_vm4, %v4529_v44 }
  0xba   : > { %v872_v22 = vpop.f32.mrf.mxu3 }
  0xbb   : > { %v4572_v25 = vadd.f32 %v872_v22, %v732_v29  ;;  %v735_v51 = vpop.f32.mrf.mxu2  ;;  %v575_v22 = vrot.slane %v448_v47, 1 }
  0xbd   : > { %v700_v14 = vpop.f32.mrf.mxu0 }
  0xbe   : > { %v840_v18 = vpop.f32.mrf.mxu1 }
  0xbf   : > { %3851 = vmatmul.msk.bf16.gmra.mxu3 %vm639_vm4, %v4319_v43  ;;  %v4580_v0 = vadd.f32 %v840_v18, %v700_v14  ;;  %v576_v18 = vor.u32 %v575_v22, %v445_v27 }
  0xc0   : > { %3869 = vmatmul.msk.bf16.gmra.mxu0 %vm639_vm4, %v4326_v46 }
  0xc1   : > { %3886 = vmatmul.msk.bf16.gmra.mxu1 %vm639_vm4, %v4576_v58  ;;  %v4600_v42 = vsel %vm4501_vm7, %v576_v18, 0 }
  0xc2   : > { %v875_v53 = vpop.f32.mrf.mxu3  ;;  %6421 = vst [vmem:[#allocation22_spill] sm:$0xff] %v4600_v42 }
  0xc3   : > { %v4586_v29 = vadd.f32 %v875_v53, %v735_v51  ;;  %v737_v59 = vpop.f32.mrf.mxu2 }
  0xc5   : > { %v702_v61 = vpop.f32.mrf.mxu0 }
  0xc6   : > { %v842_v33 = vpop.f32.mrf.mxu1 }
  0xc7   : > { %v4590_v50 = vadd.f32 %v842_v33, %v702_v61 }
  0xc8   : > { %3835 = vmatmul.msk.bf16.gmra.mxu2 %vm639_vm4, %v4552_v63 }
  0xca   : > { %v877_v14 = vpop.f32.mrf.mxu3 }
  0xcb   : > { %v4596_v36 = vadd.f32 %v877_v14, %v737_v59  ;;  %v740_v37 = vpop.f32.mrf.mxu2  ;;  %v577_v14 = vrot.slane %v455_v48, 1 }
  0xcd   : > { %6420 = vst [vmem:[#allocation21_spill] sm:$0xff] %v4596_v36  ;;  %v705_v51 = vpop.f32.mrf.mxu0 }
  0xce   : > { %v845_v53 = vpop.f32.mrf.mxu1 }
  0xcf   : > { %3852 = vmatmul.msk.bf16.gmra.mxu3 %vm639_vm4, %v4355_v20  ;;  %v4604_v47 = vadd.f32 %v845_v53, %v705_v51  ;;  %v578_v53 = vor.u32 %v577_v14, %v452_v24 }
  0xd0   : > { %3870 = vmatmul.msk.bf16.gmra.mxu0 %vm639_vm4, %v4362_v23 }
  0xd1   : > { %3887 = vmatmul.msk.bf16.gmra.mxu1 %vm639_vm4, %v4600_v42  ;;  %v4624_v60 = vsel %vm4501_vm7, %v578_v53, 0 }
  0xd2   : > { %v880_v27 = vpop.f32.mrf.mxu3  ;;  %6424 = vst [vmem:[#allocation25_spill] sm:$0xff] %v4624_v60 }
  0xd3   : > { %v4610_v59 = vadd.f32 %v880_v27, %v740_v37  ;;  %v742_v61 = vpop.f32.mrf.mxu2 }
  0xd5   : > { %6422 = vst [vmem:[#allocation23_spill] sm:$0xff] %v4610_v59  ;;  %v707_v33 = vpop.f32.mrf.mxu0 }
  0xd6   : > { %v847_v22 = vpop.f32.mrf.mxu1 }
  0xd7   : > { %v4614_v18 = vadd.f32 %v847_v22, %v707_v33 }
  0xd8   : > { %3836 = vmatmul.msk.bf16.gmra.mxu2 %vm639_vm4, %v4576_v58 }
  0xda   : > { %v882_v51 = vpop.f32.mrf.mxu3 }
  0xdb   : > { %v4620_v2 = vadd.f32 %v882_v51, %v742_v61  ;;  %v745_v11 = vpop.f32.mrf.mxu2  ;;  %v6426_v51 = vshll.u32 %v4434_v30, 16 }
  0xdd   : > { %6423 = vst [vmem:[#allocation24_spill] sm:$0xff] %v4620_v2  ;;  %v710_v37 = vpop.f32.mrf.mxu0  ;;  %v579_v53 = vrot.slane %v6426_v51, 1 }
  0xde   : > { %v850_v27 = vpop.f32.mrf.mxu1 }
  0xdf   : > { %3853 = vmatmul.msk.bf16.gmra.mxu3 %vm639_vm4, %v4391_v5  ;;  %v4628_v48 = vadd.f32 %v850_v27, %v710_v37  ;;  %v6427_v27 = vshrl.u32 %v4434_v30, 16 }
  0xe0   : > { %3871 = vmatmul.msk.bf16.gmra.mxu0 %vm639_vm4, %v4398_v10 }
  0xe1   : > { %3888 = vmatmul.msk.bf16.gmra.mxu1 %vm639_vm4, %v4624_v60  ;;  %v580_v10 = vor.u32 %v579_v53, %v6427_v27 }
  0xe2   : > { %v885_v24 = vpop.f32.mrf.mxu3 }
  0xe3   : > { %v4634_v61 = vadd.f32 %v885_v24, %v745_v11  ;;  %v747_v33 = vpop.f32.mrf.mxu2 }
  0xe5   : > { %6425 = vst [vmem:[#allocation26_spill] sm:$0xff] %v4634_v61  ;;  %v712_v22 = vpop.f32.mrf.mxu0  ;;  %v4648_v61 = vsel %vm4501_vm7, %v580_v10, 0  ;;  %v6431_v10 = vshll.u32 %v4221_v32, 16 }
  0xe6   : > { %v852_v14 = vpop.f32.mrf.mxu1  ;;  %6429 = vst [vmem:[#allocation28_spill] sm:$0xff] %v4648_v61 }
  0xe7   : > { %v4638_v2 = vadd.f32 %v852_v14, %v712_v22  ;;  %v581_v27 = vrot.slane %v6431_v10, 1 }
  0xe8   : > { %3837 = vmatmul.msk.bf16.gmra.mxu2 %vm639_vm4, %v4600_v42 }
  0xea   : > { %v887_v37 = vpop.f32.mrf.mxu3 }
  0xeb   : > { %v4644_v23 = vadd.f32 %v887_v37, %v747_v33  ;;  %v750_v59 = vpop.f32.mrf.mxu2 }
  0xed   : > { %6428 = vst [vmem:[#allocation27_spill] sm:$0xff] %v4644_v23  ;;  %v715_v11 = vpop.f32.mrf.mxu0 }
  0xee   : > { %v855_v24 = vpop.f32.mrf.mxu1 }
  0xef   : > { %3854 = vmatmul.msk.bf16.gmra.mxu3 %vm639_vm4, %v4427_v6  ;;  %v4652_v22 = vadd.f32 %v855_v24, %v715_v11  ;;  %v6432_v24 = vshrl.u32 %v4221_v32, 16 }
  0xf0   : > { %3872 = vmatmul.msk.bf16.gmra.mxu0 %vm639_vm4, %v4434_v30 }
  0xf1   : > { %3889 = vmatmul.msk.bf16.gmra.mxu1 %vm639_vm4, %v4648_v61  ;;  %v582_v30 = vor.u32 %v581_v27, %v6432_v24 }
  0xf2   : > { %v890_v33 = vpop.f32.mrf.mxu3 }
  0xf3   : > { %v4658_v14 = vadd.f32 %v890_v33, %v750_v59  ;;  %v752_v51 = vpop.f32.mrf.mxu2 }
  0xf5   : > { %6430 = vst [vmem:[#allocation29_spill] sm:$0xff] %v4658_v14  ;;  %v717_v53 = vpop.f32.mrf.mxu0  ;;  %v4672_v14 = vsel %vm4501_vm7, %v582_v30, 0  ;;  %v6436_v30 = vshll.u32 %v4237_v45, 16 }
  0xf6   : > { %v857_v37 = vpop.f32.mrf.mxu1  ;;  %6434 = vst [vmem:[#allocation31_spill] sm:$0xff] %v4672_v14 }
  0xf7   : > { %v4662_v23 = vadd.f32 %v857_v37, %v717_v53  ;;  %v583_v24 = vrot.slane %v6436_v30, 1 }
  0xf8   : > { %3838 = vmatmul.msk.bf16.gmra.mxu2 %vm639_vm4, %v4624_v60 }
  0xfa   : > { %v892_v11 = vpop.f32.mrf.mxu3 }
  0xfb   : > { %v4668_v6 = vadd.f32 %v892_v11, %v752_v51  ;;  %v755_v5 = vpop.f32.mrf.mxu2 }
  0xfd   : > { %6433 = vst [vmem:[#allocation30_spill] sm:$0xff] %v4668_v6  ;;  %v720_v59 = vpop.f32.mrf.mxu0 }
  0xfe   : > { %v860_v33 = vpop.f32.mrf.mxu1 }
  0xff   : > { %3855 = vmatmul.msk.bf16.gmra.mxu3 %vm639_vm4, %v4464_v31  ;;  %v4676_v53 = vadd.f32 %v860_v33, %v720_v59  ;;  %v6437_v33 = vshrl.u32 %v4237_v45, 16 }
 0x100   : > { %3873 = vmatmul.msk.bf16.gmra.mxu0 %vm639_vm4, %v4221_v32 }
 0x101   : > { %3890 = vmatmul.msk.bf16.gmra.mxu1 %vm639_vm4, %v4672_v14  ;;  %v584_v32 = vor.u32 %v583_v24, %v6437_v33 }
 0x102   : > { %v895_v51 = vpop.f32.mrf.mxu3 }
 0x103   : > { %v4682_v37 = vadd.f32 %v895_v51, %v755_v5  ;;  %v757_v10 = vpop.f32.mrf.mxu2  ;;  %v3949_v5 = vld [vmem:[%s6292_s2 + $0x2] sm:$0x3] }
 0x105   : > { %6435 = vst [vmem:[#allocation32_spill] sm:$0xff] %v4682_v37  ;;  %v722_v27 = vpop.f32.mrf.mxu0  ;;  %v2301_v37 = vsel %vm672_vm0, %v3949_v5, 0  ;;  %v6440_v5 = vshll.u32 %v4279_v9, 16 }
 0x106   : > { %v862_v11 = vpop.f32.mrf.mxu1  ;;  %2310 = vmatpush.bf16.msra.mxu1 %v2301_v37 }
 0x107   : > { %v4686_v6 = vadd.f32 %v862_v11, %v722_v27  ;;  %v4700_v27 = vsel %vm4501_vm7, %v584_v32, 0  ;;  %v585_v32 = vrot.slane %v6440_v5, 1 }
 0x108   : > { %3839 = vmatmul.msk.bf16.gmra.mxu2 %vm639_vm4, %v4648_v61 }
 0x10a   : > { %v897_v59 = vpop.f32.mrf.mxu3 }
 0x10b   : > { %v4692_v31 = vadd.f32 %v897_v59, %v757_v10  ;;  %v760_v60 = vpop.f32.mrf.mxu2 }
 0x10d   : > { %6438 = vst [vmem:[#allocation33_spill] sm:$0xff] %v4692_v31  ;;  %v1224_v51 = vpop.f32.mrf.mxu0  ;;  %v6441_v31 = vshrl.u32 %v4279_v9, 16 }
 0x10e   : > { %v1353_v30 = vpop.f32.mrf.mxu1 }
 0x10f   : > { %3856 = vmatmul.msk.bf16.gmra.mxu3 %vm639_vm4, %v4243_v49  ;;  %v586_v49 = vor.u32 %v585_v32, %v6441_v31 }
 0x110   : > { %3874 = vmatmul.msk.bf16.gmra.mxu0 %vm639_vm4, %v4237_v45 }
 0x111   : > { %3891 = vmatmul.msk.bf16.gmra.mxu1 %vm639_vm4, %v4700_v27 }
 0x112   : > { %v900_v10 = vpop.f32.mrf.mxu3 }
 0x113   : > { %v4708_v11 = vadd.f32 %v900_v10, %v760_v60  ;;  %v762_v24 = vpop.f32.mrf.mxu2 }
 0x115   : > { %6439 = vst [vmem:[#allocation34_spill] sm:$0xff] %v4708_v11  ;;  %v1226_v59 = vpop.f32.mrf.mxu0  ;;  %v4721_v11 = vsel %vm4501_vm7, %v586_v49, 0  ;;  %v6443_v49 = vshll.u32 %v4311_v35, 16 }
 0x116   : > { %v1355_v33 = vpop.f32.mrf.mxu1 }
 0x118   : > { %3840 = vmatmul.msk.bf16.gmra.mxu2 %vm639_vm4, %v4672_v14 }
 0x11a   : > { %v902_v37 = vpop.f32.mrf.mxu3 }
 0x11b   : > { %v4716_v45 = vadd.f32 %v902_v37, %v762_v24  ;;  %v967_v61 = vpop.f32.mrf.mxu2 }
 0x11c   : > { %v1047_v36 = vadd.f32 %v967_v61, %v4509_v21 }
 0x11d   : > { %6442 = vst [vmem:[#allocation35_spill] sm:$0xff] %v4716_v45  ;;  %v1229_v60 = vpop.f32.mrf.mxu0  ;;  %v587_v45 = vrot.slane %v6443_v49, 1 }
 0x11e   : > { %v1358_v10 = vpop.f32.mrf.mxu1 }
 0x11f   : > { %3857 = vmatmul.msk.bf16.gmra.mxu3 %vm639_vm4, %v4277_v7  ;;  %v6444_v7 = vshrl.u32 %v4311_v35, 16 }
 0x120   : > { %3875 = vmatmul.msk.bf16.gmra.mxu0 %vm639_vm4, %v4279_v9 }
 0x121   : > { %3892 = vmatmul.msk.bf16.gmra.mxu1 %vm639_vm4, %v4721_v11  ;;  %v588_v42 = vor.u32 %v587_v45, %v6444_v7 }
 0x122   : > { %v1096_v31 = vpop.f32.mrf.mxu3 }
 0x123   : > { %v1176_v24 = vadd.f32 %v1096_v31, %v1047_v36  ;;  %v969_v5 = vpop.f32.mrf.mxu2 }
 0x124   : > { %v1048_v21 = vadd.f32 %v969_v5, %v4521_v57 }
 0x125   : > { %v1231_v61 = vpop.f32.mrf.mxu0  ;;  %v1304_v32 = vadd.f32 %v1224_v51, %v1176_v24  ;;  %v4741_v24 = vsel %vm4501_vm7, %v588_v42, 0 }
 0x126   : > { %v1360_v37 = vpop.f32.mrf.mxu1 }
 0x127   : > { %v4732_v14 = vadd.f32 %v1353_v30, %v1304_v32 }
 0x128   : > { %3841 = vmatmul.msk.bf16.gmra.mxu2 %vm639_vm4, %v4700_v27 }
 0x12a   : > { %v1098_v9 = vpop.f32.mrf.mxu3 }
 0x12b   : > { %v1177_v46 = vadd.f32 %v1098_v9, %v1048_v21  ;;  %v972_v36 = vpop.f32.mrf.mxu2 }
 0x12c   : > { %v1049_v31 = vadd.f32 %v972_v36, %v4533_v40  ;;  %v6446_v36 = vshrl.u32 %v4351_v16, 16 }
 0x12d   : > { %v1234_v57 = vpop.f32.mrf.mxu0  ;;  %v1305_v5 = vadd.f32 %v1226_v59, %v1177_v46 }
 0x12e   : > { %v1363_v51 = vpop.f32.mrf.mxu1 }
 0x12f   : > { %v4743_v30 = vadd.f32 %v1355_v33, %v1305_v5  ;;  %3858 = vmatmul.msk.bf16.gmra.mxu3 %vm639_vm4, %v4315_v38  ;;  %v6445_v33 = vshll.u32 %v4351_v16, 16 }
 0x130   : > { %3876 = vmatmul.msk.bf16.gmra.mxu0 %vm639_vm4, %v4311_v35 }
 0x131   : > { %3893 = vmatmul.msk.bf16.gmra.mxu1 %vm639_vm4, %v4741_v24  ;;  %v589_v21 = vrot.slane %v6445_v33, 1 }
 0x132   : > { %v1101_v45 = vpop.f32.mrf.mxu3 }
 0x133   : > { %v1178_v7 = vadd.f32 %v1101_v45, %v1049_v31  ;;  %v974_v9 = vpop.f32.mrf.mxu2  ;;  %v590_v5 = vor.u32 %v589_v21, %v6446_v36 }
 0x134   : > { %v1050_v46 = vadd.f32 %v974_v9, %v4543_v56 }
 0x135   : > { %v1236_v40 = vpop.f32.mrf.mxu0  ;;  %v1306_v59 = vadd.f32 %v1229_v60, %v1178_v7  ;;  %v4763_v7 = vsel %vm4501_vm7, %v590_v5, 0 }
 0x136   : > { %v1365_v42 = vpop.f32.mrf.mxu1 }
 0x137   : > { %v4754_v32 = vadd.f32 %v1358_v10, %v1306_v59 }
 0x138   : > { %3842 = vmatmul.msk.bf16.gmra.mxu2 %vm639_vm4, %v4721_v11 }
 0x13a   : > { %v1103_v49 = vpop.f32.mrf.mxu3 }
 0x13b   : > { %v1179_v35 = vadd.f32 %v1103_v49, %v1050_v46  ;;  %v977_v31 = vpop.f32.mrf.mxu2 }
 0x13c   : > { %v1051_v45 = vadd.f32 %v977_v31, %v4556_v26  ;;  %v6448_v31 = vshrl.u32 %v4383_v62, 16 }
 0x13d   : > { %v1239_v56 = vpop.f32.mrf.mxu0  ;;  %v1307_v9 = vadd.f32 %v1231_v61, %v1179_v35 }
 0x13e   : > { %v1368_v60 = vpop.f32.mrf.mxu1 }
 0x13f   : > { %v4765_v10 = vadd.f32 %v1360_v37, %v1307_v9  ;;  %3859 = vmatmul.msk.bf16.gmra.mxu3 %vm639_vm4, %v4349_v12  ;;  %v6447_v37 = vshll.u32 %v4383_v62, 16 }
 0x140   : > { %3877 = vmatmul.msk.bf16.gmra.mxu0 %vm639_vm4, %v4351_v16 }
 0x141   : > { %3894 = vmatmul.msk.bf16.gmra.mxu1 %vm639_vm4, %v4763_v7  ;;  %v591_v49 = vrot.slane %v6447_v37, 1 }
 0x142   : > { %v1106_v46 = vpop.f32.mrf.mxu3 }
 0x143   : > { %v1180_v26 = vadd.f32 %v1106_v46, %v1051_v45  ;;  %v979_v59 = vpop.f32.mrf.mxu2  ;;  %v592_v9 = vor.u32 %v591_v49, %v6448_v31 }
 0x144   : > { %v1052_v35 = vadd.f32 %v979_v59, %v4566_v4 }
 0x145   : > { %v1241_v61 = vpop.f32.mrf.mxu0  ;;  %v1308_v33 = vadd.f32 %v1234_v57, %v1180_v26  ;;  %v4785_v26 = vsel %vm4501_vm7, %v592_v9, 0 }
 0x146   : > { %v1370_v21 = vpop.f32.mrf.mxu1 }
 0x147   : > { %v4776_v36 = vadd.f32 %v1363_v51, %v1308_v33 }
 0x148   : > { %3843 = vmatmul.msk.bf16.gmra.mxu2 %vm639_vm4, %v4741_v24 }
 0x14a   : > { %v1108_v5 = vpop.f32.mrf.mxu3 }
 0x14b   : > { %v1181_v16 = vadd.f32 %v1108_v5, %v1052_v35  ;;  %v982_v45 = vpop.f32.mrf.mxu2 }
 0x14c   : > { %v1053_v46 = vadd.f32 %v982_v45, %v4580_v0  ;;  %v6451_v45 = vshrl.u32 %v4423_v17, 16 }
 0x14d   : > { %v1244_v4 = vpop.f32.mrf.mxu0  ;;  %v1309_v59 = vadd.f32 %v1236_v40, %v1181_v16 }
 0x14e   : > { %v1373_v57 = vpop.f32.mrf.mxu1 }
 0x14f   : > { %v4787_v51 = vadd.f32 %v1365_v42, %v1309_v59  ;;  %3860 = vmatmul.msk.bf16.gmra.mxu3 %vm639_vm4, %v4387_v1  ;;  %v6449_v42 = vshll.u32 %v4423_v17, 16 }
 0x150   : > { %3878 = vmatmul.msk.bf16.gmra.mxu0 %vm639_vm4, %v4383_v62 }
 0x151   : > { %3895 = vmatmul.msk.bf16.gmra.mxu1 %vm639_vm4, %v4785_v26  ;;  %v593_v5 = vrot.slane %v6449_v42, 1 }
 0x152   : > { %v1111_v35 = vpop.f32.mrf.mxu3 }
 0x153   : > { %v1182_v0 = vadd.f32 %v1111_v35, %v1053_v46  ;;  %v984_v33 = vpop.f32.mrf.mxu2  ;;  %v594_v59 = vor.u32 %v593_v5, %v6451_v45 }
 0x154   : > { %v1054_v16 = vadd.f32 %v984_v33, %v4590_v50 }
 0x155   : > { %v1246_v40 = vpop.f32.mrf.mxu0  ;;  %v1310_v37 = vadd.f32 %v1239_v56, %v1182_v0 }
 0x156   : > { %v1375_v49 = vpop.f32.mrf.mxu1 }
 0x157   : > { %v4798_v31 = vadd.f32 %v1368_v60, %v1310_v37  ;;  %v4807_v60 = vsel %vm4501_vm7, %v594_v59, 0  ;;  %v295_v59 = vld [vmem:[%s4209_s13 + $0xf0] sm:$0xff] }
 0x158   : > { %3844 = vmatmul.msk.bf16.gmra.mxu2 %vm639_vm4, %v4763_v7 }
 0x159   : > { %6450 = vst [vmem:[#allocation36_spill] sm:$0xff] %v4798_v31 }
 0x15a   : > { %v1113_v9 = vpop.f32.mrf.mxu3 }
 0x15b   : > { %v1183_v62 = vadd.f32 %v1113_v9, %v1054_v16  ;;  %v987_v46 = vpop.f32.mrf.mxu2 }
 0x15c   : > { %v1055_v35 = vadd.f32 %v987_v46, %v4604_v47  ;;  %v296_v46 = vld [vmem:[%s4209_s13 + $0xf8] sm:$0xff]  ;;  %s263_s13 = scalar_lea.vmem %s6296_s6, %s3798_s22 }
 0x15d   : > { %v1249_v50 = vpop.f32.mrf.mxu0  ;;  %v1311_v33 = vadd.f32 %v1241_v61, %v1183_v62 }
 0x15e   : > { %v1378_v56 = vpop.f32.mrf.mxu1 }
 0x15f   : > { %v4809_v0 = vadd.f32 %v1370_v21, %v1311_v33  ;;  %3861 = vmatmul.msk.bf16.gmra.mxu3 %vm639_vm4, %v4421_v3  ;;  %v6454_v21 = vshll.u32 %v4457_v39, 16 }
 0x160   : > { %3879 = vmatmul.msk.bf16.gmra.mxu0 %vm639_vm4, %v4423_v17  ;;  %v327_v17 = vpack.c.bf16 %v295_v59, %v295_v59 }
 0x161   : > { %6452 = vst [vmem:[#allocation37_spill] sm:$0xff] %v4809_v0  ;;  %3896 = vmatmul.msk.bf16.gmra.mxu1 %vm639_vm4, %v4807_v60  ;;  %v595_v9 = vrot.slane %v6454_v21, 1 }
 0x162   : > { %v1116_v47 = vpop.f32.mrf.mxu3  ;;  %v391_v21 = vunpack.c.l.b16 %v327_v17 }
 0x163   : > { %v1184_v62 = vadd.f32 %v1116_v47, %v1055_v35  ;;  %v989_v61 = vpop.f32.mrf.mxu2  ;;  %v328_v35 = vpack.c.bf16 %v296_v46, %v296_v46  ;;  %v6456_v47 = vshrl.u32 %v4457_v39, 16 }
 0x164   : > { %v1056_v16 = vadd.f32 %v989_v61, %v4614_v18 }
 0x165   : > { %v1251_v37 = vpop.f32.mrf.mxu0  ;;  %v1312_v42 = vadd.f32 %v1244_v4, %v1184_v62  ;;  %v596_v18 = vor.u32 %v595_v9, %v6456_v47 }
 0x166   : > { %v4818_v5 = vpop.f32.mrf.mxu1 }
 0x167   : > { %6453 = vst [vmem:[#allocation38_spill] sm:$0xff] %v4818_v5  ;;  %v4822_v45 = vadd.f32 %v1373_v57, %v1312_v42  ;;  %v392_v57 = vunpack.c.l.b16 %v328_v35 }
 0x168   : > { %3845 = vmatmul.msk.bf16.gmra.mxu2 %vm639_vm4, %v4785_v26 }
 0x169   : > { %6455 = vst [vmem:[#allocation39_spill] sm:$0xff] %v4822_v45  ;;  %v4833_v45 = vsel %vm4501_vm7, %v596_v18, 0 }
 0x16a   : > { %v1118_v33 = vpop.f32.mrf.mxu3 }
 0x16b   : > { %v1185_v61 = vadd.f32 %v1118_v33, %v1056_v16  ;;  %v992_v4 = vpop.f32.mrf.mxu2 }
 0x16c   : > { %v1057_v62 = vadd.f32 %v992_v4, %v4628_v48 }
 0x16d   : > { %v1254_v5 = vpop.f32.mrf.mxu0  ;;  %v1313_v0 = vadd.f32 %v1246_v40, %v1185_v61  ;;  %v4843_v40 = vpack.c.b16 %v392_v57, %v391_v21 }
 0x16e   : > { %v1383_v42 = vpop.f32.mrf.mxu1 }
 0x16f   : > { %v4835_v31 = vadd.f32 %v1375_v49, %v1313_v0  ;;  %3862 = vmatmul.msk.bf16.gmra.mxu3 %vm639_vm4, %v4455_v34  ;;  %v525_v59 = vshll.u32 %v4843_v40, 16  ;;  %v522_v47 = vshrl.u32 %v4843_v40, 16 }
 0x170   : > { %3880 = vmatmul.msk.bf16.gmra.mxu0 %vm639_vm4, %v4457_v39 }
 0x171   : > { %3897 = vmatmul.msk.bf16.gmra.mxu1 %vm639_vm4, %v4833_v45  ;;  %v597_v33 = vrot.slane %v525_v59, 1 }
 0x172   : > { %v1121_v48 = vpop.f32.mrf.mxu3 }
 0x173   : > { %v1186_v17 = vadd.f32 %v1121_v48, %v1057_v62  ;;  %v994_v16 = vpop.f32.mrf.mxu2  ;;  %v598_v61 = vor.u32 %v597_v33, %v522_v47 }
 0x174   : > { %v1058_v9 = vadd.f32 %v994_v16, %v4638_v2  ;;  %v524_v16 = vrot.slane %v522_v47, 7 }
 0x175   : > { %v1256_v49 = vpop.f32.mrf.mxu0  ;;  %v1314_v0 = vadd.f32 %v1249_v50, %v1186_v17  ;;  %v4859_v48 = vsel %vm4501_vm7, %v598_v61, 0 }
 0x176   : > { %v4847_v46 = vpop.f32.mrf.mxu1  ;;  %v527_v61 = vor.u32 %v525_v59, %v524_v16 }
 0x177   : > { %6457 = vst [vmem:[#allocation40_spill] sm:$0xff] %v4847_v46  ;;  %v4849_v35 = vadd.f32 %v1378_v56, %v1314_v0 }
 0x178   : > { %3846 = vmatmul.msk.bf16.gmra.mxu2 %vm639_vm4, %v4807_v60 }
 0x17a   : > { %v1123_v18 = vpop.f32.mrf.mxu3 }
 0x17b   : > { %v1187_v4 = vadd.f32 %v1123_v18, %v1058_v9  ;;  %v997_v62 = vpop.f32.mrf.mxu2 }
 0x17c   : > { %v1059_v2 = vadd.f32 %v997_v62, %v4652_v22 }
 0x17d   : > { %v1259_v21 = vpop.f32.mrf.mxu0  ;;  %v4855_v57 = vadd.f32 %v1251_v37, %v1187_v4 }
 0x17e   : > { %v1388_v50 = vpop.f32.mrf.mxu1 }
 0x17f   : > { %3863 = vmatmul.msk.bf16.gmra.mxu3 %vm639_vm4, %v4499_v19 }
 0x180   : > { %3881 = vmatmul.msk.bf16.gmra.mxu0 %vm639_vm4, %v4843_v40 }
 0x181   : > { %3898 = vmatmul.msk.bf16.gmra.mxu1 %vm639_vm4, %v4859_v48 }
 0x182   : > { %v1126_v56 = vpop.f32.mrf.mxu3 }
 0x183   : > { %v1188_v17 = vadd.f32 %v1126_v56, %v1059_v2  ;;  %v999_v22 = vpop.f32.mrf.mxu2  ;;  %v4877_v2 = vsel %vm4188_vm3, 0, %v527_v61 }
 0x184   : > { %v1060_v37 = vadd.f32 %v999_v22, %v4662_v23 }
 0x185   : > { %v1261_v9 = vpop.f32.mrf.mxu0  ;;  %v1316_v0 = vadd.f32 %v1254_v5, %v1188_v17 }
 0x186   : > { %v4868_v33 = vpop.f32.mrf.mxu1 }
 0x187   : > { %v4870_v18 = vadd.f32 %v1383_v42, %v1316_v0  ;;  %v6458_v42 = vmov 0  }
 0x188   : > { %3847 = vmatmul.msk.bf16.gmra.mxu2 %vm639_vm4, %v4833_v45 }
 0x18a   : > { %v1128_v4 = vpop.f32.mrf.mxu3 }
 0x18b   : > { %v1189_v62 = vadd.f32 %v1128_v4, %v1060_v37  ;;  %v1002_v28 = vpop.f32.mrf.mxu2 }
 0x18c   : > { %v1061_v46 = vadd.f32 %v1002_v28, %v4676_v53 }
 0x18d   : > { %v1264_v23 = vpop.f32.mrf.mxu0  ;;  %v4879_v47 = vadd.f32 %v1256_v49, %v1189_v62 }
 0x18e   : > { %v1393_v5 = vpop.f32.mrf.mxu1 }
 0x18f   : > { %3864 = vmatmul.msk.bf16.gmra.mxu3 %vm639_vm4, %v4877_v2 }
 0x190   : > { %3933 = vmatmul.msk.bf16.vlgmr.msra.gmra.mxu0 %vm639_vm4, %v4529_v44 }
 0x191   : > { %2311 = vmatmul.bf16.vlgmr.msra.gmra.mxu1 %v6458_v42 }
 0x192   : > { %v1131_v59 = vpop.f32.mrf.mxu3 }
 0x193   : > { %v1190_v56 = vadd.f32 %v1131_v59, %v1061_v46  ;;  %v1004_v17 = vpop.f32.mrf.mxu2 }
 0x194   : > { %v1062_v28 = vadd.f32 %v1004_v17, %v4686_v6 }
 0x195   : > { %v1266_v53 = vpop.f32.mrf.mxu0  ;;  %v1318_v22 = vadd.f32 %v1259_v21, %v1190_v56 }
 0x196   : > { %v4887_v37 = vpop.f32.mrf.mxu1 }
 0x197   : > { %v4889_v49 = vadd.f32 %v1388_v50, %v1318_v22 }
 0x198   : > { %3900 = vmatmul.msk.bf16.vlgmr.msra.gmra.mxu2 %vm639_vm4, %v4283_v13 }
 0x19a   : > { %v1133_v16 = vpop.f32.mrf.mxu3 }
 0x19b   : > { %v1191_v0 = vadd.f32 %v1133_v16, %v1062_v28  ;;  %v1007_v61 = vpop.f32.mrf.mxu2 }
 0x19c   : > { %v1063_v44 = vadd.f32 %v1007_v61, %v4539_v55 }
 0x19d   : > { %v1269_v4 = vpop.f32.mrf.mxu0  ;;  %v4894_v62 = vadd.f32 %v1261_v9, %v1191_v0 }
 0x19e   : > { %v1398_v46 = vpop.f32.mrf.mxu1 }
 0x19f   : > { %3917 = vmatmul.msk.bf16.vlgmr.msra.gmra.mxu3 %vm639_vm4, %v4254_v52 }
 0x1a0   : > { %3934 = vmatmul.msk.bf16.gmra.mxu0 %vm639_vm4, %v4552_v63 }
 0x1a2   : > { %v1136_v6 = vpop.f32.mrf.mxu3 }
 0x1a3   : > { %v1192_v21 = vadd.f32 %v1136_v6, %v1063_v44  ;;  %v1009_v50 = vpop.f32.mrf.mxu2 }
 0x1a4   : > { %v1064_v13 = vadd.f32 %v1009_v50, %v4548_v41 }
 0x1a5   : > { %v1271_v59 = vpop.f32.mrf.mxu0  ;;  %v1320_v56 = vadd.f32 %v1264_v23, %v1192_v21 }
 0x1a6   : > { %v4901_v17 = vpop.f32.mrf.mxu1 }
 0x1a7   : > { %v4903_v55 = vadd.f32 %v1393_v5, %v1320_v56  ;;  %v6460_v56 = vld [vmem:[#allocation9_spill] sm:$0xff] }
 0x1a8   : > { %3901 = vmatmul.msk.bf16.gmra.mxu2 %vm639_vm4, %v4319_v43 }
 0x1aa   : > { %v1138_v9 = vpop.f32.mrf.mxu3 }
 0x1ab   : > { %v1193_v28 = vadd.f32 %v1138_v9, %v1064_v13  ;;  %v1012_v52 = vpop.f32.mrf.mxu2 }
 0x1ac   : > { %v1065_v22 = vadd.f32 %v1012_v52, %v4562_v54 }
 0x1ad   : > { %v1274_v63 = vpop.f32.mrf.mxu0  ;;  %v4908_v16 = vadd.f32 %v1266_v53, %v1193_v28 }
 0x1ae   : > { %v1403_v41 = vpop.f32.mrf.mxu1 }
 0x1af   : > { %3918 = vmatmul.msk.bf16.gmra.mxu3 %vm639_vm4, %v4290_v15 }
 0x1b0   : > { %3935 = vmatmul.msk.bf16.gmra.mxu0 %vm639_vm4, %v4576_v58 }
 0x1b2   : > { %v1141_v23 = vpop.f32.mrf.mxu3 }
 0x1b3   : > { %v1194_v5 = vadd.f32 %v1141_v23, %v1065_v22  ;;  %v1014_v0 = vpop.f32.mrf.mxu2 }
 0x1b4   : > { %v1066_v43 = vadd.f32 %v1014_v0, %v4572_v25  ;;  %v6461_v25 = vld [vmem:[#allocation22_spill] sm:$0xff] }
 0x1b5   : > { %v1276_v61 = vpop.f32.mrf.mxu0  ;;  %v1322_v44 = vadd.f32 %v1269_v4, %v1194_v5 }
 0x1b6   : > { %v4919_v53 = vpop.f32.mrf.mxu1 }
 0x1b7   : > { %v4915_v6 = vadd.f32 %v1398_v46, %v1322_v44  ;;  %6459 = vst [vmem:[#allocation41_spill] sm:$0xff] %v4919_v53  ;;  %v6464_v44 = vld [vmem:[#allocation23_spill] sm:$0xff] }
 0x1b8   : > { %3902 = vmatmul.msk.bf16.gmra.mxu2 %vm639_vm4, %v4355_v20  ;;  %v6462_v20 = vld [vmem:[#allocation21_spill] sm:$0xff] }
 0x1ba   : > { %v1143_v54 = vpop.f32.mrf.mxu3 }
 0x1bb   : > { %v1195_v15 = vadd.f32 %v1143_v54, %v1066_v43  ;;  %v1017_v21 = vpop.f32.mrf.mxu2 }
 0x1bc   : > { %v1067_v58 = vadd.f32 %v1017_v21, %v4586_v29  ;;  %v6463_v29 = vld [vmem:[#allocation13_spill] sm:$0xff] }
 0x1bd   : > { %v1279_v50 = vpop.f32.mrf.mxu0  ;;  %v4922_v13 = vadd.f32 %v1271_v59, %v1195_v15 }
 0x1be   : > { %v1408_v52 = vpop.f32.mrf.mxu1 }
 0x1bf   : > { %3919 = vmatmul.msk.bf16.gmra.mxu3 %vm639_vm4, %v6460_v56  ;;  %v6466_v56 = vld [vmem:[#allocation11_spill] sm:$0xff] }
 0x1c0   : > { %3936 = vmatmul.msk.bf16.gmra.mxu0 %vm639_vm4, %v6461_v25  ;;  %v6467_v25 = vld [vmem:[#allocation25_spill] sm:$0xff] }
 0x1c2   : > { %v1146_v4 = vpop.f32.mrf.mxu3 }
 0x1c3   : > { %v1196_v46 = vadd.f32 %v1146_v4, %v1067_v58  ;;  %v1019_v9 = vpop.f32.mrf.mxu2 }
 0x1c4   : > { %v1068_v28 = vadd.f32 %v1019_v9, %v6462_v20 }
 0x1c5   : > { %v1281_v22 = vpop.f32.mrf.mxu0  ;;  %v1324_v23 = vadd.f32 %v1274_v63, %v1196_v46  ;;  %v6468_v46 = vld [vmem:[#allocation24_spill] sm:$0xff] }
 0x1c6   : > { %v4936_v58 = vpop.f32.mrf.mxu1 }
 0x1c7   : > { %v4929_v5 = vadd.f32 %v1403_v41, %v1324_v23  ;;  %6465 = vst [vmem:[#allocation9_spill] sm:$0xff] %v4936_v58 }
 0x1c8   : > { %3903 = vmatmul.msk.bf16.gmra.mxu2 %vm639_vm4, %v6463_v29  ;;  %v6470_v29 = vld [vmem:[#allocation16_spill] sm:$0xff] }
 0x1ca   : > { %v1148_v59 = vpop.f32.mrf.mxu3 }
 0x1cb   : > { %v1197_v0 = vadd.f32 %v1148_v59, %v1068_v28  ;;  %v1022_v43 = vpop.f32.mrf.mxu2 }
 0x1cc   : > { %v1069_v54 = vadd.f32 %v1022_v43, %v6464_v44  ;;  %v6471_v44 = vld [vmem:[#allocation26_spill] sm:$0xff] }
 0x1cd   : > { %v1284_v15 = vpop.f32.mrf.mxu0  ;;  %v4934_v21 = vadd.f32 %v1276_v61, %v1197_v0 }
 0x1ce   : > { %v1413_v61 = vpop.f32.mrf.mxu1 }
 0x1cf   : > { %3920 = vmatmul.msk.bf16.gmra.mxu3 %vm639_vm4, %v6466_v56 }
 0x1d0   : > { %3937 = vmatmul.msk.bf16.gmra.mxu0 %vm639_vm4, %v6467_v25 }
 0x1d2   : > { %v1151_v63 = vpop.f32.mrf.mxu3 }
 0x1d3   : > { %v1198_v41 = vadd.f32 %v1151_v63, %v1069_v54  ;;  %v1024_v4 = vpop.f32.mrf.mxu2  ;;  %v6473_v54 = vld [vmem:[#allocation14_spill] sm:$0xff]  ;;  %v6474_v63 = vld [vmem:[#allocation28_spill] sm:$0xff] }
 0x1d4   : > { %v1070_v9 = vadd.f32 %v1024_v4, %v6468_v46  ;;  %v6476_v46 = vld [vmem:[#allocation27_spill] sm:$0xff] }
 0x1d5   : > { %v1286_v20 = vpop.f32.mrf.mxu0  ;;  %v1326_v28 = vadd.f32 %v1279_v50, %v1198_v41 }
 0x1d7   : > { %v4943_v23 = vadd.f32 %v1408_v52, %v1326_v28  ;;  %v4954_v52 = vpop.f32.mrf.mxu1 }
 0x1d8   : > { %3904 = vmatmul.msk.bf16.gmra.mxu2 %vm639_vm4, %v6470_v29  ;;  %6475 = vst [vmem:[#allocation13_spill] sm:$0xff] %v4954_v52 }
 0x1d9   : > { %6469 = vst [vmem:[#allocation22_spill] sm:$0xff] %v4943_v23 }
 0x1da   : > { %v1153_v59 = vpop.f32.mrf.mxu3 }
 0x1db   : > { %v1199_v0 = vadd.f32 %v1153_v59, %v1070_v9  ;;  %v1027_v43 = vpop.f32.mrf.mxu2 }
 0x1dc   : > { %v1071_v56 = vadd.f32 %v1027_v43, %v6471_v44  ;;  %v6477_v43 = vld [vmem:[#allocation18_spill] sm:$0xff] }
 0x1dd   : > { %v1289_v58 = vpop.f32.mrf.mxu0  ;;  %v4948_v25 = vadd.f32 %v1281_v22, %v1199_v0 }
 0x1df   : > { %6472 = vst [vmem:[#allocation21_spill] sm:$0xff] %v4948_v25  ;;  %3921 = vmatmul.msk.bf16.gmra.mxu3 %vm639_vm4, %v6473_v54  ;;  %v6478_v54 = vld [vmem:[#allocation29_spill] sm:$0xff] }
 0x1e0   : > { %3938 = vmatmul.msk.bf16.gmra.mxu0 %vm639_vm4, %v6474_v63  ;;  %v1418_v63 = vpop.f32.mrf.mxu1 }
 0x1e2   : > { %v1156_v50 = vpop.f32.mrf.mxu3 }
 0x1e3   : > { %v1200_v41 = vadd.f32 %v1156_v50, %v1071_v56  ;;  %v1029_v4 = vpop.f32.mrf.mxu2  ;;  %v6480_v56 = vld [vmem:[#allocation17_spill] sm:$0xff]  ;;  %v6481_v50 = vld [vmem:[#allocation31_spill] sm:$0xff] }
 0x1e4   : > { %v1072_v28 = vadd.f32 %v1029_v4, %v6476_v46  ;;  %v6482_v4 = vld [vmem:[#allocation30_spill] sm:$0xff] }
 0x1e5   : > { %v1291_v9 = vpop.f32.mrf.mxu0  ;;  %v1328_v29 = vadd.f32 %v1284_v15, %v1200_v41 }
 0x1e7   : > { %v4957_v59 = vadd.f32 %v1413_v61, %v1328_v29 }
 0x1e8   : > { %3905 = vmatmul.msk.bf16.gmra.mxu2 %vm639_vm4, %v6477_v43  ;;  %v4969_v43 = vpop.f32.mrf.mxu1 }
 0x1e9   : > { %6483 = vst [vmem:[#allocation11_spill] sm:$0xff] %v4969_v43  ;;  %v6490_v43 = vld [vmem:[#allocation34_spill] sm:$0xff] }
 0x1ea   : > { %v1158_v22 = vpop.f32.mrf.mxu3 }
 0x1eb   : > { %v1201_v0 = vadd.f32 %v1158_v22, %v1072_v28  ;;  %v1032_v44 = vpop.f32.mrf.mxu2 }
 0x1ec   : > { %v1073_v25 = vadd.f32 %v1032_v44, %v6478_v54  ;;  %v6484_v44 = vld [vmem:[#allocation5_spill] sm:$0xff] }
 0x1ed   : > { %v1294_v23 = vpop.f32.mrf.mxu0  ;;  %v4962_v53 = vadd.f32 %v1286_v20, %v1201_v0 }
 0x1ef   : > { %6479 = vst [vmem:[#allocation23_spill] sm:$0xff] %v4962_v53  ;;  %3922 = vmatmul.msk.bf16.gmra.mxu3 %vm639_vm4, %v6480_v56  ;;  %v6485_v56 = vld [vmem:[#allocation32_spill] sm:$0xff] }
 0x1f0   : > { %3939 = vmatmul.msk.bf16.gmra.mxu0 %vm639_vm4, %v6481_v50 }
 0x1f2   : > { %v1161_v15 = vpop.f32.mrf.mxu3 }
 0x1f3   : > { %v1202_v61 = vadd.f32 %v1161_v15, %v1073_v25  ;;  %v1034_v41 = vpop.f32.mrf.mxu2  ;;  %v6487_v25 = vld [vmem:[#allocation3_spill] sm:$0xff] }
 0x1f4   : > { %v1074_v46 = vadd.f32 %v1034_v41, %v6482_v4 }
 0x1f5   : > { %v1296_v29 = vpop.f32.mrf.mxu0  ;;  %v1330_v28 = vadd.f32 %v1289_v58, %v1202_v61  ;;  %v2267_v58 = vld [vmem:[%s6292_s2] sm:$0x3]  ;;  %v3981_v61 = vld [vmem:[%s6292_s2 + $0x4] sm:$0x3] }
 0x1f6   : > { %v2438_v15 = vsel %vm672_vm0, %v2267_v58, 0 }
 0x1f7   : > { %v4971_v22 = vadd.f32 %v1418_v63, %v1330_v28  ;;  %v1423_v63 = vpop.f32.mrf.mxu1  ;;  %2447 = vmatpush.bf16.msrb.mxu2 %v2438_v15  ;;  %v6488_v28 = vld [vmem:[#allocation33_spill] sm:$0xff] }
 0x1f8   : > { %3906 = vmatmul.msk.bf16.gmra.mxu2 %vm639_vm4, %v6484_v44 }
 0x1fa   : > { %v1163_v20 = vpop.f32.mrf.mxu3 }
 0x1fb   : > { %v1203_v0 = vadd.f32 %v1163_v20, %v1074_v46  ;;  %v1037_v54 = vpop.f32.mrf.mxu2 }
 0x1fc   : > { %v1075_v52 = vadd.f32 %v1037_v54, %v6485_v56 }
 0x1fd   : > { %v1299_v50 = vpop.f32.mrf.mxu0  ;;  %v4976_v53 = vadd.f32 %v1291_v9, %v1203_v0  ;;  %v2577_v9 = vsel %vm672_vm0, %v3981_v61, 0 }
 0x1fe   : > { %2586 = vmatpush.bf16.msrb.mxu3 %v2577_v9 }
 0x1ff   : > { %6486 = vst [vmem:[#allocation25_spill] sm:$0xff] %v4976_v53  ;;  %3923 = vmatmul.msk.bf16.gmra.mxu3 %vm639_vm4, %v6487_v25  ;;  %v4995_v25 = vpop.f32.mrf.mxu1 }
 0x200   : > { %3940 = vmatmul.msk.bf16.gmra.mxu0 %vm639_vm4, %v4700_v27  ;;  %v6489_v27 = vld [vmem:[#allocation6_spill] sm:$0xff] }
 0x202   : > { %v1166_v41 = vpop.f32.mrf.mxu3 }
 0x203   : > { %v1204_v4 = vadd.f32 %v1166_v41, %v1075_v52  ;;  %v1039_v46 = vpop.f32.mrf.mxu2  ;;  %v6491_v52 = vld [vmem:[#allocation4_spill] sm:$0xff] }
 0x204   : > { %v1076_v44 = vadd.f32 %v1039_v46, %v6488_v28 }
 0x205   : > { %v1301_v20 = vpop.f32.mrf.mxu0  ;;  %v1332_v0 = vadd.f32 %v1294_v23, %v1204_v4  ;;  %v3998_v23 = vld [vmem:[%s6292_s2 + $0x6] sm:$0x3] }
 0x207   : > { %v4991_v54 = vadd.f32 %v1423_v63, %v1332_v0  ;;  %v2706_v63 = vsel %vm672_vm0, %v3998_v23, 0 }
 0x208   : > { %3907 = vmatmul.msk.bf16.gmra.mxu2 %vm639_vm4, %v6489_v27  ;;  %2715 = vmatpush.bf16.msrb.mxu0 %v2706_v63  ;;  %v6493_v63 = vld [vmem:[#allocation7_spill] sm:$0xff] }
 0x20a   : > { %v1168_v56 = vpop.f32.mrf.mxu3 }
 0x20b   : > { %v1205_v58 = vadd.f32 %v1168_v56, %v1076_v44  ;;  %v1042_v15 = vpop.f32.mrf.mxu2  ;;  %v4015_v56 = vld [vmem:[%s6292_s2 + $0x8] sm:$0x3] }
 0x20c   : > { %v1077_v61 = vadd.f32 %v1042_v15, %v6490_v43  ;;  %v6492_v43 = vld [vmem:[#allocation35_spill] sm:$0xff] }
 0x20d   : > { %v1731_v53 = vpop.f32.mrf.mxu0  ;;  %v4998_v9 = vadd.f32 %v1296_v29, %v1205_v58  ;;  %v1428_v29 = vpop.f32.mrf.mxu1 }
 0x20f   : > { %3924 = vmatmul.msk.bf16.gmra.mxu3 %vm639_vm4, %v6491_v52 }
 0x210   : > { %3941 = vmatmul.msk.bf16.gmra.mxu0 %vm639_vm4, %v4721_v11  ;;  %v2834_v11 = vsel %vm672_vm0, %v4015_v56, 0 }
 0x211   : > { %2843 = vmatpush.bf16.msrb.mxu1 %v2834_v11 }
 0x212   : > { %v1171_v41 = vpop.f32.mrf.mxu3 }
 0x213   : > { %v1206_v4 = vadd.f32 %v1171_v41, %v1077_v61  ;;  %v1044_v46 = vpop.f32.mrf.mxu2 }
 0x214   : > { %v1078_v28 = vadd.f32 %v1044_v46, %v6492_v43 }
 0x215   : > { %v1733_v44 = vpop.f32.mrf.mxu0  ;;  %v1334_v0 = vadd.f32 %v1299_v50, %v1206_v4 }
 0x217   : > { %v5009_v27 = vadd.f32 %v1428_v29, %v1334_v0  ;;  %v5033_v29 = vld [vmem:[%s6294_s4] ss:$0 sm:$0xff] }
 0x218   : > { %3908 = vmatmul.msk.bf16.gmra.mxu2 %vm639_vm4, %v4315_v38  ;;  %v5027_v38 = vld [vmem:[%s6293_s3] ss:$0 sm:$0xff] }
 0x21a   : > { %v1173_v58 = vpop.f32.mrf.mxu3 }
 0x21b   : > { %v1207_v15 = vadd.f32 %v1173_v58, %v1078_v28  ;;  %v1479_v61 = vpop.f32.mrf.mxu2 }
 0x21c   : > { %v1559_v50 = vadd.f32 %v1479_v61, %v4732_v14 }
 0x21d   : > { %v1736_v52 = vpop.f32.mrf.mxu0  ;;  %v5017_v23 = vadd.f32 %v1301_v20, %v1207_v15 }
 0x21f   : > { %3925 = vmatmul.msk.bf16.gmra.mxu3 %vm639_vm4, %v6493_v63  ;;  %v6494_v63 = vld [vmem:[#allocation8_spill] sm:$0xff] }
 0x220   : > { %3942 = vmatmul.msk.bf16.gmra.mxu0 %vm639_vm4, %v4741_v24 }
 0x222   : > { %v1605_v41 = vpop.f32.mrf.mxu3 }
 0x223   : > { %v1685_v4 = vadd.f32 %v1605_v41, %v1559_v50  ;;  %v1481_v46 = vpop.f32.mrf.mxu2 }
 0x224   : > { %v1560_v14 = vadd.f32 %v1481_v46, %v4743_v30 }
 0x225   : > { %v1811_v43 = vadd.f32 %v1731_v53, %v1685_v4  ;;  %v1738_v28 = vpop.f32.mrf.mxu0 }
 0x227   : > { %v1847_v20 = vmul.f32 %v5027_v38, %v1811_v43 }
 0x228   : > { %3909 = vmatmul.msk.bf16.gmra.mxu2 %vm639_vm4, %v4349_v12 }
 0x229   : > { %v1883_v0 = vadd.f32 %v5033_v29, %v1847_v20 }
 0x22a   : > { %v1607_v24 = vpop.f32.mrf.mxu3 }
 0x22b   : > { %v1686_v56 = vadd.f32 %v1607_v24, %v1560_v14  ;;  %v1484_v11 = vpop.f32.mrf.mxu2  ;;  %v1915_v15 = vmax.f32 %v1883_v0, 0.0 }
 0x22c   : > { %v1561_v30 = vadd.f32 %v1484_v11, %v4754_v32 }
 0x22d   : > { %v1812_v58 = vadd.f32 %v1733_v44, %v1686_v56  ;;  %v1741_v53 = vpop.f32.mrf.mxu0  ;;  %v1947_v41 = vpack.c.bf16 %v1915_v15, %v1915_v15 }
 0x22f   : > { %v1848_v61 = vmul.f32 %v5027_v38, %v1812_v58  ;;  %3926 = vmatmul.msk.bf16.gmra.mxu3 %vm639_vm4, %v6494_v63  ;;  %v2011_v24 = vunpack.c.l.b16 %v1947_v41 }
 0x230   : > { %3943 = vmatmul.msk.bf16.gmra.mxu0 %vm639_vm4, %v4763_v7 }
 0x231   : > { %v1884_v12 = vadd.f32 %v5033_v29, %v1848_v61 }
 0x232   : > { %v1610_v50 = vpop.f32.mrf.mxu3 }
 0x233   : > { %v1916_v4 = vmax.f32 %v1884_v12, 0.0  ;;  %v1687_v46 = vadd.f32 %v1610_v50, %v1561_v30  ;;  %v1486_v43 = vpop.f32.mrf.mxu2  ;;  %v6495_v50 = vld [vmem:[#allocation10_spill] sm:$0xff] }
 0x234   : > { %v1562_v7 = vadd.f32 %v1486_v43, %v4765_v10 }
 0x235   : > { %v1948_v44 = vpack.c.bf16 %v1916_v4, %v1916_v4  ;;  %v1813_v20 = vadd.f32 %v1736_v52, %v1687_v46  ;;  %v1743_v14 = vpop.f32.mrf.mxu0 }
 0x237   : > { %v2012_v0 = vunpack.c.l.b16 %v1948_v44  ;;  %v1849_v56 = vmul.f32 %v5027_v38, %v1813_v20 }
 0x238   : > { %3910 = vmatmul.msk.bf16.gmra.mxu2 %vm639_vm4, %v4387_v1 }
 0x239   : > { %v5050_v58 = vpack.c.b16 %v2012_v0, %v2011_v24  ;;  %v1885_v11 = vadd.f32 %v5033_v29, %v1849_v56 }
 0x23a   : > { %v1612_v32 = vpop.f32.mrf.mxu3 }
 0x23b   : > { %v1688_v15 = vadd.f32 %v1612_v32, %v1562_v7  ;;  %v1489_v61 = vpop.f32.mrf.mxu2  ;;  %3950 = vmatmul.msk.bf16.gmra.mxu1 %vm639_vm4, %v5050_v58  ;;  %v1917_v12 = vmax.f32 %v1885_v11, 0.0 }
 0x23c   : > { %v1563_v10 = vadd.f32 %v1489_v61, %v4776_v36 }
 0x23d   : > { %v1814_v52 = vadd.f32 %v1738_v28, %v1688_v15  ;;  %v1746_v63 = vpop.f32.mrf.mxu0  ;;  %v1949_v4 = vpack.c.bf16 %v1917_v12, %v1917_v12 }
 0x23f   : > { %v1850_v30 = vmul.f32 %v5027_v38, %v1814_v52  ;;  %3927 = vmatmul.msk.bf16.gmra.mxu3 %vm639_vm4, %v6495_v50  ;;  %v2013_v0 = vunpack.c.l.b16 %v1949_v4  ;;  %v6496_v50 = vld [vmem:[#allocation12_spill] sm:$0xff] }
 0x240   : > { %3944 = vmatmul.msk.bf16.gmra.mxu0 %vm639_vm4, %v4785_v26 }
 0x241   : > { %v1886_v1 = vadd.f32 %v5033_v29, %v1850_v30 }
 0x242   : > { %v1615_v41 = vpop.f32.mrf.mxu3 }
 0x243   : > { %v1918_v46 = vmax.f32 %v1886_v1, 0.0  ;;  %v1689_v43 = vadd.f32 %v1615_v41, %v1563_v10  ;;  %v1491_v44 = vpop.f32.mrf.mxu2 }
 0x244   : > { %v1564_v32 = vadd.f32 %v1491_v44, %v4787_v51  ;;  %v6497_v51 = vld [vmem:[#allocation36_spill] sm:$0xff] }
 0x245   : > { %v1950_v28 = vpack.c.bf16 %v1918_v46, %v1918_v46  ;;  %v1815_v20 = vadd.f32 %v1741_v53, %v1689_v43  ;;  %v1748_v24 = vpop.f32.mrf.mxu0 }
 0x247   : > { %v2014_v56 = vunpack.c.l.b16 %v1950_v28  ;;  %v1851_v7 = vmul.f32 %v5027_v38, %v1815_v20 }
 0x248   : > { %3911 = vmatmul.msk.bf16.gmra.mxu2 %vm639_vm4, %v4421_v3 }
 0x249   : > { %v5065_v26 = vpack.c.b16 %v2014_v56, %v2013_v0  ;;  %v1887_v11 = vadd.f32 %v5033_v29, %v1851_v7  ;;  %v6498_v7 = vld [vmem:[#allocation37_spill] sm:$0xff] }
 0x24a   : > { %v1617_v36 = vpop.f32.mrf.mxu3 }
 0x24b   : > { %v1690_v15 = vadd.f32 %v1617_v36, %v1564_v32  ;;  %v1494_v61 = vpop.f32.mrf.mxu2  ;;  %3951 = vmatmul.msk.bf16.gmra.mxu1 %vm639_vm4, %v5065_v26  ;;  %v1919_v12 = vmax.f32 %v1887_v11, 0.0 }
 0x24c   : > { %v1565_v1 = vadd.f32 %v1494_v61, %v6497_v51 }
 0x24d   : > { %v1816_v53 = vadd.f32 %v1743_v14, %v1690_v15  ;;  %v1751_v52 = vpop.f32.mrf.mxu0  ;;  %v1951_v41 = vpack.c.bf16 %v1919_v12, %v1919_v12 }
 0x24f   : > { %v1852_v30 = vmul.f32 %v5027_v38, %v1816_v53  ;;  %3928 = vmatmul.msk.bf16.gmra.mxu3 %vm639_vm4, %v6496_v50  ;;  %v2015_v20 = vunpack.c.l.b16 %v1951_v41  ;;  %v6499_v50 = vld [vmem:[#allocation15_spill] sm:$0xff] }
 0x250   : > { %3945 = vmatmul.msk.bf16.gmra.mxu0 %vm639_vm4, %v4807_v60 }
 0x251   : > { %v1888_v3 = vadd.f32 %v5033_v29, %v1852_v30 }
 0x252   : > { %v1620_v10 = vpop.f32.mrf.mxu3 }
 0x253   : > { %v1920_v4 = vmax.f32 %v1888_v3, 0.0  ;;  %v1691_v46 = vadd.f32 %v1620_v10, %v1565_v1  ;;  %v1496_v43 = vpop.f32.mrf.mxu2  ;;  %v6500_v3 = vld [vmem:[#allocation39_spill] sm:$0xff] }
 0x254   : > { %v1566_v32 = vadd.f32 %v1496_v43, %v6498_v7 }
 0x255   : > { %v1952_v14 = vpack.c.bf16 %v1920_v4, %v1920_v4  ;;  %v1817_v44 = vadd.f32 %v1746_v63, %v1691_v46  ;;  %v1753_v28 = vpop.f32.mrf.mxu0 }
 0x257   : > { %v2016_v0 = vunpack.c.l.b16 %v1952_v14  ;;  %v1853_v56 = vmul.f32 %v5027_v38, %v1817_v44 }
 0x258   : > { %3912 = vmatmul.msk.bf16.gmra.mxu2 %vm639_vm4, %v4455_v34 }
 0x259   : > { %v5081_v60 = vpack.c.b16 %v2016_v0, %v2015_v20  ;;  %v1889_v11 = vadd.f32 %v5033_v29, %v1853_v56 }
 0x25a   : > { %v1622_v36 = vpop.f32.mrf.mxu3 }
 0x25b   : > { %v1692_v15 = vadd.f32 %v1622_v36, %v1566_v32  ;;  %v1499_v61 = vpop.f32.mrf.mxu2  ;;  %3952 = vmatmul.msk.bf16.gmra.mxu1 %vm639_vm4, %v5081_v60  ;;  %v1921_v12 = vmax.f32 %v1889_v11, 0.0 }
 0x25c   : > { %v1567_v51 = vadd.f32 %v1499_v61, %v6500_v3 }
 0x25d   : > { %v1818_v63 = vadd.f32 %v1748_v24, %v1692_v15  ;;  %v1756_v53 = vpop.f32.mrf.mxu0  ;;  %v1953_v10 = vpack.c.bf16 %v1921_v12, %v1921_v12 }
 0x25f   : > { %v1854_v30 = vmul.f32 %v5027_v38, %v1818_v63  ;;  %3929 = vmatmul.msk.bf16.gmra.mxu3 %vm639_vm4, %v6499_v50  ;;  %v2017_v44 = vunpack.c.l.b16 %v1953_v10  ;;  %v6501_v10 = vld [vmem:[#allocation38_spill] sm:$0xff] }
 0x260   : > { %3946 = vmatmul.msk.bf16.gmra.mxu0 %vm639_vm4, %v4833_v45 }
 0x261   : > { %v1890_v34 = vadd.f32 %v5033_v29, %v1854_v30 }
 0x262   : > { %v1625_v1 = vpop.f32.mrf.mxu3 }
 0x263   : > { %v1922_v41 = vmax.f32 %v1890_v34, 0.0  ;;  %v1693_v4 = vadd.f32 %v1625_v1, %v1567_v51  ;;  %v1501_v46 = vpop.f32.mrf.mxu2 }
 0x264   : > { %v1568_v56 = vadd.f32 %v1501_v46, %v4835_v31 }
 0x265   : > { %v1954_v24 = vpack.c.bf16 %v1922_v41, %v1922_v41  ;;  %v1819_v43 = vadd.f32 %v1751_v52, %v1693_v4  ;;  %v1758_v14 = vpop.f32.mrf.mxu0  ;;  %v1444_v41 = vadd.f32 %v6501_v10, %v4855_v57 }
 0x267   : > { %v2018_v20 = vunpack.c.l.b16 %v1954_v24  ;;  %v1855_v0 = vmul.f32 %v5027_v38, %v1819_v43 }
 0x268   : > { %3913 = vmatmul.msk.bf16.gmra.mxu2 %vm639_vm4, %v4499_v19 }
 0x269   : > { %v5097_v45 = vpack.c.b16 %v2018_v20, %v2017_v44  ;;  %v1891_v32 = vadd.f32 %v5033_v29, %v1855_v0 }
 0x26a   : > { %v1627_v7 = vpop.f32.mrf.mxu3 }
 0x26b   : > { %v1694_v36 = vadd.f32 %v1627_v7, %v1568_v56  ;;  %v1504_v11 = vpop.f32.mrf.mxu2  ;;  %3953 = vmatmul.msk.bf16.gmra.mxu1 %vm639_vm4, %v5097_v45  ;;  %v1923_v61 = vmax.f32 %v1891_v32, 0.0 }
 0x26c   : > { %v1569_v31 = vadd.f32 %v1504_v11, %v4849_v35 }
 0x26d   : > { %v1820_v52 = vadd.f32 %v1753_v28, %v1694_v36  ;;  %v1761_v15 = vpop.f32.mrf.mxu0  ;;  %v1955_v30 = vpack.c.bf16 %v1923_v61, %v1923_v61 }
 0x26f   : > { %v1856_v63 = vmul.f32 %v5027_v38, %v1820_v52  ;;  %3930 = vmatmul.msk.bf16.gmra.mxu3 %vm639_vm4, %v4457_v39  ;;  %v2019_v4 = vunpack.c.l.b16 %v1955_v30  ;;  %v6503_v30 = vld [vmem:[#allocation40_spill] sm:$0xff] }
 0x270   : > { %3947 = vmatmul.msk.bf16.gmra.mxu0 %vm639_vm4, %v4859_v48 }
 0x271   : > { %v1892_v19 = vadd.f32 %v5033_v29, %v1856_v63 }
 0x272   : > { %v1630_v12 = vpop.f32.mrf.mxu3 }
 0x273   : > { %v1924_v50 = vmax.f32 %v1892_v19, 0.0  ;;  %v1695_v34 = vadd.f32 %v1630_v12, %v1569_v31  ;;  %v1506_v3 = vpop.f32.mrf.mxu2 }
 0x274   : > { %v1570_v35 = vadd.f32 %v1506_v3, %v1444_v41  ;;  %v2063_v41 = vshll.u32 %v5050_v58, 16 }
 0x275   : > { %v1956_v28 = vpack.c.bf16 %v1924_v50, %v1924_v50  ;;  %v1821_v51 = vadd.f32 %v1756_v53, %v1695_v34  ;;  %v1763_v1 = vpop.f32.mrf.mxu0 }
 0x277   : > { %v2020_v39 = vunpack.c.l.b16 %v1956_v28  ;;  %v1857_v46 = vmul.f32 %v5027_v38, %v1821_v51  ;;  %v6504_v28 = vld [vmem:[#allocation2_spill] sm:$0xff] }
 0x278   : > { %3914 = vmatmul.msk.bf16.gmra.mxu2 %vm639_vm4, %v4877_v2  ;;  %v6502_v2 = vld [vmem:[#allocation20_spill] sm:$0xff] }
 0x279   : > { %v5115_v48 = vpack.c.b16 %v2020_v39, %v2019_v4  ;;  %v1893_v43 = vadd.f32 %v5033_v29, %v1857_v46 }
 0x27a   : > { %v1632_v24 = vpop.f32.mrf.mxu3 }
 0x27b   : > { %v1696_v44 = vadd.f32 %v1632_v24, %v1570_v35  ;;  %v1509_v20 = vpop.f32.mrf.mxu2  ;;  %3954 = vmatmul.msk.bf16.gmra.mxu1 %vm639_vm4, %v5115_v48  ;;  %v1925_v0 = vmax.f32 %v1893_v43, 0.0 }
 0x27c   : > { %v1571_v32 = vadd.f32 %v1509_v20, %v4870_v18 }
 0x27d   : > { %v1822_v53 = vadd.f32 %v1758_v14, %v1696_v44  ;;  %v1766_v57 = vpop.f32.mrf.mxu0  ;;  %v1957_v11 = vpack.c.bf16 %v1925_v0, %v1925_v0  ;;  %v2060_v14 = vshrl.u32 %v5050_v58, 16 }
 0x27f   : > { %v1858_v56 = vmul.f32 %v5027_v38, %v1822_v53  ;;  %3931 = vmatmul.msk.bf16.gmra.mxu3 %vm639_vm4, %v4843_v40  ;;  %v1446_v40 = vadd.f32 %v6503_v30, %v4879_v47  ;;  %v2021_v50 = vunpack.c.l.b16 %v1957_v11  ;;  %v2062_v18 = vrot.slane %v2060_v14, 7 }
 0x280   : > { %3948 = vmatmul.msk.bf16.gmra.mxu0 %vm639_vm4, %v6502_v2  ;;  %v2067_v11 = vshrl.u32 %v5065_v26, 16 }
 0x281   : > { %v1894_v7 = vadd.f32 %v5033_v29, %v1858_v56  ;;  %v2065_v46 = vor.u32 %v2063_v41, %v2062_v18 }
 0x282   : > { %v1635_v36 = vpop.f32.mrf.mxu3 }
 0x283   : > { %v1926_v52 = vmax.f32 %v1894_v7, 0.0  ;;  %v1697_v61 = vadd.f32 %v1635_v36, %v1571_v32  ;;  %v1511_v63 = vpop.f32.mrf.mxu2  ;;  %v2187_v20 = vsel %vm4188_vm3, 0, %v2065_v46 }
 0x284   : > { %v1572_v10 = vadd.f32 %v1511_v63, %v1446_v40 }
 0x285   : > { %v1958_v19 = vpack.c.bf16 %v1926_v52, %v1926_v52  ;;  %v1823_v31 = vadd.f32 %v1761_v15, %v1697_v61  ;;  %v1768_v12 = vpop.f32.mrf.mxu0 }
 0x287   : > { %v2022_v34 = vunpack.c.l.b16 %v1958_v19  ;;  %v1859_v3 = vmul.f32 %v5027_v38, %v1823_v31  ;;  %v1448_v19 = vadd.f32 %v4868_v33, %v4894_v62 }
 0x288   : > { %3915 = vmatmul.msk.bf16.gmra.mxu2 %vm639_vm4, %v6504_v28 }
 0x289   : > { %v5135_v51 = vpack.c.b16 %v2022_v34, %v2021_v50  ;;  %v1895_v4 = vadd.f32 %v5033_v29, %v1859_v3  ;;  %v2070_v3 = vshll.u32 %v5065_v26, 16 }
 0x28a   : > { %v1637_v15 = vpop.f32.mrf.mxu3 }
 0x28b   : > { %v1698_v39 = vadd.f32 %v1637_v15, %v1572_v10  ;;  %v1514_v47 = vpop.f32.mrf.mxu2  ;;  %3955 = vmatmul.msk.bf16.gmra.mxu1 %vm639_vm4, %v5135_v51  ;;  %v1927_v43 = vmax.f32 %v1895_v4, 0.0 }
 0x28c   : > { %v1573_v0 = vadd.f32 %v1514_v47, %v4889_v49  ;;  %v2069_v49 = vrot.slane %v2067_v11, 7 }
 0x28d   : > { %v1824_v35 = vadd.f32 %v1763_v1, %v1698_v39  ;;  %v1771_v24 = vpop.f32.mrf.mxu0  ;;  %v1959_v7 = vpack.c.bf16 %v1927_v43, %v1927_v43  ;;  %v5164_v39 = vpop.f32.mrf.mxu1 }
 0x28e   : > { %v2072_v62 = vor.u32 %v2070_v3, %v2069_v49 }
 0x28f   : > { %v1860_v44 = vmul.f32 %v5027_v38, %v1824_v35  ;;  %1679 = vmatmul.bf16.gmra.mxu3 %v6458_v42  ;;  %v2023_v31 = vunpack.c.l.b16 %v1959_v7 }
 0x290   : > { %3999 = vmatmul.msk.bf16.vlgmr.msrb.gmra.mxu0 %vm639_vm4, %v2187_v20  ;;  %v5171_v35 = vsel %vm4188_vm3, 0, %v2072_v62 }
 0x291   : > { %v1896_v53 = vadd.f32 %v5033_v29, %v1860_v44 }
 0x292   : > { %v1640_v56 = vpop.f32.mrf.mxu3 }
 0x293   : > { %v1928_v32 = vmax.f32 %v1896_v53, 0.0  ;;  %v1699_v36 = vadd.f32 %v1640_v56, %v1573_v0  ;;  %v1516_v1 = vpop.f32.mrf.mxu2 }
 0x294   : > { %v1574_v34 = vadd.f32 %v1516_v1, %v1448_v19 }
 0x295   : > { %v1960_v52 = vpack.c.bf16 %v1928_v32, %v1928_v32  ;;  %v1825_v61 = vadd.f32 %v1766_v57, %v1699_v36  ;;  %v1773_v63 = vpop.f32.mrf.mxu0  ;;  %v2074_v32 = vshrl.u32 %v5081_v60, 16  ;;  %v5180_v19 = vpop.f32.mrf.mxu1 }
 0x297   : > { %v2024_v30 = vunpack.c.l.b16 %v1960_v52  ;;  %v1861_v40 = vmul.f32 %v5027_v38, %v1825_v61  ;;  %v1450_v61 = vadd.f32 %v4887_v37, %v4908_v16  ;;  %v2076_v49 = vrot.slane %v2074_v32, 7 }
 0x298   : > { %3965 = vmatmul.msk.bf16.vlgmr.msrb.gmra.mxu2 %vm639_vm4, %v6504_v28 }
 0x299   : > { %v5156_v50 = vpack.c.b16 %v2024_v30, %v2023_v31  ;;  %v1897_v18 = vadd.f32 %v5033_v29, %v1861_v40  ;;  %v2203_v31 = vrot.slane %v2063_v41, 1 }
 0x29a   : > { %v1642_v57 = vpop.f32.mrf.mxu3 }
 0x29b   : > { %v1700_v10 = vadd.f32 %v1642_v57, %v1574_v34  ;;  %v1519_v33 = vpop.f32.mrf.mxu2  ;;  %3956 = vmatmul.msk.bf16.gmra.mxu1 %vm639_vm4, %v5156_v50  ;;  %v1929_v47 = vmax.f32 %v1897_v18, 0.0  ;;  %v2204_v37 = vor.u32 %v2203_v31, %v2060_v14 }
 0x29d   : > { %v1826_v15 = vadd.f32 %v1768_v12, %v1700_v10  ;;  %v1776_v4 = vpop.f32.mrf.mxu0  ;;  %v1575_v12 = vadd.f32 %v1519_v33, %v4903_v55  ;;  %v1961_v53 = vpack.c.bf16 %v1929_v47, %v1929_v47  ;;  %v5198_v47 = vsel %vm4501_vm7, %v2204_v37, 0 }
 0x29f   : > { %v1862_v46 = vmul.f32 %v5027_v38, %v1826_v15  ;;  %3982 = vmatmul.msk.bf16.vlgmr.msrb.gmra.mxu3 %vm639_vm4, %v6502_v2  ;;  %v2025_v30 = vunpack.c.l.b16 %v1961_v53 }
 0x2a0   : > { %4000 = vmatmul.msk.bf16.gmra.mxu0 %vm639_vm4, %v5171_v35 }
 0x2a1   : > { %v1898_v43 = vadd.f32 %v5033_v29, %v1862_v46 }
 0x2a2   : > { %v1645_v44 = vpop.f32.mrf.mxu3 }
 0x2a3   : > { %v1930_v0 = vmax.f32 %v1898_v43, 0.0  ;;  %v1701_v56 = vadd.f32 %v1645_v44, %v1575_v12  ;;  %v1521_v7 = vpop.f32.mrf.mxu2  ;;  %v5207_v12 = vpop.f32.mrf.mxu1 }
 0x2a4   : > { %v1576_v57 = vadd.f32 %v1521_v7, %v1450_v61 }
 0x2a5   : > { %v1962_v36 = vpack.c.bf16 %v1930_v0, %v1930_v0  ;;  %v1827_v1 = vadd.f32 %v1771_v24, %v1701_v56  ;;  %v1778_v52 = vpop.f32.mrf.mxu0  ;;  %v2077_v24 = vshll.u32 %v5081_v60, 16 }
 0x2a7   : > { %v2026_v40 = vunpack.c.l.b16 %v1962_v36  ;;  %v1863_v55 = vmul.f32 %v5027_v38, %v1827_v1  ;;  %v2079_v33 = vor.u32 %v2077_v24, %v2076_v49  ;;  %v2081_v1 = vshrl.u32 %v5097_v45, 16 }
 0x2a8   : > { %3966 = vmatmul.msk.bf16.gmra.mxu2 %vm639_vm4, %v2187_v20 }
 0x2a9   : > { %v5186_v34 = vpack.c.b16 %v2026_v40, %v2025_v30  ;;  %v1899_v16 = vadd.f32 %v5033_v29, %v1863_v55  ;;  %v5205_v14 = vsel %vm4188_vm3, 0, %v2079_v33  ;;  %v1452_v40 = vadd.f32 %v4901_v17, %v4922_v13 }
 0x2aa   : > { %v1647_v18 = vpop.f32.mrf.mxu3  ;;  %v2205_v55 = vrot.slane %v2070_v3, 1  ;;  %v2084_v17 = vshll.u32 %v5097_v45, 16 }
 0x2ab   : > { %v1702_v41 = vadd.f32 %v1647_v18, %v1576_v57  ;;  %v1524_v10 = vpop.f32.mrf.mxu2  ;;  %3957 = vmatmul.msk.bf16.gmra.mxu1 %vm639_vm4, %v5186_v34  ;;  %v1931_v46 = vmax.f32 %v1899_v16, 0.0  ;;  %v2083_v18 = vrot.slane %v2081_v1, 7 }
 0x2ac   : > { %v1577_v44 = vadd.f32 %v1524_v10, %v4915_v6  ;;  %v2206_v3 = vor.u32 %v2205_v55, %v2067_v11  ;;  %v6343_v55 = vshrl.u32 %v5115_v48, 16 }
 0x2ad   : > { %v1828_v20 = vadd.f32 %v1773_v63, %v1702_v41  ;;  %v1781_v62 = vpop.f32.mrf.mxu0  ;;  %v1963_v0 = vpack.c.bf16 %v1931_v46, %v1931_v46 }
 0x2af   : > { %v1864_v43 = vmul.f32 %v5027_v38, %v1828_v20  ;;  %3983 = vmatmul.msk.bf16.gmra.mxu3 %vm639_vm4, %v5198_v47  ;;  %v2027_v49 = vunpack.c.l.b16 %v1963_v0  ;;  %v2086_v20 = vor.u32 %v2084_v17, %v2083_v18  ;;  %v6506_v18 = vld [vmem:[#allocation41_spill] sm:$0xff] }
 0x2b0   : > { %4001 = vmatmul.msk.bf16.gmra.mxu0 %vm639_vm4, %v5205_v14 }
 0x2b1   : > { %v1900_v63 = vadd.f32 %v5033_v29, %v1864_v43  ;;  %v5244_v11 = vsel %vm4188_vm3, 0, %v2086_v20 }
 0x2b2   : > { %v1650_v53 = vpop.f32.mrf.mxu3 }
 0x2b3   : > { %v1932_v56 = vmax.f32 %v1900_v63, 0.0  ;;  %v1703_v7 = vadd.f32 %v1650_v53, %v1577_v44  ;;  %v1526_v36 = vpop.f32.mrf.mxu2  ;;  %v5237_v63 = vsel %vm4501_vm7, %v2206_v3, 0 }
 0x2b4   : > { %v1578_v16 = vadd.f32 %v1526_v36, %v1452_v40 }
 0x2b5   : > { %v1964_v61 = vpack.c.bf16 %v1932_v56, %v1932_v56  ;;  %v1829_v31 = vadd.f32 %v1776_v4, %v1703_v7  ;;  %v1783_v30 = vpop.f32.mrf.mxu0 }
 0x2b7   : > { %v2028_v57 = vunpack.c.l.b16 %v1964_v61  ;;  %v1865_v6 = vmul.f32 %v5027_v38, %v1829_v31 }
 0x2b8   : > { %v5221_v37 = vpop.f32.mrf.mxu1  ;;  %3967 = vmatmul.msk.bf16.gmra.mxu2 %vm639_vm4, %v5171_v35 }
 0x2b9   : > { %v5225_v4 = vpack.c.b16 %v2028_v57, %v2027_v49  ;;  %v1901_v41 = vadd.f32 %v5033_v29, %v1865_v6 }
 0x2ba   : > { %v1652_v13 = vpop.f32.mrf.mxu3 }
 0x2bb   : > { %v1704_v10 = vadd.f32 %v1652_v13, %v1578_v16  ;;  %v1529_v33 = vpop.f32.mrf.mxu2  ;;  %3958 = vmatmul.msk.bf16.gmra.mxu1 %vm639_vm4, %v5225_v4  ;;  %v1933_v44 = vmax.f32 %v1901_v41, 0.0  ;;  %v1454_v16 = vadd.f32 %v6506_v18, %v4934_v21  ;;  %v2207_v13 = vrot.slane %v2077_v24, 1 }
 0x2bc   : > { %v1579_v56 = vadd.f32 %v1529_v33, %v4929_v5  ;;  %v2091_v21 = vshll.u32 %v5115_v48, 16 }
 0x2bd   : > { %v1830_v46 = vadd.f32 %v1778_v52, %v1704_v10  ;;  %v1786_v43 = vpop.f32.mrf.mxu0  ;;  %v1965_v36 = vpack.c.bf16 %v1933_v44, %v1933_v44  ;;  %v2090_v10 = vrot.slane %v6343_v55, 7  ;;  %v2208_v24 = vor.u32 %v2207_v13, %v2074_v32 }
 0x2be   : > { %v2211_v2 = vrot.slane %v2091_v21, 1 }
 0x2bf   : > { %v1866_v53 = vmul.f32 %v5027_v38, %v1830_v46  ;;  %3984 = vmatmul.msk.bf16.gmra.mxu3 %vm639_vm4, %v5237_v63  ;;  %v2029_v3 = vunpack.c.l.b16 %v1965_v36 }
 0x2c0   : > { %v5246_v0 = vpop.f32.mrf.mxu1  ;;  %4002 = vmatmul.msk.bf16.gmra.mxu0 %vm639_vm4, %v5244_v11 }
 0x2c1   : > { %v1902_v52 = vadd.f32 %v5033_v29, %v1866_v53 }
 0x2c2   : > { %v1655_v7 = vpop.f32.mrf.mxu3 }
 0x2c3   : > { %v1934_v61 = vmax.f32 %v1902_v52, 0.0  ;;  %v1705_v31 = vadd.f32 %v1655_v7, %v1579_v56  ;;  %v1531_v40 = vpop.f32.mrf.mxu2  ;;  %v2093_v56 = vor.u32 %v2091_v21, %v2090_v10  ;;  %v6344_v10 = vshrl.u32 %v5135_v51, 16 }
 0x2c4   : > { %v1580_v20 = vadd.f32 %v1531_v40, %v1454_v16  ;;  %v6516_v21 = vshrl.u32 %v5115_v48, 16 }
 0x2c5   : > { %v1966_v49 = vpack.c.bf16 %v1934_v61, %v1934_v61  ;;  %v1831_v57 = vadd.f32 %v1781_v62, %v1705_v31  ;;  %v1788_v6 = vpop.f32.mrf.mxu0  ;;  %v5276_v61 = vsel %vm4501_vm7, %v2208_v24, 0  ;;  %v5283_v32 = vsel %vm4188_vm3, 0, %v2093_v56 }
 0x2c6   : > { %6507 = vst [vmem:[#allocation24_spill] sm:$0xff] %v5283_v32 }
 0x2c7   : > { %v2030_v41 = vunpack.c.l.b16 %v1966_v49  ;;  %v1867_v5 = vmul.f32 %v5027_v38, %v1831_v57  ;;  %v6508_v57 = vld [vmem:[#allocation22_spill] sm:$0xff] }
 0x2c8   : > { %v5260_v33 = vpop.f32.mrf.mxu1  ;;  %3968 = vmatmul.msk.bf16.gmra.mxu2 %vm639_vm4, %v5205_v14 }
 0x2c9   : > { %v5264_v62 = vpack.c.b16 %v2030_v41, %v2029_v3  ;;  %v1903_v44 = vadd.f32 %v5033_v29, %v1867_v5 }
 0x2ca   : > { %v1657_v46 = vpop.f32.mrf.mxu3 }
 0x2cb   : > { %v1706_v53 = vadd.f32 %v1657_v46, %v1580_v20  ;;  %v1534_v52 = vpop.f32.mrf.mxu2  ;;  %3959 = vmatmul.msk.bf16.gmra.mxu1 %vm639_vm4, %v5264_v62  ;;  %v1935_v31 = vmax.f32 %v1903_v44, 0.0  ;;  %v6509_v44 = vld [vmem:[#allocation21_spill] sm:$0xff] }
 0x2cc   : > { %v1581_v18 = vadd.f32 %v1534_v52, %v6508_v57 }
 0x2cd   : > { %v1832_v7 = vadd.f32 %v1783_v30, %v1706_v53  ;;  %v1791_v36 = vpop.f32.mrf.mxu0  ;;  %v1967_v13 = vpack.c.bf16 %v1935_v31, %v1935_v31  ;;  %v6510_v53 = vld [vmem:[#allocation9_spill] sm:$0xff]  ;;  %v2097_v31 = vrot.slane %v6344_v10, 7 }
 0x2ce   : > { %v1456_v56 = vadd.f32 %v6510_v53, %v6509_v44  ;;  %v6514_v10 = vld [vmem:[#allocation13_spill] sm:$0xff] }
 0x2cf   : > { %v1868_v40 = vmul.f32 %v5027_v38, %v1832_v7  ;;  %3985 = vmatmul.msk.bf16.gmra.mxu3 %vm639_vm4, %v5276_v61  ;;  %v2209_v7 = vrot.slane %v2084_v17, 1  ;;  %v2031_v55 = vunpack.c.l.b16 %v1967_v13 }
 0x2d0   : > { %v5285_v49 = vpop.f32.mrf.mxu1  ;;  %4003 = vmatmul.msk.bf16.gmra.mxu0 %vm639_vm4, %v5283_v32 }
 0x2d1   : > { %v1904_v30 = vadd.f32 %v5033_v29, %v1868_v40  ;;  %v2210_v17 = vor.u32 %v2209_v7, %v2081_v1 }
 0x2d2   : > { %v1660_v16 = vpop.f32.mrf.mxu3 }
 0x2d3   : > { %v1936_v3 = vmax.f32 %v1904_v30, 0.0  ;;  %v1707_v41 = vadd.f32 %v1660_v16, %v1581_v18  ;;  %v1536_v5 = vpop.f32.mrf.mxu2  ;;  %v6345_v18 = vshll.u32 %v5135_v51, 16 }
 0x2d4   : > { %v1582_v57 = vadd.f32 %v1536_v5, %v1456_v56  ;;  %v5315_v5 = vsel %vm4501_vm7, %v2210_v17, 0  ;;  %v6348_v17 = vshrl.u32 %v5156_v50, 16 }
 0x2d5   : > { %v1968_v20 = vpack.c.bf16 %v1936_v3, %v1936_v3  ;;  %v1833_v46 = vadd.f32 %v1786_v43, %v1707_v41  ;;  %v1793_v24 = vpop.f32.mrf.mxu0  ;;  %6511 = vst [vmem:[#allocation16_spill] sm:$0xff] %v5315_v5 }
 0x2d7   : > { %v2032_v40 = vunpack.c.l.b16 %v1968_v20  ;;  %v1869_v52 = vmul.f32 %v5027_v38, %v1833_v46  ;;  %v2100_v20 = vor.u32 %v6345_v18, %v2097_v31 }
 0x2d8   : > { %v5299_v30 = vpop.f32.mrf.mxu1  ;;  %3969 = vmatmul.msk.bf16.gmra.mxu2 %vm639_vm4, %v5244_v11 }
 0x2d9   : > { %v5303_v43 = vpack.c.b16 %v2032_v40, %v2031_v55  ;;  %v1905_v13 = vadd.f32 %v5033_v29, %v1869_v52  ;;  %v5322_v1 = vsel %vm4188_vm3, 0, %v2100_v20 }
 0x2da   : > { %v1662_v16 = vpop.f32.mrf.mxu3  ;;  %6512 = vst [vmem:[#allocation26_spill] sm:$0xff] %v5322_v1 }
 0x2db   : > { %v1708_v3 = vadd.f32 %v1662_v16, %v1582_v57  ;;  %v1539_v41 = vpop.f32.mrf.mxu2  ;;  %3960 = vmatmul.msk.bf16.gmra.mxu1 %vm639_vm4, %v5303_v43  ;;  %v1937_v44 = vmax.f32 %v1905_v13, 0.0 }
 0x2dc   : > { %v1583_v7 = vadd.f32 %v1539_v41, %v4957_v59  ;;  %v2104_v41 = vrot.slane %v6348_v17, 7  ;;  %v6519_v17 = vld [vmem:[#allocation25_spill] sm:$0xff] }
 0x2dd   : > { %v1834_v46 = vadd.f32 %v1788_v6, %v1708_v3  ;;  %v1796_v55 = vpop.f32.mrf.mxu0  ;;  %v1969_v52 = vpack.c.bf16 %v1937_v44, %v1937_v44 }
 0x2df   : > { %v1870_v53 = vmul.f32 %v5027_v38, %v1834_v46  ;;  %3986 = vmatmul.msk.bf16.gmra.mxu3 %vm639_vm4, %v5315_v5  ;;  %v6513_v46 = vld [vmem:[#allocation23_spill] sm:$0xff]  ;;  %v2033_v28 = vunpack.c.l.b16 %v1969_v52 }
 0x2e0   : > { %v5324_v56 = vpop.f32.mrf.mxu1  ;;  %4004 = vmatmul.msk.bf16.gmra.mxu0 %vm639_vm4, %v5322_v1  ;;  %v1458_v18 = vadd.f32 %v6514_v10, %v6513_v46  ;;  %v6349_v10 = vshll.u32 %v5156_v50, 16 }
 0x2e1   : > { %v1906_v6 = vadd.f32 %v5033_v29, %v1870_v53 }
 0x2e2   : > { %v1665_v40 = vpop.f32.mrf.mxu3 }
 0x2e3   : > { %v1938_v31 = vmax.f32 %v1906_v6, 0.0  ;;  %v1709_v57 = vadd.f32 %v1665_v40, %v1583_v7  ;;  %v1541_v16 = vpop.f32.mrf.mxu2  ;;  %v2212_v40 = vor.u32 %v2211_v2, %v6516_v21 }
 0x2e4   : > { %v1584_v6 = vadd.f32 %v1541_v16, %v1458_v18 }
 0x2e5   : > { %v1970_v13 = vpack.c.bf16 %v1938_v31, %v1938_v31  ;;  %v1835_v3 = vadd.f32 %v1791_v36, %v1709_v57  ;;  %v1798_v20 = vpop.f32.mrf.mxu0  ;;  %v5354_v18 = vsel %vm4501_vm7, %v2212_v40, 0 }
 0x2e6   : > { %6517 = vst [vmem:[#allocation28_spill] sm:$0xff] %v5354_v18 }
 0x2e7   : > { %v2034_v53 = vunpack.c.l.b16 %v1970_v13  ;;  %v1871_v59 = vmul.f32 %v5027_v38, %v1835_v3  ;;  %v2107_v13 = vor.u32 %v6349_v10, %v2104_v41  ;;  %v6520_v10 = vld [vmem:[#allocation11_spill] sm:$0xff] }
 0x2e8   : > { %v5338_v44 = vpop.f32.mrf.mxu1  ;;  %3970 = vmatmul.msk.bf16.gmra.mxu2 %vm639_vm4, %v5283_v32  ;;  %v1460_v42 = vadd.f32 %v6520_v10, %v6519_v17  ;;  %v6357_v17 = vshll.u32 %v5186_v34, 16 }
 0x2e9   : > { %v5342_v36 = vpack.c.b16 %v2034_v53, %v2033_v28  ;;  %v1907_v52 = vadd.f32 %v5033_v29, %v1871_v59  ;;  %v5361_v2 = vsel %vm4188_vm3, 0, %v2107_v13 }
 0x2ea   : > { %v1667_v7 = vpop.f32.mrf.mxu3  ;;  %6518 = vst [vmem:[#allocation27_spill] sm:$0xff] %v5361_v2 }
 0x2eb   : > { %6515 = vst [vmem:[#allocation14_spill] sm:$0xff] %v5342_v36  ;;  %v1710_v31 = vadd.f32 %v1667_v7, %v1584_v6  ;;  %v1544_v57 = vpop.f32.mrf.mxu2  ;;  %3961 = vmatmul.msk.bf16.gmra.mxu1 %vm639_vm4, %v5342_v36  ;;  %v1939_v16 = vmax.f32 %v1907_v52, 0.0  ;;  %v6356_v52 = vshrl.u32 %v5186_v34, 16 }
 0x2ec   : > { %v1585_v59 = vadd.f32 %v1544_v57, %v4971_v22 }
 0x2ed   : > { %v1836_v3 = vadd.f32 %v1793_v24, %v1710_v31  ;;  %v1801_v28 = vpop.f32.mrf.mxu0  ;;  %v1971_v6 = vpack.c.bf16 %v1939_v16, %v1939_v16  ;;  %v2111_v57 = vrot.slane %v6356_v52, 7  ;;  %v1462_v52 = vadd.f32 %v4995_v25, %v4998_v9  ;;  %v4032_v9 = vld [vmem:[%s6292_s2 + $0xa] sm:$0x3] }
 0x2ef   : > { %v1872_v46 = vmul.f32 %v5027_v38, %v1836_v3  ;;  %3987 = vmatmul.msk.bf16.gmra.mxu3 %vm639_vm4, %v5354_v18  ;;  %v6521_v18 = vshll.u32 %v5135_v51, 16 }
 0x2f0   : > { %v5363_v53 = vpop.f32.mrf.mxu1  ;;  %4005 = vmatmul.msk.bf16.gmra.mxu0 %vm639_vm4, %v5361_v2 }
 0x2f1   : > { %v1908_v24 = vadd.f32 %v5033_v29, %v1872_v46  ;;  %v2213_v32 = vrot.slane %v6521_v18, 1  ;;  %v2035_v46 = vunpack.c.l.b16 %v1971_v6  ;;  %v6523_v18 = vshrl.u32 %v5135_v51, 16 }
 0x2f2   : > { %v1670_v41 = vpop.f32.mrf.mxu3 }
 0x2f3   : > { %v1940_v7 = vmax.f32 %v1908_v24, 0.0  ;;  %v1711_v21 = vadd.f32 %v1670_v41, %v1585_v59  ;;  %v1546_v40 = vpop.f32.mrf.mxu2  ;;  %v2214_v59 = vor.u32 %v2213_v32, %v6523_v18 }
 0x2f4   : > { %v1586_v24 = vadd.f32 %v1546_v40, %v1460_v42 }
 0x2f5   : > { %v1972_v31 = vpack.c.bf16 %v1940_v7, %v1940_v7  ;;  %v1837_v3 = vadd.f32 %v1796_v55, %v1711_v21  ;;  %v5370_v13 = vpop.f32.mrf.mxu0  ;;  %v2114_v21 = vor.u32 %v6357_v17, %v2111_v57  ;;  %v5397_v42 = vsel %vm4501_vm7, %v2214_v59, 0 }
 0x2f6   : > { %6524 = vst [vmem:[#allocation29_spill] sm:$0xff] %v5397_v42  ;;  %v6526_v17 = vshll.u32 %v5156_v50, 16 }
 0x2f7   : > { %v2036_v5 = vunpack.c.l.b16 %v1972_v31  ;;  %v1873_v22 = vmul.f32 %v5027_v38, %v1837_v3  ;;  %v5404_v3 = vsel %vm4188_vm3, 0, %v2114_v21 }
 0x2f8   : > { %v5379_v16 = vpop.f32.mrf.mxu1  ;;  %3971 = vmatmul.msk.bf16.gmra.mxu2 %vm639_vm4, %v5322_v1  ;;  %6525 = vst [vmem:[#allocation17_spill] sm:$0xff] %v5404_v3 }
 0x2f9   : > { %v5383_v55 = vpack.c.b16 %v2036_v5, %v2035_v46  ;;  %v1909_v41 = vadd.f32 %v5033_v29, %v1873_v22 }
 0x2fa   : > { %v1672_v10 = vpop.f32.mrf.mxu3 }
 0x2fb   : > { %6522 = vst [vmem:[#allocation18_spill] sm:$0xff] %v5383_v55  ;;  %v1712_v6 = vadd.f32 %v1672_v10, %v1586_v24  ;;  %v1549_v7 = vpop.f32.mrf.mxu2  ;;  %3962 = vmatmul.msk.bf16.gmra.mxu1 %vm639_vm4, %v5383_v55  ;;  %v1941_v40 = vmax.f32 %v1909_v41, 0.0  ;;  %v6361_v41 = vshrl.u32 %v5225_v4, 16 }
 0x2fc   : > { %v1587_v22 = vadd.f32 %v1549_v7, %v4991_v54 }
 0x2fd   : > { %v1838_v31 = vadd.f32 %v1798_v20, %v1712_v6  ;;  %v5393_v5 = vpop.f32.mrf.mxu0  ;;  %v1973_v24 = vpack.c.bf16 %v1941_v40, %v1941_v40  ;;  %v2118_v7 = vrot.slane %v6361_v41, 7  ;;  %v6531_v41 = vshll.u32 %v5186_v34, 16 }
 0x2ff   : > { %v1874_v32 = vmul.f32 %v5027_v38, %v1838_v31  ;;  %3988 = vmatmul.msk.bf16.gmra.mxu3 %vm639_vm4, %v5397_v42  ;;  %v2215_v42 = vrot.slane %v6526_v17, 1  ;;  %v4049_v17 = vld [vmem:[%s6292_s2 + $0xc] sm:$0x3] }
 0x300   : > { %v5406_v46 = vpop.f32.mrf.mxu1  ;;  %4006 = vmatmul.msk.bf16.gmra.mxu0 %vm639_vm4, %v5404_v3 }
 0x301   : > { %v1910_v20 = vadd.f32 %v5033_v29, %v1874_v32  ;;  %v2037_v32 = vunpack.c.l.b16 %v1973_v24  ;;  %v6528_v24 = vshrl.u32 %v5156_v50, 16 }
 0x302   : > { %v1675_v57 = vpop.f32.mrf.mxu3 }
 0x303   : > { %v1942_v10 = vmax.f32 %v1910_v20, 0.0  ;;  %v1713_v18 = vadd.f32 %v1675_v57, %v1587_v22  ;;  %v1551_v59 = vpop.f32.mrf.mxu2  ;;  %v4066_v22 = vld [vmem:[%s6292_s2 + $0xe] sm:$0x3] }
 0x304   : > { %v1588_v25 = vadd.f32 %v1551_v59, %v1462_v52  ;;  %v3089_v52 = vsel %vm672_vm0, %v4049_v17, 0 }
 0x305   : > { %v1974_v6 = vpack.c.bf16 %v1942_v10, %v1942_v10  ;;  %v1839_v31 = vadd.f32 %v1801_v28, %v1713_v18  ;;  %v5413_v21 = vpop.f32.mrf.mxu0  ;;  %v6362_v28 = vshll.u32 %v5225_v4, 16  ;;  %v2216_v10 = vor.u32 %v2215_v42, %v6528_v24  ;;  %3098 = vmatpush.bf16.msra.mxu3 %v3089_v52  ;;  %v4082_v42 = vld [vmem:[%s6292_s2 + $0x10] sm:$0x3] }
 0x306   : > { %v3215_v18 = vsel %vm672_vm0, %v4066_v22, 0 }
 0x307   : > { %v2038_v1 = vunpack.c.l.b16 %v1974_v6  ;;  %v1875_v54 = vmul.f32 %v5027_v38, %v1839_v31  ;;  %3224 = vmatpush.bf16.msra.mxu0 %v3215_v18 }
 0x308   : > { %v5422_v40 = vpop.f32.mrf.mxu1  ;;  %3972 = vmatmul.msk.bf16.gmra.mxu2 %vm639_vm4, %v5361_v2 }
 0x309   : > { %v5427_v20 = vpack.c.b16 %v2038_v1, %v2037_v32  ;;  %v2963_v1 = vsel %vm672_vm0, %v4032_v9, 0  ;;  %v1911_v59 = vadd.f32 %v5033_v29, %v1875_v54  ;;  %v2121_v32 = vor.u32 %v6362_v28, %v2118_v7 }
 0x30a   : > { %v1677_v57 = vpop.f32.mrf.mxu3  ;;  %2972 = vmatpush.bf16.msra.mxu2 %v2963_v1  ;;  %v3341_v54 = vsel %vm672_vm0, %v4082_v42, 0  ;;  %v2217_v28 = vrot.slane %v6531_v41, 1 }
 0x30b   : > { %6527 = vst [vmem:[#allocation31_spill] sm:$0xff] %v5427_v20  ;;  %v1714_v6 = vadd.f32 %v1677_v57, %v1588_v25  ;;  %v1554_v31 = vpop.f32.mrf.mxu2  ;;  %3963 = vmatmul.msk.bf16.gmra.mxu1 %vm639_vm4, %v5427_v20  ;;  %v5455_v25 = vsel %vm4501_vm7, %v2216_v10, 0  ;;  %v1943_v22 = vmax.f32 %v1911_v59, 0.0  ;;  %v5462_v57 = vsel %vm4188_vm3, 0, %v2121_v32 }
 0x30c   : > { %6529 = vst [vmem:[#allocation30_spill] sm:$0xff] %v5455_v25  ;;  %3350 = vmatpush.bf16.msra.mxu1 %v3341_v54  ;;  %v1589_v10 = vadd.f32 %v1554_v31, %v5009_v27  ;;  %v1464_v54 = vadd.f32 %v5164_v39, %v5017_v23  ;;  %v4115_v27 = vld [vmem:[%s6293_s3] ss:$0 sm:$0xff]  ;;  %v2126_v39 = vshll.u32 %v5264_v62, 16 }
 0x30d   : > { %v1840_v9 = vadd.f32 %v5370_v13, %v1714_v6  ;;  %v2717_v17 = vpop.f32.mrf.mxu0  ;;  %6530 = vst [vmem:[#allocation5_spill] sm:$0xff] %v5462_v57  ;;  %v1975_v52 = vpack.c.bf16 %v1943_v22, %v1943_v22  ;;  %v6363_v6 = vshrl.u32 %v5264_v62, 16 }
 0x30f   : > { %v1876_v7 = vmul.f32 %v5027_v38, %v1840_v9  ;;  %3989 = vmatmul.msk.bf16.gmra.mxu3 %vm639_vm4, %v5455_v25  ;;  %v2125_v22 = vrot.slane %v6363_v6, 7 }
 0x310   : > { %v5464_v24 = vpop.f32.mrf.mxu1  ;;  %4007 = vmatmul.msk.bf16.gmra.mxu0 %vm639_vm4, %v5462_v57 }
 0x311   : > { %v1912_v13 = vadd.f32 %v5033_v29, %v1876_v7  ;;  %v2039_v29 = vunpack.c.l.b16 %v1975_v52  ;;  %v4116_v52 = vld [vmem:[%s6294_s4] ss:$0 sm:$0xff] }
 0x312   : > { %v1680_v1 = vpop.f32.mrf.mxu3 }
 0x313   : > { %v1944_v18 = vmax.f32 %v1912_v13, 0.0  ;;  %v1715_v38 = vadd.f32 %v1680_v1, %v1589_v10  ;;  %v1556_v59 = vpop.f32.mrf.mxu2  ;;  %v6533_v10 = vshrl.u32 %v5186_v34, 16 }
 0x314   : > { %v1590_v23 = vadd.f32 %v1556_v59, %v1464_v54 }
 0x315   : > { %v1976_v42 = vpack.c.bf16 %v1944_v18, %v1944_v18  ;;  %v1841_v32 = vadd.f32 %v5393_v5, %v1715_v38  ;;  %v2719_v9 = vpop.f32.mrf.mxu0  ;;  %v2218_v1 = vor.u32 %v2217_v28, %v6533_v10 }
 0x317   : > { %v2040_v7 = vunpack.c.l.b16 %v1976_v42  ;;  %v1877_v31 = vmul.f32 %v4115_v27, %v1841_v32  ;;  %v2128_v32 = vor.u32 %v2126_v39, %v2125_v22  ;;  %v5498_v54 = vsel %vm4501_vm7, %v2218_v1, 0 }
 0x318   : > { %v5481_v13 = vpop.f32.mrf.mxu1  ;;  %3973 = vmatmul.msk.bf16.gmra.mxu2 %vm639_vm4, %v5404_v3  ;;  %6534 = vst [vmem:[#allocation3_spill] sm:$0xff] %v5498_v54 }
 0x319   : > { %v5485_v5 = vpack.c.b16 %v2040_v7, %v2039_v29  ;;  %v1913_v18 = vadd.f32 %v4116_v52, %v1877_v31  ;;  %v5504_v31 = vsel %vm4188_vm3, 0, %v2128_v32  ;;  %v6536_v32 = vshll.u32 %v5225_v4, 16 }
 0x31a   : > { %v1682_v41 = vpop.f32.mrf.mxu3  ;;  %6535 = vst [vmem:[#allocation33_spill] sm:$0xff] %v5504_v31 }
 0x31b   : > { %6532 = vst [vmem:[#allocation32_spill] sm:$0xff] %v5485_v5  ;;  %v1716_v38 = vadd.f32 %v1682_v41, %v1590_v23  ;;  %3964 = vmatmul.msk.bf16.gmra.mxu1 %vm639_vm4, %v5485_v5  ;;  %v2449_v42 = vpop.f32.mrf.mxu2  ;;  %v1945_v7 = vmax.f32 %v1913_v18, 0.0  ;;  %v2219_v3 = vrot.slane %v6536_v32, 1 }
 0x31c   : > { %v2450_v22 = vadd.f32 %v2449_v42, %v5180_v19 }
 0x31d   : > { %v1842_v29 = vadd.f32 %v5413_v21, %v1716_v38  ;;  %v2722_v59 = vpop.f32.mrf.mxu0  ;;  %v1977_v10 = vpack.c.bf16 %v1945_v7, %v1945_v7  ;;  %v6371_v38 = vshrl.u32 %v5303_v43, 16 }
 0x31f   : > { %v1878_v28 = vmul.f32 %v4115_v27, %v1842_v29  ;;  %3990 = vmatmul.msk.bf16.gmra.mxu3 %vm639_vm4, %v5498_v54  ;;  %v2041_v25 = vunpack.c.l.b16 %v1977_v10 }
 0x320   : > { %v5506_v23 = vpop.f32.mrf.mxu1  ;;  %4008 = vmatmul.msk.bf16.gmra.mxu0 %vm639_vm4, %v5504_v31 }
 0x321   : > { %v1914_v21 = vadd.f32 %v4116_v52, %v1878_v28  ;;  %v2132_v52 = vrot.slane %v6371_v38, 7 }
 0x322   : > { %v2588_v41 = vpop.f32.mrf.mxu3 }
 0x323   : > { %v1946_v1 = vmax.f32 %v1914_v21, 0.0  ;;  %v2668_v18 = vadd.f32 %v2588_v41, %v2450_v22  ;;  %v2451_v27 = vpop.f32.mrf.mxu2  ;;  %v6537_v21 = vshrl.u32 %v5225_v4, 16 }
 0x324   : > { %v2452_v7 = vadd.f32 %v2451_v27, %v5207_v12 }
 0x325   : > { %v1978_v29 = vpack.c.bf16 %v1946_v1, %v1946_v1  ;;  %v2724_v6 = vpop.f32.mrf.mxu0  ;;  %v5512_v54 = vadd.f32 %v2717_v17, %v2668_v18  ;;  %v2133_v17 = vshll.u32 %v5303_v43, 16  ;;  %v2220_v22 = vor.u32 %v2219_v3, %v6537_v21 }
 0x326   : > { %v2137_v21 = vshrl.u32 %v5342_v36, 16 }
 0x327   : > { %v2042_v2 = vunpack.c.l.b16 %v1978_v29  ;;  %v2135_v1 = vor.u32 %v2133_v17, %v2132_v52  ;;  %v5538_v27 = vsel %vm4501_vm7, %v2220_v22, 0 }
 0x328   : > { %v5518_v19 = vpop.f32.mrf.mxu1  ;;  %3974 = vmatmul.msk.bf16.gmra.mxu2 %vm639_vm4, %v5462_v57  ;;  %6538 = vst [vmem:[#allocation6_spill] sm:$0xff] %v5538_v27  ;;  %v2147_v57 = vshll.u32 %v5383_v55, 16 }
 0x329   : > { %v5522_v42 = vpack.c.b16 %v2042_v2, %v2041_v25 }
 0x32a   : > { %v2590_v28 = vpop.f32.mrf.mxu3 }
 0x32b   : > { %v2669_v41 = vadd.f32 %v2590_v28, %v2452_v7  ;;  %v2454_v10 = vpop.f32.mrf.mxu2  ;;  %4016 = vmatmul.msk.bf16.vlgmr.msrb.gmra.mxu1 %vm639_vm4, %v5050_v58  ;;  %v6370_v18 = vshll.u32 %v5522_v42, 16  ;;  %v6372_v2 = vshrl.u32 %v5522_v42, 16  ;;  %v5544_v58 = vsel %vm4188_vm3, 0, %v2135_v1 }
 0x32c   : > { %6539 = vst [vmem:[#allocation34_spill] sm:$0xff] %v5544_v58  ;;  %v2455_v32 = vadd.f32 %v2454_v10, %v5221_v37  ;;  %v2221_v1 = vrot.slane %v2126_v39, 1  ;;  %v6541_v10 = vshrl.u32 %v5264_v62, 16 }
 0x32d   : > { %v2727_v29 = vpop.f32.mrf.mxu0  ;;  %v5532_v25 = vadd.f32 %v2719_v9, %v2669_v41  ;;  %v2233_v12 = vrot.slane %v6370_v18, 1  ;;  %v2139_v18 = vrot.slane %v2137_v21, 7 }
 0x32f   : > { %3991 = vmatmul.msk.bf16.gmra.mxu3 %vm639_vm4, %v5538_v27  ;;  %v5548_v3 = vor.u32 %v2233_v12, %v6372_v2  ;;  %v2140_v2 = vshll.u32 %v5342_v36, 16 }
 0x330   : > { %v5550_v9 = vpop.f32.mrf.mxu1  ;;  %4009 = vmatmul.msk.bf16.gmra.mxu0 %vm639_vm4, %v5544_v58 }
 0x331   : > { %6540 = vst [vmem:[#allocation4_spill] sm:$0xff] %v5548_v3  ;;  %v2142_v39 = vor.u32 %v2140_v2, %v2139_v18 }
 0x332   : > { %v2593_v52 = vpop.f32.mrf.mxu3 }
 0x333   : > { %v2670_v7 = vadd.f32 %v2593_v52, %v2455_v32  ;;  %v2456_v28 = vpop.f32.mrf.mxu2  ;;  %v2222_v32 = vor.u32 %v2221_v1, %v6541_v10 }
 0x334   : > { %v2457_v12 = vadd.f32 %v2456_v28, %v5246_v0  ;;  %v5578_v0 = vsel %vm4188_vm3, 0, %v2142_v39 }
 0x335   : > { %v2729_v22 = vpop.f32.mrf.mxu0  ;;  %v5556_v41 = vadd.f32 %v2722_v59, %v2670_v7  ;;  %6543 = vst [vmem:[#allocation7_spill] sm:$0xff] %v5578_v0 }
 0x338   : > { %v5558_v38 = vpop.f32.mrf.mxu1  ;;  %3975 = vmatmul.msk.bf16.gmra.mxu2 %vm639_vm4, %v5504_v31  ;;  %v5572_v31 = vsel %vm4501_vm7, %v2222_v32, 0 }
 0x339   : > { %6542 = vst [vmem:[#allocation35_spill] sm:$0xff] %v5572_v31 }
 0x33a   : > { %v2595_v37 = vpop.f32.mrf.mxu3 }
 0x33b   : > { %v2671_v52 = vadd.f32 %v2595_v37, %v2457_v12  ;;  %v2459_v3 = vpop.f32.mrf.mxu2  ;;  %4017 = vmatmul.msk.bf16.gmra.mxu1 %vm639_vm4, %v5065_v26  ;;  %v2144_v37 = vshrl.u32 %v5383_v55, 16 }
 0x33c   : > { %v2460_v18 = vadd.f32 %v2459_v3, %v5260_v33  ;;  %v6544_v3 = vshrl.u32 %v5303_v43, 16 }
 0x33d   : > { %v2732_v59 = vpop.f32.mrf.mxu0  ;;  %v5568_v7 = vadd.f32 %v2724_v6, %v2671_v52  ;;  %v2223_v52 = vrot.slane %v2133_v17, 1 }
 0x33f   : > { %3992 = vmatmul.msk.bf16.gmra.mxu3 %vm639_vm4, %v5572_v31  ;;  %v2146_v31 = vrot.slane %v2144_v37, 7 }
 0x340   : > { %v5580_v28 = vpop.f32.mrf.mxu1  ;;  %4010 = vmatmul.msk.bf16.gmra.mxu0 %vm639_vm4, %v5578_v0 }
 0x341   : > { %v2149_v17 = vor.u32 %v2147_v57, %v2146_v31 }
 0x342   : > { %v2598_v6 = vpop.f32.mrf.mxu3 }
 0x343   : > { %v2672_v1 = vadd.f32 %v2598_v6, %v2460_v18  ;;  %v2461_v12 = vpop.f32.mrf.mxu2  ;;  %v2224_v18 = vor.u32 %v2223_v52, %v6544_v3 }
 0x344   : > { %v2462_v39 = vadd.f32 %v2461_v12, %v5285_v49  ;;  %v5608_v49 = vsel %vm4188_vm3, 0, %v2149_v17 }
 0x345   : > { %v2734_v10 = vpop.f32.mrf.mxu0  ;;  %v5586_v32 = vadd.f32 %v2727_v29, %v2672_v1  ;;  %6547 = vst [vmem:[#allocation12_spill] sm:$0xff] %v5608_v49 }
 0x348   : > { %v5588_v27 = vpop.f32.mrf.mxu1  ;;  %3976 = vmatmul.msk.bf16.gmra.mxu2 %vm639_vm4, %v5544_v58  ;;  %v5602_v58 = vsel %vm4501_vm7, %v2224_v18, 0 }
 0x349   : > { %6546 = vst [vmem:[#allocation10_spill] sm:$0xff] %v5602_v58 }
 0x34a   : > { %v2600_v33 = vpop.f32.mrf.mxu3 }
 0x34b   : > { %v2673_v6 = vadd.f32 %v2600_v33, %v2462_v39  ;;  %v2464_v36 = vpop.f32.mrf.mxu2  ;;  %4018 = vmatmul.msk.bf16.gmra.mxu1 %vm639_vm4, %v5081_v60  ;;  %v2151_v33 = vshrl.u32 %v5427_v20, 16 }
 0x34c   : > { %v2465_v31 = vadd.f32 %v2464_v36, %v5299_v30 }
 0x34d   : > { %v2737_v29 = vpop.f32.mrf.mxu0  ;;  %v5598_v1 = vadd.f32 %v2729_v22, %v2673_v6  ;;  %v2225_v6 = vrot.slane %v2140_v2, 1 }
 0x34f   : > { %6545 = vst [vmem:[#allocation8_spill] sm:$0xff] %v5598_v1  ;;  %3993 = vmatmul.msk.bf16.gmra.mxu3 %vm639_vm4, %v5602_v58  ;;  %v2153_v58 = vrot.slane %v2151_v33, 7  ;;  %v2154_v1 = vshll.u32 %v5427_v20, 16  ;;  %v2226_v36 = vor.u32 %v2225_v6, %v2137_v21  ;;  %v2161_v20 = vshll.u32 %v5485_v5, 16 }
 0x350   : > { %v5610_v12 = vpop.f32.mrf.mxu1  ;;  %4011 = vmatmul.msk.bf16.gmra.mxu0 %vm639_vm4, %v5608_v49 }
 0x352   : > { %v2603_v22 = vpop.f32.mrf.mxu3 }
 0x353   : > { %v2674_v52 = vadd.f32 %v2603_v22, %v2465_v31  ;;  %v2466_v39 = vpop.f32.mrf.mxu2 }
 0x354   : > { %v2467_v17 = vadd.f32 %v2466_v39, %v5324_v56 }
 0x355   : > { %v2739_v3 = vpop.f32.mrf.mxu0  ;;  %v5616_v18 = vadd.f32 %v2732_v59, %v2674_v52  ;;  %v2156_v59 = vor.u32 %v2154_v1, %v2153_v58 }
 0x357   : > { %6548 = vst [vmem:[#allocation36_spill] sm:$0xff] %v5616_v18  ;;  %v5630_v18 = vsel %vm4501_vm7, %v2226_v36, 0  ;;  %v5636_v56 = vsel %vm4188_vm3, 0, %v2156_v59 }
 0x358   : > { %v5618_v55 = vpop.f32.mrf.mxu1  ;;  %3977 = vmatmul.msk.bf16.gmra.mxu2 %vm639_vm4, %v5578_v0  ;;  %6549 = vst [vmem:[#allocation37_spill] sm:$0xff] %v5630_v18 }
 0x35a   : > { %v2605_v30 = vpop.f32.mrf.mxu3 }
 0x35b   : > { %v2675_v31 = vadd.f32 %v2605_v30, %v2467_v17  ;;  %v2469_v22 = vpop.f32.mrf.mxu2  ;;  %4019 = vmatmul.msk.bf16.gmra.mxu1 %vm639_vm4, %v5097_v45  ;;  %v2158_v17 = vshrl.u32 %v5485_v5, 16 }
 0x35c   : > { %v2470_v58 = vadd.f32 %v2469_v22, %v5338_v44 }
 0x35d   : > { %v2742_v52 = vpop.f32.mrf.mxu0  ;;  %v5626_v2 = vadd.f32 %v2734_v10, %v2675_v31  ;;  %v2227_v31 = vrot.slane %v2147_v57, 1 }
 0x35f   : > { %3994 = vmatmul.msk.bf16.gmra.mxu3 %vm639_vm4, %v5630_v18  ;;  %v2160_v18 = vrot.slane %v2158_v17, 7  ;;  %v2228_v22 = vor.u32 %v2227_v31, %v2144_v37 }
 0x360   : > { %v5638_v21 = vpop.f32.mrf.mxu1  ;;  %4012 = vmatmul.msk.bf16.gmra.mxu0 %vm639_vm4, %v5636_v56 }
 0x362   : > { %v2608_v10 = vpop.f32.mrf.mxu3 }
 0x363   : > { %v2676_v39 = vadd.f32 %v2608_v10, %v2470_v58  ;;  %v2471_v6 = vpop.f32.mrf.mxu2 }
 0x364   : > { %v2472_v59 = vadd.f32 %v2471_v6, %v5363_v53 }
 0x365   : > { %v2744_v30 = vpop.f32.mrf.mxu0  ;;  %v5644_v36 = vadd.f32 %v2737_v29, %v2676_v39  ;;  %v2163_v29 = vor.u32 %v2161_v20, %v2160_v18 }
 0x367   : > { %6550 = vst [vmem:[#allocation15_spill] sm:$0xff] %v5644_v36  ;;  %v5658_v36 = vsel %vm4501_vm7, %v2228_v22, 0  ;;  %v5664_v53 = vsel %vm4188_vm3, 0, %v2163_v29  ;;  %v2229_v22 = vrot.slane %v2154_v1, 1 }
 0x368   : > { %v5646_v0 = vpop.f32.mrf.mxu1  ;;  %3978 = vmatmul.msk.bf16.gmra.mxu2 %vm639_vm4, %v5608_v49  ;;  %6552 = vst [vmem:[#allocation38_spill] sm:$0xff] %v5658_v36 }
 0x36a   : > { %v2610_v44 = vpop.f32.mrf.mxu3 }
 0x36b   : > { %v2677_v58 = vadd.f32 %v2610_v44, %v2472_v59  ;;  %v2474_v10 = vpop.f32.mrf.mxu2  ;;  %4020 = vmatmul.msk.bf16.gmra.mxu1 %vm639_vm4, %v5115_v48 }
 0x36c   : > { %v2475_v18 = vadd.f32 %v2474_v10, %v5379_v16 }
 0x36d   : > { %v2747_v39 = vpop.f32.mrf.mxu0  ;;  %v5654_v57 = vadd.f32 %v2739_v3, %v2677_v58  ;;  %v6553_v58 = vshrl.u32 %v5522_v42, 16 }
 0x36f   : > { %6551 = vst [vmem:[#allocation39_spill] sm:$0xff] %v5654_v57  ;;  %3995 = vmatmul.msk.bf16.gmra.mxu3 %vm639_vm4, %v5658_v36  ;;  %v2167_v36 = vrot.slane %v6553_v58, 7  ;;  %v2230_v57 = vor.u32 %v2229_v22, %v2151_v33  ;;  %v2231_v58 = vrot.slane %v2161_v20, 1 }
 0x370   : > { %v5666_v37 = vpop.f32.mrf.mxu1  ;;  %4013 = vmatmul.msk.bf16.gmra.mxu0 %vm639_vm4, %v5664_v53 }
 0x372   : > { %v2613_v3 = vpop.f32.mrf.mxu3 }
 0x373   : > { %v2678_v6 = vadd.f32 %v2613_v3, %v2475_v18  ;;  %v2476_v31 = vpop.f32.mrf.mxu2 }
 0x374   : > { %v2477_v29 = vadd.f32 %v2476_v31, %v5406_v46 }
 0x375   : > { %v2749_v59 = vpop.f32.mrf.mxu0  ;;  %v5671_v44 = vadd.f32 %v2742_v52, %v2678_v6  ;;  %v6554_v52 = vshll.u32 %v5522_v42, 16  ;;  %v5688_v6 = vsel %vm4501_vm7, %v2230_v57, 0 }
 0x377   : > { %v2170_v1 = vor.u32 %v6554_v52, %v2167_v36  ;;  %v2232_v52 = vor.u32 %v2231_v58, %v2158_v17 }
 0x378   : > { %v5675_v49 = vpop.f32.mrf.mxu1  ;;  %3979 = vmatmul.msk.bf16.gmra.mxu2 %vm639_vm4, %v5636_v56 }
 0x379   : > { %v5694_v46 = vsel %vm4188_vm3, 0, %v2170_v1  ;;  %v5714_v20 = vsel %vm4501_vm7, %v2232_v52, 0 }
 0x37a   : > { %v2615_v5 = vpop.f32.mrf.mxu3  ;;  %6555 = vst [vmem:[#allocation40_spill] sm:$0xff] %v5694_v46 }
 0x37b   : > { %v2679_v16 = vadd.f32 %v2615_v5, %v2477_v29  ;;  %v2479_v10 = vpop.f32.mrf.mxu2  ;;  %4021 = vmatmul.msk.bf16.gmra.mxu1 %vm639_vm4, %v5135_v51 }
 0x37c   : > { %v2480_v33 = vadd.f32 %v2479_v10, %v5422_v40 }
 0x37d   : > { %v2752_v18 = vpop.f32.mrf.mxu0  ;;  %v5684_v3 = vadd.f32 %v2744_v30, %v2679_v16 }
 0x37f   : > { %3996 = vmatmul.msk.bf16.gmra.mxu3 %vm639_vm4, %v5688_v6 }
 0x380   : > { %v5696_v5 = vpop.f32.mrf.mxu1  ;;  %4014 = vmatmul.msk.bf16.gmra.mxu0 %vm639_vm4, %v5694_v46 }
 0x382   : > { %v2618_v30 = vpop.f32.mrf.mxu3 }
 0x383   : > { %v2680_v36 = vadd.f32 %v2618_v30, %v2480_v33  ;;  %v2481_v31 = vpop.f32.mrf.mxu2 }
 0x384   : > { %v2482_v8 = vadd.f32 %v2481_v31, %v5464_v24 }
 0x385   : > { %v2754_v22 = vpop.f32.mrf.mxu0  ;;  %v5701_v57 = vadd.f32 %v2747_v39, %v2680_v36 }
 0x388   : > { %v5703_v29 = vpop.f32.mrf.mxu1  ;;  %3980 = vmatmul.msk.bf16.gmra.mxu2 %vm639_vm4, %v5664_v53 }
 0x38a   : > { %v2620_v16 = vpop.f32.mrf.mxu3 }
 0x38b   : > { %v2681_v1 = vadd.f32 %v2620_v16, %v2482_v8  ;;  %v2484_v46 = vpop.f32.mrf.mxu2  ;;  %4022 = vmatmul.msk.bf16.gmra.mxu1 %vm639_vm4, %v5156_v50 }
 0x38c   : > { %v2485_v24 = vadd.f32 %v2484_v46, %v5481_v13 }
 0x38d   : > { %v2757_v40 = vpop.f32.mrf.mxu0  ;;  %v5710_v10 = vadd.f32 %v2749_v59, %v2681_v1 }
 0x38f   : > { %3997 = vmatmul.msk.bf16.gmra.mxu3 %vm639_vm4, %v5714_v20 }
 0x390   : > { %v5718_v39 = vpop.f32.mrf.mxu1  ;;  %4067 = vmatmul.msk.bf16.vlgmr.msra.gmra.mxu0 %vm639_vm4, %v5065_v26 }
 0x392   : > { %v2623_v17 = vpop.f32.mrf.mxu3 }
 0x393   : > { %v2682_v33 = vadd.f32 %v2623_v17, %v2485_v24  ;;  %v2486_v30 = vpop.f32.mrf.mxu2 }
 0x394   : > { %v2487_v58 = vadd.f32 %v2486_v30, %v5506_v23 }
 0x395   : > { %v2759_v36 = vpop.f32.mrf.mxu0  ;;  %v5723_v59 = vadd.f32 %v2752_v18, %v2682_v33 }
 0x398   : > { %v5725_v31 = vpop.f32.mrf.mxu1  ;;  %4033 = vmatmul.msk.bf16.vlgmr.msra.gmra.mxu2 %vm639_vm4, %v5198_v47 }
 0x39a   : > { %v2625_v8 = vpop.f32.mrf.mxu3 }
 0x39b   : > { %v2683_v16 = vadd.f32 %v2625_v8, %v2487_v58  ;;  %v2489_v52 = vpop.f32.mrf.mxu2  ;;  %4023 = vmatmul.msk.bf16.gmra.mxu1 %vm639_vm4, %v5186_v34 }
 0x39c   : > { %v2490_v47 = vadd.f32 %v2489_v52, %v5518_v19 }
 0x39d   : > { %v2762_v26 = vpop.f32.mrf.mxu0  ;;  %v5732_v13 = vadd.f32 %v2754_v22, %v2683_v16 }
 0x39f   : > { %4050 = vmatmul.msk.bf16.vlgmr.msra.gmra.mxu3 %vm639_vm4, %v5171_v35 }
 0x3a0   : > { %v5736_v18 = vpop.f32.mrf.mxu1  ;;  %4068 = vmatmul.msk.bf16.gmra.mxu0 %vm639_vm4, %v5081_v60 }
 0x3a2   : > { %v2628_v23 = vpop.f32.mrf.mxu3 }
 0x3a3   : > { %v2684_v46 = vadd.f32 %v2628_v23, %v2490_v47  ;;  %v2491_v1 = vpop.f32.mrf.mxu2 }
 0x3a4   : > { %v2492_v22 = vadd.f32 %v2491_v1, %v5550_v9 }
 0x3a5   : > { %v2764_v24 = vpop.f32.mrf.mxu0  ;;  %v5741_v17 = vadd.f32 %v2757_v40, %v2684_v46 }
 0x3a8   : > { %v2845_v33 = vpop.f32.mrf.mxu1  ;;  %4034 = vmatmul.msk.bf16.gmra.mxu2 %vm639_vm4, %v5237_v63 }
 0x3a9   : > { %v5747_v35 = vadd.f32 %v2845_v33, %v5512_v54 }
 0x3aa   : > { %v2630_v30 = vpop.f32.mrf.mxu3 }
 0x3ab   : > { %v2685_v58 = vadd.f32 %v2630_v30, %v2492_v22  ;;  %v2494_v60 = vpop.f32.mrf.mxu2  ;;  %4024 = vmatmul.msk.bf16.gmra.mxu1 %vm639_vm4, %v5225_v4 }
 0x3ac   : > { %v2495_v9 = vadd.f32 %v2494_v60, %v5558_v38 }
 0x3ad   : > { %v2767_v19 = vpop.f32.mrf.mxu0  ;;  %v5751_v8 = vadd.f32 %v2759_v36, %v2685_v58 }
 0x3af   : > { %4051 = vmatmul.msk.bf16.gmra.mxu3 %vm639_vm4, %v5205_v14 }
 0x3b0   : > { %v2847_v40 = vpop.f32.mrf.mxu1  ;;  %4069 = vmatmul.msk.bf16.gmra.mxu0 %vm639_vm4, %v5097_v45 }
 0x3b1   : > { %v5759_v54 = vadd.f32 %v2847_v40, %v5532_v25 }
 0x3b2   : > { %v2633_v16 = vpop.f32.mrf.mxu3 }
 0x3b3   : > { %v2686_v52 = vadd.f32 %v2633_v16, %v2495_v9  ;;  %v2496_v47 = vpop.f32.mrf.mxu2  ;;  %v6556_v16 = vld [vmem:[#allocation16_spill] sm:$0xff] }
 0x3b4   : > { %v2497_v14 = vadd.f32 %v2496_v47, %v5580_v28 }
 0x3b5   : > { %v2769_v23 = vpop.f32.mrf.mxu0  ;;  %v5761_v46 = vadd.f32 %v2762_v26, %v2686_v52 }
 0x3b8   : > { %v2850_v36 = vpop.f32.mrf.mxu1  ;;  %4035 = vmatmul.msk.bf16.gmra.mxu2 %vm639_vm4, %v5276_v61 }
 0x3b9   : > { %v5767_v1 = vadd.f32 %v2850_v36, %v5556_v41 }
 0x3ba   : > { %v2635_v45 = vpop.f32.mrf.mxu3 }
 0x3bb   : > { %v2687_v38 = vadd.f32 %v2635_v45, %v2497_v14  ;;  %v2499_v33 = vpop.f32.mrf.mxu2  ;;  %4025 = vmatmul.msk.bf16.gmra.mxu1 %vm639_vm4, %v5264_v62 }
 0x3bc   : > { %v2500_v28 = vadd.f32 %v2499_v33, %v5588_v27 }
 0x3bd   : > { %v2772_v25 = vpop.f32.mrf.mxu0  ;;  %v5771_v22 = vadd.f32 %v2764_v24, %v2687_v38 }
 0x3bf   : > { %4052 = vmatmul.msk.bf16.gmra.mxu3 %vm639_vm4, %v5244_v11 }
 0x3c0   : > { %v2852_v26 = vpop.f32.mrf.mxu1  ;;  %4070 = vmatmul.msk.bf16.gmra.mxu0 %vm639_vm4, %v5115_v48 }
 0x3c1   : > { %v5779_v41 = vadd.f32 %v2852_v26, %v5568_v7 }
 0x3c2   : > { %v2638_v30 = vpop.f32.mrf.mxu3 }
 0x3c3   : > { %v2688_v58 = vadd.f32 %v2638_v30, %v2500_v28  ;;  %v2501_v60 = vpop.f32.mrf.mxu2 }
 0x3c4   : > { %v2502_v11 = vadd.f32 %v2501_v60, %v5610_v12 }
 0x3c5   : > { %v2774_v40 = vpop.f32.mrf.mxu0  ;;  %v5781_v9 = vadd.f32 %v2767_v19, %v2688_v58  ;;  %v6557_v19 = vld [vmem:[#allocation24_spill] sm:$0xff] }
 0x3c6   : > { %v6559_v58 = vld [vmem:[#allocation28_spill] sm:$0xff] }
 0x3c8   : > { %v2855_v24 = vpop.f32.mrf.mxu1  ;;  %4036 = vmatmul.msk.bf16.gmra.mxu2 %vm639_vm4, %v6556_v16 }
 0x3c9   : > { %v5787_v52 = vadd.f32 %v2855_v24, %v5586_v32  ;;  %v6558_v32 = vld [vmem:[#allocation8_spill] sm:$0xff] }
 0x3ca   : > { %v2640_v48 = vpop.f32.mrf.mxu3  ;;  %v6560_v24 = vld [vmem:[#allocation36_spill] sm:$0xff] }
 0x3cb   : > { %v2689_v27 = vadd.f32 %v2640_v48, %v2502_v11  ;;  %v2504_v47 = vpop.f32.mrf.mxu2  ;;  %4026 = vmatmul.msk.bf16.gmra.mxu1 %vm639_vm4, %v5303_v43 }
 0x3cc   : > { %v2505_v12 = vadd.f32 %v2504_v47, %v5618_v55 }
 0x3cd   : > { %v2777_v7 = vpop.f32.mrf.mxu0  ;;  %v5791_v36 = vadd.f32 %v2769_v23, %v2689_v27  ;;  %v6561_v27 = vld [vmem:[#allocation14_spill] sm:$0xff] }
 0x3cf   : > { %4053 = vmatmul.msk.bf16.gmra.mxu3 %vm639_vm4, %v6557_v19 }
 0x3d0   : > { %v2857_v14 = vpop.f32.mrf.mxu1  ;;  %4071 = vmatmul.msk.bf16.gmra.mxu0 %vm639_vm4, %v5135_v51 }
 0x3d1   : > { %v5799_v45 = vadd.f32 %v2857_v14, %v6558_v32 }
 0x3d2   : > { %v2643_v38 = vpop.f32.mrf.mxu3 }
 0x3d3   : > { %v2690_v33 = vadd.f32 %v2643_v38, %v2505_v12  ;;  %v2506_v26 = vpop.f32.mrf.mxu2 }
 0x3d4   : > { %v2507_v60 = vadd.f32 %v2506_v26, %v5638_v21 }
 0x3d5   : > { %v2779_v28 = vpop.f32.mrf.mxu0  ;;  %v5801_v30 = vadd.f32 %v2772_v25, %v2690_v33  ;;  %v6562_v25 = vld [vmem:[#allocation26_spill] sm:$0xff] }
 0x3d8   : > { %v2860_v23 = vpop.f32.mrf.mxu1  ;;  %4037 = vmatmul.msk.bf16.gmra.mxu2 %vm639_vm4, %v6559_v58 }
 0x3d9   : > { %v5807_v11 = vadd.f32 %v2860_v23, %v6560_v24 }
 0x3da   : > { %v2645_v51 = vpop.f32.mrf.mxu3 }
 0x3db   : > { %v2691_v55 = vadd.f32 %v2645_v51, %v2507_v60  ;;  %v2509_v48 = vpop.f32.mrf.mxu2  ;;  %4027 = vmatmul.msk.bf16.gmra.mxu1 %vm639_vm4, %v6561_v27  ;;  %v6563_v60 = vld [vmem:[#allocation29_spill] sm:$0xff]  ;;  %v6564_v51 = vld [vmem:[#allocation15_spill] sm:$0xff] }
 0x3dc   : > { %v2510_v21 = vadd.f32 %v2509_v48, %v5646_v0 }
 0x3dd   : > { %v2782_v47 = vpop.f32.mrf.mxu0  ;;  %v5811_v19 = vadd.f32 %v2774_v40, %v2691_v55 }
 0x3df   : > { %4054 = vmatmul.msk.bf16.gmra.mxu3 %vm639_vm4, %v6562_v25 }
 0x3e0   : > { %v2862_v14 = vpop.f32.mrf.mxu1  ;;  %4072 = vmatmul.msk.bf16.gmra.mxu0 %vm639_vm4, %v5156_v50 }
 0x3e1   : > { %v5819_v12 = vadd.f32 %v2862_v14, %v5626_v2  ;;  %v6566_v2 = vld [vmem:[#allocation18_spill] sm:$0xff] }
 0x3e2   : > { %v2648_v32 = vpop.f32.mrf.mxu3 }
 0x3e3   : > { %v2692_v38 = vadd.f32 %v2648_v32, %v2510_v21  ;;  %v2511_v33 = vpop.f32.mrf.mxu2  ;;  %v6568_v32 = vld [vmem:[#allocation39_spill] sm:$0xff] }
 0x3e4   : > { %v2512_v24 = vadd.f32 %v2511_v33, %v5666_v37 }
 0x3e5   : > { %v2784_v26 = vpop.f32.mrf.mxu0  ;;  %v5821_v23 = vadd.f32 %v2777_v7, %v2692_v38  ;;  %v6567_v7 = vld [vmem:[#allocation27_spill] sm:$0xff] }
 0x3e8   : > { %v2865_v40 = vpop.f32.mrf.mxu1  ;;  %4038 = vmatmul.msk.bf16.gmra.mxu2 %vm639_vm4, %v6563_v60 }
 0x3e9   : > { %v5827_v55 = vadd.f32 %v2865_v40, %v6564_v51 }
 0x3ea   : > { %v2650_v50 = vpop.f32.mrf.mxu3 }
 0x3eb   : > { %6565 = vst [vmem:[#allocation19_spill] sm:$0xff] %v5827_v55  ;;  %v2693_v0 = vadd.f32 %v2650_v50, %v2512_v24  ;;  %v2514_v48 = vpop.f32.mrf.mxu2  ;;  %4028 = vmatmul.msk.bf16.gmra.mxu1 %vm639_vm4, %v6566_v2 }
 0x3ec   : > { %v2515_v37 = vadd.f32 %v2514_v48, %v5675_v49 }
 0x3ed   : > { %v5831_v25 = vadd.f32 %v2779_v28, %v2693_v0  ;;  %v2787_v14 = vpop.f32.mrf.mxu0  ;;  %v6569_v0 = vld [vmem:[#allocation30_spill] sm:$0xff] }
 0x3ef   : > { %4055 = vmatmul.msk.bf16.gmra.mxu3 %vm639_vm4, %v6567_v7 }
 0x3f0   : > { %v2867_v21 = vpop.f32.mrf.mxu1  ;;  %4073 = vmatmul.msk.bf16.gmra.mxu0 %vm639_vm4, %v5186_v34 }
 0x3f1   : > { %v5839_v38 = vadd.f32 %v2867_v21, %v6568_v32  ;;  %v6570_v21 = vld [vmem:[#allocation31_spill] sm:$0xff] }
 0x3f2   : > { %v2653_v33 = vpop.f32.mrf.mxu3 }
 0x3f3   : > { %v2694_v40 = vadd.f32 %v2653_v33, %v2515_v37  ;;  %v2516_v24 = vpop.f32.mrf.mxu2 }
 0x3f4   : > { %v2517_v7 = vadd.f32 %v2516_v24, %v5696_v5 }
 0x3f5   : > { %v5841_v51 = vadd.f32 %v2782_v47, %v2694_v40  ;;  %v2789_v28 = vpop.f32.mrf.mxu0  ;;  %v6571_v47 = vld [vmem:[#allocation17_spill] sm:$0xff] }
 0x3f8   : > { %v2870_v50 = vpop.f32.mrf.mxu1  ;;  %4039 = vmatmul.msk.bf16.gmra.mxu2 %vm639_vm4, %v6569_v0 }
 0x3f9   : > { %v5847_v55 = vadd.f32 %v2870_v50, %v5671_v44 }
 0x3fa   : > { %v2655_v34 = vpop.f32.mrf.mxu3 }
 0x3fb   : > { %v2695_v49 = vadd.f32 %v2655_v34, %v2517_v7  ;;  %v2519_v48 = vpop.f32.mrf.mxu2  ;;  %4029 = vmatmul.msk.bf16.gmra.mxu1 %vm639_vm4, %v6570_v21  ;;  %v6572_v34 = vld [vmem:[#allocation3_spill] sm:$0xff] }
 0x3fc   : > { %v2520_v5 = vadd.f32 %v2519_v48, %v5703_v29 }
 0x3fd   : > { %v5851_v37 = vadd.f32 %v2784_v26, %v2695_v49  ;;  %v2792_v33 = vpop.f32.mrf.mxu0 }
 0x3ff   : > { %4056 = vmatmul.msk.bf16.gmra.mxu3 %vm639_vm4, %v6571_v47 }
 0x400   : > { %v2872_v32 = vpop.f32.mrf.mxu1  ;;  %4074 = vmatmul.msk.bf16.gmra.mxu0 %vm639_vm4, %v5225_v4 }
 0x401   : > { %v5859_v44 = vadd.f32 %v2872_v32, %v5684_v3  ;;  %v6574_v3 = vld [vmem:[#allocation32_spill] sm:$0xff] }
 0x402   : > { %v2658_v40 = vpop.f32.mrf.mxu3 }
 0x403   : > { %v2696_v24 = vadd.f32 %v2658_v40, %v2520_v5  ;;  %v2521_v50 = vpop.f32.mrf.mxu2 }
 0x404   : > { %v2522_v49 = vadd.f32 %v2521_v50, %v5718_v39 }
 0x405   : > { %v5861_v7 = vadd.f32 %v2787_v14, %v2696_v24  ;;  %v2794_v32 = vpop.f32.mrf.mxu0  ;;  %v6575_v14 = vld [vmem:[#allocation5_spill] sm:$0xff] }
 0x408   : > { %v2875_v26 = vpop.f32.mrf.mxu1  ;;  %4040 = vmatmul.msk.bf16.gmra.mxu2 %vm639_vm4, %v6572_v34 }
 0x409   : > { %v5867_v47 = vadd.f32 %v2875_v26, %v5701_v57 }
 0x40a   : > { %v2660_v4 = vpop.f32.mrf.mxu3 }
 0x40b   : > { %6573 = vst [vmem:[#allocation41_spill] sm:$0xff] %v5867_v47  ;;  %v2697_v29 = vadd.f32 %v2660_v4, %v2522_v49  ;;  %v2524_v48 = vpop.f32.mrf.mxu2  ;;  %4030 = vmatmul.msk.bf16.gmra.mxu1 %vm639_vm4, %v6574_v3 }
 0x40c   : > { %v2525_v39 = vadd.f32 %v2524_v48, %v5725_v31 }
 0x40d   : > { %v5871_v5 = vadd.f32 %v2789_v28, %v2697_v29  ;;  %v3226_v4 = vpop.f32.mrf.mxu0  ;;  %v6576_v29 = vld [vmem:[#allocation6_spill] sm:$0xff] }
 0x40f   : > { %4057 = vmatmul.msk.bf16.gmra.mxu3 %vm639_vm4, %v6575_v14 }
 0x410   : > { %v2877_v40 = vpop.f32.mrf.mxu1  ;;  %4075 = vmatmul.msk.bf16.gmra.mxu0 %vm639_vm4, %v5264_v62 }
 0x411   : > { %v5879_v57 = vadd.f32 %v2877_v40, %v5710_v10  ;;  %v6577_v40 = vld [vmem:[#allocation33_spill] sm:$0xff] }
 0x412   : > { %v2663_v24 = vpop.f32.mrf.mxu3 }
 0x413   : > { %v2698_v50 = vadd.f32 %v2663_v24, %v2525_v39  ;;  %v2526_v26 = vpop.f32.mrf.mxu2 }
 0x414   : > { %v2527_v14 = vadd.f32 %v2526_v26, %v5736_v18 }
 0x415   : > { %v5881_v49 = vadd.f32 %v2792_v33, %v2698_v50  ;;  %v3228_v39 = vpop.f32.mrf.mxu0 }
 0x418   : > { %v2880_v28 = vpop.f32.mrf.mxu1  ;;  %4041 = vmatmul.msk.bf16.gmra.mxu2 %vm639_vm4, %v6576_v29 }
 0x419   : > { %v5887_v47 = vadd.f32 %v2880_v28, %v5723_v59 }
 0x41a   : > { %v2665_v62 = vpop.f32.mrf.mxu3 }
 0x41b   : > { %v2699_v31 = vadd.f32 %v2665_v62, %v2527_v14  ;;  %4031 = vmatmul.msk.bf16.gmra.mxu1 %vm639_vm4, %v5522_v42  ;;  %v2974_v10 = vpop.f32.mrf.mxu2 }
 0x41c   : > { %v3054_v48 = vadd.f32 %v2974_v10, %v5747_v35 }
 0x41d   : > { %v5892_v33 = vadd.f32 %v2794_v32, %v2699_v31  ;;  %v6578_v32 = vld [vmem:[#allocation35_spill] sm:$0xff]  ;;  %v3231_v31 = vpop.f32.mrf.mxu0 }
 0x41f   : > { %4058 = vmatmul.msk.bf16.gmra.mxu3 %vm639_vm4, %v6577_v40 }
 0x420   : > { %v2882_v24 = vpop.f32.mrf.mxu1  ;;  %4076 = vmatmul.msk.bf16.gmra.mxu0 %vm639_vm4, %v5303_v43 }
 0x421   : > { %v5899_v59 = vadd.f32 %v2882_v24, %v5732_v13 }
 0x422   : > { %v3100_v18 = vpop.f32.mrf.mxu3 }
 0x423   : > { %v3180_v50 = vadd.f32 %v3100_v18, %v3054_v48  ;;  %v2976_v26 = vpop.f32.mrf.mxu2 }
 0x424   : > { %v3055_v28 = vadd.f32 %v2976_v26, %v5759_v54  ;;  %v6579_v54 = vld [vmem:[#allocation34_spill] sm:$0xff] }
 0x425   : > { %v5902_v14 = vadd.f32 %v3226_v4, %v3180_v50  ;;  %v3233_v26 = vpop.f32.mrf.mxu0 }
 0x428   : > { %v2885_v35 = vpop.f32.mrf.mxu1  ;;  %4042 = vmatmul.msk.bf16.gmra.mxu2 %vm639_vm4, %v6578_v32 }
 0x429   : > { %v5907_v62 = vadd.f32 %v2885_v35, %v5741_v17 }
 0x42a   : > { %v3102_v10 = vpop.f32.mrf.mxu3 }
 0x42b   : > { %v3181_v43 = vadd.f32 %v3102_v10, %v3055_v28  ;;  %v2979_v40 = vpop.f32.mrf.mxu2  ;;  %4083 = vmatmul.msk.bf16.vlgmr.msra.gmra.mxu1 %vm639_vm4, %v5237_v63 }
 0x42c   : > { %v3056_v13 = vadd.f32 %v2979_v40, %v5767_v1 }
 0x42d   : > { %v5912_v48 = vadd.f32 %v3228_v39, %v3181_v43  ;;  %v6580_v39 = vld [vmem:[#allocation10_spill] sm:$0xff] }
 0x42f   : > { %4059 = vmatmul.msk.bf16.gmra.mxu3 %vm639_vm4, %v6579_v54 }
 0x430   : > { %v2887_v4 = vpop.f32.mrf.mxu1  ;;  %4077 = vmatmul.msk.bf16.gmra.mxu0 %vm639_vm4, %v6561_v27 }
 0x431   : > { %v5919_v17 = vadd.f32 %v2887_v4, %v5751_v8 }
 0x432   : > { %v3105_v24 = vpop.f32.mrf.mxu3 }
 0x433   : > { %v3182_v18 = vadd.f32 %v3105_v24, %v3056_v13  ;;  %v2981_v50 = vpop.f32.mrf.mxu2 }
 0x434   : > { %v3057_v63 = vadd.f32 %v2981_v50, %v5779_v41  ;;  %v3236_v41 = vpop.f32.mrf.mxu0 }
 0x435   : > { %v5922_v28 = vadd.f32 %v3231_v31, %v3182_v18  ;;  %v6581_v31 = vld [vmem:[#allocation7_spill] sm:$0xff] }
 0x438   : > { %v2890_v1 = vpop.f32.mrf.mxu1  ;;  %4043 = vmatmul.msk.bf16.gmra.mxu2 %vm639_vm4, %v6580_v39 }
 0x439   : > { %v5927_v35 = vadd.f32 %v2890_v1, %v5761_v46 }
 0x43a   : > { %v3107_v10 = vpop.f32.mrf.mxu3 }
 0x43b   : > { %v3183_v27 = vadd.f32 %v3107_v10, %v3057_v63  ;;  %v2984_v43 = vpop.f32.mrf.mxu2  ;;  %4084 = vmatmul.msk.bf16.gmra.mxu1 %vm639_vm4, %v5276_v61 }
 0x43c   : > { %v3058_v8 = vadd.f32 %v2984_v43, %v5787_v52  ;;  %v3238_v52 = vpop.f32.mrf.mxu0 }
 0x43d   : > { %v5932_v40 = vadd.f32 %v3233_v26, %v3183_v27  ;;  %v6582_v26 = vld [vmem:[#allocation37_spill] sm:$0xff] }
 0x43f   : > { %4060 = vmatmul.msk.bf16.gmra.mxu3 %vm639_vm4, %v6581_v31 }
 0x440   : > { %v2892_v13 = vpop.f32.mrf.mxu1  ;;  %4078 = vmatmul.msk.bf16.gmra.mxu0 %vm639_vm4, %v6566_v2 }
 0x441   : > { %v5939_v46 = vadd.f32 %v2892_v13, %v5771_v22 }
 0x442   : > { %v3110_v54 = vpop.f32.mrf.mxu3 }
 0x443   : > { %v3184_v4 = vadd.f32 %v3110_v54, %v3058_v8  ;;  %v2986_v24 = vpop.f32.mrf.mxu2 }
 0x444   : > { %v3059_v61 = vadd.f32 %v2986_v24, %v5799_v45  ;;  %v6583_v45 = vld [vmem:[#allocation12_spill] sm:$0xff]  ;;  %v3241_v8 = vpop.f32.mrf.mxu0 }
 0x445   : > { %v5942_v18 = vadd.f32 %v3236_v41, %v3184_v4  ;;  %v6584_v4 = vld [vmem:[#allocation38_spill] sm:$0xff] }
 0x448   : > { %v2895_v50 = vpop.f32.mrf.mxu1  ;;  %4044 = vmatmul.msk.bf16.gmra.mxu2 %vm639_vm4, %v6582_v26 }
 0x449   : > { %v5947_v63 = vadd.f32 %v2895_v50, %v5781_v9 }
 0x44a   : > { %v3112_v1 = vpop.f32.mrf.mxu3 }
 0x44b   : > { %v3185_v2 = vadd.f32 %v3112_v1, %v3059_v61  ;;  %v2989_v10 = vpop.f32.mrf.mxu2  ;;  %4085 = vmatmul.msk.bf16.gmra.mxu1 %vm639_vm4, %v6556_v16 }
 0x44c   : > { %v3060_v22 = vadd.f32 %v2989_v10, %v5807_v11  ;;  %v6588_v10 = vld [vmem:[#allocation2_spill] sm:$0xff] }
 0x44d   : > { %v5952_v27 = vadd.f32 %v3238_v52, %v3185_v2 }
 0x44f   : > { %4061 = vmatmul.msk.bf16.gmra.mxu3 %vm639_vm4, %v6583_v45 }
 0x450   : > { %v2897_v43 = vpop.f32.mrf.mxu1  ;;  %4079 = vmatmul.msk.bf16.gmra.mxu0 %vm639_vm4, %v6570_v21 }
 0x451   : > { %v5959_v9 = vadd.f32 %v2897_v43, %v5791_v36  ;;  %v3243_v36 = vpop.f32.mrf.mxu0 }
 0x452   : > { %v3115_v41 = vpop.f32.mrf.mxu3 }
 0x453   : > { %v3186_v31 = vadd.f32 %v3115_v41, %v3060_v22  ;;  %v2991_v13 = vpop.f32.mrf.mxu2 }
 0x454   : > { %v3061_v16 = vadd.f32 %v2991_v13, %v5819_v12 }
 0x455   : > { %v5962_v54 = vadd.f32 %v3241_v8, %v3186_v31 }
 0x458   : > { %v2900_v11 = vpop.f32.mrf.mxu1  ;;  %4045 = vmatmul.msk.bf16.gmra.mxu2 %vm639_vm4, %v6584_v4 }
 0x459   : > { %v5967_v24 = vadd.f32 %v2900_v11, %v5801_v30 }
 0x45a   : > { %v3117_v61 = vpop.f32.mrf.mxu3 }
 0x45b   : > { %v3187_v21 = vadd.f32 %v3117_v61, %v3061_v16  ;;  %4086 = vmatmul.msk.bf16.gmra.mxu1 %vm639_vm4, %v6559_v58 }
 0x45d   : > { %v5971_v52 = vadd.f32 %v3243_v36, %v3187_v21 }
 0x45f   : > { %4062 = vmatmul.msk.bf16.gmra.mxu3 %vm639_vm4, %v5636_v56 }
 0x460   : > { %v2902_v12 = vpop.f32.mrf.mxu1  ;;  %4080 = vmatmul.msk.bf16.gmra.mxu0 %vm639_vm4, %v6574_v3  ;;  %v6586_v3 = vmov 0  }
 0x461   : > { %v5978_v50 = vadd.f32 %v2902_v12, %v5811_v19  ;;  %v6054_v12 = vpop.f32.mrf.mxu0 }
 0x462   : > { %v6046_v41 = vpop.f32.mrf.mxu3 }
 0x468   : > { %v2905_v30 = vpop.f32.mrf.mxu1  ;;  %4046 = vmatmul.msk.bf16.gmra.mxu2 %vm639_vm4, %v5688_v6 }
 0x469   : > { %v5983_v1 = vadd.f32 %v2905_v30, %v5821_v23 }
 0x46b   : > { %4087 = vmatmul.msk.bf16.gmra.mxu1 %vm639_vm4, %v6563_v60  ;;  %v6585_v60 = vld [vmem:[#allocation40_spill] sm:$0xff] }
 0x46f   : > { %4063 = vmatmul.msk.bf16.gmra.mxu3 %vm639_vm4, %v5664_v53 }
 0x470   : > { %v2907_v56 = vpop.f32.mrf.mxu1  ;;  %4081 = vmatmul.msk.bf16.gmra.mxu0 %vm639_vm4, %v5522_v42 }
 0x471   : > { %v5992_v58 = vadd.f32 %v2907_v56, %v5831_v25  ;;  %v6587_v25 = vld [vmem:[#allocation4_spill] sm:$0xff] }
 0x472   : > { %v6010_v2 = vsel %vm4501_vm7, %v6587_v25, 0 }
 0x478   : > { %v2910_v19 = vpop.f32.mrf.mxu1  ;;  %4047 = vmatmul.msk.bf16.gmra.mxu2 %vm639_vm4, %v5714_v20 }
 0x479   : > { %v5997_v23 = vadd.f32 %v2910_v19, %v5841_v51 }
 0x47b   : > { %4088 = vmatmul.msk.bf16.gmra.mxu1 %vm639_vm4, %v6569_v0 }
 0x47f   : > { %4064 = vmatmul.msk.bf16.gmra.mxu3 %vm639_vm4, %v6585_v60 }
 0x480   : > { %v2912_v53 = vpop.f32.mrf.mxu1  ;;  %3300 = vmatmul.bf16.gmra.mxu0 %v6586_v3  ;;  %v6062_v3 = vpop.f32.mrf.mxu3 }
 0x481   : > { %v6005_v42 = vadd.f32 %v2912_v53, %v5851_v37 }
 0x488   : > { %v2915_v51 = vpop.f32.mrf.mxu1  ;;  %4048 = vmatmul.msk.bf16.gmra.mxu2 %vm639_vm4, %v6010_v2 }
 0x489   : > { %v6015_v0 = vadd.f32 %v2915_v51, %v5861_v7 }
 0x48b   : > { %4089 = vmatmul.msk.bf16.gmra.mxu1 %vm639_vm4, %v6572_v34 }
 0x48f   : > { %4065 = vmatmul.msk.bf16.gmra.mxu3 %vm639_vm4, %v6588_v10 }
 0x490   : > { %v2917_v37 = vpop.f32.mrf.mxu1 }
 0x491   : > { %v6022_v22 = vadd.f32 %v2917_v37, %v5871_v5 }
 0x498   : > { %v2920_v15 = vpop.f32.mrf.mxu1 }
 0x499   : > { %v6025_v45 = vadd.f32 %v2920_v15, %v5881_v49  ;;  %v6043_v49 = vpop.f32.mrf.mxu2  ;;  %v6068_v15 = vpop.f32.mrf.mxu0 }
 0x49b   : > { %4090 = vmatmul.msk.bf16.gmra.mxu1 %vm639_vm4, %v6576_v29 }
 0x4a0   : > { %v2922_v7 = vpop.f32.mrf.mxu1 }
 0x4a1   : > { %v6031_v43 = vadd.f32 %v2922_v7, %v5892_v33  ;;  %v6057_v56 = vpop.f32.mrf.mxu2 }
 0x4a8   : > { %v3352_v34 = vpop.f32.mrf.mxu1 }
 0x4a9   : > { %v3432_v8 = vadd.f32 %v3352_v34, %v5902_v14 }
 0x4ab   : > { %v3637_v5 = vpack.c.bf16 %v3432_v8, %v3432_v8  ;;  %4091 = vmatmul.msk.bf16.gmra.mxu1 %vm639_vm4, %v6578_v32  ;;  %v3535_v33 = vmul.f32 %v3432_v8, %v3432_v8  ;;  %v3464_v31 = vsel %vm639_vm4, %v3432_v8, 0.0 }
 0x4ad   : > { %3670 = vst.msk [vmem:[%s6037_s10] sm:$0xf] %vm3669_vm8, %v3637_v5  ;;  %v3567_v32 = vsel %vm639_vm4, %v3535_v33, 0.0  ;;  %v6071_v5 = vpop.f32.mrf.mxu2  ;;  %v6076_v33 = vpop.f32.mrf.mxu3 }
 0x4b0   : > { %v3354_v29 = vpop.f32.mrf.mxu1 }
 0x4b1   : > { %v3433_v14 = vadd.f32 %v3354_v29, %v5912_v48 }
 0x4b3   : > { %v3465_v13 = vsel %vm639_vm4, %v3433_v14, 0.0  ;;  %v3536_v16 = vmul.f32 %v3433_v14, %v3433_v14  ;;  %v3638_v11 = vpack.c.bf16 %v3433_v14, %v3433_v14 }
 0x4b4   : > { %v3466_v61 = vadd.f32 %v3465_v13, %v3464_v31 }
 0x4b5   : > { %v3568_v21 = vsel %vm639_vm4, %v3536_v16, 0.0  ;;  %3671 = vst.msk [vmem:[%s6037_s10 + $0x4] sm:$0xf] %vm3669_vm8, %v3638_v11 }
 0x4b6   : > { %v3569_v36 = vadd.f32 %v3568_v21, %v3567_v32 }
 0x4b8   : > { %v3357_v48 = vpop.f32.mrf.mxu1 }
 0x4b9   : > { %v3434_v30 = vadd.f32 %v3357_v48, %v5922_v28 }
 0x4bb   : > { %v3467_v19 = vsel %vm639_vm4, %v3434_v30, 0.0  ;;  %v3537_v60 = vmul.f32 %v3434_v30, %v3434_v30  ;;  %v3639_v53 = vpack.c.bf16 %v3434_v30, %v3434_v30  ;;  %4092 = vmatmul.msk.bf16.gmra.mxu1 %vm639_vm4, %v6580_v39  ;;  %v6089_v30 = vpop.f32.mrf.mxu3 }
 0x4bc   : > { %v3468_v25 = vadd.f32 %v3467_v19, %v3466_v61  ;;  %v6082_v61 = vpop.f32.mrf.mxu0 }
 0x4bd   : > { %v3570_v51 = vsel %vm639_vm4, %v3537_v60, 0.0  ;;  %3672 = vst.msk [vmem:[%s6037_s10 + $0x8] sm:$0xf] %vm3669_vm8, %v3639_v53 }
 0x4be   : > { %v3571_v10 = vadd.f32 %v3570_v51, %v3569_v36  ;;  %v6087_v36 = vpop.f32.mrf.mxu2 }
 0x4c0   : > { %v3359_v37 = vpop.f32.mrf.mxu1 }
 0x4c1   : > { %v3435_v28 = vadd.f32 %v3359_v37, %v5932_v40 }
 0x4c3   : > { %v3469_v7 = vsel %vm639_vm4, %v3435_v28, 0.0  ;;  %v3538_v34 = vmul.f32 %v3435_v28, %v3435_v28  ;;  %v3640_v8 = vpack.c.bf16 %v3435_v28, %v3435_v28 }
 0x4c4   : > { %v3470_v39 = vadd.f32 %v3469_v7, %v3468_v25 }
 0x4c5   : > { %v3572_v29 = vsel %vm639_vm4, %v3538_v34, 0.0  ;;  %3673 = vst.msk [vmem:[%s6037_s10 + $0xc] sm:$0xf] %vm3669_vm8, %v3640_v8  ;;  %v6101_v8 = vpop.f32.mrf.mxu3 }
 0x4c6   : > { %v3573_v14 = vadd.f32 %v3572_v29, %v3571_v10  ;;  %v6096_v10 = vpop.f32.mrf.mxu0  ;;  %v6098_v28 = vpop.f32.mrf.mxu2 }
 0x4c8   : > { %v3362_v31 = vpop.f32.mrf.mxu1 }
 0x4c9   : > { %v3436_v40 = vadd.f32 %v3362_v31, %v5942_v18 }
 0x4cb   : > { %v3471_v13 = vsel %vm639_vm4, %v3436_v40, 0.0  ;;  %v3539_v16 = vmul.f32 %v3436_v40, %v3436_v40  ;;  %v3641_v11 = vpack.c.bf16 %v3436_v40, %v3436_v40  ;;  %4093 = vmatmul.msk.bf16.gmra.mxu1 %vm639_vm4, %v6582_v26 }
 0x4cc   : > { %v3472_v32 = vadd.f32 %v3471_v13, %v3470_v39 }
 0x4cd   : > { %v3574_v21 = vsel %vm639_vm4, %v3539_v16, 0.0  ;;  %3674 = vst.msk [vmem:[%s6037_s10 + $0x10] sm:$0xf] %vm3669_vm8, %v3641_v11 }
 0x4ce   : > { %v3575_v48 = vadd.f32 %v3574_v21, %v3573_v14  ;;  %v6109_v13 = vpop.f32.mrf.mxu0  ;;  %v6114_v21 = vpop.f32.mrf.mxu2 }
 0x4d0   : > { %v3364_v18 = vpop.f32.mrf.mxu1 }
 0x4d1   : > { %v3437_v19 = vadd.f32 %v3364_v18, %v5952_v27 }
 0x4d3   : > { %v3473_v60 = vsel %vm639_vm4, %v3437_v19, 0.0  ;;  %v3540_v53 = vmul.f32 %v3437_v19, %v3437_v19  ;;  %v3642_v25 = vpack.c.bf16 %v3437_v19, %v3437_v19 }
 0x4d4   : > { %v3474_v26 = vadd.f32 %v3473_v60, %v3472_v32  ;;  %v6118_v60 = vpop.f32.mrf.mxu3 }
 0x4d5   : > { %v3576_v51 = vsel %vm639_vm4, %v3540_v53, 0.0  ;;  %3675 = vst.msk [vmem:[%s6037_s10 + $0x14] sm:$0xf] %vm3669_vm8, %v3642_v25 }
 0x4d6   : > { %v3577_v37 = vadd.f32 %v3576_v51, %v3575_v48  ;;  %v3063_v51 = vadd.f32 %v6057_v56, %v5839_v38 }
 0x4d8   : > { %v3367_v7 = vpop.f32.mrf.mxu1 }
 0x4d9   : > { %v3438_v34 = vadd.f32 %v3367_v7, %v5962_v54  ;;  %v6589_v54 = vld [vmem:[#allocation19_spill] sm:$0xff]  ;;  %v3189_v7 = vadd.f32 %v6062_v3, %v3063_v51 }
 0x4da   : > { %v3062_v11 = vadd.f32 %v6043_v49, %v6589_v54 }
 0x4db   : > { %v3475_v27 = vsel %vm639_vm4, %v3438_v34, 0.0  ;;  %v3541_v39 = vmul.f32 %v3438_v34, %v3438_v34  ;;  %v3643_v29 = vpack.c.bf16 %v3438_v34, %v3438_v34  ;;  %4094 = vmatmul.msk.bf16.gmra.mxu1 %vm639_vm4, %v6584_v4  ;;  %v3315_v3 = vadd.f32 %v6068_v15, %v3189_v7 }
 0x4dc   : > { %v3476_v14 = vadd.f32 %v3475_v27, %v3474_v26  ;;  %v3188_v48 = vadd.f32 %v6046_v41, %v3062_v11  ;;  %v6137_v38 = vpop.f32.mrf.mxu3 }
 0x4dd   : > { %v3578_v31 = vsel %vm639_vm4, %v3541_v39, 0.0  ;;  %3676 = vst.msk [vmem:[%s6037_s10 + $0x18] sm:$0xf] %vm3669_vm8, %v3643_v29  ;;  %v6132_v29 = vpop.f32.mrf.mxu2 }
 0x4de   : > { %v3579_v40 = vadd.f32 %v3578_v31, %v3577_v37  ;;  %v3314_v49 = vadd.f32 %v6054_v12, %v3188_v48  ;;  %v6126_v37 = vpop.f32.mrf.mxu0 }
 0x4e0   : > { %v3369_v16 = vpop.f32.mrf.mxu1 }
 0x4e1   : > { %v3439_v32 = vadd.f32 %v3369_v16, %v5971_v52 }
 0x4e3   : > { %v3477_v4 = vsel %vm639_vm4, %v3439_v32, 0.0  ;;  %v3542_v18 = vmul.f32 %v3439_v32, %v3439_v32  ;;  %v3644_v19 = vpack.c.bf16 %v3439_v32, %v3439_v32 }
 0x4e4   : > { %v3478_v53 = vadd.f32 %v3477_v4, %v3476_v14 }
 0x4e5   : > { %v3580_v25 = vsel %vm639_vm4, %v3542_v18, 0.0  ;;  %3677 = vst.msk [vmem:[%s6037_s10 + $0x1c] sm:$0xf] %vm3669_vm8, %v3644_v19  ;;  %v6149_v15 = vpop.f32.mrf.mxu2 }
 0x4e6   : > { %v3581_v26 = vadd.f32 %v3580_v25, %v3579_v40  ;;  %v3064_v40 = vadd.f32 %v6071_v5, %v5847_v55  ;;  %v6144_v48 = vpop.f32.mrf.mxu0  ;;  %v6152_v5 = vpop.f32.mrf.mxu3 }
 0x4e8   : > { %v3372_v52 = vpop.f32.mrf.mxu1 }
 0x4e9   : > { %v3440_v41 = vadd.f32 %v3372_v52, %v3314_v49 }
 0x4eb   : > { %v3479_v34 = vsel %vm639_vm4, %v3440_v41, 0.0  ;;  %v3543_v27 = vmul.f32 %v3440_v41, %v3440_v41  ;;  %v3645_v39 = vpack.c.bf16 %v3440_v41, %v3440_v41  ;;  %4095 = vmatmul.msk.bf16.gmra.mxu1 %vm639_vm4, %v5688_v6  ;;  %v3190_v6 = vadd.f32 %v6076_v33, %v3064_v40 }
 0x4ec   : > { %v3480_v14 = vadd.f32 %v3479_v34, %v3478_v53  ;;  %v3065_v53 = vadd.f32 %v6087_v36, %v5859_v44 }
 0x4ed   : > { %v3582_v12 = vsel %vm639_vm4, %v3543_v27, 0.0  ;;  %3678 = vst.msk [vmem:[%s6037_s10 + $0x20] sm:$0xf] %vm3669_vm8, %v3645_v39  ;;  %v3316_v55 = vadd.f32 %v6082_v61, %v3190_v6  ;;  %v3014_v36 = vpop.f32.mrf.mxu2 }
 0x4ee   : > { %v3583_v56 = vadd.f32 %v3582_v12, %v3581_v26  ;;  %v3191_v26 = vadd.f32 %v6089_v30, %v3065_v53  ;;  %v3263_v61 = vpop.f32.mrf.mxu0  ;;  %v6590_v30 = vld [vmem:[#allocation41_spill] sm:$0xff]  ;;  %v3140_v12 = vpop.f32.mrf.mxu3 }
 0x4ef   : > { %v3066_v39 = vadd.f32 %v6098_v28, %v6590_v30  ;;  %v3067_v28 = vadd.f32 %v6114_v21, %v5879_v57 }
 0x4f0   : > { %v3374_v31 = vpop.f32.mrf.mxu1  ;;  %v3317_v44 = vadd.f32 %v6096_v10, %v3191_v26 }
 0x4f1   : > { %v3441_v16 = vadd.f32 %v3374_v31, %v3315_v3 }
 0x4f3   : > { %v3481_v54 = vsel %vm639_vm4, %v3441_v16, 0.0  ;;  %v3544_v11 = vmul.f32 %v3441_v16, %v3441_v16  ;;  %v3646_v32 = vpack.c.bf16 %v3441_v16, %v3441_v16 }
 0x4f4   : > { %v3482_v4 = vadd.f32 %v3481_v54, %v3480_v14 }
 0x4f5   : > { %v3584_v18 = vsel %vm639_vm4, %v3544_v11, 0.0  ;;  %3679 = vst.msk [vmem:[%s6037_s10 + $0x24] sm:$0xf] %vm3669_vm8, %v3646_v32 }
 0x4f6   : > { %v3585_v19 = vadd.f32 %v3584_v18, %v3583_v56  ;;  %v3192_v56 = vadd.f32 %v6101_v8, %v3066_v39  ;;  %v3266_v54 = vpop.f32.mrf.mxu0  ;;  %v3016_v8 = vpop.f32.mrf.mxu2 }
 0x4f8   : > { %v3377_v33 = vpop.f32.mrf.mxu1  ;;  %v3318_v6 = vadd.f32 %v6109_v13, %v3192_v56 }
 0x4f9   : > { %v3442_v25 = vadd.f32 %v3377_v33, %v3316_v55  ;;  %v3142_v33 = vpop.f32.mrf.mxu3 }
 0x4fb   : > { %v3483_v49 = vsel %vm639_vm4, %v3442_v25, 0.0  ;;  %v3545_v52 = vmul.f32 %v3442_v25, %v3442_v25  ;;  %v3647_v51 = vpack.c.bf16 %v3442_v25, %v3442_v25  ;;  %4096 = vmatmul.msk.bf16.gmra.mxu1 %vm639_vm4, %v5714_v20 }
 0x4fc   : > { %v3484_v41 = vadd.f32 %v3483_v49, %v3482_v4  ;;  %v3193_v4 = vadd.f32 %v6118_v60, %v3067_v28  ;;  %v3068_v60 = vadd.f32 %v6132_v29, %v5887_v47  ;;  %v3069_v29 = vadd.f32 %v6149_v15, %v5899_v59 }
 0x4fd   : > { %v3586_v7 = vsel %vm639_vm4, %v3545_v52, 0.0  ;;  %3680 = vst.msk [vmem:[%s6037_s10 + $0x28] sm:$0xf] %vm3669_vm8, %v3647_v51 }
 0x4fe   : > { %v3587_v34 = vadd.f32 %v3586_v7, %v3585_v19  ;;  %v3319_v57 = vadd.f32 %v6126_v37, %v3193_v4  ;;  %v3268_v49 = vpop.f32.mrf.mxu0  ;;  %v3194_v52 = vadd.f32 %v6137_v38, %v3068_v60  ;;  %v3019_v7 = vpop.f32.mrf.mxu2  ;;  %v3195_v39 = vadd.f32 %v6152_v5, %v3069_v29 }
 0x4ff   : > { %v3070_v5 = vadd.f32 %v3014_v36, %v5907_v62 }
 0x500   : > { %v3379_v27 = vpop.f32.mrf.mxu1  ;;  %v3320_v30 = vadd.f32 %v6144_v48, %v3194_v52  ;;  %v3321_v59 = vadd.f32 %v3263_v61, %v3195_v39 }
 0x501   : > { %v3443_v14 = vadd.f32 %v3379_v27, %v3317_v44  ;;  %v3145_v37 = vpop.f32.mrf.mxu3  ;;  %v3196_v28 = vadd.f32 %v3140_v12, %v3070_v5 }
 0x503   : > { %v3485_v20 = vsel %vm639_vm4, %v3443_v14, 0.0  ;;  %v3546_v3 = vmul.f32 %v3443_v14, %v3443_v14  ;;  %v3648_v31 = vpack.c.bf16 %v3443_v14, %v3443_v14 }
 0x504   : > { %v3486_v40 = vadd.f32 %v3485_v20, %v3484_v41 }
 0x505   : > { %v3588_v16 = vsel %vm639_vm4, %v3546_v3, 0.0  ;;  %3681 = vst.msk [vmem:[%s6037_s10 + $0x2c] sm:$0xf] %vm3669_vm8, %v3648_v31  ;;  %v6591_v3 = vld [vmem:[#allocation20_spill] sm:$0xff] }
 0x506   : > { %v3589_v10 = vadd.f32 %v3588_v16, %v3587_v34  ;;  %v3271_v31 = vpop.f32.mrf.mxu0  ;;  %v3021_v48 = vpop.f32.mrf.mxu2 }
 0x508   : > { %v3382_v11 = vpop.f32.mrf.mxu1 }
 0x509   : > { %v3444_v32 = vadd.f32 %v3382_v11, %v3318_v6  ;;  %v3147_v15 = vpop.f32.mrf.mxu3 }
 0x50b   : > { %v3487_v18 = vsel %vm639_vm4, %v3444_v32, 0.0  ;;  %v3547_v19 = vmul.f32 %v3444_v32, %v3444_v32  ;;  %v3649_v55 = vpack.c.bf16 %v3444_v32, %v3444_v32  ;;  %4097 = vmatmul.msk.bf16.gmra.mxu1 %vm639_vm4, %v6010_v2 }
 0x50c   : > { %v3488_v53 = vadd.f32 %v3487_v18, %v3486_v40 }
 0x50d   : > { %v3590_v13 = vsel %vm639_vm4, %v3547_v19, 0.0  ;;  %3682 = vst.msk [vmem:[%s6037_s10 + $0x30] sm:$0xf] %vm3669_vm8, %v3649_v55 }
 0x50e   : > { %v3591_v25 = vadd.f32 %v3590_v13, %v3589_v10  ;;  %v3024_v61 = vpop.f32.mrf.mxu2 }
 0x510   : > { %v3384_v21 = vpop.f32.mrf.mxu1 }
 0x511   : > { %v3445_v26 = vadd.f32 %v3384_v21, %v3319_v57  ;;  %v3071_v21 = vadd.f32 %v3016_v8, %v5919_v17  ;;  %v3150_v36 = vpop.f32.mrf.mxu3 }
 0x513   : > { %v3489_v2 = vsel %vm639_vm4, %v3445_v26, 0.0  ;;  %v3548_v51 = vmul.f32 %v3445_v26, %v3445_v26  ;;  %v3650_v41 = vpack.c.bf16 %v3445_v26, %v3445_v26  ;;  %v3197_v12 = vadd.f32 %v3142_v33, %v3071_v21 }
 0x514   : > { %v3490_v34 = vadd.f32 %v3489_v2, %v3488_v53  ;;  %v3273_v53 = vpop.f32.mrf.mxu0 }
 0x515   : > { %v3592_v44 = vsel %vm639_vm4, %v3548_v51, 0.0  ;;  %3683 = vst.msk [vmem:[%s6037_s10 + $0x34] sm:$0xf] %vm3669_vm8, %v3650_v41 }
 0x516   : > { %v3593_v27 = vadd.f32 %v3592_v44, %v3591_v25  ;;  %v3322_v25 = vadd.f32 %v3266_v54, %v3196_v28  ;;  %v3026_v8 = vpop.f32.mrf.mxu2 }
 0x518   : > { %v3387_v47 = vpop.f32.mrf.mxu1 }
 0x519   : > { %v3446_v38 = vadd.f32 %v3387_v47, %v3320_v30 }
 0x51b   : > { %v3491_v14 = vsel %vm639_vm4, %v3446_v38, 0.0  ;;  %v3549_v56 = vmul.f32 %v3446_v38, %v3446_v38  ;;  %v3651_v20 = vpack.c.bf16 %v3446_v38, %v3446_v38  ;;  %4098 = vmatmul.msk.bf16.gmra.mxu1 %vm639_vm4, %v6591_v3  ;;  %v3152_v38 = vpop.f32.mrf.mxu3  ;;  %v3073_v3 = vadd.f32 %v3021_v48, %v5939_v46 }
 0x51c   : > { %v3492_v40 = vadd.f32 %v3491_v14, %v3490_v34  ;;  %v3323_v34 = vadd.f32 %v3268_v49, %v3197_v12  ;;  %v3276_v54 = vpop.f32.mrf.mxu0  ;;  %v3074_v46 = vadd.f32 %v3024_v61, %v5947_v63  ;;  %v3075_v63 = vadd.f32 %v3026_v8, %v5959_v9 }
 0x51d   : > { %v3594_v16 = vsel %vm639_vm4, %v3549_v56, 0.0  ;;  %3684 = vst.msk [vmem:[%s6037_s10 + $0x38] sm:$0xf] %vm3669_vm8, %v3651_v20 }
 0x51e   : > { %v3595_v10 = vadd.f32 %v3594_v16, %v3593_v27  ;;  %v3072_v27 = vadd.f32 %v3019_v7, %v5927_v35 }
 0x520   : > { %v3389_v6 = vpop.f32.mrf.mxu1  ;;  %v3198_v30 = vadd.f32 %v3145_v37, %v3072_v27 }
 0x521   : > { %v3447_v11 = vadd.f32 %v3389_v6, %v3321_v59  ;;  %v3029_v59 = vpop.f32.mrf.mxu2 }
 0x522   : > { %v3324_v49 = vadd.f32 %v3271_v31, %v3198_v30 }
 0x523   : > { %v3493_v32 = vsel %vm639_vm4, %v3447_v11, 0.0  ;;  %v3550_v4 = vmul.f32 %v3447_v11, %v3447_v11  ;;  %v3652_v18 = vpack.c.bf16 %v3447_v11, %v3447_v11  ;;  %v3155_v11 = vpop.f32.mrf.mxu3 }
 0x524   : > { %v3494_v19 = vadd.f32 %v3493_v32, %v3492_v40  ;;  %v3278_v7 = vpop.f32.mrf.mxu0  ;;  %v3199_v40 = vadd.f32 %v3147_v15, %v3073_v3 }
 0x525   : > { %v3596_v55 = vsel %vm639_vm4, %v3550_v4, 0.0  ;;  %3685 = vst.msk [vmem:[%s6037_s10 + $0x3c] sm:$0xf] %vm3669_vm8, %v3652_v18  ;;  %v3200_v4 = vadd.f32 %v3150_v36, %v3074_v46  ;;  %v3201_v36 = vadd.f32 %v3152_v38, %v3075_v63 }
 0x526   : > { %v3597_v13 = vadd.f32 %v3596_v55, %v3595_v10  ;;  %v3325_v31 = vadd.f32 %v3273_v53, %v3199_v40 }
 0x528   : > { %v3392_v57 = vpop.f32.mrf.mxu1 }
 0x529   : > { %v3448_v62 = vadd.f32 %v3392_v57, %v3322_v25  ;;  %v3031_v57 = vpop.f32.mrf.mxu2 }
 0x52a   : > { %v3077_v3 = vadd.f32 %v3031_v57, %v5978_v50 }
 0x52b   : > { %v3495_v60 = vsel %vm639_vm4, %v3448_v62, 0.0  ;;  %v3551_v26 = vmul.f32 %v3448_v62, %v3448_v62  ;;  %v3653_v52 = vpack.c.bf16 %v3448_v62, %v3448_v62  ;;  %v3326_v62 = vadd.f32 %v3276_v54, %v3200_v4  ;;  %v3157_v53 = vpop.f32.mrf.mxu3 }
 0x52c   : > { %v3496_v2 = vadd.f32 %v3495_v60, %v3494_v19  ;;  %v3281_v55 = vpop.f32.mrf.mxu0 }
 0x52d   : > { %v3598_v51 = vsel %vm639_vm4, %v3551_v26, 0.0  ;;  %3686 = vst.msk [vmem:[%s6037_s10 + $0x40] sm:$0xf] %vm3669_vm8, %v3653_v52 }
 0x52e   : > { %v3599_v41 = vadd.f32 %v3598_v51, %v3597_v13 }
 0x530   : > { %v3394_v44 = vpop.f32.mrf.mxu1 }
 0x531   : > { %v3449_v17 = vadd.f32 %v3394_v44, %v3323_v34  ;;  %v3327_v44 = vadd.f32 %v3278_v7, %v3201_v36  ;;  %v3034_v54 = vpop.f32.mrf.mxu2  ;;  %v3203_v7 = vadd.f32 %v3157_v53, %v3077_v3 }
 0x533   : > { %v3497_v33 = vsel %vm639_vm4, %v3449_v17, 0.0  ;;  %v3552_v47 = vmul.f32 %v3449_v17, %v3449_v17  ;;  %v3654_v29 = vpack.c.bf16 %v3449_v17, %v3449_v17  ;;  %v3076_v17 = vadd.f32 %v3029_v59, %v5967_v24  ;;  %v3160_v8 = vpop.f32.mrf.mxu3 }
 0x534   : > { %v3498_v39 = vadd.f32 %v3497_v33, %v3496_v2 }
 0x535   : > { %v3600_v14 = vsel %vm639_vm4, %v3552_v47, 0.0  ;;  %3687 = vst.msk [vmem:[%s6037_s10 + $0x44] sm:$0xf] %vm3669_vm8, %v3654_v29  ;;  %v3202_v30 = vadd.f32 %v3155_v11, %v3076_v17 }
 0x536   : > { %v3601_v56 = vadd.f32 %v3600_v14, %v3599_v41  ;;  %v3283_v41 = vpop.f32.mrf.mxu0 }
 0x537   : > { %v3329_v11 = vadd.f32 %v3283_v41, %v3203_v7 }
 0x538   : > { %v3397_v20 = vpop.f32.mrf.mxu1 }
 0x539   : > { %v3450_v35 = vadd.f32 %v3397_v20, %v3324_v49 }
 0x53b   : > { %v3499_v37 = vsel %vm639_vm4, %v3450_v35, 0.0  ;;  %v3553_v16 = vmul.f32 %v3450_v35, %v3450_v35  ;;  %v3655_v10 = vpack.c.bf16 %v3450_v35, %v3450_v35  ;;  %v3036_v35 = vpop.f32.mrf.mxu2 }
 0x53c   : > { %v3500_v6 = vadd.f32 %v3499_v37, %v3498_v39 }
 0x53d   : > { %v3602_v5 = vsel %vm639_vm4, %v3553_v16, 0.0  ;;  %3688 = vst.msk [vmem:[%s6037_s10 + $0x48] sm:$0xf] %vm3669_vm8, %v3655_v10  ;;  %v3162_v10 = vpop.f32.mrf.mxu3 }
 0x53e   : > { %v3603_v28 = vadd.f32 %v3602_v5, %v3601_v56  ;;  %v3328_v56 = vadd.f32 %v3281_v55, %v3202_v30  ;;  %v3286_v49 = vpop.f32.mrf.mxu0 }
 0x540   : > { %v3399_v32 = vpop.f32.mrf.mxu1 }
 0x541   : > { %v3451_v48 = vadd.f32 %v3399_v32, %v3325_v31  ;;  %v3078_v31 = vadd.f32 %v3034_v54, %v5983_v1  ;;  %v3079_v1 = vadd.f32 %v3036_v35, %v5992_v58 }
 0x543   : > { %v3501_v15 = vsel %vm639_vm4, %v3451_v48, 0.0  ;;  %v3554_v18 = vmul.f32 %v3451_v48, %v3451_v48  ;;  %v3656_v19 = vpack.c.bf16 %v3451_v48, %v3451_v48  ;;  %v3204_v46 = vadd.f32 %v3160_v8, %v3078_v31 }
 0x544   : > { %v3502_v13 = vadd.f32 %v3501_v15, %v3500_v6  ;;  %v3205_v53 = vadd.f32 %v3162_v10, %v3079_v1 }
 0x545   : > { %v3604_v25 = vsel %vm639_vm4, %v3554_v18, 0.0  ;;  %3689 = vst.msk [vmem:[%s6037_s10 + $0x4c] sm:$0xf] %vm3669_vm8, %v3656_v19  ;;  %v3039_v18 = vpop.f32.mrf.mxu2  ;;  %v3330_v57 = vadd.f32 %v3286_v49, %v3204_v46 }
 0x546   : > { %v3605_v21 = vadd.f32 %v3604_v25, %v3603_v28  ;;  %v3288_v32 = vpop.f32.mrf.mxu0  ;;  %v3080_v58 = vadd.f32 %v3039_v18, %v5997_v23 }
 0x548   : > { %v3402_v12 = vpop.f32.mrf.mxu1 }
 0x549   : > { %v3452_v61 = vadd.f32 %v3402_v12, %v3326_v62 }
 0x54b   : > { %v3503_v60 = vsel %vm639_vm4, %v3452_v61, 0.0  ;;  %v3555_v26 = vmul.f32 %v3452_v61, %v3452_v61  ;;  %v3657_v52 = vpack.c.bf16 %v3452_v61, %v3452_v61 }
 0x54c   : > { %v3504_v2 = vadd.f32 %v3503_v60, %v3502_v13  ;;  %v3165_v13 = vpop.f32.mrf.mxu3 }
 0x54d   : > { %v3606_v51 = vsel %vm639_vm4, %v3555_v26, 0.0  ;;  %3690 = vst.msk [vmem:[%s6037_s10 + $0x50] sm:$0xf] %vm3669_vm8, %v3657_v52  ;;  %v3041_v52 = vpop.f32.mrf.mxu2  ;;  %v3206_v54 = vadd.f32 %v3165_v13, %v3080_v58 }
 0x54e   : > { %v3607_v34 = vadd.f32 %v3606_v51, %v3605_v21  ;;  %v3291_v36 = vpop.f32.mrf.mxu0  ;;  %v3331_v51 = vadd.f32 %v3288_v32, %v3205_v53 }
 0x550   : > { %v3404_v27 = vpop.f32.mrf.mxu1 }
 0x551   : > { %v3453_v9 = vadd.f32 %v3404_v27, %v3327_v44 }
 0x553   : > { %v3505_v33 = vsel %vm639_vm4, %v3453_v9, 0.0  ;;  %v3556_v47 = vmul.f32 %v3453_v9, %v3453_v9  ;;  %v3658_v29 = vpack.c.bf16 %v3453_v9, %v3453_v9 }
 0x554   : > { %v3506_v38 = vadd.f32 %v3505_v33, %v3504_v2  ;;  %v3167_v41 = vpop.f32.mrf.mxu3 }
 0x555   : > { %v3608_v39 = vsel %vm639_vm4, %v3556_v47, 0.0  ;;  %3691 = vst.msk [vmem:[%s6037_s10 + $0x54] sm:$0xf] %vm3669_vm8, %v3658_v29  ;;  %v3332_v29 = vadd.f32 %v3291_v36, %v3206_v54 }
 0x556   : > { %v3609_v14 = vadd.f32 %v3608_v39, %v3607_v34  ;;  %v3293_v33 = vpop.f32.mrf.mxu0 }
 0x558   : > { %v3407_v20 = vpop.f32.mrf.mxu1 }
 0x559   : > { %v3454_v24 = vadd.f32 %v3407_v20, %v3328_v56 }
 0x55b   : > { %v3507_v40 = vsel %vm639_vm4, %v3454_v24, 0.0  ;;  %v3557_v37 = vmul.f32 %v3454_v24, %v3454_v24  ;;  %v3659_v16 = vpack.c.bf16 %v3454_v24, %v3454_v24 }
 0x55c   : > { %v3508_v59 = vadd.f32 %v3507_v40, %v3506_v38  ;;  %v3044_v38 = vpop.f32.mrf.mxu2  ;;  %v3170_v56 = vpop.f32.mrf.mxu3 }
 0x55d   : > { %v3610_v6 = vsel %vm639_vm4, %v3557_v37, 0.0  ;;  %3692 = vst.msk [vmem:[%s6037_s10 + $0x58] sm:$0xf] %vm3669_vm8, %v3659_v16 }
 0x55e   : > { %v3611_v5 = vadd.f32 %v3610_v6, %v3609_v14  ;;  %v3081_v14 = vadd.f32 %v3041_v52, %v6005_v42  ;;  %v3296_v16 = vpop.f32.mrf.mxu0 }
 0x560   : > { %v3409_v28 = vpop.f32.mrf.mxu1  ;;  %v3207_v49 = vadd.f32 %v3167_v41, %v3081_v14 }
 0x561   : > { %v3455_v50 = vadd.f32 %v3409_v28, %v3329_v11 }
 0x562   : > { %v3333_v37 = vadd.f32 %v3293_v33, %v3207_v49 }
 0x563   : > { %v3509_v48 = vsel %vm639_vm4, %v3455_v50, 0.0  ;;  %v3558_v4 = vmul.f32 %v3455_v50, %v3455_v50  ;;  %v3660_v15 = vpack.c.bf16 %v3455_v50, %v3455_v50 }
 0x564   : > { %v3510_v19 = vadd.f32 %v3509_v48, %v3508_v59  ;;  %v3082_v59 = vadd.f32 %v3044_v38, %v6015_v0  ;;  %v3046_v6 = vpop.f32.mrf.mxu2  ;;  %v3172_v50 = vpop.f32.mrf.mxu3 }
 0x565   : > { %v3612_v55 = vsel %vm639_vm4, %v3558_v4, 0.0  ;;  %3693 = vst.msk [vmem:[%s6037_s10 + $0x5c] sm:$0xf] %vm3669_vm8, %v3660_v15  ;;  %v3083_v18 = vadd.f32 %v3046_v6, %v6022_v22 }
 0x566   : > { %v3613_v25 = vadd.f32 %v3612_v55, %v3611_v5  ;;  %v3208_v5 = vadd.f32 %v3170_v56, %v3082_v59 }
 0x567   : > { %v3209_v55 = vadd.f32 %v3172_v50, %v3083_v18 }
 0x568   : > { %v3412_v21 = vpop.f32.mrf.mxu1  ;;  %v3334_v4 = vadd.f32 %v3296_v16, %v3208_v5 }
 0x569   : > { %v3456_v62 = vadd.f32 %v3412_v21, %v3330_v57 }
 0x56b   : > { %v3511_v12 = vsel %vm639_vm4, %v3456_v62, 0.0  ;;  %v3559_v63 = vmul.f32 %v3456_v62, %v3456_v62  ;;  %v3661_v61 = vpack.c.bf16 %v3456_v62, %v3456_v62 }
 0x56c   : > { %v3512_v60 = vadd.f32 %v3511_v12, %v3510_v19  ;;  %v3298_v19 = vpop.f32.mrf.mxu0  ;;  %v3049_v21 = vpop.f32.mrf.mxu2 }
 0x56d   : > { %v3614_v26 = vsel %vm639_vm4, %v3559_v63, 0.0  ;;  %3694 = vst.msk [vmem:[%s6037_s10 + $0x60] sm:$0xf] %vm3669_vm8, %v3661_v61  ;;  %v3175_v53 = vpop.f32.mrf.mxu3  ;;  %v3335_v63 = vadd.f32 %v3298_v19, %v3209_v55  ;;  %v3084_v22 = vadd.f32 %v3049_v21, %v6025_v45 }
 0x56e   : > { %v3615_v2 = vadd.f32 %v3614_v26, %v3613_v25 }
 0x56f   : > { %v3210_v26 = vadd.f32 %v3175_v53, %v3084_v22 }
 0x570   : > { %v3414_v34 = vpop.f32.mrf.mxu1 }
 0x571   : > { %v3457_v44 = vadd.f32 %v3414_v34, %v3331_v51 }
 0x573   : > { %v3513_v27 = vsel %vm639_vm4, %v3457_v44, 0.0  ;;  %v3560_v17 = vmul.f32 %v3457_v44, %v3457_v44  ;;  %v3662_v9 = vpack.c.bf16 %v3457_v44, %v3457_v44 }
 0x574   : > { %v3514_v8 = vadd.f32 %v3513_v27, %v3512_v60  ;;  %v3301_v60 = vpop.f32.mrf.mxu0  ;;  %v3051_v58 = vpop.f32.mrf.mxu2 }
 0x575   : > { %v3616_v30 = vsel %vm639_vm4, %v3560_v17, 0.0  ;;  %3695 = vst.msk [vmem:[%s6037_s10 + $0x64] sm:$0xf] %vm3669_vm8, %v3662_v9  ;;  %v3336_v54 = vadd.f32 %v3301_v60, %v3210_v26  ;;  %v3177_v27 = vpop.f32.mrf.mxu3  ;;  %v3085_v45 = vadd.f32 %v3051_v58, %v6031_v43 }
 0x576   : > { %v3617_v47 = vadd.f32 %v3616_v30, %v3615_v2 }
 0x578   : > { %v3417_v39 = vpop.f32.mrf.mxu1 }
 0x579   : > { %v3458_v23 = vadd.f32 %v3417_v39, %v3332_v29 }
 0x57b   : > { %v3515_v20 = vsel %vm639_vm4, %v3458_v23, 0.0  ;;  %v3561_v3 = vmul.f32 %v3458_v23, %v3458_v23  ;;  %v3663_v24 = vpack.c.bf16 %v3458_v23, %v3458_v23 }
 0x57c   : > { %v3516_v35 = vadd.f32 %v3515_v20, %v3514_v8  ;;  %v3211_v8 = vadd.f32 %v3177_v27, %v3085_v45  ;;  %v3303_v29 = vpop.f32.mrf.mxu0 }
 0x57d   : > { %v3618_v7 = vsel %vm639_vm4, %v3561_v3, 0.0  ;;  %3696 = vst.msk [vmem:[%s6037_s10 + $0x68] sm:$0xf] %vm3669_vm8, %v3663_v24 }
 0x57e   : > { %v3619_v40 = vadd.f32 %v3618_v7, %v3617_v47  ;;  %v3337_v23 = vadd.f32 %v3303_v29, %v3211_v8 }
 0x580   : > { %v3419_v10 = vpop.f32.mrf.mxu1 }
 0x581   : > { %v3459_v42 = vadd.f32 %v3419_v10, %v3333_v37 }
 0x583   : > { %v3517_v11 = vsel %vm639_vm4, %v3459_v42, 0.0  ;;  %v3562_v28 = vmul.f32 %v3459_v42, %v3459_v42  ;;  %v3664_v31 = vpack.c.bf16 %v3459_v42, %v3459_v42 }
 0x584   : > { %v3518_v32 = vadd.f32 %v3517_v11, %v3516_v35 }
 0x585   : > { %v3620_v46 = vsel %vm639_vm4, %v3562_v28, 0.0  ;;  %3697 = vst.msk [vmem:[%s6037_s10 + $0x6c] sm:$0xf] %vm3669_vm8, %v3664_v31 }
 0x586   : > { %v3621_v48 = vadd.f32 %v3620_v46, %v3619_v40 }
 0x588   : > { %v3422_v15 = vpop.f32.mrf.mxu1 }
 0x589   : > { %v3460_v0 = vadd.f32 %v3422_v15, %v3334_v4 }
 0x58b   : > { %v3519_v13 = vsel %vm639_vm4, %v3460_v0, 0.0  ;;  %v3563_v25 = vmul.f32 %v3460_v0, %v3460_v0  ;;  %v3665_v57 = vpack.c.bf16 %v3460_v0, %v3460_v0 }
 0x58c   : > { %v3520_v1 = vadd.f32 %v3519_v13, %v3518_v32 }
 0x58d   : > { %v3622_v62 = vsel %vm639_vm4, %v3563_v25, 0.0  ;;  %3698 = vst.msk [vmem:[%s6037_s10 + $0x70] sm:$0xf] %vm3669_vm8, %v3665_v57 }
 0x58e   : > { %v3623_v12 = vadd.f32 %v3622_v62, %v3621_v48 }
 0x590   : > { %v3424_v61 = vpop.f32.mrf.mxu1 }
 0x591   : > { %v3461_v36 = vadd.f32 %v3424_v61, %v3335_v63 }
 0x593   : > { %v3521_v52 = vsel %vm639_vm4, %v3461_v36, 0.0  ;;  %v3564_v2 = vmul.f32 %v3461_v36, %v3461_v36  ;;  %v3666_v51 = vpack.c.bf16 %v3461_v36, %v3461_v36 }
 0x594   : > { %v3522_v41 = vadd.f32 %v3521_v52, %v3520_v1 }
 0x595   : > { %v3624_v34 = vsel %vm639_vm4, %v3564_v2, 0.0  ;;  %3699 = vst.msk [vmem:[%s6037_s10 + $0x74] sm:$0xf] %vm3669_vm8, %v3666_v51 }
 0x596   : > { %v3625_v44 = vadd.f32 %v3624_v34, %v3623_v12 }
 0x598   : > { %v3427_v17 = vpop.f32.mrf.mxu1 }
 0x599   : > { %v3462_v9 = vadd.f32 %v3427_v17, %v3336_v54 }
 0x59b   : > { %v3523_v30 = vsel %vm639_vm4, %v3462_v9, 0.0  ;;  %v3565_v33 = vmul.f32 %v3462_v9, %v3462_v9  ;;  %v3667_v47 = vpack.c.bf16 %v3462_v9, %v3462_v9 }
 0x59c   : > { %v3524_v38 = vadd.f32 %v3523_v30, %v3522_v41 }
 0x59d   : > { %v3626_v39 = vsel %vm639_vm4, %v3565_v33, 0.0  ;;  %3700 = vst.msk [vmem:[%s6037_s10 + $0x78] sm:$0xf] %vm3669_vm8, %v3667_v47 }
 0x59e   : > { %v3627_v14 = vadd.f32 %v3626_v39, %v3625_v44 }
 0x5a0   : > { %v3429_v56 = vpop.f32.mrf.mxu1 }
 0x5a1   : > { %v3463_v49 = vadd.f32 %v3429_v56, %v3337_v23 }
 0x5a3   : > { %v3525_v43 = vsel %vm639_vm4, %v3463_v49, 0.0  ;;  %v3566_v20 = vmul.f32 %v3463_v49, %v3463_v49  ;;  %v3668_v3 = vpack.c.bf16 %v3463_v49, %v3463_v49 }
 0x5a4   : > { %v3526_v24 = vadd.f32 %v3525_v43, %v3524_v38 }
 0x5a5   : > { %v3628_v35 = vsel %vm639_vm4, %v3566_v20, 0.0  ;;  %3701 = vst.msk [vmem:[%s6037_s10 + $0x7c] sm:$0xf] %vm3669_vm8, %v3668_v3 }
 0x5a6   : > { %v3527_v7 = vrot.slane %v3526_v24, 4  ;;  %v3629_v40 = vadd.f32 %v3628_v35, %v3627_v14 }
 0x5a8   : > { %v3528_v37 = vadd.f32 %v3527_v7, %v3526_v24  ;;  %v3630_v16 = vrot.slane %v3629_v40, 4 }
 0x5aa   : > { %v3529_v10 = vrot.slane %v3528_v37, 2  ;;  %v3631_v59 = vadd.f32 %v3630_v16, %v3629_v40 }
 0x5ac   : > { %v3530_v42 = vadd.f32 %v3529_v10, %v3528_v37  ;;  %v3632_v6 = vrot.slane %v3631_v59, 2 }
 0x5ae   : > { %v3531_v5 = vrot.slane %v3530_v42, 1  ;;  %v3633_v11 = vadd.f32 %v3632_v6, %v3631_v59 }
 0x5b0   : > { %v3532_v28 = vadd.f32 %v3531_v5, %v3530_v42  ;;  %v3634_v31 = vrot.slane %v3633_v11, 1 }
 0x5b2   : > { %3534 = vst.msk [vmem:[%s263_s13] sm:$0x1] %vm3533_vm9, %v3532_v28  ;;  %v3635_v50 = vadd.f32 %v3634_v31, %v3633_v11 }
 0x5b4   : > { %3636 = vst.msk [vmem:[%s263_s13 + $0x1] sm:$0x1] %vm3533_vm9, %v3635_v50 }
 0x5b5 PF: > { %s17_s21 = sadd.s32 1, %s4123_s21  }
 0x5b6   : > { %p14_p5 = scmp.ge.s32.totalorder %s17_s21, 4  }
 0x5b8   :  { %16 = sbr.rel (!%p14_p5) target bundleno = 1 (0x1), region = 98 }

</bundles_post_ra>
